<compile_context>
chip_gen: v7x
topology: tpu7x:2x2x1
jax: 0.10.0
libtpu: 0.0.40
codegen_flags: <defaults>
</compile_context>

<pallas_src>
import functools
import math
from typing import NamedTuple

import jax
import jax.numpy as jnp
from jax.experimental import pallas as pl
from jax.experimental.pallas import tpu as pltpu

NEGATIVE_SLOPE = 0.1  # HiFi-GAN LeakyReLU slope
C_PAD = 8             # channel padding (sublane multiple)

# ---------------------------------------------------------------------------
# Synthetic HiFi-GAN discriminator configuration
# ---------------------------------------------------------------------------
PERIODS = (2, 3)
MPD_CHANNELS = (1, 4, 8, 8)
MPD_KERNEL, MPD_STRIDE, MPD_PAD = 5, 3, 2
MPD_POST_KERNEL, MPD_POST_PAD = 3, 1

NUM_SCALES = 2
MSD_CHANNELS = (1, 4, 8, 8)
MSD_KERNEL, MSD_PAD = 5, 2
MSD_STRIDES = (1, 2, 2)
MSD_POST_KERNEL, MSD_POST_PAD = 3, 1

POOL_KERNEL, POOL_STRIDE, POOL_PAD = 4, 2, 2

# Per-layer static configs: (c_in, c_out, kernel, stride, pad, apply_act)
MPD_LAYER_CFGS = tuple(
    (c_in, c_out, MPD_KERNEL, MPD_STRIDE, MPD_PAD, True)
    for c_in, c_out in zip(MPD_CHANNELS[:-1], MPD_CHANNELS[1:])
) + ((MPD_CHANNELS[-1], 1, MPD_POST_KERNEL, 1, MPD_POST_PAD, False),)

MSD_LAYER_CFGS = tuple(
    (c_in, c_out, MSD_KERNEL, s, MSD_PAD, True)
    for (c_in, c_out), s in zip(zip(MSD_CHANNELS[:-1], MSD_CHANNELS[1:]), MSD_STRIDES)
) + ((MSD_CHANNELS[-1], 1, MSD_POST_KERNEL, 1, MSD_POST_PAD, False),)


class LayerPlan(NamedTuple):
    c_in: int
    c_out: int
    k: int
    s: int
    p: int
    act: bool
    l_in: int
    l_full: int   # stride-1 conv output length
    l_out: int    # strided conv output length


def _branch_plan(n_batch, in_len, layer_cfgs):
    plan = []
    cur = in_len
    seg = 0       # max padded activation extent per sample
    rhs_w = 0     # max im2col RHS width (N * l_full)
    rows_max = 0  # max im2col RHS rows (K * C_PAD)
    for (c_in, c_out, k, s, p, act) in layer_cfgs:
        l_full = cur + 2 * p - k + 1
        l_out = (cur + 2 * p - k) // s + 1
        seg = max(seg, cur + 2 * p)
        rhs_w = max(rhs_w, n_batch * l_full)
        rows_max = max(rows_max, k * C_PAD)
        plan.append(LayerPlan(c_in, c_out, k, s, p, act, cur, l_full, l_out))
        cur = l_out
    return tuple(plan), seg, rhs_w, rows_max


# ---------------------------------------------------------------------------
# Pallas kernel: one FUSED discriminator branch (all conv layers in one call)
# ---------------------------------------------------------------------------
def _fused_branch_kernel(*refs, plan, n_strided):
    """refs = x, w_0..w_{L-1}, b_0..b_{L-1}, sel_0..sel_{S-1},
              feat_0..feat_{L-1}, buf_a, buf_b, rhs_buf.

    x:       (N, C0, L0)            bf16 — folded batch, channels, length
    w_i:     (C_PAD, K_i*C_PAD)     bf16 — tap-major, zero-padded channels
    b_i:     (C_PAD, 1)             f32
    sel_j:   (N*l_full, N*l_out)    bf16 — block-diag 0/1 column selection
    feat_i:  (c_out_i, N*l_out_i)   f32  — lane-dense feature-map outputs
    buf_a/b: (N, C_PAD, SEG)        bf16 — ping-pong padded activations
    rhs_buf: (rows_max, rhs_w)      f32  — im2col staging
    """
    n_layers = len(plan)
    x_ref = refs[0]
    w_refs = refs[1:1 + n_layers]
    b_refs = refs[1 + n_layers:1 + 2 * n_layers]
    sel_refs = refs[1 + 2 * n_layers:1 + 2 * n_layers + n_strided]
    feat_refs = refs[1 + 2 * n_layers + n_strided:1 + 3 * n_layers + n_strided]
    buf_a, buf_b, rhs_buf = refs[1 + 3 * n_layers + n_strided:]

    n_batch, in_ch, in_len = x_ref.shape
    pad0 = plan[0].p

    # Zero the first activation buffer ONCE (covers padded channels and the
    # first layer's pad strips).  buf_b / rhs_buf are fully written before
    # they are ever read, so they need no init (no per-layer memsets).
    buf_a[...] = jnp.zeros(buf_a.shape, buf_a.dtype)
    buf_a[:, 0:in_ch, pad0:pad0 + in_len] = x_ref[...]

    src, dst = buf_a, buf_b
    sel_idx = 0
    for li, cfg in enumerate(plan):
        is_last = li == n_layers - 1
        rows = cfg.k * C_PAD
        l_win = cfg.l_full
        nl_win = n_batch * l_win

        # ---- in-kernel im2col: fill RHS staging (K*C_PAD, N*l_full) -------
        # K*N small unit-stride copies; every read region below is written
        # here, so no stale data is ever consumed.
        for k in range(cfg.k):
            for n in range(n_batch):
                rhs_buf[k * C_PAD:(k + 1) * C_PAD,
                        n * l_win:(n + 1) * l_win] = (
                    src[n, 0:C_PAD, k:k + l_win].astype(jnp.float32))

        rhs = rhs_buf[0:rows, 0:nl_win].astype(jnp.bfloat16)
        if cfg.s > 1:
            # Strided conv: exact bf16 0/1 column selection on the MXU
            # (precomputed in glue; keeps both MXU operands bf16).
            rhs = jnp.dot(rhs, sel_refs[sel_idx][...],
                          preferred_element_type=jnp.float32
                          ).astype(jnp.bfloat16)
            sel_idx += 1

        # ---- ONE MXU matmul for the whole layer (all taps, whole batch) ---
        y = jnp.dot(w_refs[li][...], rhs,
                    preferred_element_type=jnp.float32)     # (C_PAD, N*l_out)
        y = y + b_refs[li][...]                               # f32 epilogue
        if cfg.act:
            y = jnp.where(y >= 0, y, NEGATIVE_SLOPE * y)      # LeakyReLU (VPU)

        # Lane-dense, layer-at-once feature-map store.
        feat_refs[li][...] = y[0:cfg.c_out, :]

        if not is_last:
            np_ = plan[li + 1].p
            yb = y.astype(jnp.bfloat16)                       # cast once
            for n in range(n_batch):
                dst[n, 0:C_PAD, np_:np_ + cfg.l_out] = (
                    yb[:, n * cfg.l_out:(n + 1) * cfg.l_out])
            # Zero only the pad strips the next layer actually reads
            # (left pad and right pad; ping-pong reuse makes this mandatory).
            if np_ > 0:
                dst[:, :, 0:np_] = jnp.zeros((n_batch, C_PAD, np_), dst.dtype)
                dst[:, :, np_ + cfg.l_out:cfg.l_out + 2 * np_] = jnp.zeros(
                    (n_batch, C_PAD, np_), dst.dtype)
            src, dst = dst, src


def _full_spec(shape):
    nd = len(shape)
    return pl.BlockSpec(shape, lambda *_: (0,) * nd)


def _run_branch(x, layer_params, layer_cfgs):
    """Run one fused discriminator branch.

    x: (N, C0, L0) f32 (batch already folded for the MPD path)
    layer_params: list of (weight (c_out, c_in, K), bias (c_out,))
    Returns list of lane-dense per-layer feature maps (c_out_i, N*l_out_i) f32.
    """
    N, C0, L0 = x.shape
    plan, seg, rhs_w, rows_max = _branch_plan(N, L0, layer_cfgs)

    x_bf = x.astype(jnp.bfloat16)

    w_inputs, b_inputs, sel_inputs = [], [], []
    flops = 0
    for cfg, (w, b) in zip(plan, layer_params):
        # (c_out, c_in, K) -> zero-padded (C_PAD, K*C_PAD), tap-major rows.
        w_pad = jnp.zeros((C_PAD, cfg.k, C_PAD), jnp.float32)
        w_pad = w_pad.at[:cfg.c_out, :, :cfg.c_in].set(jnp.transpose(w, (0, 2, 1)))
        w_inputs.append(w_pad.reshape(C_PAD, cfg.k * C_PAD).astype(jnp.bfloat16))
        b_inputs.append(jnp.zeros((C_PAD, 1), jnp.float32).at[:cfg.c_out, 0].set(b))
        flops += 2 * C_PAD * (cfg.k * C_PAD) * (N * cfg.l_out)
        if cfg.s > 1:
            # Block-diagonal 0/1 selection picking every stride-th column.
            r = jnp.arange(N * cfg.l_full)
            c = jnp.arange(N * cfg.l_out)
            sel = ((r[:, None] // cfg.l_full == c[None, :] // cfg.l_out)
                   & (r[:, None] % cfg.l_full == cfg.s * (c[None, :] % cfg.l_out)))
            sel_inputs.append(sel.astype(jnp.bfloat16))
            flops += 2 * (cfg.k * C_PAD) * (N * cfg.l_full) * (N * cfg.l_out)

    inputs = [x_bf] + w_inputs + b_inputs + sel_inputs
    in_specs = [_full_spec(a.shape) for a in inputs]

    out_shapes = tuple(
        jax.ShapeDtypeStruct((cfg.c_out, N * cfg.l_out), jnp.float32)
        for cfg in plan)
    out_specs = tuple(_full_spec(s.shape) for s in out_shapes)

    bytes_accessed = (sum(math.prod(a.shape) * a.dtype.itemsize for a in inputs)
                      + sum(math.prod(s.shape) * 4 for s in out_shapes))

    kernel = functools.partial(_fused_branch_kernel, plan=plan,
                               n_strided=len(sel_inputs))

    feats = pl.pallas_call(
        kernel,
        out_shape=out_shapes,
        in_specs=in_specs,
        out_specs=out_specs,
        scratch_shapes=[
            pltpu.VMEM((N, C_PAD, seg), jnp.bfloat16),    # activation ping
            pltpu.VMEM((N, C_PAD, seg), jnp.bfloat16),    # activation pong
            pltpu.VMEM((rows_max, rhs_w), jnp.float32),   # im2col RHS staging
        ],
        compiler_params=pltpu.CompilerParams(vmem_limit_bytes=32 * 1024 * 1024),
        cost_estimate=pl.CostEstimate(flops=int(flops), transcendentals=0,
                                      bytes_accessed=int(bytes_accessed)),
    )(*inputs)
    return list(feats)


# ---------------------------------------------------------------------------
# Deterministic parameters
# ---------------------------------------------------------------------------
def _init_conv(key, c_out, c_in, k):
    kw, kb = jax.random.split(key)
    w = 0.1 * jax.random.normal(kw, (c_out, c_in, k), jnp.float32)
    b = 0.01 * jax.random.normal(kb, (c_out,), jnp.float32)
    return w, b


def init_params(key):
    params = {"mpd": [], "msd": []}
    for _ in PERIODS:
        layers = []
        for (c_in, c_out, k_sz, *_rest) in MPD_LAYER_CFGS:
            key, sub = jax.random.split(key)
            layers.append(_init_conv(sub, c_out, c_in, k_sz))
        params["mpd"].append(layers)
    for _ in range(NUM_SCALES):
        layers = []
        for (c_in, c_out, k_sz, *_rest) in MSD_LAYER_CFGS:
            key, sub = jax.random.split(key)
            layers.append(_init_conv(sub, c_out, c_in, k_sz))
        params["msd"].append(layers)
    return params


# ---------------------------------------------------------------------------
# Forward passes (glue orchestrating one fused Pallas kernel per branch)
# ---------------------------------------------------------------------------
def period_discriminator_forward(x, layer_params, period):
    B, C, T = x.shape
    if T % period != 0:
        # Matches the PyTorch reference (reflect pad); requires n_pad < T.
        n_pad = period - T % period
        x = jnp.pad(x, ((0, 0), (0, 0), (0, n_pad)), mode="reflect")
        T = T + n_pad
    H = T // period
    # Fold the width (period) axis into batch ONCE; Conv2d kernels are (Kh,1),
    # so the whole MPD stack runs in this folded layout.
    xf = jnp.transpose(x.reshape(B, C, H, period), (0, 3, 1, 2)).reshape(
        B * period, C, H)

    feats2d = _run_branch(xf, layer_params, MPD_LAYER_CFGS)

    # Unfold from lane-dense (c_out, B*period*l_out) back to NCHW in glue.
    feats = []
    for f in feats2d:
        c_out = f.shape[0]
        l_out = f.shape[1] // (B * period)
        f4 = f.reshape(c_out, B, period, l_out)
        feats.append(jnp.transpose(f4, (1, 0, 3, 2)))   # (B, c_out, l_out, period)
    out = feats[-1].reshape(B, -1)                        # torch.flatten(x, 1, -1)
    return out, tuple(feats)


def scale_discriminator_forward(x, layer_params):
    B = x.shape[0]
    feats2d = _run_branch(x, layer_params, MSD_LAYER_CFGS)
    feats = []
    for f in feats2d:
        c_out = f.shape[0]
        l_out = f.shape[1] // B
        feats.append(jnp.transpose(f.reshape(c_out, B, l_out), (1, 0, 2)))
    out = feats[-1].reshape(B, -1)
    return out, tuple(feats)


def avg_pool1d(x, kernel=POOL_KERNEL, stride=POOL_STRIDE, pad=POOL_PAD):
    """AvgPool1d (count_include_pad=True) in plain JAX glue - trivial VPU work."""
    B, C, L = x.shape
    xp = jnp.pad(x, ((0, 0), (0, 0), (pad, pad)))
    l_out = (L + 2 * pad - kernel) // stride + 1
    acc = xp[:, :, 0:(l_out - 1) * stride + 1:stride]
    for k in range(1, kernel):
        acc = acc + xp[:, :, k:k + (l_out - 1) * stride + 1:stride]
    return acc / float(kernel)


def multi_period_forward(x, mpd_params):
    outs, fmaps = [], []
    for period, p in zip(PERIODS, mpd_params):
        o, f = period_discriminator_forward(x, p, period)
        outs.append(o)
        fmaps.append(f)
    return tuple(outs), tuple(fmaps)


def multi_scale_forward(x, msd_params):
    outs, fmaps = [], []
    for i, p in enumerate(msd_params):
        if i > 0:
            x = avg_pool1d(x)
        o, f = scale_discriminator_forward(x, p)
        outs.append(o)
        fmaps.append(f)
    return tuple(outs), tuple(fmaps)


def discriminator_forward(x, params):
    """Matches Discriminator.forward: returns
    ((period_output, scale_output), (period_feature_map, scale_feature_map))."""
    period_output, period_feature_map = multi_period_forward(x, params["mpd"])
    scale_output, scale_feature_map = multi_scale_forward(x, params["msd"])
    return (period_output, scale_output), (period_feature_map, scale_feature_map)


# ---------------------------------------------------------------------------
# Pure-JAX reference (for correctness cross-check; f32 throughout)
# ---------------------------------------------------------------------------
def _ref_conv1d(x, w, b, stride, pad):
    y = jax.lax.conv_general_dilated(
        x, w, window_strides=(stride,), padding=[(pad, pad)],
        dimension_numbers=("NCH", "OIH", "NCH"))
    return y + b[None, :, None]


def _ref_branch(x, layer_params, layer_cfgs):
    feats = []
    h = x
    for (c_in, c_out, k, s, p, act), (w, b) in zip(layer_cfgs, layer_params):
        h = _ref_conv1d(h, w, b, s, p)
        if act:
            h = jnp.where(h >= 0, h, NEGATIVE_SLOPE * h)
        feats.append(h)
    return feats


def reference_forward(x, params):
    B, C, T = x.shape
    p_outs, p_fmaps = [], []
    for period, lp in zip(PERIODS, params["mpd"]):
        xt, Tt = x, T
        if Tt % period != 0:
            n_pad = period - Tt % period
            xt = jnp.pad(xt, ((0, 0), (0, 0), (0, n_pad)), mode="reflect")
            Tt += n_pad
        H = Tt // period
        xf = jnp.transpose(xt.reshape(B, C, H, period), (0, 3, 1, 2)).reshape(
            B * period, C, H)
        fs = _ref_branch(xf, lp, MPD_LAYER_CFGS)
        fmaps = []
        for f in fs:
            c_out, l = f.shape[1], f.shape[2]
            fmaps.append(jnp.transpose(f.reshape(B, period, c_out, l), (0, 2, 3, 1)))
        p_outs.append(fmaps[-1].reshape(B, -1))
        p_fmaps.append(tuple(fmaps))
    s_outs, s_fmaps = [], []
    xs = x
    for i, lp in enumerate(params["msd"]):
        if i > 0:
            xs = avg_pool1d(xs)
        fs = _ref_branch(xs, lp, MSD_LAYER_CFGS)
        s_outs.append(fs[-1].reshape(B, -1))
        s_fmaps.append(tuple(fs))
    return ((tuple(p_outs), tuple(s_outs)), (tuple(p_fmaps), tuple(s_fmaps)))


# ---------------------------------------------------------------------------
if __name__ == "__main__":
    key = jax.random.PRNGKey(0)
    key, pkey, xkey = jax.random.split(key, 3)
    params = init_params(pkey)

    B, C_IN, L = 2, 1, 48          # waveform-like input (batch, in_channels, length)
    x = jax.random.normal(xkey, (B, C_IN, L), jnp.float32)

    fwd = jax.jit(discriminator_forward)
    out = jax.block_until_ready(fwd(x, params))

    (period_output, scale_output), (period_fmap, scale_fmap) = out
    assert len(period_output) == len(PERIODS)
    assert len(scale_output) == NUM_SCALES
    assert all(len(f) == len(MPD_LAYER_CFGS) for f in period_fmap)
    assert all(len(f) == len(MSD_LAYER_CFGS) for f in scale_fmap)
    assert all(bool(jnp.all(jnp.isfinite(o))) for o in period_output + scale_output)

    # Cross-check against a pure f32 JAX reference (bf16 MXU tolerance).
    ref = jax.block_until_ready(reference_forward(x, params))
    for a, r in zip(jax.tree_util.tree_leaves(out), jax.tree_util.tree_leaves(ref)):
        assert a.shape == r.shape, (a.shape, r.shape)
        assert bool(jnp.allclose(a, r, rtol=1e-1, atol=1e-2)), "mismatch vs reference"

    print("KERNEL_OK")
</pallas_src>

<mosaic_0001>
module attributes {stable_mosaic.version = 11 : i64} {
  func.func @_fused_branch_kernel(%arg0: memref<4x1x24xbf16, #tpu.memory_space<vmem>>, %arg1: memref<8x40xbf16, #tpu.memory_space<vmem>>, %arg2: memref<8x40xbf16, #tpu.memory_space<vmem>>, %arg3: memref<8x40xbf16, #tpu.memory_space<vmem>>, %arg4: memref<8x24xbf16, #tpu.memory_space<vmem>>, %arg5: memref<8x1xf32, #tpu.memory_space<vmem>>, %arg6: memref<8x1xf32, #tpu.memory_space<vmem>>, %arg7: memref<8x1xf32, #tpu.memory_space<vmem>>, %arg8: memref<8x1xf32, #tpu.memory_space<vmem>>, %arg9: memref<96x32xbf16, #tpu.memory_space<vmem>>, %arg10: memref<32x12xbf16, #tpu.memory_space<vmem>>, %arg11: memref<12x4xbf16, #tpu.memory_space<vmem>>, %arg12: memref<4x32xf32, #tpu.memory_space<vmem>>, %arg13: memref<8x12xf32, #tpu.memory_space<vmem>>, %arg14: memref<8x4xf32, #tpu.memory_space<vmem>>, %arg15: memref<1x4xf32, #tpu.memory_space<vmem>>, %arg16: memref<4x8x28xbf16, #tpu.memory_space<vmem>>, %arg17: memref<4x8x28xbf16, #tpu.memory_space<vmem>>, %arg18: memref<40x96xf32, #tpu.memory_space<vmem>>) attributes {dimension_semantics = [], scalar_prefetch = 0 : i64, scratch_operands = 3 : i64, tpu.core_type = #tpu.core_type<tc>} {
    %cst = arith.constant 0.000000e+00 : bf16
    %0 = vector.broadcast %cst : bf16 to vector<4x8x28xbf16>
    %c0 = arith.constant 0 : index
    %c0_0 = arith.constant 0 : index
    %c0_1 = arith.constant 0 : index
    %1 = vector.load %arg16[%c0, %c0_0, %c0_1] : memref<4x8x28xbf16, #tpu.memory_space<vmem>>, vector<4x8x28xbf16>
    tpu.vector_store %arg16[%c0, %c0_0, %c0_1], %0 {strides = array<i32>} : memref<4x8x28xbf16, #tpu.memory_space<vmem>>, vector<4x8x28xbf16>,
    %c0_2 = arith.constant 0 : index
    %c0_3 = arith.constant 0 : index
    %c0_4 = arith.constant 0 : index
    %2 = vector.load %arg0[%c0_2, %c0_3, %c0_4] : memref<4x1x24xbf16, #tpu.memory_space<vmem>>, vector<4x1x24xbf16>
    %c0_5 = arith.constant 0 : index
    %c0_6 = arith.constant 0 : index
    %c2 = arith.constant 2 : index
    %3 = vector.load %arg16[%c0_5, %c0_6, %c2] : memref<4x8x28xbf16, #tpu.memory_space<vmem>>, vector<4x1x24xbf16>
    tpu.vector_store %arg16[%c0_5, %c0_6, %c2], %2 {strides = array<i32>} : memref<4x8x28xbf16, #tpu.memory_space<vmem>>, vector<4x1x24xbf16>,
    %c0_7 = arith.constant 0 : index
    %c0_8 = arith.constant 0 : index
    %c0_9 = arith.constant 0 : index
    %4 = vector.load %arg16[%c0_7, %c0_8, %c0_9] : memref<4x8x28xbf16, #tpu.memory_space<vmem>>, vector<1x8x24xbf16>
    %5 = vector.shape_cast %4 : vector<1x8x24xbf16> to vector<8x24xbf16>
    %6 = arith.extf %5 : vector<8x24xbf16> to vector<8x24xf32>
    %c0_10 = arith.constant 0 : index
    %c0_11 = arith.constant 0 : index
    %7 = vector.load %arg18[%c0_10, %c0_11] : memref<40x96xf32, #tpu.memory_space<vmem>>, vector<8x24xf32>
    tpu.vector_store %arg18[%c0_10, %c0_11], %6 {strides = array<i32>} : memref<40x96xf32, #tpu.memory_space<vmem>>, vector<8x24xf32>,
    %c1 = arith.constant 1 : index
    %c0_12 = arith.constant 0 : index
    %c0_13 = arith.constant 0 : index
    %8 = vector.load %arg16[%c1, %c0_12, %c0_13] : memref<4x8x28xbf16, #tpu.memory_space<vmem>>, vector<1x8x24xbf16>
    %9 = vector.shape_cast %8 : vector<1x8x24xbf16> to vector<8x24xbf16>
    %10 = arith.extf %9 : vector<8x24xbf16> to vector<8x24xf32>
    %c0_14 = arith.constant 0 : index
    %c24 = arith.constant 24 : index
    %11 = vector.load %arg18[%c0_14, %c24] : memref<40x96xf32, #tpu.memory_space<vmem>>, vector<8x24xf32>
    tpu.vector_store %arg18[%c0_14, %c24], %10 {strides = array<i32>} : memref<40x96xf32, #tpu.memory_space<vmem>>, vector<8x24xf32>,
    %c2_15 = arith.constant 2 : index
    %c0_16 = arith.constant 0 : index
    %c0_17 = arith.constant 0 : index
    %12 = vector.load %arg16[%c2_15, %c0_16, %c0_17] : memref<4x8x28xbf16, #tpu.memory_space<vmem>>, vector<1x8x24xbf16>
    %13 = vector.shape_cast %12 : vector<1x8x24xbf16> to vector<8x24xbf16>
    %14 = arith.extf %13 : vector<8x24xbf16> to vector<8x24xf32>
    %c0_18 = arith.constant 0 : index
    %c48 = arith.constant 48 : index
    %15 = vector.load %arg18[%c0_18, %c48] : memref<40x96xf32, #tpu.memory_space<vmem>>, vector<8x24xf32>
    tpu.vector_store %arg18[%c0_18, %c48], %14 {strides = array<i32>} : memref<40x96xf32, #tpu.memory_space<vmem>>, vector<8x24xf32>,
    %c3 = arith.constant 3 : index
    %c0_19 = arith.constant 0 : index
    %c0_20 = arith.constant 0 : index
    %16 = vector.load %arg16[%c3, %c0_19, %c0_20] : memref<4x8x28xbf16, #tpu.memory_space<vmem>>, vector<1x8x24xbf16>
    %17 = vector.shape_cast %16 : vector<1x8x24xbf16> to vector<8x24xbf16>
    %18 = arith.extf %17 : vector<8x24xbf16> to vector<8x24xf32>
    %c0_21 = arith.constant 0 : index
    %c72 = arith.constant 72 : index
    %19 = vector.load %arg18[%c0_21, %c72] : memref<40x96xf32, #tpu.memory_space<vmem>>, vector<8x24xf32>
    tpu.vector_store %arg18[%c0_21, %c72], %18 {strides = array<i32>} : memref<40x96xf32, #tpu.memory_space<vmem>>, vector<8x24xf32>,
    %c0_22 = arith.constant 0 : index
    %c0_23 = arith.constant 0 : index
    %c1_24 = arith.constant 1 : index
    %20 = vector.load %arg16[%c0_22, %c0_23, %c1_24] : memref<4x8x28xbf16, #tpu.memory_space<vmem>>, vector<1x8x24xbf16>
    %21 = vector.shape_cast %20 : vector<1x8x24xbf16> to vector<8x24xbf16>
    %22 = arith.extf %21 : vector<8x24xbf16> to vector<8x24xf32>
    %c8 = arith.constant 8 : index
    %c0_25 = arith.constant 0 : index
    %23 = vector.load %arg18[%c8, %c0_25] : memref<40x96xf32, #tpu.memory_space<vmem>>, vector<8x24xf32>
    tpu.vector_store %arg18[%c8, %c0_25], %22 {strides = array<i32>} : memref<40x96xf32, #tpu.memory_space<vmem>>, vector<8x24xf32>,
    %c1_26 = arith.constant 1 : index
    %c0_27 = arith.constant 0 : index
    %c1_28 = arith.constant 1 : index
    %24 = vector.load %arg16[%c1_26, %c0_27, %c1_28] : memref<4x8x28xbf16, #tpu.memory_space<vmem>>, vector<1x8x24xbf16>
    %25 = vector.shape_cast %24 : vector<1x8x24xbf16> to vector<8x24xbf16>
    %26 = arith.extf %25 : vector<8x24xbf16> to vector<8x24xf32>
    %c8_29 = arith.constant 8 : index
    %c24_30 = arith.constant 24 : index
    %27 = vector.load %arg18[%c8_29, %c24_30] : memref<40x96xf32, #tpu.memory_space<vmem>>, vector<8x24xf32>
    tpu.vector_store %arg18[%c8_29, %c24_30], %26 {strides = array<i32>} : memref<40x96xf32, #tpu.memory_space<vmem>>, vector<8x24xf32>,
    %c2_31 = arith.constant 2 : index
    %c0_32 = arith.constant 0 : index
    %c1_33 = arith.constant 1 : index
    %28 = vector.load %arg16[%c2_31, %c0_32, %c1_33] : memref<4x8x28xbf16, #tpu.memory_space<vmem>>, vector<1x8x24xbf16>
    %29 = vector.shape_cast %28 : vector<1x8x24xbf16> to vector<8x24xbf16>
    %30 = arith.extf %29 : vector<8x24xbf16> to vector<8x24xf32>
    %c8_34 = arith.constant 8 : index
    %c48_35 = arith.constant 48 : index
    %31 = vector.load %arg18[%c8_34, %c48_35] : memref<40x96xf32, #tpu.memory_space<vmem>>, vector<8x24xf32>
    tpu.vector_store %arg18[%c8_34, %c48_35], %30 {strides = array<i32>} : memref<40x96xf32, #tpu.memory_space<vmem>>, vector<8x24xf32>,
    %c3_36 = arith.constant 3 : index
    %c0_37 = arith.constant 0 : index
    %c1_38 = arith.constant 1 : index
    %32 = vector.load %arg16[%c3_36, %c0_37, %c1_38] : memref<4x8x28xbf16, #tpu.memory_space<vmem>>, vector<1x8x24xbf16>
    %33 = vector.shape_cast %32 : vector<1x8x24xbf16> to vector<8x24xbf16>
    %34 = arith.extf %33 : vector<8x24xbf16> to vector<8x24xf32>
    %c8_39 = arith.constant 8 : index
    %c72_40 = arith.constant 72 : index
    %35 = vector.load %arg18[%c8_39, %c72_40] : memref<40x96xf32, #tpu.memory_space<vmem>>, vector<8x24xf32>
    tpu.vector_store %arg18[%c8_39, %c72_40], %34 {strides = array<i32>} : memref<40x96xf32, #tpu.memory_space<vmem>>, vector<8x24xf32>,
    %c0_41 = arith.constant 0 : index
    %c0_42 = arith.constant 0 : index
    %c2_43 = arith.constant 2 : index
    %36 = vector.load %arg16[%c0_41, %c0_42, %c2_43] : memref<4x8x28xbf16, #tpu.memory_space<vmem>>, vector<1x8x24xbf16>
    %37 = vector.shape_cast %36 : vector<1x8x24xbf16> to vector<8x24xbf16>
    %38 = arith.extf %37 : vector<8x24xbf16> to vector<8x24xf32>
    %c16 = arith.constant 16 : index
    %c0_44 = arith.constant 0 : index
    %39 = vector.load %arg18[%c16, %c0_44] : memref<40x96xf32, #tpu.memory_space<vmem>>, vector<8x24xf32>
    tpu.vector_store %arg18[%c16, %c0_44], %38 {strides = array<i32>} : memref<40x96xf32, #tpu.memory_space<vmem>>, vector<8x24xf32>,
    %c1_45 = arith.constant 1 : index
    %c0_46 = arith.constant 0 : index
    %c2_47 = arith.constant 2 : index
    %40 = vector.load %arg16[%c1_45, %c0_46, %c2_47] : memref<4x8x28xbf16, #tpu.memory_space<vmem>>, vector<1x8x24xbf16>
    %41 = vector.shape_cast %40 : vector<1x8x24xbf16> to vector<8x24xbf16>
    %42 = arith.extf %41 : vector<8x24xbf16> to vector<8x24xf32>
    %c16_48 = arith.constant 16 : index
    %c24_49 = arith.constant 24 : index
    %43 = vector.load %arg18[%c16_48, %c24_49] : memref<40x96xf32, #tpu.memory_space<vmem>>, vector<8x24xf32>
    tpu.vector_store %arg18[%c16_48, %c24_49], %42 {strides = array<i32>} : memref<40x96xf32, #tpu.memory_space<vmem>>, vector<8x24xf32>,
    %c2_50 = arith.constant 2 : index
    %c0_51 = arith.constant 0 : index
    %c2_52 = arith.constant 2 : index
    %44 = vector.load %arg16[%c2_50, %c0_51, %c2_52] : memref<4x8x28xbf16, #tpu.memory_space<vmem>>, vector<1x8x24xbf16>
    %45 = vector.shape_cast %44 : vector<1x8x24xbf16> to vector<8x24xbf16>
    %46 = arith.extf %45 : vector<8x24xbf16> to vector<8x24xf32>
    %c16_53 = arith.constant 16 : index
    %c48_54 = arith.constant 48 : index
    %47 = vector.load %arg18[%c16_53, %c48_54] : memref<40x96xf32, #tpu.memory_space<vmem>>, vector<8x24xf32>
    tpu.vector_store %arg18[%c16_53, %c48_54], %46 {strides = array<i32>} : memref<40x96xf32, #tpu.memory_space<vmem>>, vector<8x24xf32>,
    %c3_55 = arith.constant 3 : index
    %c0_56 = arith.constant 0 : index
    %c2_57 = arith.constant 2 : index
    %48 = vector.load %arg16[%c3_55, %c0_56, %c2_57] : memref<4x8x28xbf16, #tpu.memory_space<vmem>>, vector<1x8x24xbf16>
    %49 = vector.shape_cast %48 : vector<1x8x24xbf16> to vector<8x24xbf16>
    %50 = arith.extf %49 : vector<8x24xbf16> to vector<8x24xf32>
    %c16_58 = arith.constant 16 : index
    %c72_59 = arith.constant 72 : index
    %51 = vector.load %arg18[%c16_58, %c72_59] : memref<40x96xf32, #tpu.memory_space<vmem>>, vector<8x24xf32>
    tpu.vector_store %arg18[%c16_58, %c72_59], %50 {strides = array<i32>} : memref<40x96xf32, #tpu.memory_space<vmem>>, vector<8x24xf32>,
    %c0_60 = arith.constant 0 : index
    %c0_61 = arith.constant 0 : index
    %c3_62 = arith.constant 3 : index
    %52 = vector.load %arg16[%c0_60, %c0_61, %c3_62] : memref<4x8x28xbf16, #tpu.memory_space<vmem>>, vector<1x8x24xbf16>
    %53 = vector.shape_cast %52 : vector<1x8x24xbf16> to vector<8x24xbf16>
    %54 = arith.extf %53 : vector<8x24xbf16> to vector<8x24xf32>
    %c24_63 = arith.constant 24 : index
    %c0_64 = arith.constant 0 : index
    %55 = vector.load %arg18[%c24_63, %c0_64] : memref<40x96xf32, #tpu.memory_space<vmem>>, vector<8x24xf32>
    tpu.vector_store %arg18[%c24_63, %c0_64], %54 {strides = array<i32>} : memref<40x96xf32, #tpu.memory_space<vmem>>, vector<8x24xf32>,
    %c1_65 = arith.constant 1 : index
    %c0_66 = arith.constant 0 : index
    %c3_67 = arith.constant 3 : index
    %56 = vector.load %arg16[%c1_65, %c0_66, %c3_67] : memref<4x8x28xbf16, #tpu.memory_space<vmem>>, vector<1x8x24xbf16>
    %57 = vector.shape_cast %56 : vector<1x8x24xbf16> to vector<8x24xbf16>
    %58 = arith.extf %57 : vector<8x24xbf16> to vector<8x24xf32>
    %c24_68 = arith.constant 24 : index
    %c24_69 = arith.constant 24 : index
    %59 = vector.load %arg18[%c24_68, %c24_69] : memref<40x96xf32, #tpu.memory_space<vmem>>, vector<8x24xf32>
    tpu.vector_store %arg18[%c24_68, %c24_69], %58 {strides = array<i32>} : memref<40x96xf32, #tpu.memory_space<vmem>>, vector<8x24xf32>,
    %c2_70 = arith.constant 2 : index
    %c0_71 = arith.constant 0 : index
    %c3_72 = arith.constant 3 : index
    %60 = vector.load %arg16[%c2_70, %c0_71, %c3_72] : memref<4x8x28xbf16, #tpu.memory_space<vmem>>, vector<1x8x24xbf16>
    %61 = vector.shape_cast %60 : vector<1x8x24xbf16> to vector<8x24xbf16>
    %62 = arith.extf %61 : vector<8x24xbf16> to vector<8x24xf32>
    %c24_73 = arith.constant 24 : index
    %c48_74 = arith.constant 48 : index
    %63 = vector.load %arg18[%c24_73, %c48_74] : memref<40x96xf32, #tpu.memory_space<vmem>>, vector<8x24xf32>
    tpu.vector_store %arg18[%c24_73, %c48_74], %62 {strides = array<i32>} : memref<40x96xf32, #tpu.memory_space<vmem>>, vector<8x24xf32>,
    %c3_75 = arith.constant 3 : index
    %c0_76 = arith.constant 0 : index
    %c3_77 = arith.constant 3 : index
    %64 = vector.load %arg16[%c3_75, %c0_76, %c3_77] : memref<4x8x28xbf16, #tpu.memory_space<vmem>>, vector<1x8x24xbf16>
    %65 = vector.shape_cast %64 : vector<1x8x24xbf16> to vector<8x24xbf16>
    %66 = arith.extf %65 : vector<8x24xbf16> to vector<8x24xf32>
    %c24_78 = arith.constant 24 : index
    %c72_79 = arith.constant 72 : index
    %67 = vector.load %arg18[%c24_78, %c72_79] : memref<40x96xf32, #tpu.memory_space<vmem>>, vector<8x24xf32>
    tpu.vector_store %arg18[%c24_78, %c72_79], %66 {strides = array<i32>} : memref<40x96xf32, #tpu.memory_space<vmem>>, vector<8x24xf32>,
    %c0_80 = arith.constant 0 : index
    %c0_81 = arith.constant 0 : index
    %c4 = arith.constant 4 : index
    %68 = vector.load %arg16[%c0_80, %c0_81, %c4] : memref<4x8x28xbf16, #tpu.memory_space<vmem>>, vector<1x8x24xbf16>
    %69 = vector.shape_cast %68 : vector<1x8x24xbf16> to vector<8x24xbf16>
    %70 = arith.extf %69 : vector<8x24xbf16> to vector<8x24xf32>
    %c32 = arith.constant 32 : index
    %c0_82 = arith.constant 0 : index
    %71 = vector.load %arg18[%c32, %c0_82] : memref<40x96xf32, #tpu.memory_space<vmem>>, vector<8x24xf32>
    tpu.vector_store %arg18[%c32, %c0_82], %70 {strides = array<i32>} : memref<40x96xf32, #tpu.memory_space<vmem>>, vector<8x24xf32>,
    %c1_83 = arith.constant 1 : index
    %c0_84 = arith.constant 0 : index
    %c4_85 = arith.constant 4 : index
    %72 = vector.load %arg16[%c1_83, %c0_84, %c4_85] : memref<4x8x28xbf16, #tpu.memory_space<vmem>>, vector<1x8x24xbf16>
    %73 = vector.shape_cast %72 : vector<1x8x24xbf16> to vector<8x24xbf16>
    %74 = arith.extf %73 : vector<8x24xbf16> to vector<8x24xf32>
    %c32_86 = arith.constant 32 : index
    %c24_87 = arith.constant 24 : index
    %75 = vector.load %arg18[%c32_86, %c24_87] : memref<40x96xf32, #tpu.memory_space<vmem>>, vector<8x24xf32>
    tpu.vector_store %arg18[%c32_86, %c24_87], %74 {strides = array<i32>} : memref<40x96xf32, #tpu.memory_space<vmem>>, vector<8x24xf32>,
    %c2_88 = arith.constant 2 : index
    %c0_89 = arith.constant 0 : index
    %c4_90 = arith.constant 4 : index
    %76 = vector.load %arg16[%c2_88, %c0_89, %c4_90] : memref<4x8x28xbf16, #tpu.memory_space<vmem>>, vector<1x8x24xbf16>
    %77 = vector.shape_cast %76 : vector<1x8x24xbf16> to vector<8x24xbf16>
    %78 = arith.extf %77 : vector<8x24xbf16> to vector<8x24xf32>
    %c32_91 = arith.constant 32 : index
    %c48_92 = arith.constant 48 : index
    %79 = vector.load %arg18[%c32_91, %c48_92] : memref<40x96xf32, #tpu.memory_space<vmem>>, vector<8x24xf32>
    tpu.vector_store %arg18[%c32_91, %c48_92], %78 {strides = array<i32>} : memref<40x96xf32, #tpu.memory_space<vmem>>, vector<8x24xf32>,
    %c3_93 = arith.constant 3 : index
    %c0_94 = arith.constant 0 : index
    %c4_95 = arith.constant 4 : index
    %80 = vector.load %arg16[%c3_93, %c0_94, %c4_95] : memref<4x8x28xbf16, #tpu.memory_space<vmem>>, vector<1x8x24xbf16>
    %81 = vector.shape_cast %80 : vector<1x8x24xbf16> to vector<8x24xbf16>
    %82 = arith.extf %81 : vector<8x24xbf16> to vector<8x24xf32>
    %c32_96 = arith.constant 32 : index
    %c72_97 = arith.constant 72 : index
    %83 = vector.load %arg18[%c32_96, %c72_97] : memref<40x96xf32, #tpu.memory_space<vmem>>, vector<8x24xf32>
    tpu.vector_store %arg18[%c32_96, %c72_97], %82 {strides = array<i32>} : memref<40x96xf32, #tpu.memory_space<vmem>>, vector<8x24xf32>,
    %c0_98 = arith.constant 0 : index
    %c0_99 = arith.constant 0 : index
    %84 = vector.load %arg18[%c0_98, %c0_99] : memref<40x96xf32, #tpu.memory_space<vmem>>, vector<40x96xf32>
    %85 = arith.truncf %84 : vector<40x96xf32> to vector<40x96xbf16>
    %c0_100 = arith.constant 0 : index
    %c0_101 = arith.constant 0 : index
    %86 = vector.load %arg9[%c0_100, %c0_101] : memref<96x32xbf16, #tpu.memory_space<vmem>>, vector<96x32xbf16>
    %cst_102 = arith.constant dense<0.000000e+00> : vector<40x32xf32>
    %87 = tpu.matmul %85, %86, %cst_102 {dimension_numbers = #tpu.dot_dimension_numbers<[1], [0], [0], [1], [0, 0, 1, 1], [], []>} : vector<40x96xbf16>, vector<96x32xbf16>, vector<40x32xf32> -> vector<40x32xf32>
    %88 = arith.truncf %87 : vector<40x32xf32> to vector<40x32xbf16>
    %c0_103 = arith.constant 0 : index
    %c0_104 = arith.constant 0 : index
    %89 = vector.load %arg1[%c0_103, %c0_104] : memref<8x40xbf16, #tpu.memory_space<vmem>>, vector<8x40xbf16>
    %cst_105 = arith.constant dense<0.000000e+00> : vector<8x32xf32>
    %90 = tpu.matmul %89, %88, %cst_105 {dimension_numbers = #tpu.dot_dimension_numbers<[1], [0], [0], [1], [0, 0, 1, 1], [], []>} : vector<8x40xbf16>, vector<40x32xbf16>, vector<8x32xf32> -> vector<8x32xf32>
    %c0_106 = arith.constant 0 : index
    %c0_107 = arith.constant 0 : index
    %91 = vector.load %arg5[%c0_106, %c0_107] : memref<8x1xf32, #tpu.memory_space<vmem>>, vector<8x1xf32>
    %92 = vector.broadcast %91 : vector<8x1xf32> to vector<8x32xf32>
    %93 = arith.addf %90, %92 : vector<8x32xf32>
    %cst_108 = arith.constant 0.000000e+00 : f32
    %94 = vector.broadcast %cst_108 : f32 to vector<8x32xf32>
    %95 = arith.cmpf oge, %93, %94 : vector<8x32xf32>
    %cst_109 = arith.constant 1.000000e-01 : f32
    %96 = vector.broadcast %cst_109 : f32 to vector<8x32xf32>
    %97 = arith.mulf %96, %93 : vector<8x32xf32>
    %98 = arith.select %95, %93, %97 : vector<8x32xi1>, vector<8x32xf32>
    %99 = vector.extract_strided_slice %98 {offsets = [0, 0], sizes = [4, 32], strides = [1, 1]} : vector<8x32xf32> to vector<4x32xf32>
    %c0_110 = arith.constant 0 : index
    %c0_111 = arith.constant 0 : index
    %100 = vector.load %arg12[%c0_110, %c0_111] : memref<4x32xf32, #tpu.memory_space<vmem>>, vector<4x32xf32>
    tpu.vector_store %arg12[%c0_110, %c0_111], %99 {strides = array<i32>} : memref<4x32xf32, #tpu.memory_space<vmem>>, vector<4x32xf32>,
    %101 = arith.truncf %98 : vector<8x32xf32> to vector<8x32xbf16>
    %102 = vector.extract_strided_slice %101 {offsets = [0, 0], sizes = [8, 8], strides = [1, 1]} : vector<8x32xbf16> to vector<8x8xbf16>
    %c0_112 = arith.constant 0 : index
    %c0_113 = arith.constant 0 : index
    %c2_114 = arith.constant 2 : index
    %103 = vector.load %arg17[%c0_112, %c0_113, %c2_114] : memref<4x8x28xbf16, #tpu.memory_space<vmem>>, vector<1x8x8xbf16>
    %104 = vector.shape_cast %103 : vector<1x8x8xbf16> to vector<8x8xbf16>
    %105 = vector.shape_cast %102 : vector<8x8xbf16> to vector<1x8x8xbf16>
    tpu.vector_store %arg17[%c0_112, %c0_113, %c2_114], %105 {strides = array<i32>} : memref<4x8x28xbf16, #tpu.memory_space<vmem>>, vector<1x8x8xbf16>,
    %106 = vector.extract_strided_slice %101 {offsets = [0, 8], sizes = [8, 8], strides = [1, 1]} : vector<8x32xbf16> to vector<8x8xbf16>
    %c1_115 = arith.constant 1 : index
    %c0_116 = arith.constant 0 : index
    %c2_117 = arith.constant 2 : index
    %107 = vector.load %arg17[%c1_115, %c0_116, %c2_117] : memref<4x8x28xbf16, #tpu.memory_space<vmem>>, vector<1x8x8xbf16>
    %108 = vector.shape_cast %107 : vector<1x8x8xbf16> to vector<8x8xbf16>
    %109 = vector.shape_cast %106 : vector<8x8xbf16> to vector<1x8x8xbf16>
    tpu.vector_store %arg17[%c1_115, %c0_116, %c2_117], %109 {strides = array<i32>} : memref<4x8x28xbf16, #tpu.memory_space<vmem>>, vector<1x8x8xbf16>,
    %110 = vector.extract_strided_slice %101 {offsets = [0, 16], sizes = [8, 8], strides = [1, 1]} : vector<8x32xbf16> to vector<8x8xbf16>
    %c2_118 = arith.constant 2 : index
    %c0_119 = arith.constant 0 : index
    %c2_120 = arith.constant 2 : index
    %111 = vector.load %arg17[%c2_118, %c0_119, %c2_120] : memref<4x8x28xbf16, #tpu.memory_space<vmem>>, vector<1x8x8xbf16>
    %112 = vector.shape_cast %111 : vector<1x8x8xbf16> to vector<8x8xbf16>
    %113 = vector.shape_cast %110 : vector<8x8xbf16> to vector<1x8x8xbf16>
    tpu.vector_store %arg17[%c2_118, %c0_119, %c2_120], %113 {strides = array<i32>} : memref<4x8x28xbf16, #tpu.memory_space<vmem>>, vector<1x8x8xbf16>,
    %114 = vector.extract_strided_slice %101 {offsets = [0, 24], sizes = [8, 8], strides = [1, 1]} : vector<8x32xbf16> to vector<8x8xbf16>
    %c3_121 = arith.constant 3 : index
    %c0_122 = arith.constant 0 : index
    %c2_123 = arith.constant 2 : index
    %115 = vector.load %arg17[%c3_121, %c0_122, %c2_123] : memref<4x8x28xbf16, #tpu.memory_space<vmem>>, vector<1x8x8xbf16>
    %116 = vector.shape_cast %115 : vector<1x8x8xbf16> to vector<8x8xbf16>
    %117 = vector.shape_cast %114 : vector<8x8xbf16> to vector<1x8x8xbf16>
    tpu.vector_store %arg17[%c3_121, %c0_122, %c2_123], %117 {strides = array<i32>} : memref<4x8x28xbf16, #tpu.memory_space<vmem>>, vector<1x8x8xbf16>,
    %cst_124 = arith.constant 0.000000e+00 : bf16
    %118 = vector.broadcast %cst_124 : bf16 to vector<4x8x2xbf16>
    %c0_125 = arith.constant 0 : index
    %c0_126 = arith.constant 0 : index
    %c0_127 = arith.constant 0 : index
    %119 = vector.load %arg17[%c0_125, %c0_126, %c0_127] : memref<4x8x28xbf16, #tpu.memory_space<vmem>>, vector<4x8x2xbf16>
    tpu.vector_store %arg17[%c0_125, %c0_126, %c0_127], %118 {strides = array<i32>} : memref<4x8x28xbf16, #tpu.memory_space<vmem>>, vector<4x8x2xbf16>,
    %cst_128 = arith.constant 0.000000e+00 : bf16
    %120 = vector.broadcast %cst_128 : bf16 to vector<4x8x2xbf16>
    %c0_129 = arith.constant 0 : index
    %c0_130 = arith.constant 0 : index
    %c10 = arith.constant 10 : index
    %121 = vector.load %arg17[%c0_129, %c0_130, %c10] : memref<4x8x28xbf16, #tpu.memory_space<vmem>>, vector<4x8x2xbf16>
    tpu.vector_store %arg17[%c0_129, %c0_130, %c10], %120 {strides = array<i32>} : memref<4x8x28xbf16, #tpu.memory_space<vmem>>, vector<4x8x2xbf16>,
    %c0_131 = arith.constant 0 : index
    %c0_132 = arith.constant 0 : index
    %c0_133 = arith.constant 0 : index
    %122 = vector.load %arg17[%c0_131, %c0_132, %c0_133] : memref<4x8x28xbf16, #tpu.memory_space<vmem>>, vector<1x8x8xbf16>
    %123 = vector.shape_cast %122 : vector<1x8x8xbf16> to vector<8x8xbf16>
    %124 = arith.extf %123 : vector<8x8xbf16> to vector<8x8xf32>
    %c0_134 = arith.constant 0 : index
    %c0_135 = arith.constant 0 : index
    %125 = vector.load %arg18[%c0_134, %c0_135] : memref<40x96xf32, #tpu.memory_space<vmem>>, vector<8x8xf32>
    tpu.vector_store %arg18[%c0_134, %c0_135], %124 {strides = array<i32>} : memref<40x96xf32, #tpu.memory_space<vmem>>, vector<8x8xf32>,
    %c1_136 = arith.constant 1 : index
    %c0_137 = arith.constant 0 : index
    %c0_138 = arith.constant 0 : index
    %126 = vector.load %arg17[%c1_136, %c0_137, %c0_138] : memref<4x8x28xbf16, #tpu.memory_space<vmem>>, vector<1x8x8xbf16>
    %127 = vector.shape_cast %126 : vector<1x8x8xbf16> to vector<8x8xbf16>
    %128 = arith.extf %127 : vector<8x8xbf16> to vector<8x8xf32>
    %c0_139 = arith.constant 0 : index
    %c8_140 = arith.constant 8 : index
    %129 = vector.load %arg18[%c0_139, %c8_140] : memref<40x96xf32, #tpu.memory_space<vmem>>, vector<8x8xf32>
    tpu.vector_store %arg18[%c0_139, %c8_140], %128 {strides = array<i32>} : memref<40x96xf32, #tpu.memory_space<vmem>>, vector<8x8xf32>,
    %c2_141 = arith.constant 2 : index
    %c0_142 = arith.constant 0 : index
    %c0_143 = arith.constant 0 : index
    %130 = vector.load %arg17[%c2_141, %c0_142, %c0_143] : memref<4x8x28xbf16, #tpu.memory_space<vmem>>, vector<1x8x8xbf16>
    %131 = vector.shape_cast %130 : vector<1x8x8xbf16> to vector<8x8xbf16>
    %132 = arith.extf %131 : vector<8x8xbf16> to vector<8x8xf32>
    %c0_144 = arith.constant 0 : index
    %c16_145 = arith.constant 16 : index
    %133 = vector.load %arg18[%c0_144, %c16_145] : memref<40x96xf32, #tpu.memory_space<vmem>>, vector<8x8xf32>
    tpu.vector_store %arg18[%c0_144, %c16_145], %132 {strides = array<i32>} : memref<40x96xf32, #tpu.memory_space<vmem>>, vector<8x8xf32>,
    %c3_146 = arith.constant 3 : index
    %c0_147 = arith.constant 0 : index
    %c0_148 = arith.constant 0 : index
    %134 = vector.load %arg17[%c3_146, %c0_147, %c0_148] : memref<4x8x28xbf16, #tpu.memory_space<vmem>>, vector<1x8x8xbf16>
    %135 = vector.shape_cast %134 : vector<1x8x8xbf16> to vector<8x8xbf16>
    %136 = arith.extf %135 : vector<8x8xbf16> to vector<8x8xf32>
    %c0_149 = arith.constant 0 : index
    %c24_150 = arith.constant 24 : index
    %137 = vector.load %arg18[%c0_149, %c24_150] : memref<40x96xf32, #tpu.memory_space<vmem>>, vector<8x8xf32>
    tpu.vector_store %arg18[%c0_149, %c24_150], %136 {strides = array<i32>} : memref<40x96xf32, #tpu.memory_space<vmem>>, vector<8x8xf32>,
    %c0_151 = arith.constant 0 : index
    %c0_152 = arith.constant 0 : index
    %c1_153 = arith.constant 1 : index
    %138 = vector.load %arg17[%c0_151, %c0_152, %c1_153] : memref<4x8x28xbf16, #tpu.memory_space<vmem>>, vector<1x8x8xbf16>
    %139 = vector.shape_cast %138 : vector<1x8x8xbf16> to vector<8x8xbf16>
    %140 = arith.extf %139 : vector<8x8xbf16> to vector<8x8xf32>
    %c8_154 = arith.constant 8 : index
    %c0_155 = arith.constant 0 : index
    %141 = vector.load %arg18[%c8_154, %c0_155] : memref<40x96xf32, #tpu.memory_space<vmem>>, vector<8x8xf32>
    tpu.vector_store %arg18[%c8_154, %c0_155], %140 {strides = array<i32>} : memref<40x96xf32, #tpu.memory_space<vmem>>, vector<8x8xf32>,
    %c1_156 = arith.constant 1 : index
    %c0_157 = arith.constant 0 : index
    %c1_158 = arith.constant 1 : index
    %142 = vector.load %arg17[%c1_156, %c0_157, %c1_158] : memref<4x8x28xbf16, #tpu.memory_space<vmem>>, vector<1x8x8xbf16>
    %143 = vector.shape_cast %142 : vector<1x8x8xbf16> to vector<8x8xbf16>
    %144 = arith.extf %143 : vector<8x8xbf16> to vector<8x8xf32>
    %c8_159 = arith.constant 8 : index
    %c8_160 = arith.constant 8 : index
    %145 = vector.load %arg18[%c8_159, %c8_160] : memref<40x96xf32, #tpu.memory_space<vmem>>, vector<8x8xf32>
    tpu.vector_store %arg18[%c8_159, %c8_160], %144 {strides = array<i32>} : memref<40x96xf32, #tpu.memory_space<vmem>>, vector<8x8xf32>,
    %c2_161 = arith.constant 2 : index
    %c0_162 = arith.constant 0 : index
    %c1_163 = arith.constant 1 : index
    %146 = vector.load %arg17[%c2_161, %c0_162, %c1_163] : memref<4x8x28xbf16, #tpu.memory_space<vmem>>, vector<1x8x8xbf16>
    %147 = vector.shape_cast %146 : vector<1x8x8xbf16> to vector<8x8xbf16>
    %148 = arith.extf %147 : vector<8x8xbf16> to vector<8x8xf32>
    %c8_164 = arith.constant 8 : index
    %c16_165 = arith.constant 16 : index
    %149 = vector.load %arg18[%c8_164, %c16_165] : memref<40x96xf32, #tpu.memory_space<vmem>>, vector<8x8xf32>
    tpu.vector_store %arg18[%c8_164, %c16_165], %148 {strides = array<i32>} : memref<40x96xf32, #tpu.memory_space<vmem>>, vector<8x8xf32>,
    %c3_166 = arith.constant 3 : index
    %c0_167 = arith.constant 0 : index
    %c1_168 = arith.constant 1 : index
    %150 = vector.load %arg17[%c3_166, %c0_167, %c1_168] : memref<4x8x28xbf16, #tpu.memory_space<vmem>>, vector<1x8x8xbf16>
    %151 = vector.shape_cast %150 : vector<1x8x8xbf16> to vector<8x8xbf16>
    %152 = arith.extf %151 : vector<8x8xbf16> to vector<8x8xf32>
    %c8_169 = arith.constant 8 : index
    %c24_170 = arith.constant 24 : index
    %153 = vector.load %arg18[%c8_169, %c24_170] : memref<40x96xf32, #tpu.memory_space<vmem>>, vector<8x8xf32>
    tpu.vector_store %arg18[%c8_169, %c24_170], %152 {strides = array<i32>} : memref<40x96xf32, #tpu.memory_space<vmem>>, vector<8x8xf32>,
    %c0_171 = arith.constant 0 : index
    %c0_172 = arith.constant 0 : index
    %c2_173 = arith.constant 2 : index
    %154 = vector.load %arg17[%c0_171, %c0_172, %c2_173] : memref<4x8x28xbf16, #tpu.memory_space<vmem>>, vector<1x8x8xbf16>
    %155 = vector.shape_cast %154 : vector<1x8x8xbf16> to vector<8x8xbf16>
    %156 = arith.extf %155 : vector<8x8xbf16> to vector<8x8xf32>
    %c16_174 = arith.constant 16 : index
    %c0_175 = arith.constant 0 : index
    %157 = vector.load %arg18[%c16_174, %c0_175] : memref<40x96xf32, #tpu.memory_space<vmem>>, vector<8x8xf32>
    tpu.vector_store %arg18[%c16_174, %c0_175], %156 {strides = array<i32>} : memref<40x96xf32, #tpu.memory_space<vmem>>, vector<8x8xf32>,
    %c1_176 = arith.constant 1 : index
    %c0_177 = arith.constant 0 : index
    %c2_178 = arith.constant 2 : index
    %158 = vector.load %arg17[%c1_176, %c0_177, %c2_178] : memref<4x8x28xbf16, #tpu.memory_space<vmem>>, vector<1x8x8xbf16>
    %159 = vector.shape_cast %158 : vector<1x8x8xbf16> to vector<8x8xbf16>
    %160 = arith.extf %159 : vector<8x8xbf16> to vector<8x8xf32>
    %c16_179 = arith.constant 16 : index
    %c8_180 = arith.constant 8 : index
    %161 = vector.load %arg18[%c16_179, %c8_180] : memref<40x96xf32, #tpu.memory_space<vmem>>, vector<8x8xf32>
    tpu.vector_store %arg18[%c16_179, %c8_180], %160 {strides = array<i32>} : memref<40x96xf32, #tpu.memory_space<vmem>>, vector<8x8xf32>,
    %c2_181 = arith.constant 2 : index
    %c0_182 = arith.constant 0 : index
    %c2_183 = arith.constant 2 : index
    %162 = vector.load %arg17[%c2_181, %c0_182, %c2_183] : memref<4x8x28xbf16, #tpu.memory_space<vmem>>, vector<1x8x8xbf16>
    %163 = vector.shape_cast %162 : vector<1x8x8xbf16> to vector<8x8xbf16>
    %164 = arith.extf %163 : vector<8x8xbf16> to vector<8x8xf32>
    %c16_184 = arith.constant 16 : index
    %c16_185 = arith.constant 16 : index
    %165 = vector.load %arg18[%c16_184, %c16_185] : memref<40x96xf32, #tpu.memory_space<vmem>>, vector<8x8xf32>
    tpu.vector_store %arg18[%c16_184, %c16_185], %164 {strides = array<i32>} : memref<40x96xf32, #tpu.memory_space<vmem>>, vector<8x8xf32>,
    %c3_186 = arith.constant 3 : index
    %c0_187 = arith.constant 0 : index
    %c2_188 = arith.constant 2 : index
    %166 = vector.load %arg17[%c3_186, %c0_187, %c2_188] : memref<4x8x28xbf16, #tpu.memory_space<vmem>>, vector<1x8x8xbf16>
    %167 = vector.shape_cast %166 : vector<1x8x8xbf16> to vector<8x8xbf16>
    %168 = arith.extf %167 : vector<8x8xbf16> to vector<8x8xf32>
    %c16_189 = arith.constant 16 : index
    %c24_190 = arith.constant 24 : index
    %169 = vector.load %arg18[%c16_189, %c24_190] : memref<40x96xf32, #tpu.memory_space<vmem>>, vector<8x8xf32>
    tpu.vector_store %arg18[%c16_189, %c24_190], %168 {strides = array<i32>} : memref<40x96xf32, #tpu.memory_space<vmem>>, vector<8x8xf32>,
    %c0_191 = arith.constant 0 : index
    %c0_192 = arith.constant 0 : index
    %c3_193 = arith.constant 3 : index
    %170 = vector.load %arg17[%c0_191, %c0_192, %c3_193] : memref<4x8x28xbf16, #tpu.memory_space<vmem>>, vector<1x8x8xbf16>
    %171 = vector.shape_cast %170 : vector<1x8x8xbf16> to vector<8x8xbf16>
    %172 = arith.extf %171 : vector<8x8xbf16> to vector<8x8xf32>
    %c24_194 = arith.constant 24 : index
    %c0_195 = arith.constant 0 : index
    %173 = vector.load %arg18[%c24_194, %c0_195] : memref<40x96xf32, #tpu.memory_space<vmem>>, vector<8x8xf32>
    tpu.vector_store %arg18[%c24_194, %c0_195], %172 {strides = array<i32>} : memref<40x96xf32, #tpu.memory_space<vmem>>, vector<8x8xf32>,
    %c1_196 = arith.constant 1 : index
    %c0_197 = arith.constant 0 : index
    %c3_198 = arith.constant 3 : index
    %174 = vector.load %arg17[%c1_196, %c0_197, %c3_198] : memref<4x8x28xbf16, #tpu.memory_space<vmem>>, vector<1x8x8xbf16>
    %175 = vector.shape_cast %174 : vector<1x8x8xbf16> to vector<8x8xbf16>
    %176 = arith.extf %175 : vector<8x8xbf16> to vector<8x8xf32>
    %c24_199 = arith.constant 24 : index
    %c8_200 = arith.constant 8 : index
    %177 = vector.load %arg18[%c24_199, %c8_200] : memref<40x96xf32, #tpu.memory_space<vmem>>, vector<8x8xf32>
    tpu.vector_store %arg18[%c24_199, %c8_200], %176 {strides = array<i32>} : memref<40x96xf32, #tpu.memory_space<vmem>>, vector<8x8xf32>,
    %c2_201 = arith.constant 2 : index
    %c0_202 = arith.constant 0 : index
    %c3_203 = arith.constant 3 : index
    %178 = vector.load %arg17[%c2_201, %c0_202, %c3_203] : memref<4x8x28xbf16, #tpu.memory_space<vmem>>, vector<1x8x8xbf16>
    %179 = vector.shape_cast %178 : vector<1x8x8xbf16> to vector<8x8xbf16>
    %180 = arith.extf %179 : vector<8x8xbf16> to vector<8x8xf32>
    %c24_204 = arith.constant 24 : index
    %c16_205 = arith.constant 16 : index
    %181 = vector.load %arg18[%c24_204, %c16_205] : memref<40x96xf32, #tpu.memory_space<vmem>>, vector<8x8xf32>
    tpu.vector_store %arg18[%c24_204, %c16_205], %180 {strides = array<i32>} : memref<40x96xf32, #tpu.memory_space<vmem>>, vector<8x8xf32>,
    %c3_206 = arith.constant 3 : index
    %c0_207 = arith.constant 0 : index
    %c3_208 = arith.constant 3 : index
    %182 = vector.load %arg17[%c3_206, %c0_207, %c3_208] : memref<4x8x28xbf16, #tpu.memory_space<vmem>>, vector<1x8x8xbf16>
    %183 = vector.shape_cast %182 : vector<1x8x8xbf16> to vector<8x8xbf16>
    %184 = arith.extf %183 : vector<8x8xbf16> to vector<8x8xf32>
    %c24_209 = arith.constant 24 : index
    %c24_210 = arith.constant 24 : index
    %185 = vector.load %arg18[%c24_209, %c24_210] : memref<40x96xf32, #tpu.memory_space<vmem>>, vector<8x8xf32>
    tpu.vector_store %arg18[%c24_209, %c24_210], %184 {strides = array<i32>} : memref<40x96xf32, #tpu.memory_space<vmem>>, vector<8x8xf32>,
    %c0_211 = arith.constant 0 : index
    %c0_212 = arith.constant 0 : index
    %c4_213 = arith.constant 4 : index
    %186 = vector.load %arg17[%c0_211, %c0_212, %c4_213] : memref<4x8x28xbf16, #tpu.memory_space<vmem>>, vector<1x8x8xbf16>
    %187 = vector.shape_cast %186 : vector<1x8x8xbf16> to vector<8x8xbf16>
    %188 = arith.extf %187 : vector<8x8xbf16> to vector<8x8xf32>
    %c32_214 = arith.constant 32 : index
    %c0_215 = arith.constant 0 : index
    %189 = vector.load %arg18[%c32_214, %c0_215] : memref<40x96xf32, #tpu.memory_space<vmem>>, vector<8x8xf32>
    tpu.vector_store %arg18[%c32_214, %c0_215], %188 {strides = array<i32>} : memref<40x96xf32, #tpu.memory_space<vmem>>, vector<8x8xf32>,
    %c1_216 = arith.constant 1 : index
    %c0_217 = arith.constant 0 : index
    %c4_218 = arith.constant 4 : index
    %190 = vector.load %arg17[%c1_216, %c0_217, %c4_218] : memref<4x8x28xbf16, #tpu.memory_space<vmem>>, vector<1x8x8xbf16>
    %191 = vector.shape_cast %190 : vector<1x8x8xbf16> to vector<8x8xbf16>
    %192 = arith.extf %191 : vector<8x8xbf16> to vector<8x8xf32>
    %c32_219 = arith.constant 32 : index
    %c8_220 = arith.constant 8 : index
    %193 = vector.load %arg18[%c32_219, %c8_220] : memref<40x96xf32, #tpu.memory_space<vmem>>, vector<8x8xf32>
    tpu.vector_store %arg18[%c32_219, %c8_220], %192 {strides = array<i32>} : memref<40x96xf32, #tpu.memory_space<vmem>>, vector<8x8xf32>,
    %c2_221 = arith.constant 2 : index
    %c0_222 = arith.constant 0 : index
    %c4_223 = arith.constant 4 : index
    %194 = vector.load %arg17[%c2_221, %c0_222, %c4_223] : memref<4x8x28xbf16, #tpu.memory_space<vmem>>, vector<1x8x8xbf16>
    %195 = vector.shape_cast %194 : vector<1x8x8xbf16> to vector<8x8xbf16>
    %196 = arith.extf %195 : vector<8x8xbf16> to vector<8x8xf32>
    %c32_224 = arith.constant 32 : index
    %c16_225 = arith.constant 16 : index
    %197 = vector.load %arg18[%c32_224, %c16_225] : memref<40x96xf32, #tpu.memory_space<vmem>>, vector<8x8xf32>
    tpu.vector_store %arg18[%c32_224, %c16_225], %196 {strides = array<i32>} : memref<40x96xf32, #tpu.memory_space<vmem>>, vector<8x8xf32>,
    %c3_226 = arith.constant 3 : index
    %c0_227 = arith.constant 0 : index
    %c4_228 = arith.constant 4 : index
    %198 = vector.load %arg17[%c3_226, %c0_227, %c4_228] : memref<4x8x28xbf16, #tpu.memory_space<vmem>>, vector<1x8x8xbf16>
    %199 = vector.shape_cast %198 : vector<1x8x8xbf16> to vector<8x8xbf16>
    %200 = arith.extf %199 : vector<8x8xbf16> to vector<8x8xf32>
    %c32_229 = arith.constant 32 : index
    %c24_230 = arith.constant 24 : index
    %201 = vector.load %arg18[%c32_229, %c24_230] : memref<40x96xf32, #tpu.memory_space<vmem>>, vector<8x8xf32>
    tpu.vector_store %arg18[%c32_229, %c24_230], %200 {strides = array<i32>} : memref<40x96xf32, #tpu.memory_space<vmem>>, vector<8x8xf32>,
    %c0_231 = arith.constant 0 : index
    %c0_232 = arith.constant 0 : index
    %202 = vector.load %arg18[%c0_231, %c0_232] : memref<40x96xf32, #tpu.memory_space<vmem>>, vector<40x32xf32>
    %203 = arith.truncf %202 : vector<40x32xf32> to vector<40x32xbf16>
    %c0_233 = arith.constant 0 : index
    %c0_234 = arith.constant 0 : index
    %204 = vector.load %arg10[%c0_233, %c0_234] : memref<32x12xbf16, #tpu.memory_space<vmem>>, vector<32x12xbf16>
    %cst_235 = arith.constant dense<0.000000e+00> : vector<40x12xf32>
    %205 = tpu.matmul %203, %204, %cst_235 {dimension_numbers = #tpu.dot_dimension_numbers<[1], [0], [0], [1], [0, 0, 1, 1], [], []>} : vector<40x32xbf16>, vector<32x12xbf16>, vector<40x12xf32> -> vector<40x12xf32>
    %206 = arith.truncf %205 : vector<40x12xf32> to vector<40x12xbf16>
    %c0_236 = arith.constant 0 : index
    %c0_237 = arith.constant 0 : index
    %207 = vector.load %arg2[%c0_236, %c0_237] : memref<8x40xbf16, #tpu.memory_space<vmem>>, vector<8x40xbf16>
    %cst_238 = arith.constant dense<0.000000e+00> : vector<8x12xf32>
    %208 = tpu.matmul %207, %206, %cst_238 {dimension_numbers = #tpu.dot_dimension_numbers<[1], [0], [0], [1], [0, 0, 1, 1], [], []>} : vector<8x40xbf16>, vector<40x12xbf16>, vector<8x12xf32> -> vector<8x12xf32>
    %c0_239 = arith.constant 0 : index
    %c0_240 = arith.constant 0 : index
    %209 = vector.load %arg6[%c0_239, %c0_240] : memref<8x1xf32, #tpu.memory_space<vmem>>, vector<8x1xf32>
    %210 = vector.broadcast %209 : vector<8x1xf32> to vector<8x12xf32>
    %211 = arith.addf %208, %210 : vector<8x12xf32>
    %cst_241 = arith.constant 0.000000e+00 : f32
    %212 = vector.broadcast %cst_241 : f32 to vector<8x12xf32>
    %213 = arith.cmpf oge, %211, %212 : vector<8x12xf32>
    %cst_242 = arith.constant 1.000000e-01 : f32
    %214 = vector.broadcast %cst_242 : f32 to vector<8x12xf32>
    %215 = arith.mulf %214, %211 : vector<8x12xf32>
    %216 = arith.select %213, %211, %215 : vector<8x12xi1>, vector<8x12xf32>
    %c0_243 = arith.constant 0 : index
    %c0_244 = arith.constant 0 : index
    %217 = vector.load %arg13[%c0_243, %c0_244] : memref<8x12xf32, #tpu.memory_space<vmem>>, vector<8x12xf32>
    tpu.vector_store %arg13[%c0_243, %c0_244], %216 {strides = array<i32>} : memref<8x12xf32, #tpu.memory_space<vmem>>, vector<8x12xf32>,
    %218 = arith.truncf %216 : vector<8x12xf32> to vector<8x12xbf16>
    %219 = vector.extract_strided_slice %218 {offsets = [0, 0], sizes = [8, 3], strides = [1, 1]} : vector<8x12xbf16> to vector<8x3xbf16>
    %c0_245 = arith.constant 0 : index
    %c0_246 = arith.constant 0 : index
    %c2_247 = arith.constant 2 : index
    %220 = vector.load %arg16[%c0_245, %c0_246, %c2_247] : memref<4x8x28xbf16, #tpu.memory_space<vmem>>, vector<1x8x3xbf16>
    %221 = vector.shape_cast %220 : vector<1x8x3xbf16> to vector<8x3xbf16>
    %222 = vector.shape_cast %219 : vector<8x3xbf16> to vector<1x8x3xbf16>
    tpu.vector_store %arg16[%c0_245, %c0_246, %c2_247], %222 {strides = array<i32>} : memref<4x8x28xbf16, #tpu.memory_space<vmem>>, vector<1x8x3xbf16>,
    %223 = vector.extract_strided_slice %218 {offsets = [0, 3], sizes = [8, 3], strides = [1, 1]} : vector<8x12xbf16> to vector<8x3xbf16>
    %c1_248 = arith.constant 1 : index
    %c0_249 = arith.constant 0 : index
    %c2_250 = arith.constant 2 : index
    %224 = vector.load %arg16[%c1_248, %c0_249, %c2_250] : memref<4x8x28xbf16, #tpu.memory_space<vmem>>, vector<1x8x3xbf16>
    %225 = vector.shape_cast %224 : vector<1x8x3xbf16> to vector<8x3xbf16>
    %226 = vector.shape_cast %223 : vector<8x3xbf16> to vector<1x8x3xbf16>
    tpu.vector_store %arg16[%c1_248, %c0_249, %c2_250], %226 {strides = array<i32>} : memref<4x8x28xbf16, #tpu.memory_space<vmem>>, vector<1x8x3xbf16>,
    %227 = vector.extract_strided_slice %218 {offsets = [0, 6], sizes = [8, 3], strides = [1, 1]} : vector<8x12xbf16> to vector<8x3xbf16>
    %c2_251 = arith.constant 2 : index
    %c0_252 = arith.constant 0 : index
    %c2_253 = arith.constant 2 : index
    %228 = vector.load %arg16[%c2_251, %c0_252, %c2_253] : memref<4x8x28xbf16, #tpu.memory_space<vmem>>, vector<1x8x3xbf16>
    %229 = vector.shape_cast %228 : vector<1x8x3xbf16> to vector<8x3xbf16>
    %230 = vector.shape_cast %227 : vector<8x3xbf16> to vector<1x8x3xbf16>
    tpu.vector_store %arg16[%c2_251, %c0_252, %c2_253], %230 {strides = array<i32>} : memref<4x8x28xbf16, #tpu.memory_space<vmem>>, vector<1x8x3xbf16>,
    %231 = vector.extract_strided_slice %218 {offsets = [0, 9], sizes = [8, 3], strides = [1, 1]} : vector<8x12xbf16> to vector<8x3xbf16>
    %c3_254 = arith.constant 3 : index
    %c0_255 = arith.constant 0 : index
    %c2_256 = arith.constant 2 : index
    %232 = vector.load %arg16[%c3_254, %c0_255, %c2_256] : memref<4x8x28xbf16, #tpu.memory_space<vmem>>, vector<1x8x3xbf16>
    %233 = vector.shape_cast %232 : vector<1x8x3xbf16> to vector<8x3xbf16>
    %234 = vector.shape_cast %231 : vector<8x3xbf16> to vector<1x8x3xbf16>
    tpu.vector_store %arg16[%c3_254, %c0_255, %c2_256], %234 {strides = array<i32>} : memref<4x8x28xbf16, #tpu.memory_space<vmem>>, vector<1x8x3xbf16>,
    %cst_257 = arith.constant 0.000000e+00 : bf16
    %235 = vector.broadcast %cst_257 : bf16 to vector<4x8x2xbf16>
    %c0_258 = arith.constant 0 : index
    %c0_259 = arith.constant 0 : index
    %c0_260 = arith.constant 0 : index
    %236 = vector.load %arg16[%c0_258, %c0_259, %c0_260] : memref<4x8x28xbf16, #tpu.memory_space<vmem>>, vector<4x8x2xbf16>
    tpu.vector_store %arg16[%c0_258, %c0_259, %c0_260], %235 {strides = array<i32>} : memref<4x8x28xbf16, #tpu.memory_space<vmem>>, vector<4x8x2xbf16>,
    %cst_261 = arith.constant 0.000000e+00 : bf16
    %237 = vector.broadcast %cst_261 : bf16 to vector<4x8x2xbf16>
    %c0_262 = arith.constant 0 : index
    %c0_263 = arith.constant 0 : index
    %c5 = arith.constant 5 : index
    %238 = vector.load %arg16[%c0_262, %c0_263, %c5] : memref<4x8x28xbf16, #tpu.memory_space<vmem>>, vector<4x8x2xbf16>
    tpu.vector_store %arg16[%c0_262, %c0_263, %c5], %237 {strides = array<i32>} : memref<4x8x28xbf16, #tpu.memory_space<vmem>>, vector<4x8x2xbf16>,
    %c0_264 = arith.constant 0 : index
    %c0_265 = arith.constant 0 : index
    %c0_266 = arith.constant 0 : index
    %239 = vector.load %arg16[%c0_264, %c0_265, %c0_266] : memref<4x8x28xbf16, #tpu.memory_space<vmem>>, vector<1x8x3xbf16>
    %240 = vector.shape_cast %239 : vector<1x8x3xbf16> to vector<8x3xbf16>
    %241 = arith.extf %240 : vector<8x3xbf16> to vector<8x3xf32>
    %c0_267 = arith.constant 0 : index
    %c0_268 = arith.constant 0 : index
    %242 = vector.load %arg18[%c0_267, %c0_268] : memref<40x96xf32, #tpu.memory_space<vmem>>, vector<8x3xf32>
    tpu.vector_store %arg18[%c0_267, %c0_268], %241 {strides = array<i32>} : memref<40x96xf32, #tpu.memory_space<vmem>>, vector<8x3xf32>,
    %c1_269 = arith.constant 1 : index
    %c0_270 = arith.constant 0 : index
    %c0_271 = arith.constant 0 : index
    %243 = vector.load %arg16[%c1_269, %c0_270, %c0_271] : memref<4x8x28xbf16, #tpu.memory_space<vmem>>, vector<1x8x3xbf16>
    %244 = vector.shape_cast %243 : vector<1x8x3xbf16> to vector<8x3xbf16>
    %245 = arith.extf %244 : vector<8x3xbf16> to vector<8x3xf32>
    %c0_272 = arith.constant 0 : index
    %c3_273 = arith.constant 3 : index
    %246 = vector.load %arg18[%c0_272, %c3_273] : memref<40x96xf32, #tpu.memory_space<vmem>>, vector<8x3xf32>
    tpu.vector_store %arg18[%c0_272, %c3_273], %245 {strides = array<i32>} : memref<40x96xf32, #tpu.memory_space<vmem>>, vector<8x3xf32>,
    %c2_274 = arith.constant 2 : index
    %c0_275 = arith.constant 0 : index
    %c0_276 = arith.constant 0 : index
    %247 = vector.load %arg16[%c2_274, %c0_275, %c0_276] : memref<4x8x28xbf16, #tpu.memory_space<vmem>>, vector<1x8x3xbf16>
    %248 = vector.shape_cast %247 : vector<1x8x3xbf16> to vector<8x3xbf16>
    %249 = arith.extf %248 : vector<8x3xbf16> to vector<8x3xf32>
    %c0_277 = arith.constant 0 : index
    %c6 = arith.constant 6 : index
    %250 = vector.load %arg18[%c0_277, %c6] : memref<40x96xf32, #tpu.memory_space<vmem>>, vector<8x3xf32>
    tpu.vector_store %arg18[%c0_277, %c6], %249 {strides = array<i32>} : memref<40x96xf32, #tpu.memory_space<vmem>>, vector<8x3xf32>,
    %c3_278 = arith.constant 3 : index
    %c0_279 = arith.constant 0 : index
    %c0_280 = arith.constant 0 : index
    %251 = vector.load %arg16[%c3_278, %c0_279, %c0_280] : memref<4x8x28xbf16, #tpu.memory_space<vmem>>, vector<1x8x3xbf16>
    %252 = vector.shape_cast %251 : vector<1x8x3xbf16> to vector<8x3xbf16>
    %253 = arith.extf %252 : vector<8x3xbf16> to vector<8x3xf32>
    %c0_281 = arith.constant 0 : index
    %c9 = arith.constant 9 : index
    %254 = vector.load %arg18[%c0_281, %c9] : memref<40x96xf32, #tpu.memory_space<vmem>>, vector<8x3xf32>
    tpu.vector_store %arg18[%c0_281, %c9], %253 {strides = array<i32>} : memref<40x96xf32, #tpu.memory_space<vmem>>, vector<8x3xf32>,
    %c0_282 = arith.constant 0 : index
    %c0_283 = arith.constant 0 : index
    %c1_284 = arith.constant 1 : index
    %255 = vector.load %arg16[%c0_282, %c0_283, %c1_284] : memref<4x8x28xbf16, #tpu.memory_space<vmem>>, vector<1x8x3xbf16>
    %256 = vector.shape_cast %255 : vector<1x8x3xbf16> to vector<8x3xbf16>
    %257 = arith.extf %256 : vector<8x3xbf16> to vector<8x3xf32>
    %c8_285 = arith.constant 8 : index
    %c0_286 = arith.constant 0 : index
    %258 = vector.load %arg18[%c8_285, %c0_286] : memref<40x96xf32, #tpu.memory_space<vmem>>, vector<8x3xf32>
    tpu.vector_store %arg18[%c8_285, %c0_286], %257 {strides = array<i32>} : memref<40x96xf32, #tpu.memory_space<vmem>>, vector<8x3xf32>,
    %c1_287 = arith.constant 1 : index
    %c0_288 = arith.constant 0 : index
    %c1_289 = arith.constant 1 : index
    %259 = vector.load %arg16[%c1_287, %c0_288, %c1_289] : memref<4x8x28xbf16, #tpu.memory_space<vmem>>, vector<1x8x3xbf16>
    %260 = vector.shape_cast %259 : vector<1x8x3xbf16> to vector<8x3xbf16>
    %261 = arith.extf %260 : vector<8x3xbf16> to vector<8x3xf32>
    %c8_290 = arith.constant 8 : index
    %c3_291 = arith.constant 3 : index
    %262 = vector.load %arg18[%c8_290, %c3_291] : memref<40x96xf32, #tpu.memory_space<vmem>>, vector<8x3xf32>
    tpu.vector_store %arg18[%c8_290, %c3_291], %261 {strides = array<i32>} : memref<40x96xf32, #tpu.memory_space<vmem>>, vector<8x3xf32>,
    %c2_292 = arith.constant 2 : index
    %c0_293 = arith.constant 0 : index
    %c1_294 = arith.constant 1 : index
    %263 = vector.load %arg16[%c2_292, %c0_293, %c1_294] : memref<4x8x28xbf16, #tpu.memory_space<vmem>>, vector<1x8x3xbf16>
    %264 = vector.shape_cast %263 : vector<1x8x3xbf16> to vector<8x3xbf16>
    %265 = arith.extf %264 : vector<8x3xbf16> to vector<8x3xf32>
    %c8_295 = arith.constant 8 : index
    %c6_296 = arith.constant 6 : index
    %266 = vector.load %arg18[%c8_295, %c6_296] : memref<40x96xf32, #tpu.memory_space<vmem>>, vector<8x3xf32>
    tpu.vector_store %arg18[%c8_295, %c6_296], %265 {strides = array<i32>} : memref<40x96xf32, #tpu.memory_space<vmem>>, vector<8x3xf32>,
    %c3_297 = arith.constant 3 : index
    %c0_298 = arith.constant 0 : index
    %c1_299 = arith.constant 1 : index
    %267 = vector.load %arg16[%c3_297, %c0_298, %c1_299] : memref<4x8x28xbf16, #tpu.memory_space<vmem>>, vector<1x8x3xbf16>
    %268 = vector.shape_cast %267 : vector<1x8x3xbf16> to vector<8x3xbf16>
    %269 = arith.extf %268 : vector<8x3xbf16> to vector<8x3xf32>
    %c8_300 = arith.constant 8 : index
    %c9_301 = arith.constant 9 : index
    %270 = vector.load %arg18[%c8_300, %c9_301] : memref<40x96xf32, #tpu.memory_space<vmem>>, vector<8x3xf32>
    tpu.vector_store %arg18[%c8_300, %c9_301], %269 {strides = array<i32>} : memref<40x96xf32, #tpu.memory_space<vmem>>, vector<8x3xf32>,
    %c0_302 = arith.constant 0 : index
    %c0_303 = arith.constant 0 : index
    %c2_304 = arith.constant 2 : index
    %271 = vector.load %arg16[%c0_302, %c0_303, %c2_304] : memref<4x8x28xbf16, #tpu.memory_space<vmem>>, vector<1x8x3xbf16>
    %272 = vector.shape_cast %271 : vector<1x8x3xbf16> to vector<8x3xbf16>
    %273 = arith.extf %272 : vector<8x3xbf16> to vector<8x3xf32>
    %c16_305 = arith.constant 16 : index
    %c0_306 = arith.constant 0 : index
    %274 = vector.load %arg18[%c16_305, %c0_306] : memref<40x96xf32, #tpu.memory_space<vmem>>, vector<8x3xf32>
    tpu.vector_store %arg18[%c16_305, %c0_306], %273 {strides = array<i32>} : memref<40x96xf32, #tpu.memory_space<vmem>>, vector<8x3xf32>,
    %c1_307 = arith.constant 1 : index
    %c0_308 = arith.constant 0 : index
    %c2_309 = arith.constant 2 : index
    %275 = vector.load %arg16[%c1_307, %c0_308, %c2_309] : memref<4x8x28xbf16, #tpu.memory_space<vmem>>, vector<1x8x3xbf16>
    %276 = vector.shape_cast %275 : vector<1x8x3xbf16> to vector<8x3xbf16>
    %277 = arith.extf %276 : vector<8x3xbf16> to vector<8x3xf32>
    %c16_310 = arith.constant 16 : index
    %c3_311 = arith.constant 3 : index
    %278 = vector.load %arg18[%c16_310, %c3_311] : memref<40x96xf32, #tpu.memory_space<vmem>>, vector<8x3xf32>
    tpu.vector_store %arg18[%c16_310, %c3_311], %277 {strides = array<i32>} : memref<40x96xf32, #tpu.memory_space<vmem>>, vector<8x3xf32>,
    %c2_312 = arith.constant 2 : index
    %c0_313 = arith.constant 0 : index
    %c2_314 = arith.constant 2 : index
    %279 = vector.load %arg16[%c2_312, %c0_313, %c2_314] : memref<4x8x28xbf16, #tpu.memory_space<vmem>>, vector<1x8x3xbf16>
    %280 = vector.shape_cast %279 : vector<1x8x3xbf16> to vector<8x3xbf16>
    %281 = arith.extf %280 : vector<8x3xbf16> to vector<8x3xf32>
    %c16_315 = arith.constant 16 : index
    %c6_316 = arith.constant 6 : index
    %282 = vector.load %arg18[%c16_315, %c6_316] : memref<40x96xf32, #tpu.memory_space<vmem>>, vector<8x3xf32>
    tpu.vector_store %arg18[%c16_315, %c6_316], %281 {strides = array<i32>} : memref<40x96xf32, #tpu.memory_space<vmem>>, vector<8x3xf32>,
    %c3_317 = arith.constant 3 : index
    %c0_318 = arith.constant 0 : index
    %c2_319 = arith.constant 2 : index
    %283 = vector.load %arg16[%c3_317, %c0_318, %c2_319] : memref<4x8x28xbf16, #tpu.memory_space<vmem>>, vector<1x8x3xbf16>
    %284 = vector.shape_cast %283 : vector<1x8x3xbf16> to vector<8x3xbf16>
    %285 = arith.extf %284 : vector<8x3xbf16> to vector<8x3xf32>
    %c16_320 = arith.constant 16 : index
    %c9_321 = arith.constant 9 : index
    %286 = vector.load %arg18[%c16_320, %c9_321] : memref<40x96xf32, #tpu.memory_space<vmem>>, vector<8x3xf32>
    tpu.vector_store %arg18[%c16_320, %c9_321], %285 {strides = array<i32>} : memref<40x96xf32, #tpu.memory_space<vmem>>, vector<8x3xf32>,
    %c0_322 = arith.constant 0 : index
    %c0_323 = arith.constant 0 : index
    %c3_324 = arith.constant 3 : index
    %287 = vector.load %arg16[%c0_322, %c0_323, %c3_324] : memref<4x8x28xbf16, #tpu.memory_space<vmem>>, vector<1x8x3xbf16>
    %288 = vector.shape_cast %287 : vector<1x8x3xbf16> to vector<8x3xbf16>
    %289 = arith.extf %288 : vector<8x3xbf16> to vector<8x3xf32>
    %c24_325 = arith.constant 24 : index
    %c0_326 = arith.constant 0 : index
    %290 = vector.load %arg18[%c24_325, %c0_326] : memref<40x96xf32, #tpu.memory_space<vmem>>, vector<8x3xf32>
    tpu.vector_store %arg18[%c24_325, %c0_326], %289 {strides = array<i32>} : memref<40x96xf32, #tpu.memory_space<vmem>>, vector<8x3xf32>,
    %c1_327 = arith.constant 1 : index
    %c0_328 = arith.constant 0 : index
    %c3_329 = arith.constant 3 : index
    %291 = vector.load %arg16[%c1_327, %c0_328, %c3_329] : memref<4x8x28xbf16, #tpu.memory_space<vmem>>, vector<1x8x3xbf16>
    %292 = vector.shape_cast %291 : vector<1x8x3xbf16> to vector<8x3xbf16>
    %293 = arith.extf %292 : vector<8x3xbf16> to vector<8x3xf32>
    %c24_330 = arith.constant 24 : index
    %c3_331 = arith.constant 3 : index
    %294 = vector.load %arg18[%c24_330, %c3_331] : memref<40x96xf32, #tpu.memory_space<vmem>>, vector<8x3xf32>
    tpu.vector_store %arg18[%c24_330, %c3_331], %293 {strides = array<i32>} : memref<40x96xf32, #tpu.memory_space<vmem>>, vector<8x3xf32>,
    %c2_332 = arith.constant 2 : index
    %c0_333 = arith.constant 0 : index
    %c3_334 = arith.constant 3 : index
    %295 = vector.load %arg16[%c2_332, %c0_333, %c3_334] : memref<4x8x28xbf16, #tpu.memory_space<vmem>>, vector<1x8x3xbf16>
    %296 = vector.shape_cast %295 : vector<1x8x3xbf16> to vector<8x3xbf16>
    %297 = arith.extf %296 : vector<8x3xbf16> to vector<8x3xf32>
    %c24_335 = arith.constant 24 : index
    %c6_336 = arith.constant 6 : index
    %298 = vector.load %arg18[%c24_335, %c6_336] : memref<40x96xf32, #tpu.memory_space<vmem>>, vector<8x3xf32>
    tpu.vector_store %arg18[%c24_335, %c6_336], %297 {strides = array<i32>} : memref<40x96xf32, #tpu.memory_space<vmem>>, vector<8x3xf32>,
    %c3_337 = arith.constant 3 : index
    %c0_338 = arith.constant 0 : index
    %c3_339 = arith.constant 3 : index
    %299 = vector.load %arg16[%c3_337, %c0_338, %c3_339] : memref<4x8x28xbf16, #tpu.memory_space<vmem>>, vector<1x8x3xbf16>
    %300 = vector.shape_cast %299 : vector<1x8x3xbf16> to vector<8x3xbf16>
    %301 = arith.extf %300 : vector<8x3xbf16> to vector<8x3xf32>
    %c24_340 = arith.constant 24 : index
    %c9_341 = arith.constant 9 : index
    %302 = vector.load %arg18[%c24_340, %c9_341] : memref<40x96xf32, #tpu.memory_space<vmem>>, vector<8x3xf32>
    tpu.vector_store %arg18[%c24_340, %c9_341], %301 {strides = array<i32>} : memref<40x96xf32, #tpu.memory_space<vmem>>, vector<8x3xf32>,
    %c0_342 = arith.constant 0 : index
    %c0_343 = arith.constant 0 : index
    %c4_344 = arith.constant 4 : index
    %303 = vector.load %arg16[%c0_342, %c0_343, %c4_344] : memref<4x8x28xbf16, #tpu.memory_space<vmem>>, vector<1x8x3xbf16>
    %304 = vector.shape_cast %303 : vector<1x8x3xbf16> to vector<8x3xbf16>
    %305 = arith.extf %304 : vector<8x3xbf16> to vector<8x3xf32>
    %c32_345 = arith.constant 32 : index
    %c0_346 = arith.constant 0 : index
    %306 = vector.load %arg18[%c32_345, %c0_346] : memref<40x96xf32, #tpu.memory_space<vmem>>, vector<8x3xf32>
    tpu.vector_store %arg18[%c32_345, %c0_346], %305 {strides = array<i32>} : memref<40x96xf32, #tpu.memory_space<vmem>>, vector<8x3xf32>,
    %c1_347 = arith.constant 1 : index
    %c0_348 = arith.constant 0 : index
    %c4_349 = arith.constant 4 : index
    %307 = vector.load %arg16[%c1_347, %c0_348, %c4_349] : memref<4x8x28xbf16, #tpu.memory_space<vmem>>, vector<1x8x3xbf16>
    %308 = vector.shape_cast %307 : vector<1x8x3xbf16> to vector<8x3xbf16>
    %309 = arith.extf %308 : vector<8x3xbf16> to vector<8x3xf32>
    %c32_350 = arith.constant 32 : index
    %c3_351 = arith.constant 3 : index
    %310 = vector.load %arg18[%c32_350, %c3_351] : memref<40x96xf32, #tpu.memory_space<vmem>>, vector<8x3xf32>
    tpu.vector_store %arg18[%c32_350, %c3_351], %309 {strides = array<i32>} : memref<40x96xf32, #tpu.memory_space<vmem>>, vector<8x3xf32>,
    %c2_352 = arith.constant 2 : index
    %c0_353 = arith.constant 0 : index
    %c4_354 = arith.constant 4 : index
    %311 = vector.load %arg16[%c2_352, %c0_353, %c4_354] : memref<4x8x28xbf16, #tpu.memory_space<vmem>>, vector<1x8x3xbf16>
    %312 = vector.shape_cast %311 : vector<1x8x3xbf16> to vector<8x3xbf16>
    %313 = arith.extf %312 : vector<8x3xbf16> to vector<8x3xf32>
    %c32_355 = arith.constant 32 : index
    %c6_356 = arith.constant 6 : index
    %314 = vector.load %arg18[%c32_355, %c6_356] : memref<40x96xf32, #tpu.memory_space<vmem>>, vector<8x3xf32>
    tpu.vector_store %arg18[%c32_355, %c6_356], %313 {strides = array<i32>} : memref<40x96xf32, #tpu.memory_space<vmem>>, vector<8x3xf32>,
    %c3_357 = arith.constant 3 : index
    %c0_358 = arith.constant 0 : index
    %c4_359 = arith.constant 4 : index
    %315 = vector.load %arg16[%c3_357, %c0_358, %c4_359] : memref<4x8x28xbf16, #tpu.memory_space<vmem>>, vector<1x8x3xbf16>
    %316 = vector.shape_cast %315 : vector<1x8x3xbf16> to vector<8x3xbf16>
    %317 = arith.extf %316 : vector<8x3xbf16> to vector<8x3xf32>
    %c32_360 = arith.constant 32 : index
    %c9_361 = arith.constant 9 : index
    %318 = vector.load %arg18[%c32_360, %c9_361] : memref<40x96xf32, #tpu.memory_space<vmem>>, vector<8x3xf32>
    tpu.vector_store %arg18[%c32_360, %c9_361], %317 {strides = array<i32>} : memref<40x96xf32, #tpu.memory_space<vmem>>, vector<8x3xf32>,
    %c0_362 = arith.constant 0 : index
    %c0_363 = arith.constant 0 : index
    %319 = vector.load %arg18[%c0_362, %c0_363] : memref<40x96xf32, #tpu.memory_space<vmem>>, vector<40x12xf32>
    %320 = arith.truncf %319 : vector<40x12xf32> to vector<40x12xbf16>
    %c0_364 = arith.constant 0 : index
    %c0_365 = arith.constant 0 : index
    %321 = vector.load %arg11[%c0_364, %c0_365] : memref<12x4xbf16, #tpu.memory_space<vmem>>, vector<12x4xbf16>
    %cst_366 = arith.constant dense<0.000000e+00> : vector<40x4xf32>
    %322 = tpu.matmul %320, %321, %cst_366 {dimension_numbers = #tpu.dot_dimension_numbers<[1], [0], [0], [1], [0, 0, 1, 1], [], []>} : vector<40x12xbf16>, vector<12x4xbf16>, vector<40x4xf32> -> vector<40x4xf32>
    %323 = arith.truncf %322 : vector<40x4xf32> to vector<40x4xbf16>
    %c0_367 = arith.constant 0 : index
    %c0_368 = arith.constant 0 : index
    %324 = vector.load %arg3[%c0_367, %c0_368] : memref<8x40xbf16, #tpu.memory_space<vmem>>, vector<8x40xbf16>
    %cst_369 = arith.constant dense<0.000000e+00> : vector<8x4xf32>
    %325 = tpu.matmul %324, %323, %cst_369 {dimension_numbers = #tpu.dot_dimension_numbers<[1], [0], [0], [1], [0, 0, 1, 1], [], []>} : vector<8x40xbf16>, vector<40x4xbf16>, vector<8x4xf32> -> vector<8x4xf32>
    %c0_370 = arith.constant 0 : index
    %c0_371 = arith.constant 0 : index
    %326 = vector.load %arg7[%c0_370, %c0_371] : memref<8x1xf32, #tpu.memory_space<vmem>>, vector<8x1xf32>
    %327 = vector.broadcast %326 : vector<8x1xf32> to vector<8x4xf32>
    %328 = arith.addf %325, %327 : vector<8x4xf32>
    %cst_372 = arith.constant 0.000000e+00 : f32
    %329 = vector.broadcast %cst_372 : f32 to vector<8x4xf32>
    %330 = arith.cmpf oge, %328, %329 : vector<8x4xf32>
    %cst_373 = arith.constant 1.000000e-01 : f32
    %331 = vector.broadcast %cst_373 : f32 to vector<8x4xf32>
    %332 = arith.mulf %331, %328 : vector<8x4xf32>
    %333 = arith.select %330, %328, %332 : vector<8x4xi1>, vector<8x4xf32>
    %c0_374 = arith.constant 0 : index
    %c0_375 = arith.constant 0 : index
    %334 = vector.load %arg14[%c0_374, %c0_375] : memref<8x4xf32, #tpu.memory_space<vmem>>, vector<8x4xf32>
    tpu.vector_store %arg14[%c0_374, %c0_375], %333 {strides = array<i32>} : memref<8x4xf32, #tpu.memory_space<vmem>>, vector<8x4xf32>,
    %335 = arith.truncf %333 : vector<8x4xf32> to vector<8x4xbf16>
    %336 = vector.extract_strided_slice %335 {offsets = [0, 0], sizes = [8, 1], strides = [1, 1]} : vector<8x4xbf16> to vector<8x1xbf16>
    %c0_376 = arith.constant 0 : index
    %c0_377 = arith.constant 0 : index
    %c1_378 = arith.constant 1 : index
    %337 = vector.load %arg17[%c0_376, %c0_377, %c1_378] : memref<4x8x28xbf16, #tpu.memory_space<vmem>>, vector<1x8x1xbf16>
    %338 = vector.shape_cast %337 : vector<1x8x1xbf16> to vector<8x1xbf16>
    %339 = vector.shape_cast %336 : vector<8x1xbf16> to vector<1x8x1xbf16>
    tpu.vector_store %arg17[%c0_376, %c0_377, %c1_378], %339 {strides = array<i32>} : memref<4x8x28xbf16, #tpu.memory_space<vmem>>, vector<1x8x1xbf16>,
    %340 = vector.extract_strided_slice %335 {offsets = [0, 1], sizes = [8, 1], strides = [1, 1]} : vector<8x4xbf16> to vector<8x1xbf16>
    %c1_379 = arith.constant 1 : index
    %c0_380 = arith.constant 0 : index
    %c1_381 = arith.constant 1 : index
    %341 = vector.load %arg17[%c1_379, %c0_380, %c1_381] : memref<4x8x28xbf16, #tpu.memory_space<vmem>>, vector<1x8x1xbf16>
    %342 = vector.shape_cast %341 : vector<1x8x1xbf16> to vector<8x1xbf16>
    %343 = vector.shape_cast %340 : vector<8x1xbf16> to vector<1x8x1xbf16>
    tpu.vector_store %arg17[%c1_379, %c0_380, %c1_381], %343 {strides = array<i32>} : memref<4x8x28xbf16, #tpu.memory_space<vmem>>, vector<1x8x1xbf16>,
    %344 = vector.extract_strided_slice %335 {offsets = [0, 2], sizes = [8, 1], strides = [1, 1]} : vector<8x4xbf16> to vector<8x1xbf16>
    %c2_382 = arith.constant 2 : index
    %c0_383 = arith.constant 0 : index
    %c1_384 = arith.constant 1 : index
    %345 = vector.load %arg17[%c2_382, %c0_383, %c1_384] : memref<4x8x28xbf16, #tpu.memory_space<vmem>>, vector<1x8x1xbf16>
    %346 = vector.shape_cast %345 : vector<1x8x1xbf16> to vector<8x1xbf16>
    %347 = vector.shape_cast %344 : vector<8x1xbf16> to vector<1x8x1xbf16>
    tpu.vector_store %arg17[%c2_382, %c0_383, %c1_384], %347 {strides = array<i32>} : memref<4x8x28xbf16, #tpu.memory_space<vmem>>, vector<1x8x1xbf16>,
    %348 = vector.extract_strided_slice %335 {offsets = [0, 3], sizes = [8, 1], strides = [1, 1]} : vector<8x4xbf16> to vector<8x1xbf16>
    %c3_385 = arith.constant 3 : index
    %c0_386 = arith.constant 0 : index
    %c1_387 = arith.constant 1 : index
    %349 = vector.load %arg17[%c3_385, %c0_386, %c1_387] : memref<4x8x28xbf16, #tpu.memory_space<vmem>>, vector<1x8x1xbf16>
    %350 = vector.shape_cast %349 : vector<1x8x1xbf16> to vector<8x1xbf16>
    %351 = vector.shape_cast %348 : vector<8x1xbf16> to vector<1x8x1xbf16>
    tpu.vector_store %arg17[%c3_385, %c0_386, %c1_387], %351 {strides = array<i32>} : memref<4x8x28xbf16, #tpu.memory_space<vmem>>, vector<1x8x1xbf16>,
    %cst_388 = arith.constant 0.000000e+00 : bf16
    %352 = vector.broadcast %cst_388 : bf16 to vector<4x8x1xbf16>
    %c0_389 = arith.constant 0 : index
    %c0_390 = arith.constant 0 : index
    %c0_391 = arith.constant 0 : index
    %353 = vector.load %arg17[%c0_389, %c0_390, %c0_391] : memref<4x8x28xbf16, #tpu.memory_space<vmem>>, vector<4x8x1xbf16>
    tpu.vector_store %arg17[%c0_389, %c0_390, %c0_391], %352 {strides = array<i32>} : memref<4x8x28xbf16, #tpu.memory_space<vmem>>, vector<4x8x1xbf16>,
    %cst_392 = arith.constant 0.000000e+00 : bf16
    %354 = vector.broadcast %cst_392 : bf16 to vector<4x8x1xbf16>
    %c0_393 = arith.constant 0 : index
    %c0_394 = arith.constant 0 : index
    %c2_395 = arith.constant 2 : index
    %355 = vector.load %arg17[%c0_393, %c0_394, %c2_395] : memref<4x8x28xbf16, #tpu.memory_space<vmem>>, vector<4x8x1xbf16>
    tpu.vector_store %arg17[%c0_393, %c0_394, %c2_395], %354 {strides = array<i32>} : memref<4x8x28xbf16, #tpu.memory_space<vmem>>, vector<4x8x1xbf16>,
    %c0_396 = arith.constant 0 : index
    %c0_397 = arith.constant 0 : index
    %c0_398 = arith.constant 0 : index
    %356 = vector.load %arg17[%c0_396, %c0_397, %c0_398] : memref<4x8x28xbf16, #tpu.memory_space<vmem>>, vector<1x8x1xbf16>
    %357 = vector.shape_cast %356 : vector<1x8x1xbf16> to vector<8x1xbf16>
    %358 = arith.extf %357 : vector<8x1xbf16> to vector<8x1xf32>
    %c0_399 = arith.constant 0 : index
    %c0_400 = arith.constant 0 : index
    %359 = vector.load %arg18[%c0_399, %c0_400] : memref<40x96xf32, #tpu.memory_space<vmem>>, vector<8x1xf32>
    tpu.vector_store %arg18[%c0_399, %c0_400], %358 {strides = array<i32>} : memref<40x96xf32, #tpu.memory_space<vmem>>, vector<8x1xf32>,
    %c1_401 = arith.constant 1 : index
    %c0_402 = arith.constant 0 : index
    %c0_403 = arith.constant 0 : index
    %360 = vector.load %arg17[%c1_401, %c0_402, %c0_403] : memref<4x8x28xbf16, #tpu.memory_space<vmem>>, vector<1x8x1xbf16>
    %361 = vector.shape_cast %360 : vector<1x8x1xbf16> to vector<8x1xbf16>
    %362 = arith.extf %361 : vector<8x1xbf16> to vector<8x1xf32>
    %c0_404 = arith.constant 0 : index
    %c1_405 = arith.constant 1 : index
    %363 = vector.load %arg18[%c0_404, %c1_405] : memref<40x96xf32, #tpu.memory_space<vmem>>, vector<8x1xf32>
    tpu.vector_store %arg18[%c0_404, %c1_405], %362 {strides = array<i32>} : memref<40x96xf32, #tpu.memory_space<vmem>>, vector<8x1xf32>,
    %c2_406 = arith.constant 2 : index
    %c0_407 = arith.constant 0 : index
    %c0_408 = arith.constant 0 : index
    %364 = vector.load %arg17[%c2_406, %c0_407, %c0_408] : memref<4x8x28xbf16, #tpu.memory_space<vmem>>, vector<1x8x1xbf16>
    %365 = vector.shape_cast %364 : vector<1x8x1xbf16> to vector<8x1xbf16>
    %366 = arith.extf %365 : vector<8x1xbf16> to vector<8x1xf32>
    %c0_409 = arith.constant 0 : index
    %c2_410 = arith.constant 2 : index
    %367 = vector.load %arg18[%c0_409, %c2_410] : memref<40x96xf32, #tpu.memory_space<vmem>>, vector<8x1xf32>
    tpu.vector_store %arg18[%c0_409, %c2_410], %366 {strides = array<i32>} : memref<40x96xf32, #tpu.memory_space<vmem>>, vector<8x1xf32>,
    %c3_411 = arith.constant 3 : index
    %c0_412 = arith.constant 0 : index
    %c0_413 = arith.constant 0 : index
    %368 = vector.load %arg17[%c3_411, %c0_412, %c0_413] : memref<4x8x28xbf16, #tpu.memory_space<vmem>>, vector<1x8x1xbf16>
    %369 = vector.shape_cast %368 : vector<1x8x1xbf16> to vector<8x1xbf16>
    %370 = arith.extf %369 : vector<8x1xbf16> to vector<8x1xf32>
    %c0_414 = arith.constant 0 : index
    %c3_415 = arith.constant 3 : index
    %371 = vector.load %arg18[%c0_414, %c3_415] : memref<40x96xf32, #tpu.memory_space<vmem>>, vector<8x1xf32>
    tpu.vector_store %arg18[%c0_414, %c3_415], %370 {strides = array<i32>} : memref<40x96xf32, #tpu.memory_space<vmem>>, vector<8x1xf32>,
    %c0_416 = arith.constant 0 : index
    %c0_417 = arith.constant 0 : index
    %c1_418 = arith.constant 1 : index
    %372 = vector.load %arg17[%c0_416, %c0_417, %c1_418] : memref<4x8x28xbf16, #tpu.memory_space<vmem>>, vector<1x8x1xbf16>
    %373 = vector.shape_cast %372 : vector<1x8x1xbf16> to vector<8x1xbf16>
    %374 = arith.extf %373 : vector<8x1xbf16> to vector<8x1xf32>
    %c8_419 = arith.constant 8 : index
    %c0_420 = arith.constant 0 : index
    %375 = vector.load %arg18[%c8_419, %c0_420] : memref<40x96xf32, #tpu.memory_space<vmem>>, vector<8x1xf32>
    tpu.vector_store %arg18[%c8_419, %c0_420], %374 {strides = array<i32>} : memref<40x96xf32, #tpu.memory_space<vmem>>, vector<8x1xf32>,
    %c1_421 = arith.constant 1 : index
    %c0_422 = arith.constant 0 : index
    %c1_423 = arith.constant 1 : index
    %376 = vector.load %arg17[%c1_421, %c0_422, %c1_423] : memref<4x8x28xbf16, #tpu.memory_space<vmem>>, vector<1x8x1xbf16>
    %377 = vector.shape_cast %376 : vector<1x8x1xbf16> to vector<8x1xbf16>
    %378 = arith.extf %377 : vector<8x1xbf16> to vector<8x1xf32>
    %c8_424 = arith.constant 8 : index
    %c1_425 = arith.constant 1 : index
    %379 = vector.load %arg18[%c8_424, %c1_425] : memref<40x96xf32, #tpu.memory_space<vmem>>, vector<8x1xf32>
    tpu.vector_store %arg18[%c8_424, %c1_425], %378 {strides = array<i32>} : memref<40x96xf32, #tpu.memory_space<vmem>>, vector<8x1xf32>,
    %c2_426 = arith.constant 2 : index
    %c0_427 = arith.constant 0 : index
    %c1_428 = arith.constant 1 : index
    %380 = vector.load %arg17[%c2_426, %c0_427, %c1_428] : memref<4x8x28xbf16, #tpu.memory_space<vmem>>, vector<1x8x1xbf16>
    %381 = vector.shape_cast %380 : vector<1x8x1xbf16> to vector<8x1xbf16>
    %382 = arith.extf %381 : vector<8x1xbf16> to vector<8x1xf32>
    %c8_429 = arith.constant 8 : index
    %c2_430 = arith.constant 2 : index
    %383 = vector.load %arg18[%c8_429, %c2_430] : memref<40x96xf32, #tpu.memory_space<vmem>>, vector<8x1xf32>
    tpu.vector_store %arg18[%c8_429, %c2_430], %382 {strides = array<i32>} : memref<40x96xf32, #tpu.memory_space<vmem>>, vector<8x1xf32>,
    %c3_431 = arith.constant 3 : index
    %c0_432 = arith.constant 0 : index
    %c1_433 = arith.constant 1 : index
    %384 = vector.load %arg17[%c3_431, %c0_432, %c1_433] : memref<4x8x28xbf16, #tpu.memory_space<vmem>>, vector<1x8x1xbf16>
    %385 = vector.shape_cast %384 : vector<1x8x1xbf16> to vector<8x1xbf16>
    %386 = arith.extf %385 : vector<8x1xbf16> to vector<8x1xf32>
    %c8_434 = arith.constant 8 : index
    %c3_435 = arith.constant 3 : index
    %387 = vector.load %arg18[%c8_434, %c3_435] : memref<40x96xf32, #tpu.memory_space<vmem>>, vector<8x1xf32>
    tpu.vector_store %arg18[%c8_434, %c3_435], %386 {strides = array<i32>} : memref<40x96xf32, #tpu.memory_space<vmem>>, vector<8x1xf32>,
    %c0_436 = arith.constant 0 : index
    %c0_437 = arith.constant 0 : index
    %c2_438 = arith.constant 2 : index
    %388 = vector.load %arg17[%c0_436, %c0_437, %c2_438] : memref<4x8x28xbf16, #tpu.memory_space<vmem>>, vector<1x8x1xbf16>
    %389 = vector.shape_cast %388 : vector<1x8x1xbf16> to vector<8x1xbf16>
    %390 = arith.extf %389 : vector<8x1xbf16> to vector<8x1xf32>
    %c16_439 = arith.constant 16 : index
    %c0_440 = arith.constant 0 : index
    %391 = vector.load %arg18[%c16_439, %c0_440] : memref<40x96xf32, #tpu.memory_space<vmem>>, vector<8x1xf32>
    tpu.vector_store %arg18[%c16_439, %c0_440], %390 {strides = array<i32>} : memref<40x96xf32, #tpu.memory_space<vmem>>, vector<8x1xf32>,
    %c1_441 = arith.constant 1 : index
    %c0_442 = arith.constant 0 : index
    %c2_443 = arith.constant 2 : index
    %392 = vector.load %arg17[%c1_441, %c0_442, %c2_443] : memref<4x8x28xbf16, #tpu.memory_space<vmem>>, vector<1x8x1xbf16>
    %393 = vector.shape_cast %392 : vector<1x8x1xbf16> to vector<8x1xbf16>
    %394 = arith.extf %393 : vector<8x1xbf16> to vector<8x1xf32>
    %c16_444 = arith.constant 16 : index
    %c1_445 = arith.constant 1 : index
    %395 = vector.load %arg18[%c16_444, %c1_445] : memref<40x96xf32, #tpu.memory_space<vmem>>, vector<8x1xf32>
    tpu.vector_store %arg18[%c16_444, %c1_445], %394 {strides = array<i32>} : memref<40x96xf32, #tpu.memory_space<vmem>>, vector<8x1xf32>,
    %c2_446 = arith.constant 2 : index
    %c0_447 = arith.constant 0 : index
    %c2_448 = arith.constant 2 : index
    %396 = vector.load %arg17[%c2_446, %c0_447, %c2_448] : memref<4x8x28xbf16, #tpu.memory_space<vmem>>, vector<1x8x1xbf16>
    %397 = vector.shape_cast %396 : vector<1x8x1xbf16> to vector<8x1xbf16>
    %398 = arith.extf %397 : vector<8x1xbf16> to vector<8x1xf32>
    %c16_449 = arith.constant 16 : index
    %c2_450 = arith.constant 2 : index
    %399 = vector.load %arg18[%c16_449, %c2_450] : memref<40x96xf32, #tpu.memory_space<vmem>>, vector<8x1xf32>
    tpu.vector_store %arg18[%c16_449, %c2_450], %398 {strides = array<i32>} : memref<40x96xf32, #tpu.memory_space<vmem>>, vector<8x1xf32>,
    %c3_451 = arith.constant 3 : index
    %c0_452 = arith.constant 0 : index
    %c2_453 = arith.constant 2 : index
    %400 = vector.load %arg17[%c3_451, %c0_452, %c2_453] : memref<4x8x28xbf16, #tpu.memory_space<vmem>>, vector<1x8x1xbf16>
    %401 = vector.shape_cast %400 : vector<1x8x1xbf16> to vector<8x1xbf16>
    %402 = arith.extf %401 : vector<8x1xbf16> to vector<8x1xf32>
    %c16_454 = arith.constant 16 : index
    %c3_455 = arith.constant 3 : index
    %403 = vector.load %arg18[%c16_454, %c3_455] : memref<40x96xf32, #tpu.memory_space<vmem>>, vector<8x1xf32>
    tpu.vector_store %arg18[%c16_454, %c3_455], %402 {strides = array<i32>} : memref<40x96xf32, #tpu.memory_space<vmem>>, vector<8x1xf32>,
    %c0_456 = arith.constant 0 : index
    %c0_457 = arith.constant 0 : index
    %404 = vector.load %arg18[%c0_456, %c0_457] : memref<40x96xf32, #tpu.memory_space<vmem>>, vector<24x4xf32>
    %405 = arith.truncf %404 : vector<24x4xf32> to vector<24x4xbf16>
    %c0_458 = arith.constant 0 : index
    %c0_459 = arith.constant 0 : index
    %406 = vector.load %arg4[%c0_458, %c0_459] : memref<8x24xbf16, #tpu.memory_space<vmem>>, vector<8x24xbf16>
    %cst_460 = arith.constant dense<0.000000e+00> : vector<8x4xf32>
    %407 = tpu.matmul %406, %405, %cst_460 {dimension_numbers = #tpu.dot_dimension_numbers<[1], [0], [0], [1], [0, 0, 1, 1], [], []>} : vector<8x24xbf16>, vector<24x4xbf16>, vector<8x4xf32> -> vector<8x4xf32>
    %c0_461 = arith.constant 0 : index
    %c0_462 = arith.constant 0 : index
    %408 = vector.load %arg8[%c0_461, %c0_462] : memref<8x1xf32, #tpu.memory_space<vmem>>, vector<8x1xf32>
    %409 = vector.broadcast %408 : vector<8x1xf32> to vector<8x4xf32>
    %410 = arith.addf %407, %409 : vector<8x4xf32>
    %411 = vector.extract_strided_slice %410 {offsets = [0, 0], sizes = [1, 4], strides = [1, 1]} : vector<8x4xf32> to vector<1x4xf32>
    %c0_463 = arith.constant 0 : index
    %c0_464 = arith.constant 0 : index
    %412 = vector.load %arg15[%c0_463, %c0_464] : memref<1x4xf32, #tpu.memory_space<vmem>>, vector<1x4xf32>
    tpu.vector_store %arg15[%c0_463, %c0_464], %411 {strides = array<i32>} : memref<1x4xf32, #tpu.memory_space<vmem>>, vector<1x4xf32>,
    return
  }
}

module attributes {stable_mosaic.version = 11 : i64} {
  func.func @_fused_branch_kernel(%arg0: memref<2x1x48xbf16, #tpu.memory_space<vmem>>, %arg1: memref<8x40xbf16, #tpu.memory_space<vmem>>, %arg2: memref<8x40xbf16, #tpu.memory_space<vmem>>, %arg3: memref<8x40xbf16, #tpu.memory_space<vmem>>, %arg4: memref<8x24xbf16, #tpu.memory_space<vmem>>, %arg5: memref<8x1xf32, #tpu.memory_space<vmem>>, %arg6: memref<8x1xf32, #tpu.memory_space<vmem>>, %arg7: memref<8x1xf32, #tpu.memory_space<vmem>>, %arg8: memref<8x1xf32, #tpu.memory_space<vmem>>, %arg9: memref<96x48xbf16, #tpu.memory_space<vmem>>, %arg10: memref<48x24xbf16, #tpu.memory_space<vmem>>, %arg11: memref<4x96xf32, #tpu.memory_space<vmem>>, %arg12: memref<8x48xf32, #tpu.memory_space<vmem>>, %arg13: memref<8x24xf32, #tpu.memory_space<vmem>>, %arg14: memref<1x24xf32, #tpu.memory_space<vmem>>, %arg15: memref<2x8x52xbf16, #tpu.memory_space<vmem>>, %arg16: memref<2x8x52xbf16, #tpu.memory_space<vmem>>, %arg17: memref<40x96xf32, #tpu.memory_space<vmem>>) attributes {dimension_semantics = [], scalar_prefetch = 0 : i64, scratch_operands = 3 : i64, tpu.core_type = #tpu.core_type<tc>} {
    %cst = arith.constant 0.000000e+00 : bf16
    %0 = vector.broadcast %cst : bf16 to vector<2x8x52xbf16>
    %c0 = arith.constant 0 : index
    %c0_0 = arith.constant 0 : index
    %c0_1 = arith.constant 0 : index
    %1 = vector.load %arg15[%c0, %c0_0, %c0_1] : memref<2x8x52xbf16, #tpu.memory_space<vmem>>, vector<2x8x52xbf16>
    tpu.vector_store %arg15[%c0, %c0_0, %c0_1], %0 {strides = array<i32>} : memref<2x8x52xbf16, #tpu.memory_space<vmem>>, vector<2x8x52xbf16>,
    %c0_2 = arith.constant 0 : index
    %c0_3 = arith.constant 0 : index
    %c0_4 = arith.constant 0 : index
    %2 = vector.load %arg0[%c0_2, %c0_3, %c0_4] : memref<2x1x48xbf16, #tpu.memory_space<vmem>>, vector<2x1x48xbf16>
    %c0_5 = arith.constant 0 : index
    %c0_6 = arith.constant 0 : index
    %c2 = arith.constant 2 : index
    %3 = vector.load %arg15[%c0_5, %c0_6, %c2] : memref<2x8x52xbf16, #tpu.memory_space<vmem>>, vector<2x1x48xbf16>
    tpu.vector_store %arg15[%c0_5, %c0_6, %c2], %2 {strides = array<i32>} : memref<2x8x52xbf16, #tpu.memory_space<vmem>>, vector<2x1x48xbf16>,
    %c0_7 = arith.constant 0 : index
    %c0_8 = arith.constant 0 : index
    %c0_9 = arith.constant 0 : index
    %4 = vector.load %arg15[%c0_7, %c0_8, %c0_9] : memref<2x8x52xbf16, #tpu.memory_space<vmem>>, vector<1x8x48xbf16>
    %5 = vector.shape_cast %4 : vector<1x8x48xbf16> to vector<8x48xbf16>
    %6 = arith.extf %5 : vector<8x48xbf16> to vector<8x48xf32>
    %c0_10 = arith.constant 0 : index
    %c0_11 = arith.constant 0 : index
    %7 = vector.load %arg17[%c0_10, %c0_11] : memref<40x96xf32, #tpu.memory_space<vmem>>, vector<8x48xf32>
    tpu.vector_store %arg17[%c0_10, %c0_11], %6 {strides = array<i32>} : memref<40x96xf32, #tpu.memory_space<vmem>>, vector<8x48xf32>,
    %c1 = arith.constant 1 : index
    %c0_12 = arith.constant 0 : index
    %c0_13 = arith.constant 0 : index
    %8 = vector.load %arg15[%c1, %c0_12, %c0_13] : memref<2x8x52xbf16, #tpu.memory_space<vmem>>, vector<1x8x48xbf16>
    %9 = vector.shape_cast %8 : vector<1x8x48xbf16> to vector<8x48xbf16>
    %10 = arith.extf %9 : vector<8x48xbf16> to vector<8x48xf32>
    %c0_14 = arith.constant 0 : index
    %c48 = arith.constant 48 : index
    %11 = vector.load %arg17[%c0_14, %c48] : memref<40x96xf32, #tpu.memory_space<vmem>>, vector<8x48xf32>
    tpu.vector_store %arg17[%c0_14, %c48], %10 {strides = array<i32>} : memref<40x96xf32, #tpu.memory_space<vmem>>, vector<8x48xf32>,
    %c0_15 = arith.constant 0 : index
    %c0_16 = arith.constant 0 : index
    %c1_17 = arith.constant 1 : index
    %12 = vector.load %arg15[%c0_15, %c0_16, %c1_17] : memref<2x8x52xbf16, #tpu.memory_space<vmem>>, vector<1x8x48xbf16>
    %13 = vector.shape_cast %12 : vector<1x8x48xbf16> to vector<8x48xbf16>
    %14 = arith.extf %13 : vector<8x48xbf16> to vector<8x48xf32>
    %c8 = arith.constant 8 : index
    %c0_18 = arith.constant 0 : index
    %15 = vector.load %arg17[%c8, %c0_18] : memref<40x96xf32, #tpu.memory_space<vmem>>, vector<8x48xf32>
    tpu.vector_store %arg17[%c8, %c0_18], %14 {strides = array<i32>} : memref<40x96xf32, #tpu.memory_space<vmem>>, vector<8x48xf32>,
    %c1_19 = arith.constant 1 : index
    %c0_20 = arith.constant 0 : index
    %c1_21 = arith.constant 1 : index
    %16 = vector.load %arg15[%c1_19, %c0_20, %c1_21] : memref<2x8x52xbf16, #tpu.memory_space<vmem>>, vector<1x8x48xbf16>
    %17 = vector.shape_cast %16 : vector<1x8x48xbf16> to vector<8x48xbf16>
    %18 = arith.extf %17 : vector<8x48xbf16> to vector<8x48xf32>
    %c8_22 = arith.constant 8 : index
    %c48_23 = arith.constant 48 : index
    %19 = vector.load %arg17[%c8_22, %c48_23] : memref<40x96xf32, #tpu.memory_space<vmem>>, vector<8x48xf32>
    tpu.vector_store %arg17[%c8_22, %c48_23], %18 {strides = array<i32>} : memref<40x96xf32, #tpu.memory_space<vmem>>, vector<8x48xf32>,
    %c0_24 = arith.constant 0 : index
    %c0_25 = arith.constant 0 : index
    %c2_26 = arith.constant 2 : index
    %20 = vector.load %arg15[%c0_24, %c0_25, %c2_26] : memref<2x8x52xbf16, #tpu.memory_space<vmem>>, vector<1x8x48xbf16>
    %21 = vector.shape_cast %20 : vector<1x8x48xbf16> to vector<8x48xbf16>
    %22 = arith.extf %21 : vector<8x48xbf16> to vector<8x48xf32>
    %c16 = arith.constant 16 : index
    %c0_27 = arith.constant 0 : index
    %23 = vector.load %arg17[%c16, %c0_27] : memref<40x96xf32, #tpu.memory_space<vmem>>, vector<8x48xf32>
    tpu.vector_store %arg17[%c16, %c0_27], %22 {strides = array<i32>} : memref<40x96xf32, #tpu.memory_space<vmem>>, vector<8x48xf32>,
    %c1_28 = arith.constant 1 : index
    %c0_29 = arith.constant 0 : index
    %c2_30 = arith.constant 2 : index
    %24 = vector.load %arg15[%c1_28, %c0_29, %c2_30] : memref<2x8x52xbf16, #tpu.memory_space<vmem>>, vector<1x8x48xbf16>
    %25 = vector.shape_cast %24 : vector<1x8x48xbf16> to vector<8x48xbf16>
    %26 = arith.extf %25 : vector<8x48xbf16> to vector<8x48xf32>
    %c16_31 = arith.constant 16 : index
    %c48_32 = arith.constant 48 : index
    %27 = vector.load %arg17[%c16_31, %c48_32] : memref<40x96xf32, #tpu.memory_space<vmem>>, vector<8x48xf32>
    tpu.vector_store %arg17[%c16_31, %c48_32], %26 {strides = array<i32>} : memref<40x96xf32, #tpu.memory_space<vmem>>, vector<8x48xf32>,
    %c0_33 = arith.constant 0 : index
    %c0_34 = arith.constant 0 : index
    %c3 = arith.constant 3 : index
    %28 = vector.load %arg15[%c0_33, %c0_34, %c3] : memref<2x8x52xbf16, #tpu.memory_space<vmem>>, vector<1x8x48xbf16>
    %29 = vector.shape_cast %28 : vector<1x8x48xbf16> to vector<8x48xbf16>
    %30 = arith.extf %29 : vector<8x48xbf16> to vector<8x48xf32>
    %c24 = arith.constant 24 : index
    %c0_35 = arith.constant 0 : index
    %31 = vector.load %arg17[%c24, %c0_35] : memref<40x96xf32, #tpu.memory_space<vmem>>, vector<8x48xf32>
    tpu.vector_store %arg17[%c24, %c0_35], %30 {strides = array<i32>} : memref<40x96xf32, #tpu.memory_space<vmem>>, vector<8x48xf32>,
    %c1_36 = arith.constant 1 : index
    %c0_37 = arith.constant 0 : index
    %c3_38 = arith.constant 3 : index
    %32 = vector.load %arg15[%c1_36, %c0_37, %c3_38] : memref<2x8x52xbf16, #tpu.memory_space<vmem>>, vector<1x8x48xbf16>
    %33 = vector.shape_cast %32 : vector<1x8x48xbf16> to vector<8x48xbf16>
    %34 = arith.extf %33 : vector<8x48xbf16> to vector<8x48xf32>
    %c24_39 = arith.constant 24 : index
    %c48_40 = arith.constant 48 : index
    %35 = vector.load %arg17[%c24_39, %c48_40] : memref<40x96xf32, #tpu.memory_space<vmem>>, vector<8x48xf32>
    tpu.vector_store %arg17[%c24_39, %c48_40], %34 {strides = array<i32>} : memref<40x96xf32, #tpu.memory_space<vmem>>, vector<8x48xf32>,
    %c0_41 = arith.constant 0 : index
    %c0_42 = arith.constant 0 : index
    %c4 = arith.constant 4 : index
    %36 = vector.load %arg15[%c0_41, %c0_42, %c4] : memref<2x8x52xbf16, #tpu.memory_space<vmem>>, vector<1x8x48xbf16>
    %37 = vector.shape_cast %36 : vector<1x8x48xbf16> to vector<8x48xbf16>
    %38 = arith.extf %37 : vector<8x48xbf16> to vector<8x48xf32>
    %c32 = arith.constant 32 : index
    %c0_43 = arith.constant 0 : index
    %39 = vector.load %arg17[%c32, %c0_43] : memref<40x96xf32, #tpu.memory_space<vmem>>, vector<8x48xf32>
    tpu.vector_store %arg17[%c32, %c0_43], %38 {strides = array<i32>} : memref<40x96xf32, #tpu.memory_space<vmem>>, vector<8x48xf32>,
    %c1_44 = arith.constant 1 : index
    %c0_45 = arith.constant 0 : index
    %c4_46 = arith.constant 4 : index
    %40 = vector.load %arg15[%c1_44, %c0_45, %c4_46] : memref<2x8x52xbf16, #tpu.memory_space<vmem>>, vector<1x8x48xbf16>
    %41 = vector.shape_cast %40 : vector<1x8x48xbf16> to vector<8x48xbf16>
    %42 = arith.extf %41 : vector<8x48xbf16> to vector<8x48xf32>
    %c32_47 = arith.constant 32 : index
    %c48_48 = arith.constant 48 : index
    %43 = vector.load %arg17[%c32_47, %c48_48] : memref<40x96xf32, #tpu.memory_space<vmem>>, vector<8x48xf32>
    tpu.vector_store %arg17[%c32_47, %c48_48], %42 {strides = array<i32>} : memref<40x96xf32, #tpu.memory_space<vmem>>, vector<8x48xf32>,
    %c0_49 = arith.constant 0 : index
    %c0_50 = arith.constant 0 : index
    %44 = vector.load %arg17[%c0_49, %c0_50] : memref<40x96xf32, #tpu.memory_space<vmem>>, vector<40x96xf32>
    %45 = arith.truncf %44 : vector<40x96xf32> to vector<40x96xbf16>
    %c0_51 = arith.constant 0 : index
    %c0_52 = arith.constant 0 : index
    %46 = vector.load %arg1[%c0_51, %c0_52] : memref<8x40xbf16, #tpu.memory_space<vmem>>, vector<8x40xbf16>
    %cst_53 = arith.constant dense<0.000000e+00> : vector<8x96xf32>
    %47 = tpu.matmul %46, %45, %cst_53 {dimension_numbers = #tpu.dot_dimension_numbers<[1], [0], [0], [1], [0, 0, 1, 1], [], []>} : vector<8x40xbf16>, vector<40x96xbf16>, vector<8x96xf32> -> vector<8x96xf32>
    %c0_54 = arith.constant 0 : index
    %c0_55 = arith.constant 0 : index
    %48 = vector.load %arg5[%c0_54, %c0_55] : memref<8x1xf32, #tpu.memory_space<vmem>>, vector<8x1xf32>
    %49 = vector.broadcast %48 : vector<8x1xf32> to vector<8x96xf32>
    %50 = arith.addf %47, %49 : vector<8x96xf32>
    %cst_56 = arith.constant 0.000000e+00 : f32
    %51 = vector.broadcast %cst_56 : f32 to vector<8x96xf32>
    %52 = arith.cmpf oge, %50, %51 : vector<8x96xf32>
    %cst_57 = arith.constant 1.000000e-01 : f32
    %53 = vector.broadcast %cst_57 : f32 to vector<8x96xf32>
    %54 = arith.mulf %53, %50 : vector<8x96xf32>
    %55 = arith.select %52, %50, %54 : vector<8x96xi1>, vector<8x96xf32>
    %56 = vector.extract_strided_slice %55 {offsets = [0, 0], sizes = [4, 96], strides = [1, 1]} : vector<8x96xf32> to vector<4x96xf32>
    %c0_58 = arith.constant 0 : index
    %c0_59 = arith.constant 0 : index
    %57 = vector.load %arg11[%c0_58, %c0_59] : memref<4x96xf32, #tpu.memory_space<vmem>>, vector<4x96xf32>
    tpu.vector_store %arg11[%c0_58, %c0_59], %56 {strides = array<i32>} : memref<4x96xf32, #tpu.memory_space<vmem>>, vector<4x96xf32>,
    %58 = arith.truncf %55 : vector<8x96xf32> to vector<8x96xbf16>
    %59 = vector.extract_strided_slice %58 {offsets = [0, 0], sizes = [8, 48], strides = [1, 1]} : vector<8x96xbf16> to vector<8x48xbf16>
    %c0_60 = arith.constant 0 : index
    %c0_61 = arith.constant 0 : index
    %c2_62 = arith.constant 2 : index
    %60 = vector.load %arg16[%c0_60, %c0_61, %c2_62] : memref<2x8x52xbf16, #tpu.memory_space<vmem>>, vector<1x8x48xbf16>
    %61 = vector.shape_cast %60 : vector<1x8x48xbf16> to vector<8x48xbf16>
    %62 = vector.shape_cast %59 : vector<8x48xbf16> to vector<1x8x48xbf16>
    tpu.vector_store %arg16[%c0_60, %c0_61, %c2_62], %62 {strides = array<i32>} : memref<2x8x52xbf16, #tpu.memory_space<vmem>>, vector<1x8x48xbf16>,
    %63 = vector.extract_strided_slice %58 {offsets = [0, 48], sizes = [8, 48], strides = [1, 1]} : vector<8x96xbf16> to vector<8x48xbf16>
    %c1_63 = arith.constant 1 : index
    %c0_64 = arith.constant 0 : index
    %c2_65 = arith.constant 2 : index
    %64 = vector.load %arg16[%c1_63, %c0_64, %c2_65] : memref<2x8x52xbf16, #tpu.memory_space<vmem>>, vector<1x8x48xbf16>
    %65 = vector.shape_cast %64 : vector<1x8x48xbf16> to vector<8x48xbf16>
    %66 = vector.shape_cast %63 : vector<8x48xbf16> to vector<1x8x48xbf16>
    tpu.vector_store %arg16[%c1_63, %c0_64, %c2_65], %66 {strides = array<i32>} : memref<2x8x52xbf16, #tpu.memory_space<vmem>>, vector<1x8x48xbf16>,
    %cst_66 = arith.constant 0.000000e+00 : bf16
    %67 = vector.broadcast %cst_66 : bf16 to vector<2x8x2xbf16>
    %c0_67 = arith.constant 0 : index
    %c0_68 = arith.constant 0 : index
    %c0_69 = arith.constant 0 : index
    %68 = vector.load %arg16[%c0_67, %c0_68, %c0_69] : memref<2x8x52xbf16, #tpu.memory_space<vmem>>, vector<2x8x2xbf16>
    tpu.vector_store %arg16[%c0_67, %c0_68, %c0_69], %67 {strides = array<i32>} : memref<2x8x52xbf16, #tpu.memory_space<vmem>>, vector<2x8x2xbf16>,
    %cst_70 = arith.constant 0.000000e+00 : bf16
    %69 = vector.broadcast %cst_70 : bf16 to vector<2x8x2xbf16>
    %c0_71 = arith.constant 0 : index
    %c0_72 = arith.constant 0 : index
    %c50 = arith.constant 50 : index
    %70 = vector.load %arg16[%c0_71, %c0_72, %c50] : memref<2x8x52xbf16, #tpu.memory_space<vmem>>, vector<2x8x2xbf16>
    tpu.vector_store %arg16[%c0_71, %c0_72, %c50], %69 {strides = array<i32>} : memref<2x8x52xbf16, #tpu.memory_space<vmem>>, vector<2x8x2xbf16>,
    %c0_73 = arith.constant 0 : index
    %c0_74 = arith.constant 0 : index
    %c0_75 = arith.constant 0 : index
    %71 = vector.load %arg16[%c0_73, %c0_74, %c0_75] : memref<2x8x52xbf16, #tpu.memory_space<vmem>>, vector<1x8x48xbf16>
    %72 = vector.shape_cast %71 : vector<1x8x48xbf16> to vector<8x48xbf16>
    %73 = arith.extf %72 : vector<8x48xbf16> to vector<8x48xf32>
    %c0_76 = arith.constant 0 : index
    %c0_77 = arith.constant 0 : index
    %74 = vector.load %arg17[%c0_76, %c0_77] : memref<40x96xf32, #tpu.memory_space<vmem>>, vector<8x48xf32>
    tpu.vector_store %arg17[%c0_76, %c0_77], %73 {strides = array<i32>} : memref<40x96xf32, #tpu.memory_space<vmem>>, vector<8x48xf32>,
    %c1_78 = arith.constant 1 : index
    %c0_79 = arith.constant 0 : index
    %c0_80 = arith.constant 0 : index
    %75 = vector.load %arg16[%c1_78, %c0_79, %c0_80] : memref<2x8x52xbf16, #tpu.memory_space<vmem>>, vector<1x8x48xbf16>
    %76 = vector.shape_cast %75 : vector<1x8x48xbf16> to vector<8x48xbf16>
    %77 = arith.extf %76 : vector<8x48xbf16> to vector<8x48xf32>
    %c0_81 = arith.constant 0 : index
    %c48_82 = arith.constant 48 : index
    %78 = vector.load %arg17[%c0_81, %c48_82] : memref<40x96xf32, #tpu.memory_space<vmem>>, vector<8x48xf32>
    tpu.vector_store %arg17[%c0_81, %c48_82], %77 {strides = array<i32>} : memref<40x96xf32, #tpu.memory_space<vmem>>, vector<8x48xf32>,
    %c0_83 = arith.constant 0 : index
    %c0_84 = arith.constant 0 : index
    %c1_85 = arith.constant 1 : index
    %79 = vector.load %arg16[%c0_83, %c0_84, %c1_85] : memref<2x8x52xbf16, #tpu.memory_space<vmem>>, vector<1x8x48xbf16>
    %80 = vector.shape_cast %79 : vector<1x8x48xbf16> to vector<8x48xbf16>
    %81 = arith.extf %80 : vector<8x48xbf16> to vector<8x48xf32>
    %c8_86 = arith.constant 8 : index
    %c0_87 = arith.constant 0 : index
    %82 = vector.load %arg17[%c8_86, %c0_87] : memref<40x96xf32, #tpu.memory_space<vmem>>, vector<8x48xf32>
    tpu.vector_store %arg17[%c8_86, %c0_87], %81 {strides = array<i32>} : memref<40x96xf32, #tpu.memory_space<vmem>>, vector<8x48xf32>,
    %c1_88 = arith.constant 1 : index
    %c0_89 = arith.constant 0 : index
    %c1_90 = arith.constant 1 : index
    %83 = vector.load %arg16[%c1_88, %c0_89, %c1_90] : memref<2x8x52xbf16, #tpu.memory_space<vmem>>, vector<1x8x48xbf16>
    %84 = vector.shape_cast %83 : vector<1x8x48xbf16> to vector<8x48xbf16>
    %85 = arith.extf %84 : vector<8x48xbf16> to vector<8x48xf32>
    %c8_91 = arith.constant 8 : index
    %c48_92 = arith.constant 48 : index
    %86 = vector.load %arg17[%c8_91, %c48_92] : memref<40x96xf32, #tpu.memory_space<vmem>>, vector<8x48xf32>
    tpu.vector_store %arg17[%c8_91, %c48_92], %85 {strides = array<i32>} : memref<40x96xf32, #tpu.memory_space<vmem>>, vector<8x48xf32>,
    %c0_93 = arith.constant 0 : index
    %c0_94 = arith.constant 0 : index
    %c2_95 = arith.constant 2 : index
    %87 = vector.load %arg16[%c0_93, %c0_94, %c2_95] : memref<2x8x52xbf16, #tpu.memory_space<vmem>>, vector<1x8x48xbf16>
    %88 = vector.shape_cast %87 : vector<1x8x48xbf16> to vector<8x48xbf16>
    %89 = arith.extf %88 : vector<8x48xbf16> to vector<8x48xf32>
    %c16_96 = arith.constant 16 : index
    %c0_97 = arith.constant 0 : index
    %90 = vector.load %arg17[%c16_96, %c0_97] : memref<40x96xf32, #tpu.memory_space<vmem>>, vector<8x48xf32>
    tpu.vector_store %arg17[%c16_96, %c0_97], %89 {strides = array<i32>} : memref<40x96xf32, #tpu.memory_space<vmem>>, vector<8x48xf32>,
    %c1_98 = arith.constant 1 : index
    %c0_99 = arith.constant 0 : index
    %c2_100 = arith.constant 2 : index
    %91 = vector.load %arg16[%c1_98, %c0_99, %c2_100] : memref<2x8x52xbf16, #tpu.memory_space<vmem>>, vector<1x8x48xbf16>
    %92 = vector.shape_cast %91 : vector<1x8x48xbf16> to vector<8x48xbf16>
    %93 = arith.extf %92 : vector<8x48xbf16> to vector<8x48xf32>
    %c16_101 = arith.constant 16 : index
    %c48_102 = arith.constant 48 : index
    %94 = vector.load %arg17[%c16_101, %c48_102] : memref<40x96xf32, #tpu.memory_space<vmem>>, vector<8x48xf32>
    tpu.vector_store %arg17[%c16_101, %c48_102], %93 {strides = array<i32>} : memref<40x96xf32, #tpu.memory_space<vmem>>, vector<8x48xf32>,
    %c0_103 = arith.constant 0 : index
    %c0_104 = arith.constant 0 : index
    %c3_105 = arith.constant 3 : index
    %95 = vector.load %arg16[%c0_103, %c0_104, %c3_105] : memref<2x8x52xbf16, #tpu.memory_space<vmem>>, vector<1x8x48xbf16>
    %96 = vector.shape_cast %95 : vector<1x8x48xbf16> to vector<8x48xbf16>
    %97 = arith.extf %96 : vector<8x48xbf16> to vector<8x48xf32>
    %c24_106 = arith.constant 24 : index
    %c0_107 = arith.constant 0 : index
    %98 = vector.load %arg17[%c24_106, %c0_107] : memref<40x96xf32, #tpu.memory_space<vmem>>, vector<8x48xf32>
    tpu.vector_store %arg17[%c24_106, %c0_107], %97 {strides = array<i32>} : memref<40x96xf32, #tpu.memory_space<vmem>>, vector<8x48xf32>,
    %c1_108 = arith.constant 1 : index
    %c0_109 = arith.constant 0 : index
    %c3_110 = arith.constant 3 : index
    %99 = vector.load %arg16[%c1_108, %c0_109, %c3_110] : memref<2x8x52xbf16, #tpu.memory_space<vmem>>, vector<1x8x48xbf16>
    %100 = vector.shape_cast %99 : vector<1x8x48xbf16> to vector<8x48xbf16>
    %101 = arith.extf %100 : vector<8x48xbf16> to vector<8x48xf32>
    %c24_111 = arith.constant 24 : index
    %c48_112 = arith.constant 48 : index
    %102 = vector.load %arg17[%c24_111, %c48_112] : memref<40x96xf32, #tpu.memory_space<vmem>>, vector<8x48xf32>
    tpu.vector_store %arg17[%c24_111, %c48_112], %101 {strides = array<i32>} : memref<40x96xf32, #tpu.memory_space<vmem>>, vector<8x48xf32>,
    %c0_113 = arith.constant 0 : index
    %c0_114 = arith.constant 0 : index
    %c4_115 = arith.constant 4 : index
    %103 = vector.load %arg16[%c0_113, %c0_114, %c4_115] : memref<2x8x52xbf16, #tpu.memory_space<vmem>>, vector<1x8x48xbf16>
    %104 = vector.shape_cast %103 : vector<1x8x48xbf16> to vector<8x48xbf16>
    %105 = arith.extf %104 : vector<8x48xbf16> to vector<8x48xf32>
    %c32_116 = arith.constant 32 : index
    %c0_117 = arith.constant 0 : index
    %106 = vector.load %arg17[%c32_116, %c0_117] : memref<40x96xf32, #tpu.memory_space<vmem>>, vector<8x48xf32>
    tpu.vector_store %arg17[%c32_116, %c0_117], %105 {strides = array<i32>} : memref<40x96xf32, #tpu.memory_space<vmem>>, vector<8x48xf32>,
    %c1_118 = arith.constant 1 : index
    %c0_119 = arith.constant 0 : index
    %c4_120 = arith.constant 4 : index
    %107 = vector.load %arg16[%c1_118, %c0_119, %c4_120] : memref<2x8x52xbf16, #tpu.memory_space<vmem>>, vector<1x8x48xbf16>
    %108 = vector.shape_cast %107 : vector<1x8x48xbf16> to vector<8x48xbf16>
    %109 = arith.extf %108 : vector<8x48xbf16> to vector<8x48xf32>
    %c32_121 = arith.constant 32 : index
    %c48_122 = arith.constant 48 : index
    %110 = vector.load %arg17[%c32_121, %c48_122] : memref<40x96xf32, #tpu.memory_space<vmem>>, vector<8x48xf32>
    tpu.vector_store %arg17[%c32_121, %c48_122], %109 {strides = array<i32>} : memref<40x96xf32, #tpu.memory_space<vmem>>, vector<8x48xf32>,
    %c0_123 = arith.constant 0 : index
    %c0_124 = arith.constant 0 : index
    %111 = vector.load %arg17[%c0_123, %c0_124] : memref<40x96xf32, #tpu.memory_space<vmem>>, vector<40x96xf32>
    %112 = arith.truncf %111 : vector<40x96xf32> to vector<40x96xbf16>
    %c0_125 = arith.constant 0 : index
    %c0_126 = arith.constant 0 : index
    %113 = vector.load %arg9[%c0_125, %c0_126] : memref<96x48xbf16, #tpu.memory_space<vmem>>, vector<96x48xbf16>
    %cst_127 = arith.constant dense<0.000000e+00> : vector<40x48xf32>
    %114 = tpu.matmul %112, %113, %cst_127 {dimension_numbers = #tpu.dot_dimension_numbers<[1], [0], [0], [1], [0, 0, 1, 1], [], []>} : vector<40x96xbf16>, vector<96x48xbf16>, vector<40x48xf32> -> vector<40x48xf32>
    %115 = arith.truncf %114 : vector<40x48xf32> to vector<40x48xbf16>
    %c0_128 = arith.constant 0 : index
    %c0_129 = arith.constant 0 : index
    %116 = vector.load %arg2[%c0_128, %c0_129] : memref<8x40xbf16, #tpu.memory_space<vmem>>, vector<8x40xbf16>
    %cst_130 = arith.constant dense<0.000000e+00> : vector<8x48xf32>
    %117 = tpu.matmul %116, %115, %cst_130 {dimension_numbers = #tpu.dot_dimension_numbers<[1], [0], [0], [1], [0, 0, 1, 1], [], []>} : vector<8x40xbf16>, vector<40x48xbf16>, vector<8x48xf32> -> vector<8x48xf32>
    %c0_131 = arith.constant 0 : index
    %c0_132 = arith.constant 0 : index
    %118 = vector.load %arg6[%c0_131, %c0_132] : memref<8x1xf32, #tpu.memory_space<vmem>>, vector<8x1xf32>
    %119 = vector.broadcast %118 : vector<8x1xf32> to vector<8x48xf32>
    %120 = arith.addf %117, %119 : vector<8x48xf32>
    %cst_133 = arith.constant 0.000000e+00 : f32
    %121 = vector.broadcast %cst_133 : f32 to vector<8x48xf32>
    %122 = arith.cmpf oge, %120, %121 : vector<8x48xf32>
    %cst_134 = arith.constant 1.000000e-01 : f32
    %123 = vector.broadcast %cst_134 : f32 to vector<8x48xf32>
    %124 = arith.mulf %123, %120 : vector<8x48xf32>
    %125 = arith.select %122, %120, %124 : vector<8x48xi1>, vector<8x48xf32>
    %c0_135 = arith.constant 0 : index
    %c0_136 = arith.constant 0 : index
    %126 = vector.load %arg12[%c0_135, %c0_136] : memref<8x48xf32, #tpu.memory_space<vmem>>, vector<8x48xf32>
    tpu.vector_store %arg12[%c0_135, %c0_136], %125 {strides = array<i32>} : memref<8x48xf32, #tpu.memory_space<vmem>>, vector<8x48xf32>,
    %127 = arith.truncf %125 : vector<8x48xf32> to vector<8x48xbf16>
    %128 = vector.extract_strided_slice %127 {offsets = [0, 0], sizes = [8, 24], strides = [1, 1]} : vector<8x48xbf16> to vector<8x24xbf16>
    %c0_137 = arith.constant 0 : index
    %c0_138 = arith.constant 0 : index
    %c2_139 = arith.constant 2 : index
    %129 = vector.load %arg15[%c0_137, %c0_138, %c2_139] : memref<2x8x52xbf16, #tpu.memory_space<vmem>>, vector<1x8x24xbf16>
    %130 = vector.shape_cast %129 : vector<1x8x24xbf16> to vector<8x24xbf16>
    %131 = vector.shape_cast %128 : vector<8x24xbf16> to vector<1x8x24xbf16>
    tpu.vector_store %arg15[%c0_137, %c0_138, %c2_139], %131 {strides = array<i32>} : memref<2x8x52xbf16, #tpu.memory_space<vmem>>, vector<1x8x24xbf16>,
    %132 = vector.extract_strided_slice %127 {offsets = [0, 24], sizes = [8, 24], strides = [1, 1]} : vector<8x48xbf16> to vector<8x24xbf16>
    %c1_140 = arith.constant 1 : index
    %c0_141 = arith.constant 0 : index
    %c2_142 = arith.constant 2 : index
    %133 = vector.load %arg15[%c1_140, %c0_141, %c2_142] : memref<2x8x52xbf16, #tpu.memory_space<vmem>>, vector<1x8x24xbf16>
    %134 = vector.shape_cast %133 : vector<1x8x24xbf16> to vector<8x24xbf16>
    %135 = vector.shape_cast %132 : vector<8x24xbf16> to vector<1x8x24xbf16>
    tpu.vector_store %arg15[%c1_140, %c0_141, %c2_142], %135 {strides = array<i32>} : memref<2x8x52xbf16, #tpu.memory_space<vmem>>, vector<1x8x24xbf16>,
    %cst_143 = arith.constant 0.000000e+00 : bf16
    %136 = vector.broadcast %cst_143 : bf16 to vector<2x8x2xbf16>
    %c0_144 = arith.constant 0 : index
    %c0_145 = arith.constant 0 : index
    %c0_146 = arith.constant 0 : index
    %137 = vector.load %arg15[%c0_144, %c0_145, %c0_146] : memref<2x8x52xbf16, #tpu.memory_space<vmem>>, vector<2x8x2xbf16>
    tpu.vector_store %arg15[%c0_144, %c0_145, %c0_146], %136 {strides = array<i32>} : memref<2x8x52xbf16, #tpu.memory_space<vmem>>, vector<2x8x2xbf16>,
    %cst_147 = arith.constant 0.000000e+00 : bf16
    %138 = vector.broadcast %cst_147 : bf16 to vector<2x8x2xbf16>
    %c0_148 = arith.constant 0 : index
    %c0_149 = arith.constant 0 : index
    %c26 = arith.constant 26 : index
    %139 = vector.load %arg15[%c0_148, %c0_149, %c26] : memref<2x8x52xbf16, #tpu.memory_space<vmem>>, vector<2x8x2xbf16>
    tpu.vector_store %arg15[%c0_148, %c0_149, %c26], %138 {strides = array<i32>} : memref<2x8x52xbf16, #tpu.memory_space<vmem>>, vector<2x8x2xbf16>,
    %c0_150 = arith.constant 0 : index
    %c0_151 = arith.constant 0 : index
    %c0_152 = arith.constant 0 : index
    %140 = vector.load %arg15[%c0_150, %c0_151, %c0_152] : memref<2x8x52xbf16, #tpu.memory_space<vmem>>, vector<1x8x24xbf16>
    %141 = vector.shape_cast %140 : vector<1x8x24xbf16> to vector<8x24xbf16>
    %142 = arith.extf %141 : vector<8x24xbf16> to vector<8x24xf32>
    %c0_153 = arith.constant 0 : index
    %c0_154 = arith.constant 0 : index
    %143 = vector.load %arg17[%c0_153, %c0_154] : memref<40x96xf32, #tpu.memory_space<vmem>>, vector<8x24xf32>
    tpu.vector_store %arg17[%c0_153, %c0_154], %142 {strides = array<i32>} : memref<40x96xf32, #tpu.memory_space<vmem>>, vector<8x24xf32>,
    %c1_155 = arith.constant 1 : index
    %c0_156 = arith.constant 0 : index
    %c0_157 = arith.constant 0 : index
    %144 = vector.load %arg15[%c1_155, %c0_156, %c0_157] : memref<2x8x52xbf16, #tpu.memory_space<vmem>>, vector<1x8x24xbf16>
    %145 = vector.shape_cast %144 : vector<1x8x24xbf16> to vector<8x24xbf16>
    %146 = arith.extf %145 : vector<8x24xbf16> to vector<8x24xf32>
    %c0_158 = arith.constant 0 : index
    %c24_159 = arith.constant 24 : index
    %147 = vector.load %arg17[%c0_158, %c24_159] : memref<40x96xf32, #tpu.memory_space<vmem>>, vector<8x24xf32>
    tpu.vector_store %arg17[%c0_158, %c24_159], %146 {strides = array<i32>} : memref<40x96xf32, #tpu.memory_space<vmem>>, vector<8x24xf32>,
    %c0_160 = arith.constant 0 : index
    %c0_161 = arith.constant 0 : index
    %c1_162 = arith.constant 1 : index
    %148 = vector.load %arg15[%c0_160, %c0_161, %c1_162] : memref<2x8x52xbf16, #tpu.memory_space<vmem>>, vector<1x8x24xbf16>
    %149 = vector.shape_cast %148 : vector<1x8x24xbf16> to vector<8x24xbf16>
    %150 = arith.extf %149 : vector<8x24xbf16> to vector<8x24xf32>
    %c8_163 = arith.constant 8 : index
    %c0_164 = arith.constant 0 : index
    %151 = vector.load %arg17[%c8_163, %c0_164] : memref<40x96xf32, #tpu.memory_space<vmem>>, vector<8x24xf32>
    tpu.vector_store %arg17[%c8_163, %c0_164], %150 {strides = array<i32>} : memref<40x96xf32, #tpu.memory_space<vmem>>, vector<8x24xf32>,
    %c1_165 = arith.constant 1 : index
    %c0_166 = arith.constant 0 : index
    %c1_167 = arith.constant 1 : index
    %152 = vector.load %arg15[%c1_165, %c0_166, %c1_167] : memref<2x8x52xbf16, #tpu.memory_space<vmem>>, vector<1x8x24xbf16>
    %153 = vector.shape_cast %152 : vector<1x8x24xbf16> to vector<8x24xbf16>
    %154 = arith.extf %153 : vector<8x24xbf16> to vector<8x24xf32>
    %c8_168 = arith.constant 8 : index
    %c24_169 = arith.constant 24 : index
    %155 = vector.load %arg17[%c8_168, %c24_169] : memref<40x96xf32, #tpu.memory_space<vmem>>, vector<8x24xf32>
    tpu.vector_store %arg17[%c8_168, %c24_169], %154 {strides = array<i32>} : memref<40x96xf32, #tpu.memory_space<vmem>>, vector<8x24xf32>,
    %c0_170 = arith.constant 0 : index
    %c0_171 = arith.constant 0 : index
    %c2_172 = arith.constant 2 : index
    %156 = vector.load %arg15[%c0_170, %c0_171, %c2_172] : memref<2x8x52xbf16, #tpu.memory_space<vmem>>, vector<1x8x24xbf16>
    %157 = vector.shape_cast %156 : vector<1x8x24xbf16> to vector<8x24xbf16>
    %158 = arith.extf %157 : vector<8x24xbf16> to vector<8x24xf32>
    %c16_173 = arith.constant 16 : index
    %c0_174 = arith.constant 0 : index
    %159 = vector.load %arg17[%c16_173, %c0_174] : memref<40x96xf32, #tpu.memory_space<vmem>>, vector<8x24xf32>
    tpu.vector_store %arg17[%c16_173, %c0_174], %158 {strides = array<i32>} : memref<40x96xf32, #tpu.memory_space<vmem>>, vector<8x24xf32>,
    %c1_175 = arith.constant 1 : index
    %c0_176 = arith.constant 0 : index
    %c2_177 = arith.constant 2 : index
    %160 = vector.load %arg15[%c1_175, %c0_176, %c2_177] : memref<2x8x52xbf16, #tpu.memory_space<vmem>>, vector<1x8x24xbf16>
    %161 = vector.shape_cast %160 : vector<1x8x24xbf16> to vector<8x24xbf16>
    %162 = arith.extf %161 : vector<8x24xbf16> to vector<8x24xf32>
    %c16_178 = arith.constant 16 : index
    %c24_179 = arith.constant 24 : index
    %163 = vector.load %arg17[%c16_178, %c24_179] : memref<40x96xf32, #tpu.memory_space<vmem>>, vector<8x24xf32>
    tpu.vector_store %arg17[%c16_178, %c24_179], %162 {strides = array<i32>} : memref<40x96xf32, #tpu.memory_space<vmem>>, vector<8x24xf32>,
    %c0_180 = arith.constant 0 : index
    %c0_181 = arith.constant 0 : index
    %c3_182 = arith.constant 3 : index
    %164 = vector.load %arg15[%c0_180, %c0_181, %c3_182] : memref<2x8x52xbf16, #tpu.memory_space<vmem>>, vector<1x8x24xbf16>
    %165 = vector.shape_cast %164 : vector<1x8x24xbf16> to vector<8x24xbf16>
    %166 = arith.extf %165 : vector<8x24xbf16> to vector<8x24xf32>
    %c24_183 = arith.constant 24 : index
    %c0_184 = arith.constant 0 : index
    %167 = vector.load %arg17[%c24_183, %c0_184] : memref<40x96xf32, #tpu.memory_space<vmem>>, vector<8x24xf32>
    tpu.vector_store %arg17[%c24_183, %c0_184], %166 {strides = array<i32>} : memref<40x96xf32, #tpu.memory_space<vmem>>, vector<8x24xf32>,
    %c1_185 = arith.constant 1 : index
    %c0_186 = arith.constant 0 : index
    %c3_187 = arith.constant 3 : index
    %168 = vector.load %arg15[%c1_185, %c0_186, %c3_187] : memref<2x8x52xbf16, #tpu.memory_space<vmem>>, vector<1x8x24xbf16>
    %169 = vector.shape_cast %168 : vector<1x8x24xbf16> to vector<8x24xbf16>
    %170 = arith.extf %169 : vector<8x24xbf16> to vector<8x24xf32>
    %c24_188 = arith.constant 24 : index
    %c24_189 = arith.constant 24 : index
    %171 = vector.load %arg17[%c24_188, %c24_189] : memref<40x96xf32, #tpu.memory_space<vmem>>, vector<8x24xf32>
    tpu.vector_store %arg17[%c24_188, %c24_189], %170 {strides = array<i32>} : memref<40x96xf32, #tpu.memory_space<vmem>>, vector<8x24xf32>,
    %c0_190 = arith.constant 0 : index
    %c0_191 = arith.constant 0 : index
    %c4_192 = arith.constant 4 : index
    %172 = vector.load %arg15[%c0_190, %c0_191, %c4_192] : memref<2x8x52xbf16, #tpu.memory_space<vmem>>, vector<1x8x24xbf16>
    %173 = vector.shape_cast %172 : vector<1x8x24xbf16> to vector<8x24xbf16>
    %174 = arith.extf %173 : vector<8x24xbf16> to vector<8x24xf32>
    %c32_193 = arith.constant 32 : index
    %c0_194 = arith.constant 0 : index
    %175 = vector.load %arg17[%c32_193, %c0_194] : memref<40x96xf32, #tpu.memory_space<vmem>>, vector<8x24xf32>
    tpu.vector_store %arg17[%c32_193, %c0_194], %174 {strides = array<i32>} : memref<40x96xf32, #tpu.memory_space<vmem>>, vector<8x24xf32>,
    %c1_195 = arith.constant 1 : index
    %c0_196 = arith.constant 0 : index
    %c4_197 = arith.constant 4 : index
    %176 = vector.load %arg15[%c1_195, %c0_196, %c4_197] : memref<2x8x52xbf16, #tpu.memory_space<vmem>>, vector<1x8x24xbf16>
    %177 = vector.shape_cast %176 : vector<1x8x24xbf16> to vector<8x24xbf16>
    %178 = arith.extf %177 : vector<8x24xbf16> to vector<8x24xf32>
    %c32_198 = arith.constant 32 : index
    %c24_199 = arith.constant 24 : index
    %179 = vector.load %arg17[%c32_198, %c24_199] : memref<40x96xf32, #tpu.memory_space<vmem>>, vector<8x24xf32>
    tpu.vector_store %arg17[%c32_198, %c24_199], %178 {strides = array<i32>} : memref<40x96xf32, #tpu.memory_space<vmem>>, vector<8x24xf32>,
    %c0_200 = arith.constant 0 : index
    %c0_201 = arith.constant 0 : index
    %180 = vector.load %arg17[%c0_200, %c0_201] : memref<40x96xf32, #tpu.memory_space<vmem>>, vector<40x48xf32>
    %181 = arith.truncf %180 : vector<40x48xf32> to vector<40x48xbf16>
    %c0_202 = arith.constant 0 : index
    %c0_203 = arith.constant 0 : index
    %182 = vector.load %arg10[%c0_202, %c0_203] : memref<48x24xbf16, #tpu.memory_space<vmem>>, vector<48x24xbf16>
    %cst_204 = arith.constant dense<0.000000e+00> : vector<40x24xf32>
    %183 = tpu.matmul %181, %182, %cst_204 {dimension_numbers = #tpu.dot_dimension_numbers<[1], [0], [0], [1], [0, 0, 1, 1], [], []>} : vector<40x48xbf16>, vector<48x24xbf16>, vector<40x24xf32> -> vector<40x24xf32>
    %184 = arith.truncf %183 : vector<40x24xf32> to vector<40x24xbf16>
    %c0_205 = arith.constant 0 : index
    %c0_206 = arith.constant 0 : index
    %185 = vector.load %arg3[%c0_205, %c0_206] : memref<8x40xbf16, #tpu.memory_space<vmem>>, vector<8x40xbf16>
    %cst_207 = arith.constant dense<0.000000e+00> : vector<8x24xf32>
    %186 = tpu.matmul %185, %184, %cst_207 {dimension_numbers = #tpu.dot_dimension_numbers<[1], [0], [0], [1], [0, 0, 1, 1], [], []>} : vector<8x40xbf16>, vector<40x24xbf16>, vector<8x24xf32> -> vector<8x24xf32>
    %c0_208 = arith.constant 0 : index
    %c0_209 = arith.constant 0 : index
    %187 = vector.load %arg7[%c0_208, %c0_209] : memref<8x1xf32, #tpu.memory_space<vmem>>, vector<8x1xf32>
    %188 = vector.broadcast %187 : vector<8x1xf32> to vector<8x24xf32>
    %189 = arith.addf %186, %188 : vector<8x24xf32>
    %cst_210 = arith.constant 0.000000e+00 : f32
    %190 = vector.broadcast %cst_210 : f32 to vector<8x24xf32>
    %191 = arith.cmpf oge, %189, %190 : vector<8x24xf32>
    %cst_211 = arith.constant 1.000000e-01 : f32
    %192 = vector.broadcast %cst_211 : f32 to vector<8x24xf32>
    %193 = arith.mulf %192, %189 : vector<8x24xf32>
    %194 = arith.select %191, %189, %193 : vector<8x24xi1>, vector<8x24xf32>
    %c0_212 = arith.constant 0 : index
    %c0_213 = arith.constant 0 : index
    %195 = vector.load %arg13[%c0_212, %c0_213] : memref<8x24xf32, #tpu.memory_space<vmem>>, vector<8x24xf32>
    tpu.vector_store %arg13[%c0_212, %c0_213], %194 {strides = array<i32>} : memref<8x24xf32, #tpu.memory_space<vmem>>, vector<8x24xf32>,
    %196 = arith.truncf %194 : vector<8x24xf32> to vector<8x24xbf16>
    %197 = vector.extract_strided_slice %196 {offsets = [0, 0], sizes = [8, 12], strides = [1, 1]} : vector<8x24xbf16> to vector<8x12xbf16>
    %c0_214 = arith.constant 0 : index
    %c0_215 = arith.constant 0 : index
    %c1_216 = arith.constant 1 : index
    %198 = vector.load %arg16[%c0_214, %c0_215, %c1_216] : memref<2x8x52xbf16, #tpu.memory_space<vmem>>, vector<1x8x12xbf16>
    %199 = vector.shape_cast %198 : vector<1x8x12xbf16> to vector<8x12xbf16>
    %200 = vector.shape_cast %197 : vector<8x12xbf16> to vector<1x8x12xbf16>
    tpu.vector_store %arg16[%c0_214, %c0_215, %c1_216], %200 {strides = array<i32>} : memref<2x8x52xbf16, #tpu.memory_space<vmem>>, vector<1x8x12xbf16>,
    %201 = vector.extract_strided_slice %196 {offsets = [0, 12], sizes = [8, 12], strides = [1, 1]} : vector<8x24xbf16> to vector<8x12xbf16>
    %c1_217 = arith.constant 1 : index
    %c0_218 = arith.constant 0 : index
    %c1_219 = arith.constant 1 : index
    %202 = vector.load %arg16[%c1_217, %c0_218, %c1_219] : memref<2x8x52xbf16, #tpu.memory_space<vmem>>, vector<1x8x12xbf16>
    %203 = vector.shape_cast %202 : vector<1x8x12xbf16> to vector<8x12xbf16>
    %204 = vector.shape_cast %201 : vector<8x12xbf16> to vector<1x8x12xbf16>
    tpu.vector_store %arg16[%c1_217, %c0_218, %c1_219], %204 {strides = array<i32>} : memref<2x8x52xbf16, #tpu.memory_space<vmem>>, vector<1x8x12xbf16>,
    %cst_220 = arith.constant 0.000000e+00 : bf16
    %205 = vector.broadcast %cst_220 : bf16 to vector<2x8x1xbf16>
    %c0_221 = arith.constant 0 : index
    %c0_222 = arith.constant 0 : index
    %c0_223 = arith.constant 0 : index
    %206 = vector.load %arg16[%c0_221, %c0_222, %c0_223] : memref<2x8x52xbf16, #tpu.memory_space<vmem>>, vector<2x8x1xbf16>
    tpu.vector_store %arg16[%c0_221, %c0_222, %c0_223], %205 {strides = array<i32>} : memref<2x8x52xbf16, #tpu.memory_space<vmem>>, vector<2x8x1xbf16>,
    %cst_224 = arith.constant 0.000000e+00 : bf16
    %207 = vector.broadcast %cst_224 : bf16 to vector<2x8x1xbf16>
    %c0_225 = arith.constant 0 : index
    %c0_226 = arith.constant 0 : index
    %c13 = arith.constant 13 : index
    %208 = vector.load %arg16[%c0_225, %c0_226, %c13] : memref<2x8x52xbf16, #tpu.memory_space<vmem>>, vector<2x8x1xbf16>
    tpu.vector_store %arg16[%c0_225, %c0_226, %c13], %207 {strides = array<i32>} : memref<2x8x52xbf16, #tpu.memory_space<vmem>>, vector<2x8x1xbf16>,
    %c0_227 = arith.constant 0 : index
    %c0_228 = arith.constant 0 : index
    %c0_229 = arith.constant 0 : index
    %209 = vector.load %arg16[%c0_227, %c0_228, %c0_229] : memref<2x8x52xbf16, #tpu.memory_space<vmem>>, vector<1x8x12xbf16>
    %210 = vector.shape_cast %209 : vector<1x8x12xbf16> to vector<8x12xbf16>
    %211 = arith.extf %210 : vector<8x12xbf16> to vector<8x12xf32>
    %c0_230 = arith.constant 0 : index
    %c0_231 = arith.constant 0 : index
    %212 = vector.load %arg17[%c0_230, %c0_231] : memref<40x96xf32, #tpu.memory_space<vmem>>, vector<8x12xf32>
    tpu.vector_store %arg17[%c0_230, %c0_231], %211 {strides = array<i32>} : memref<40x96xf32, #tpu.memory_space<vmem>>, vector<8x12xf32>,
    %c1_232 = arith.constant 1 : index
    %c0_233 = arith.constant 0 : index
    %c0_234 = arith.constant 0 : index
    %213 = vector.load %arg16[%c1_232, %c0_233, %c0_234] : memref<2x8x52xbf16, #tpu.memory_space<vmem>>, vector<1x8x12xbf16>
    %214 = vector.shape_cast %213 : vector<1x8x12xbf16> to vector<8x12xbf16>
    %215 = arith.extf %214 : vector<8x12xbf16> to vector<8x12xf32>
    %c0_235 = arith.constant 0 : index
    %c12 = arith.constant 12 : index
    %216 = vector.load %arg17[%c0_235, %c12] : memref<40x96xf32, #tpu.memory_space<vmem>>, vector<8x12xf32>
    tpu.vector_store %arg17[%c0_235, %c12], %215 {strides = array<i32>} : memref<40x96xf32, #tpu.memory_space<vmem>>, vector<8x12xf32>,
    %c0_236 = arith.constant 0 : index
    %c0_237 = arith.constant 0 : index
    %c1_238 = arith.constant 1 : index
    %217 = vector.load %arg16[%c0_236, %c0_237, %c1_238] : memref<2x8x52xbf16, #tpu.memory_space<vmem>>, vector<1x8x12xbf16>
    %218 = vector.shape_cast %217 : vector<1x8x12xbf16> to vector<8x12xbf16>
    %219 = arith.extf %218 : vector<8x12xbf16> to vector<8x12xf32>
    %c8_239 = arith.constant 8 : index
    %c0_240 = arith.constant 0 : index
    %220 = vector.load %arg17[%c8_239, %c0_240] : memref<40x96xf32, #tpu.memory_space<vmem>>, vector<8x12xf32>
    tpu.vector_store %arg17[%c8_239, %c0_240], %219 {strides = array<i32>} : memref<40x96xf32, #tpu.memory_space<vmem>>, vector<8x12xf32>,
    %c1_241 = arith.constant 1 : index
    %c0_242 = arith.constant 0 : index
    %c1_243 = arith.constant 1 : index
    %221 = vector.load %arg16[%c1_241, %c0_242, %c1_243] : memref<2x8x52xbf16, #tpu.memory_space<vmem>>, vector<1x8x12xbf16>
    %222 = vector.shape_cast %221 : vector<1x8x12xbf16> to vector<8x12xbf16>
    %223 = arith.extf %222 : vector<8x12xbf16> to vector<8x12xf32>
    %c8_244 = arith.constant 8 : index
    %c12_245 = arith.constant 12 : index
    %224 = vector.load %arg17[%c8_244, %c12_245] : memref<40x96xf32, #tpu.memory_space<vmem>>, vector<8x12xf32>
    tpu.vector_store %arg17[%c8_244, %c12_245], %223 {strides = array<i32>} : memref<40x96xf32, #tpu.memory_space<vmem>>, vector<8x12xf32>,
    %c0_246 = arith.constant 0 : index
    %c0_247 = arith.constant 0 : index
    %c2_248 = arith.constant 2 : index
    %225 = vector.load %arg16[%c0_246, %c0_247, %c2_248] : memref<2x8x52xbf16, #tpu.memory_space<vmem>>, vector<1x8x12xbf16>
    %226 = vector.shape_cast %225 : vector<1x8x12xbf16> to vector<8x12xbf16>
    %227 = arith.extf %226 : vector<8x12xbf16> to vector<8x12xf32>
    %c16_249 = arith.constant 16 : index
    %c0_250 = arith.constant 0 : index
    %228 = vector.load %arg17[%c16_249, %c0_250] : memref<40x96xf32, #tpu.memory_space<vmem>>, vector<8x12xf32>
    tpu.vector_store %arg17[%c16_249, %c0_250], %227 {strides = array<i32>} : memref<40x96xf32, #tpu.memory_space<vmem>>, vector<8x12xf32>,
    %c1_251 = arith.constant 1 : index
    %c0_252 = arith.constant 0 : index
    %c2_253 = arith.constant 2 : index
    %229 = vector.load %arg16[%c1_251, %c0_252, %c2_253] : memref<2x8x52xbf16, #tpu.memory_space<vmem>>, vector<1x8x12xbf16>
    %230 = vector.shape_cast %229 : vector<1x8x12xbf16> to vector<8x12xbf16>
    %231 = arith.extf %230 : vector<8x12xbf16> to vector<8x12xf32>
    %c16_254 = arith.constant 16 : index
    %c12_255 = arith.constant 12 : index
    %232 = vector.load %arg17[%c16_254, %c12_255] : memref<40x96xf32, #tpu.memory_space<vmem>>, vector<8x12xf32>
    tpu.vector_store %arg17[%c16_254, %c12_255], %231 {strides = array<i32>} : memref<40x96xf32, #tpu.memory_space<vmem>>, vector<8x12xf32>,
    %c0_256 = arith.constant 0 : index
    %c0_257 = arith.constant 0 : index
    %233 = vector.load %arg17[%c0_256, %c0_257] : memref<40x96xf32, #tpu.memory_space<vmem>>, vector<24x24xf32>
    %234 = arith.truncf %233 : vector<24x24xf32> to vector<24x24xbf16>
    %c0_258 = arith.constant 0 : index
    %c0_259 = arith.constant 0 : index
    %235 = vector.load %arg4[%c0_258, %c0_259] : memref<8x24xbf16, #tpu.memory_space<vmem>>, vector<8x24xbf16>
    %cst_260 = arith.constant dense<0.000000e+00> : vector<8x24xf32>
    %236 = tpu.matmul %235, %234, %cst_260 {dimension_numbers = #tpu.dot_dimension_numbers<[1], [0], [0], [1], [0, 0, 1, 1], [], []>} : vector<8x24xbf16>, vector<24x24xbf16>, vector<8x24xf32> -> vector<8x24xf32>
    %c0_261 = arith.constant 0 : index
    %c0_262 = arith.constant 0 : index
    %237 = vector.load %arg8[%c0_261, %c0_262] : memref<8x1xf32, #tpu.memory_space<vmem>>, vector<8x1xf32>
    %238 = vector.broadcast %237 : vector<8x1xf32> to vector<8x24xf32>
    %239 = arith.addf %236, %238 : vector<8x24xf32>
    %240 = vector.extract_strided_slice %239 {offsets = [0, 0], sizes = [1, 24], strides = [1, 1]} : vector<8x24xf32> to vector<1x24xf32>
    %c0_263 = arith.constant 0 : index
    %c0_264 = arith.constant 0 : index
    %241 = vector.load %arg14[%c0_263, %c0_264] : memref<1x24xf32, #tpu.memory_space<vmem>>, vector<1x24xf32>
    tpu.vector_store %arg14[%c0_263, %c0_264], %240 {strides = array<i32>} : memref<1x24xf32, #tpu.memory_space<vmem>>, vector<1x24xf32>,
    return
  }
}

module attributes {stable_mosaic.version = 11 : i64} {
  func.func @_fused_branch_kernel(%arg0: memref<6x1x16xbf16, #tpu.memory_space<vmem>>, %arg1: memref<8x40xbf16, #tpu.memory_space<vmem>>, %arg2: memref<8x40xbf16, #tpu.memory_space<vmem>>, %arg3: memref<8x40xbf16, #tpu.memory_space<vmem>>, %arg4: memref<8x24xbf16, #tpu.memory_space<vmem>>, %arg5: memref<8x1xf32, #tpu.memory_space<vmem>>, %arg6: memref<8x1xf32, #tpu.memory_space<vmem>>, %arg7: memref<8x1xf32, #tpu.memory_space<vmem>>, %arg8: memref<8x1xf32, #tpu.memory_space<vmem>>, %arg9: memref<96x36xbf16, #tpu.memory_space<vmem>>, %arg10: memref<36x12xbf16, #tpu.memory_space<vmem>>, %arg11: memref<12x6xbf16, #tpu.memory_space<vmem>>, %arg12: memref<4x36xf32, #tpu.memory_space<vmem>>, %arg13: memref<8x12xf32, #tpu.memory_space<vmem>>, %arg14: memref<8x6xf32, #tpu.memory_space<vmem>>, %arg15: memref<1x6xf32, #tpu.memory_space<vmem>>, %arg16: memref<6x8x20xbf16, #tpu.memory_space<vmem>>, %arg17: memref<6x8x20xbf16, #tpu.memory_space<vmem>>, %arg18: memref<40x96xf32, #tpu.memory_space<vmem>>) attributes {dimension_semantics = [], scalar_prefetch = 0 : i64, scratch_operands = 3 : i64, tpu.core_type = #tpu.core_type<tc>} {
    %cst = arith.constant 0.000000e+00 : bf16
    %0 = vector.broadcast %cst : bf16 to vector<6x8x20xbf16>
    %c0 = arith.constant 0 : index
    %c0_0 = arith.constant 0 : index
    %c0_1 = arith.constant 0 : index
    %1 = vector.load %arg16[%c0, %c0_0, %c0_1] : memref<6x8x20xbf16, #tpu.memory_space<vmem>>, vector<6x8x20xbf16>
    tpu.vector_store %arg16[%c0, %c0_0, %c0_1], %0 {strides = array<i32>} : memref<6x8x20xbf16, #tpu.memory_space<vmem>>, vector<6x8x20xbf16>,
    %c0_2 = arith.constant 0 : index
    %c0_3 = arith.constant 0 : index
    %c0_4 = arith.constant 0 : index
    %2 = vector.load %arg0[%c0_2, %c0_3, %c0_4] : memref<6x1x16xbf16, #tpu.memory_space<vmem>>, vector<6x1x16xbf16>
    %c0_5 = arith.constant 0 : index
    %c0_6 = arith.constant 0 : index
    %c2 = arith.constant 2 : index
    %3 = vector.load %arg16[%c0_5, %c0_6, %c2] : memref<6x8x20xbf16, #tpu.memory_space<vmem>>, vector<6x1x16xbf16>
    tpu.vector_store %arg16[%c0_5, %c0_6, %c2], %2 {strides = array<i32>} : memref<6x8x20xbf16, #tpu.memory_space<vmem>>, vector<6x1x16xbf16>,
    %c0_7 = arith.constant 0 : index
    %c0_8 = arith.constant 0 : index
    %c0_9 = arith.constant 0 : index
    %4 = vector.load %arg16[%c0_7, %c0_8, %c0_9] : memref<6x8x20xbf16, #tpu.memory_space<vmem>>, vector<1x8x16xbf16>
    %5 = vector.shape_cast %4 : vector<1x8x16xbf16> to vector<8x16xbf16>
    %6 = arith.extf %5 : vector<8x16xbf16> to vector<8x16xf32>
    %c0_10 = arith.constant 0 : index
    %c0_11 = arith.constant 0 : index
    %7 = vector.load %arg18[%c0_10, %c0_11] : memref<40x96xf32, #tpu.memory_space<vmem>>, vector<8x16xf32>
    tpu.vector_store %arg18[%c0_10, %c0_11], %6 {strides = array<i32>} : memref<40x96xf32, #tpu.memory_space<vmem>>, vector<8x16xf32>,
    %c1 = arith.constant 1 : index
    %c0_12 = arith.constant 0 : index
    %c0_13 = arith.constant 0 : index
    %8 = vector.load %arg16[%c1, %c0_12, %c0_13] : memref<6x8x20xbf16, #tpu.memory_space<vmem>>, vector<1x8x16xbf16>
    %9 = vector.shape_cast %8 : vector<1x8x16xbf16> to vector<8x16xbf16>
    %10 = arith.extf %9 : vector<8x16xbf16> to vector<8x16xf32>
    %c0_14 = arith.constant 0 : index
    %c16 = arith.constant 16 : index
    %11 = vector.load %arg18[%c0_14, %c16] : memref<40x96xf32, #tpu.memory_space<vmem>>, vector<8x16xf32>
    tpu.vector_store %arg18[%c0_14, %c16], %10 {strides = array<i32>} : memref<40x96xf32, #tpu.memory_space<vmem>>, vector<8x16xf32>,
    %c2_15 = arith.constant 2 : index
    %c0_16 = arith.constant 0 : index
    %c0_17 = arith.constant 0 : index
    %12 = vector.load %arg16[%c2_15, %c0_16, %c0_17] : memref<6x8x20xbf16, #tpu.memory_space<vmem>>, vector<1x8x16xbf16>
    %13 = vector.shape_cast %12 : vector<1x8x16xbf16> to vector<8x16xbf16>
    %14 = arith.extf %13 : vector<8x16xbf16> to vector<8x16xf32>
    %c0_18 = arith.constant 0 : index
    %c32 = arith.constant 32 : index
    %15 = vector.load %arg18[%c0_18, %c32] : memref<40x96xf32, #tpu.memory_space<vmem>>, vector<8x16xf32>
    tpu.vector_store %arg18[%c0_18, %c32], %14 {strides = array<i32>} : memref<40x96xf32, #tpu.memory_space<vmem>>, vector<8x16xf32>,
    %c3 = arith.constant 3 : index
    %c0_19 = arith.constant 0 : index
    %c0_20 = arith.constant 0 : index
    %16 = vector.load %arg16[%c3, %c0_19, %c0_20] : memref<6x8x20xbf16, #tpu.memory_space<vmem>>, vector<1x8x16xbf16>
    %17 = vector.shape_cast %16 : vector<1x8x16xbf16> to vector<8x16xbf16>
    %18 = arith.extf %17 : vector<8x16xbf16> to vector<8x16xf32>
    %c0_21 = arith.constant 0 : index
    %c48 = arith.constant 48 : index
    %19 = vector.load %arg18[%c0_21, %c48] : memref<40x96xf32, #tpu.memory_space<vmem>>, vector<8x16xf32>
    tpu.vector_store %arg18[%c0_21, %c48], %18 {strides = array<i32>} : memref<40x96xf32, #tpu.memory_space<vmem>>, vector<8x16xf32>,
    %c4 = arith.constant 4 : index
    %c0_22 = arith.constant 0 : index
    %c0_23 = arith.constant 0 : index
    %20 = vector.load %arg16[%c4, %c0_22, %c0_23] : memref<6x8x20xbf16, #tpu.memory_space<vmem>>, vector<1x8x16xbf16>
    %21 = vector.shape_cast %20 : vector<1x8x16xbf16> to vector<8x16xbf16>
    %22 = arith.extf %21 : vector<8x16xbf16> to vector<8x16xf32>
    %c0_24 = arith.constant 0 : index
    %c64 = arith.constant 64 : index
    %23 = vector.load %arg18[%c0_24, %c64] : memref<40x96xf32, #tpu.memory_space<vmem>>, vector<8x16xf32>
    tpu.vector_store %arg18[%c0_24, %c64], %22 {strides = array<i32>} : memref<40x96xf32, #tpu.memory_space<vmem>>, vector<8x16xf32>,
    %c5 = arith.constant 5 : index
    %c0_25 = arith.constant 0 : index
    %c0_26 = arith.constant 0 : index
    %24 = vector.load %arg16[%c5, %c0_25, %c0_26] : memref<6x8x20xbf16, #tpu.memory_space<vmem>>, vector<1x8x16xbf16>
    %25 = vector.shape_cast %24 : vector<1x8x16xbf16> to vector<8x16xbf16>
    %26 = arith.extf %25 : vector<8x16xbf16> to vector<8x16xf32>
    %c0_27 = arith.constant 0 : index
    %c80 = arith.constant 80 : index
    %27 = vector.load %arg18[%c0_27, %c80] : memref<40x96xf32, #tpu.memory_space<vmem>>, vector<8x16xf32>
    tpu.vector_store %arg18[%c0_27, %c80], %26 {strides = array<i32>} : memref<40x96xf32, #tpu.memory_space<vmem>>, vector<8x16xf32>,
    %c0_28 = arith.constant 0 : index
    %c0_29 = arith.constant 0 : index
    %c1_30 = arith.constant 1 : index
    %28 = vector.load %arg16[%c0_28, %c0_29, %c1_30] : memref<6x8x20xbf16, #tpu.memory_space<vmem>>, vector<1x8x16xbf16>
    %29 = vector.shape_cast %28 : vector<1x8x16xbf16> to vector<8x16xbf16>
    %30 = arith.extf %29 : vector<8x16xbf16> to vector<8x16xf32>
    %c8 = arith.constant 8 : index
    %c0_31 = arith.constant 0 : index
    %31 = vector.load %arg18[%c8, %c0_31] : memref<40x96xf32, #tpu.memory_space<vmem>>, vector<8x16xf32>
    tpu.vector_store %arg18[%c8, %c0_31], %30 {strides = array<i32>} : memref<40x96xf32, #tpu.memory_space<vmem>>, vector<8x16xf32>,
    %c1_32 = arith.constant 1 : index
    %c0_33 = arith.constant 0 : index
    %c1_34 = arith.constant 1 : index
    %32 = vector.load %arg16[%c1_32, %c0_33, %c1_34] : memref<6x8x20xbf16, #tpu.memory_space<vmem>>, vector<1x8x16xbf16>
    %33 = vector.shape_cast %32 : vector<1x8x16xbf16> to vector<8x16xbf16>
    %34 = arith.extf %33 : vector<8x16xbf16> to vector<8x16xf32>
    %c8_35 = arith.constant 8 : index
    %c16_36 = arith.constant 16 : index
    %35 = vector.load %arg18[%c8_35, %c16_36] : memref<40x96xf32, #tpu.memory_space<vmem>>, vector<8x16xf32>
    tpu.vector_store %arg18[%c8_35, %c16_36], %34 {strides = array<i32>} : memref<40x96xf32, #tpu.memory_space<vmem>>, vector<8x16xf32>,
    %c2_37 = arith.constant 2 : index
    %c0_38 = arith.constant 0 : index
    %c1_39 = arith.constant 1 : index
    %36 = vector.load %arg16[%c2_37, %c0_38, %c1_39] : memref<6x8x20xbf16, #tpu.memory_space<vmem>>, vector<1x8x16xbf16>
    %37 = vector.shape_cast %36 : vector<1x8x16xbf16> to vector<8x16xbf16>
    %38 = arith.extf %37 : vector<8x16xbf16> to vector<8x16xf32>
    %c8_40 = arith.constant 8 : index
    %c32_41 = arith.constant 32 : index
    %39 = vector.load %arg18[%c8_40, %c32_41] : memref<40x96xf32, #tpu.memory_space<vmem>>, vector<8x16xf32>
    tpu.vector_store %arg18[%c8_40, %c32_41], %38 {strides = array<i32>} : memref<40x96xf32, #tpu.memory_space<vmem>>, vector<8x16xf32>,
    %c3_42 = arith.constant 3 : index
    %c0_43 = arith.constant 0 : index
    %c1_44 = arith.constant 1 : index
    %40 = vector.load %arg16[%c3_42, %c0_43, %c1_44] : memref<6x8x20xbf16, #tpu.memory_space<vmem>>, vector<1x8x16xbf16>
    %41 = vector.shape_cast %40 : vector<1x8x16xbf16> to vector<8x16xbf16>
    %42 = arith.extf %41 : vector<8x16xbf16> to vector<8x16xf32>
    %c8_45 = arith.constant 8 : index
    %c48_46 = arith.constant 48 : index
    %43 = vector.load %arg18[%c8_45, %c48_46] : memref<40x96xf32, #tpu.memory_space<vmem>>, vector<8x16xf32>
    tpu.vector_store %arg18[%c8_45, %c48_46], %42 {strides = array<i32>} : memref<40x96xf32, #tpu.memory_space<vmem>>, vector<8x16xf32>,
    %c4_47 = arith.constant 4 : index
    %c0_48 = arith.constant 0 : index
    %c1_49 = arith.constant 1 : index
    %44 = vector.load %arg16[%c4_47, %c0_48, %c1_49] : memref<6x8x20xbf16, #tpu.memory_space<vmem>>, vector<1x8x16xbf16>
    %45 = vector.shape_cast %44 : vector<1x8x16xbf16> to vector<8x16xbf16>
    %46 = arith.extf %45 : vector<8x16xbf16> to vector<8x16xf32>
    %c8_50 = arith.constant 8 : index
    %c64_51 = arith.constant 64 : index
    %47 = vector.load %arg18[%c8_50, %c64_51] : memref<40x96xf32, #tpu.memory_space<vmem>>, vector<8x16xf32>
    tpu.vector_store %arg18[%c8_50, %c64_51], %46 {strides = array<i32>} : memref<40x96xf32, #tpu.memory_space<vmem>>, vector<8x16xf32>,
    %c5_52 = arith.constant 5 : index
    %c0_53 = arith.constant 0 : index
    %c1_54 = arith.constant 1 : index
    %48 = vector.load %arg16[%c5_52, %c0_53, %c1_54] : memref<6x8x20xbf16, #tpu.memory_space<vmem>>, vector<1x8x16xbf16>
    %49 = vector.shape_cast %48 : vector<1x8x16xbf16> to vector<8x16xbf16>
    %50 = arith.extf %49 : vector<8x16xbf16> to vector<8x16xf32>
    %c8_55 = arith.constant 8 : index
    %c80_56 = arith.constant 80 : index
    %51 = vector.load %arg18[%c8_55, %c80_56] : memref<40x96xf32, #tpu.memory_space<vmem>>, vector<8x16xf32>
    tpu.vector_store %arg18[%c8_55, %c80_56], %50 {strides = array<i32>} : memref<40x96xf32, #tpu.memory_space<vmem>>, vector<8x16xf32>,
    %c0_57 = arith.constant 0 : index
    %c0_58 = arith.constant 0 : index
    %c2_59 = arith.constant 2 : index
    %52 = vector.load %arg16[%c0_57, %c0_58, %c2_59] : memref<6x8x20xbf16, #tpu.memory_space<vmem>>, vector<1x8x16xbf16>
    %53 = vector.shape_cast %52 : vector<1x8x16xbf16> to vector<8x16xbf16>
    %54 = arith.extf %53 : vector<8x16xbf16> to vector<8x16xf32>
    %c16_60 = arith.constant 16 : index
    %c0_61 = arith.constant 0 : index
    %55 = vector.load %arg18[%c16_60, %c0_61] : memref<40x96xf32, #tpu.memory_space<vmem>>, vector<8x16xf32>
    tpu.vector_store %arg18[%c16_60, %c0_61], %54 {strides = array<i32>} : memref<40x96xf32, #tpu.memory_space<vmem>>, vector<8x16xf32>,
    %c1_62 = arith.constant 1 : index
    %c0_63 = arith.constant 0 : index
    %c2_64 = arith.constant 2 : index
    %56 = vector.load %arg16[%c1_62, %c0_63, %c2_64] : memref<6x8x20xbf16, #tpu.memory_space<vmem>>, vector<1x8x16xbf16>
    %57 = vector.shape_cast %56 : vector<1x8x16xbf16> to vector<8x16xbf16>
    %58 = arith.extf %57 : vector<8x16xbf16> to vector<8x16xf32>
    %c16_65 = arith.constant 16 : index
    %c16_66 = arith.constant 16 : index
    %59 = vector.load %arg18[%c16_65, %c16_66] : memref<40x96xf32, #tpu.memory_space<vmem>>, vector<8x16xf32>
    tpu.vector_store %arg18[%c16_65, %c16_66], %58 {strides = array<i32>} : memref<40x96xf32, #tpu.memory_space<vmem>>, vector<8x16xf32>,
    %c2_67 = arith.constant 2 : index
    %c0_68 = arith.constant 0 : index
    %c2_69 = arith.constant 2 : index
    %60 = vector.load %arg16[%c2_67, %c0_68, %c2_69] : memref<6x8x20xbf16, #tpu.memory_space<vmem>>, vector<1x8x16xbf16>
    %61 = vector.shape_cast %60 : vector<1x8x16xbf16> to vector<8x16xbf16>
    %62 = arith.extf %61 : vector<8x16xbf16> to vector<8x16xf32>
    %c16_70 = arith.constant 16 : index
    %c32_71 = arith.constant 32 : index
    %63 = vector.load %arg18[%c16_70, %c32_71] : memref<40x96xf32, #tpu.memory_space<vmem>>, vector<8x16xf32>
    tpu.vector_store %arg18[%c16_70, %c32_71], %62 {strides = array<i32>} : memref<40x96xf32, #tpu.memory_space<vmem>>, vector<8x16xf32>,
    %c3_72 = arith.constant 3 : index
    %c0_73 = arith.constant 0 : index
    %c2_74 = arith.constant 2 : index
    %64 = vector.load %arg16[%c3_72, %c0_73, %c2_74] : memref<6x8x20xbf16, #tpu.memory_space<vmem>>, vector<1x8x16xbf16>
    %65 = vector.shape_cast %64 : vector<1x8x16xbf16> to vector<8x16xbf16>
    %66 = arith.extf %65 : vector<8x16xbf16> to vector<8x16xf32>
    %c16_75 = arith.constant 16 : index
    %c48_76 = arith.constant 48 : index
    %67 = vector.load %arg18[%c16_75, %c48_76] : memref<40x96xf32, #tpu.memory_space<vmem>>, vector<8x16xf32>
    tpu.vector_store %arg18[%c16_75, %c48_76], %66 {strides = array<i32>} : memref<40x96xf32, #tpu.memory_space<vmem>>, vector<8x16xf32>,
    %c4_77 = arith.constant 4 : index
    %c0_78 = arith.constant 0 : index
    %c2_79 = arith.constant 2 : index
    %68 = vector.load %arg16[%c4_77, %c0_78, %c2_79] : memref<6x8x20xbf16, #tpu.memory_space<vmem>>, vector<1x8x16xbf16>
    %69 = vector.shape_cast %68 : vector<1x8x16xbf16> to vector<8x16xbf16>
    %70 = arith.extf %69 : vector<8x16xbf16> to vector<8x16xf32>
    %c16_80 = arith.constant 16 : index
    %c64_81 = arith.constant 64 : index
    %71 = vector.load %arg18[%c16_80, %c64_81] : memref<40x96xf32, #tpu.memory_space<vmem>>, vector<8x16xf32>
    tpu.vector_store %arg18[%c16_80, %c64_81], %70 {strides = array<i32>} : memref<40x96xf32, #tpu.memory_space<vmem>>, vector<8x16xf32>,
    %c5_82 = arith.constant 5 : index
    %c0_83 = arith.constant 0 : index
    %c2_84 = arith.constant 2 : index
    %72 = vector.load %arg16[%c5_82, %c0_83, %c2_84] : memref<6x8x20xbf16, #tpu.memory_space<vmem>>, vector<1x8x16xbf16>
    %73 = vector.shape_cast %72 : vector<1x8x16xbf16> to vector<8x16xbf16>
    %74 = arith.extf %73 : vector<8x16xbf16> to vector<8x16xf32>
    %c16_85 = arith.constant 16 : index
    %c80_86 = arith.constant 80 : index
    %75 = vector.load %arg18[%c16_85, %c80_86] : memref<40x96xf32, #tpu.memory_space<vmem>>, vector<8x16xf32>
    tpu.vector_store %arg18[%c16_85, %c80_86], %74 {strides = array<i32>} : memref<40x96xf32, #tpu.memory_space<vmem>>, vector<8x16xf32>,
    %c0_87 = arith.constant 0 : index
    %c0_88 = arith.constant 0 : index
    %c3_89 = arith.constant 3 : index
    %76 = vector.load %arg16[%c0_87, %c0_88, %c3_89] : memref<6x8x20xbf16, #tpu.memory_space<vmem>>, vector<1x8x16xbf16>
    %77 = vector.shape_cast %76 : vector<1x8x16xbf16> to vector<8x16xbf16>
    %78 = arith.extf %77 : vector<8x16xbf16> to vector<8x16xf32>
    %c24 = arith.constant 24 : index
    %c0_90 = arith.constant 0 : index
    %79 = vector.load %arg18[%c24, %c0_90] : memref<40x96xf32, #tpu.memory_space<vmem>>, vector<8x16xf32>
    tpu.vector_store %arg18[%c24, %c0_90], %78 {strides = array<i32>} : memref<40x96xf32, #tpu.memory_space<vmem>>, vector<8x16xf32>,
    %c1_91 = arith.constant 1 : index
    %c0_92 = arith.constant 0 : index
    %c3_93 = arith.constant 3 : index
    %80 = vector.load %arg16[%c1_91, %c0_92, %c3_93] : memref<6x8x20xbf16, #tpu.memory_space<vmem>>, vector<1x8x16xbf16>
    %81 = vector.shape_cast %80 : vector<1x8x16xbf16> to vector<8x16xbf16>
    %82 = arith.extf %81 : vector<8x16xbf16> to vector<8x16xf32>
    %c24_94 = arith.constant 24 : index
    %c16_95 = arith.constant 16 : index
    %83 = vector.load %arg18[%c24_94, %c16_95] : memref<40x96xf32, #tpu.memory_space<vmem>>, vector<8x16xf32>
    tpu.vector_store %arg18[%c24_94, %c16_95], %82 {strides = array<i32>} : memref<40x96xf32, #tpu.memory_space<vmem>>, vector<8x16xf32>,
    %c2_96 = arith.constant 2 : index
    %c0_97 = arith.constant 0 : index
    %c3_98 = arith.constant 3 : index
    %84 = vector.load %arg16[%c2_96, %c0_97, %c3_98] : memref<6x8x20xbf16, #tpu.memory_space<vmem>>, vector<1x8x16xbf16>
    %85 = vector.shape_cast %84 : vector<1x8x16xbf16> to vector<8x16xbf16>
    %86 = arith.extf %85 : vector<8x16xbf16> to vector<8x16xf32>
    %c24_99 = arith.constant 24 : index
    %c32_100 = arith.constant 32 : index
    %87 = vector.load %arg18[%c24_99, %c32_100] : memref<40x96xf32, #tpu.memory_space<vmem>>, vector<8x16xf32>
    tpu.vector_store %arg18[%c24_99, %c32_100], %86 {strides = array<i32>} : memref<40x96xf32, #tpu.memory_space<vmem>>, vector<8x16xf32>,
    %c3_101 = arith.constant 3 : index
    %c0_102 = arith.constant 0 : index
    %c3_103 = arith.constant 3 : index
    %88 = vector.load %arg16[%c3_101, %c0_102, %c3_103] : memref<6x8x20xbf16, #tpu.memory_space<vmem>>, vector<1x8x16xbf16>
    %89 = vector.shape_cast %88 : vector<1x8x16xbf16> to vector<8x16xbf16>
    %90 = arith.extf %89 : vector<8x16xbf16> to vector<8x16xf32>
    %c24_104 = arith.constant 24 : index
    %c48_105 = arith.constant 48 : index
    %91 = vector.load %arg18[%c24_104, %c48_105] : memref<40x96xf32, #tpu.memory_space<vmem>>, vector<8x16xf32>
    tpu.vector_store %arg18[%c24_104, %c48_105], %90 {strides = array<i32>} : memref<40x96xf32, #tpu.memory_space<vmem>>, vector<8x16xf32>,
    %c4_106 = arith.constant 4 : index
    %c0_107 = arith.constant 0 : index
    %c3_108 = arith.constant 3 : index
    %92 = vector.load %arg16[%c4_106, %c0_107, %c3_108] : memref<6x8x20xbf16, #tpu.memory_space<vmem>>, vector<1x8x16xbf16>
    %93 = vector.shape_cast %92 : vector<1x8x16xbf16> to vector<8x16xbf16>
    %94 = arith.extf %93 : vector<8x16xbf16> to vector<8x16xf32>
    %c24_109 = arith.constant 24 : index
    %c64_110 = arith.constant 64 : index
    %95 = vector.load %arg18[%c24_109, %c64_110] : memref<40x96xf32, #tpu.memory_space<vmem>>, vector<8x16xf32>
    tpu.vector_store %arg18[%c24_109, %c64_110], %94 {strides = array<i32>} : memref<40x96xf32, #tpu.memory_space<vmem>>, vector<8x16xf32>,
    %c5_111 = arith.constant 5 : index
    %c0_112 = arith.constant 0 : index
    %c3_113 = arith.constant 3 : index
    %96 = vector.load %arg16[%c5_111, %c0_112, %c3_113] : memref<6x8x20xbf16, #tpu.memory_space<vmem>>, vector<1x8x16xbf16>
    %97 = vector.shape_cast %96 : vector<1x8x16xbf16> to vector<8x16xbf16>
    %98 = arith.extf %97 : vector<8x16xbf16> to vector<8x16xf32>
    %c24_114 = arith.constant 24 : index
    %c80_115 = arith.constant 80 : index
    %99 = vector.load %arg18[%c24_114, %c80_115] : memref<40x96xf32, #tpu.memory_space<vmem>>, vector<8x16xf32>
    tpu.vector_store %arg18[%c24_114, %c80_115], %98 {strides = array<i32>} : memref<40x96xf32, #tpu.memory_space<vmem>>, vector<8x16xf32>,
    %c0_116 = arith.constant 0 : index
    %c0_117 = arith.constant 0 : index
    %c4_118 = arith.constant 4 : index
    %100 = vector.load %arg16[%c0_116, %c0_117, %c4_118] : memref<6x8x20xbf16, #tpu.memory_space<vmem>>, vector<1x8x16xbf16>
    %101 = vector.shape_cast %100 : vector<1x8x16xbf16> to vector<8x16xbf16>
    %102 = arith.extf %101 : vector<8x16xbf16> to vector<8x16xf32>
    %c32_119 = arith.constant 32 : index
    %c0_120 = arith.constant 0 : index
    %103 = vector.load %arg18[%c32_119, %c0_120] : memref<40x96xf32, #tpu.memory_space<vmem>>, vector<8x16xf32>
    tpu.vector_store %arg18[%c32_119, %c0_120], %102 {strides = array<i32>} : memref<40x96xf32, #tpu.memory_space<vmem>>, vector<8x16xf32>,
    %c1_121 = arith.constant 1 : index
    %c0_122 = arith.constant 0 : index
    %c4_123 = arith.constant 4 : index
    %104 = vector.load %arg16[%c1_121, %c0_122, %c4_123] : memref<6x8x20xbf16, #tpu.memory_space<vmem>>, vector<1x8x16xbf16>
    %105 = vector.shape_cast %104 : vector<1x8x16xbf16> to vector<8x16xbf16>
    %106 = arith.extf %105 : vector<8x16xbf16> to vector<8x16xf32>
    %c32_124 = arith.constant 32 : index
    %c16_125 = arith.constant 16 : index
    %107 = vector.load %arg18[%c32_124, %c16_125] : memref<40x96xf32, #tpu.memory_space<vmem>>, vector<8x16xf32>
    tpu.vector_store %arg18[%c32_124, %c16_125], %106 {strides = array<i32>} : memref<40x96xf32, #tpu.memory_space<vmem>>, vector<8x16xf32>,
    %c2_126 = arith.constant 2 : index
    %c0_127 = arith.constant 0 : index
    %c4_128 = arith.constant 4 : index
    %108 = vector.load %arg16[%c2_126, %c0_127, %c4_128] : memref<6x8x20xbf16, #tpu.memory_space<vmem>>, vector<1x8x16xbf16>
    %109 = vector.shape_cast %108 : vector<1x8x16xbf16> to vector<8x16xbf16>
    %110 = arith.extf %109 : vector<8x16xbf16> to vector<8x16xf32>
    %c32_129 = arith.constant 32 : index
    %c32_130 = arith.constant 32 : index
    %111 = vector.load %arg18[%c32_129, %c32_130] : memref<40x96xf32, #tpu.memory_space<vmem>>, vector<8x16xf32>
    tpu.vector_store %arg18[%c32_129, %c32_130], %110 {strides = array<i32>} : memref<40x96xf32, #tpu.memory_space<vmem>>, vector<8x16xf32>,
    %c3_131 = arith.constant 3 : index
    %c0_132 = arith.constant 0 : index
    %c4_133 = arith.constant 4 : index
    %112 = vector.load %arg16[%c3_131, %c0_132, %c4_133] : memref<6x8x20xbf16, #tpu.memory_space<vmem>>, vector<1x8x16xbf16>
    %113 = vector.shape_cast %112 : vector<1x8x16xbf16> to vector<8x16xbf16>
    %114 = arith.extf %113 : vector<8x16xbf16> to vector<8x16xf32>
    %c32_134 = arith.constant 32 : index
    %c48_135 = arith.constant 48 : index
    %115 = vector.load %arg18[%c32_134, %c48_135] : memref<40x96xf32, #tpu.memory_space<vmem>>, vector<8x16xf32>
    tpu.vector_store %arg18[%c32_134, %c48_135], %114 {strides = array<i32>} : memref<40x96xf32, #tpu.memory_space<vmem>>, vector<8x16xf32>,
    %c4_136 = arith.constant 4 : index
    %c0_137 = arith.constant 0 : index
    %c4_138 = arith.constant 4 : index
    %116 = vector.load %arg16[%c4_136, %c0_137, %c4_138] : memref<6x8x20xbf16, #tpu.memory_space<vmem>>, vector<1x8x16xbf16>
    %117 = vector.shape_cast %116 : vector<1x8x16xbf16> to vector<8x16xbf16>
    %118 = arith.extf %117 : vector<8x16xbf16> to vector<8x16xf32>
    %c32_139 = arith.constant 32 : index
    %c64_140 = arith.constant 64 : index
    %119 = vector.load %arg18[%c32_139, %c64_140] : memref<40x96xf32, #tpu.memory_space<vmem>>, vector<8x16xf32>
    tpu.vector_store %arg18[%c32_139, %c64_140], %118 {strides = array<i32>} : memref<40x96xf32, #tpu.memory_space<vmem>>, vector<8x16xf32>,
    %c5_141 = arith.constant 5 : index
    %c0_142 = arith.constant 0 : index
    %c4_143 = arith.constant 4 : index
    %120 = vector.load %arg16[%c5_141, %c0_142, %c4_143] : memref<6x8x20xbf16, #tpu.memory_space<vmem>>, vector<1x8x16xbf16>
    %121 = vector.shape_cast %120 : vector<1x8x16xbf16> to vector<8x16xbf16>
    %122 = arith.extf %121 : vector<8x16xbf16> to vector<8x16xf32>
    %c32_144 = arith.constant 32 : index
    %c80_145 = arith.constant 80 : index
    %123 = vector.load %arg18[%c32_144, %c80_145] : memref<40x96xf32, #tpu.memory_space<vmem>>, vector<8x16xf32>
    tpu.vector_store %arg18[%c32_144, %c80_145], %122 {strides = array<i32>} : memref<40x96xf32, #tpu.memory_space<vmem>>, vector<8x16xf32>,
    %c0_146 = arith.constant 0 : index
    %c0_147 = arith.constant 0 : index
    %124 = vector.load %arg18[%c0_146, %c0_147] : memref<40x96xf32, #tpu.memory_space<vmem>>, vector<40x96xf32>
    %125 = arith.truncf %124 : vector<40x96xf32> to vector<40x96xbf16>
    %c0_148 = arith.constant 0 : index
    %c0_149 = arith.constant 0 : index
    %126 = vector.load %arg9[%c0_148, %c0_149] : memref<96x36xbf16, #tpu.memory_space<vmem>>, vector<96x36xbf16>
    %cst_150 = arith.constant dense<0.000000e+00> : vector<40x36xf32>
    %127 = tpu.matmul %125, %126, %cst_150 {dimension_numbers = #tpu.dot_dimension_numbers<[1], [0], [0], [1], [0, 0, 1, 1], [], []>} : vector<40x96xbf16>, vector<96x36xbf16>, vector<40x36xf32> -> vector<40x36xf32>
    %128 = arith.truncf %127 : vector<40x36xf32> to vector<40x36xbf16>
    %c0_151 = arith.constant 0 : index
    %c0_152 = arith.constant 0 : index
    %129 = vector.load %arg1[%c0_151, %c0_152] : memref<8x40xbf16, #tpu.memory_space<vmem>>, vector<8x40xbf16>
    %cst_153 = arith.constant dense<0.000000e+00> : vector<8x36xf32>
    %130 = tpu.matmul %129, %128, %cst_153 {dimension_numbers = #tpu.dot_dimension_numbers<[1], [0], [0], [1], [0, 0, 1, 1], [], []>} : vector<8x40xbf16>, vector<40x36xbf16>, vector<8x36xf32> -> vector<8x36xf32>
    %c0_154 = arith.constant 0 : index
    %c0_155 = arith.constant 0 : index
    %131 = vector.load %arg5[%c0_154, %c0_155] : memref<8x1xf32, #tpu.memory_space<vmem>>, vector<8x1xf32>
    %132 = vector.broadcast %131 : vector<8x1xf32> to vector<8x36xf32>
    %133 = arith.addf %130, %132 : vector<8x36xf32>
    %cst_156 = arith.constant 0.000000e+00 : f32
    %134 = vector.broadcast %cst_156 : f32 to vector<8x36xf32>
    %135 = arith.cmpf oge, %133, %134 : vector<8x36xf32>
    %cst_157 = arith.constant 1.000000e-01 : f32
    %136 = vector.broadcast %cst_157 : f32 to vector<8x36xf32>
    %137 = arith.mulf %136, %133 : vector<8x36xf32>
    %138 = arith.select %135, %133, %137 : vector<8x36xi1>, vector<8x36xf32>
    %139 = vector.extract_strided_slice %138 {offsets = [0, 0], sizes = [4, 36], strides = [1, 1]} : vector<8x36xf32> to vector<4x36xf32>
    %c0_158 = arith.constant 0 : index
    %c0_159 = arith.constant 0 : index
    %140 = vector.load %arg12[%c0_158, %c0_159] : memref<4x36xf32, #tpu.memory_space<vmem>>, vector<4x36xf32>
    tpu.vector_store %arg12[%c0_158, %c0_159], %139 {strides = array<i32>} : memref<4x36xf32, #tpu.memory_space<vmem>>, vector<4x36xf32>,
    %141 = arith.truncf %138 : vector<8x36xf32> to vector<8x36xbf16>
    %142 = vector.extract_strided_slice %141 {offsets = [0, 0], sizes = [8, 6], strides = [1, 1]} : vector<8x36xbf16> to vector<8x6xbf16>
    %c0_160 = arith.constant 0 : index
    %c0_161 = arith.constant 0 : index
    %c2_162 = arith.constant 2 : index
    %143 = vector.load %arg17[%c0_160, %c0_161, %c2_162] : memref<6x8x20xbf16, #tpu.memory_space<vmem>>, vector<1x8x6xbf16>
    %144 = vector.shape_cast %143 : vector<1x8x6xbf16> to vector<8x6xbf16>
    %145 = vector.shape_cast %142 : vector<8x6xbf16> to vector<1x8x6xbf16>
    tpu.vector_store %arg17[%c0_160, %c0_161, %c2_162], %145 {strides = array<i32>} : memref<6x8x20xbf16, #tpu.memory_space<vmem>>, vector<1x8x6xbf16>,
    %146 = vector.extract_strided_slice %141 {offsets = [0, 6], sizes = [8, 6], strides = [1, 1]} : vector<8x36xbf16> to vector<8x6xbf16>
    %c1_163 = arith.constant 1 : index
    %c0_164 = arith.constant 0 : index
    %c2_165 = arith.constant 2 : index
    %147 = vector.load %arg17[%c1_163, %c0_164, %c2_165] : memref<6x8x20xbf16, #tpu.memory_space<vmem>>, vector<1x8x6xbf16>
    %148 = vector.shape_cast %147 : vector<1x8x6xbf16> to vector<8x6xbf16>
    %149 = vector.shape_cast %146 : vector<8x6xbf16> to vector<1x8x6xbf16>
    tpu.vector_store %arg17[%c1_163, %c0_164, %c2_165], %149 {strides = array<i32>} : memref<6x8x20xbf16, #tpu.memory_space<vmem>>, vector<1x8x6xbf16>,
    %150 = vector.extract_strided_slice %141 {offsets = [0, 12], sizes = [8, 6], strides = [1, 1]} : vector<8x36xbf16> to vector<8x6xbf16>
    %c2_166 = arith.constant 2 : index
    %c0_167 = arith.constant 0 : index
    %c2_168 = arith.constant 2 : index
    %151 = vector.load %arg17[%c2_166, %c0_167, %c2_168] : memref<6x8x20xbf16, #tpu.memory_space<vmem>>, vector<1x8x6xbf16>
    %152 = vector.shape_cast %151 : vector<1x8x6xbf16> to vector<8x6xbf16>
    %153 = vector.shape_cast %150 : vector<8x6xbf16> to vector<1x8x6xbf16>
    tpu.vector_store %arg17[%c2_166, %c0_167, %c2_168], %153 {strides = array<i32>} : memref<6x8x20xbf16, #tpu.memory_space<vmem>>, vector<1x8x6xbf16>,
    %154 = vector.extract_strided_slice %141 {offsets = [0, 18], sizes = [8, 6], strides = [1, 1]} : vector<8x36xbf16> to vector<8x6xbf16>
    %c3_169 = arith.constant 3 : index
    %c0_170 = arith.constant 0 : index
    %c2_171 = arith.constant 2 : index
    %155 = vector.load %arg17[%c3_169, %c0_170, %c2_171] : memref<6x8x20xbf16, #tpu.memory_space<vmem>>, vector<1x8x6xbf16>
    %156 = vector.shape_cast %155 : vector<1x8x6xbf16> to vector<8x6xbf16>
    %157 = vector.shape_cast %154 : vector<8x6xbf16> to vector<1x8x6xbf16>
    tpu.vector_store %arg17[%c3_169, %c0_170, %c2_171], %157 {strides = array<i32>} : memref<6x8x20xbf16, #tpu.memory_space<vmem>>, vector<1x8x6xbf16>,
    %158 = vector.extract_strided_slice %141 {offsets = [0, 24], sizes = [8, 6], strides = [1, 1]} : vector<8x36xbf16> to vector<8x6xbf16>
    %c4_172 = arith.constant 4 : index
    %c0_173 = arith.constant 0 : index
    %c2_174 = arith.constant 2 : index
    %159 = vector.load %arg17[%c4_172, %c0_173, %c2_174] : memref<6x8x20xbf16, #tpu.memory_space<vmem>>, vector<1x8x6xbf16>
    %160 = vector.shape_cast %159 : vector<1x8x6xbf16> to vector<8x6xbf16>
    %161 = vector.shape_cast %158 : vector<8x6xbf16> to vector<1x8x6xbf16>
    tpu.vector_store %arg17[%c4_172, %c0_173, %c2_174], %161 {strides = array<i32>} : memref<6x8x20xbf16, #tpu.memory_space<vmem>>, vector<1x8x6xbf16>,
    %162 = vector.extract_strided_slice %141 {offsets = [0, 30], sizes = [8, 6], strides = [1, 1]} : vector<8x36xbf16> to vector<8x6xbf16>
    %c5_175 = arith.constant 5 : index
    %c0_176 = arith.constant 0 : index
    %c2_177 = arith.constant 2 : index
    %163 = vector.load %arg17[%c5_175, %c0_176, %c2_177] : memref<6x8x20xbf16, #tpu.memory_space<vmem>>, vector<1x8x6xbf16>
    %164 = vector.shape_cast %163 : vector<1x8x6xbf16> to vector<8x6xbf16>
    %165 = vector.shape_cast %162 : vector<8x6xbf16> to vector<1x8x6xbf16>
    tpu.vector_store %arg17[%c5_175, %c0_176, %c2_177], %165 {strides = array<i32>} : memref<6x8x20xbf16, #tpu.memory_space<vmem>>, vector<1x8x6xbf16>,
    %cst_178 = arith.constant 0.000000e+00 : bf16
    %166 = vector.broadcast %cst_178 : bf16 to vector<6x8x2xbf16>
    %c0_179 = arith.constant 0 : index
    %c0_180 = arith.constant 0 : index
    %c0_181 = arith.constant 0 : index
    %167 = vector.load %arg17[%c0_179, %c0_180, %c0_181] : memref<6x8x20xbf16, #tpu.memory_space<vmem>>, vector<6x8x2xbf16>
    tpu.vector_store %arg17[%c0_179, %c0_180, %c0_181], %166 {strides = array<i32>} : memref<6x8x20xbf16, #tpu.memory_space<vmem>>, vector<6x8x2xbf16>,
    %cst_182 = arith.constant 0.000000e+00 : bf16
    %168 = vector.broadcast %cst_182 : bf16 to vector<6x8x2xbf16>
    %c0_183 = arith.constant 0 : index
    %c0_184 = arith.constant 0 : index
    %c8_185 = arith.constant 8 : index
    %169 = vector.load %arg17[%c0_183, %c0_184, %c8_185] : memref<6x8x20xbf16, #tpu.memory_space<vmem>>, vector<6x8x2xbf16>
    tpu.vector_store %arg17[%c0_183, %c0_184, %c8_185], %168 {strides = array<i32>} : memref<6x8x20xbf16, #tpu.memory_space<vmem>>, vector<6x8x2xbf16>,
    %c0_186 = arith.constant 0 : index
    %c0_187 = arith.constant 0 : index
    %c0_188 = arith.constant 0 : index
    %170 = vector.load %arg17[%c0_186, %c0_187, %c0_188] : memref<6x8x20xbf16, #tpu.memory_space<vmem>>, vector<1x8x6xbf16>
    %171 = vector.shape_cast %170 : vector<1x8x6xbf16> to vector<8x6xbf16>
    %172 = arith.extf %171 : vector<8x6xbf16> to vector<8x6xf32>
    %c0_189 = arith.constant 0 : index
    %c0_190 = arith.constant 0 : index
    %173 = vector.load %arg18[%c0_189, %c0_190] : memref<40x96xf32, #tpu.memory_space<vmem>>, vector<8x6xf32>
    tpu.vector_store %arg18[%c0_189, %c0_190], %172 {strides = array<i32>} : memref<40x96xf32, #tpu.memory_space<vmem>>, vector<8x6xf32>,
    %c1_191 = arith.constant 1 : index
    %c0_192 = arith.constant 0 : index
    %c0_193 = arith.constant 0 : index
    %174 = vector.load %arg17[%c1_191, %c0_192, %c0_193] : memref<6x8x20xbf16, #tpu.memory_space<vmem>>, vector<1x8x6xbf16>
    %175 = vector.shape_cast %174 : vector<1x8x6xbf16> to vector<8x6xbf16>
    %176 = arith.extf %175 : vector<8x6xbf16> to vector<8x6xf32>
    %c0_194 = arith.constant 0 : index
    %c6 = arith.constant 6 : index
    %177 = vector.load %arg18[%c0_194, %c6] : memref<40x96xf32, #tpu.memory_space<vmem>>, vector<8x6xf32>
    tpu.vector_store %arg18[%c0_194, %c6], %176 {strides = array<i32>} : memref<40x96xf32, #tpu.memory_space<vmem>>, vector<8x6xf32>,
    %c2_195 = arith.constant 2 : index
    %c0_196 = arith.constant 0 : index
    %c0_197 = arith.constant 0 : index
    %178 = vector.load %arg17[%c2_195, %c0_196, %c0_197] : memref<6x8x20xbf16, #tpu.memory_space<vmem>>, vector<1x8x6xbf16>
    %179 = vector.shape_cast %178 : vector<1x8x6xbf16> to vector<8x6xbf16>
    %180 = arith.extf %179 : vector<8x6xbf16> to vector<8x6xf32>
    %c0_198 = arith.constant 0 : index
    %c12 = arith.constant 12 : index
    %181 = vector.load %arg18[%c0_198, %c12] : memref<40x96xf32, #tpu.memory_space<vmem>>, vector<8x6xf32>
    tpu.vector_store %arg18[%c0_198, %c12], %180 {strides = array<i32>} : memref<40x96xf32, #tpu.memory_space<vmem>>, vector<8x6xf32>,
    %c3_199 = arith.constant 3 : index
    %c0_200 = arith.constant 0 : index
    %c0_201 = arith.constant 0 : index
    %182 = vector.load %arg17[%c3_199, %c0_200, %c0_201] : memref<6x8x20xbf16, #tpu.memory_space<vmem>>, vector<1x8x6xbf16>
    %183 = vector.shape_cast %182 : vector<1x8x6xbf16> to vector<8x6xbf16>
    %184 = arith.extf %183 : vector<8x6xbf16> to vector<8x6xf32>
    %c0_202 = arith.constant 0 : index
    %c18 = arith.constant 18 : index
    %185 = vector.load %arg18[%c0_202, %c18] : memref<40x96xf32, #tpu.memory_space<vmem>>, vector<8x6xf32>
    tpu.vector_store %arg18[%c0_202, %c18], %184 {strides = array<i32>} : memref<40x96xf32, #tpu.memory_space<vmem>>, vector<8x6xf32>,
    %c4_203 = arith.constant 4 : index
    %c0_204 = arith.constant 0 : index
    %c0_205 = arith.constant 0 : index
    %186 = vector.load %arg17[%c4_203, %c0_204, %c0_205] : memref<6x8x20xbf16, #tpu.memory_space<vmem>>, vector<1x8x6xbf16>
    %187 = vector.shape_cast %186 : vector<1x8x6xbf16> to vector<8x6xbf16>
    %188 = arith.extf %187 : vector<8x6xbf16> to vector<8x6xf32>
    %c0_206 = arith.constant 0 : index
    %c24_207 = arith.constant 24 : index
    %189 = vector.load %arg18[%c0_206, %c24_207] : memref<40x96xf32, #tpu.memory_space<vmem>>, vector<8x6xf32>
    tpu.vector_store %arg18[%c0_206, %c24_207], %188 {strides = array<i32>} : memref<40x96xf32, #tpu.memory_space<vmem>>, vector<8x6xf32>,
    %c5_208 = arith.constant 5 : index
    %c0_209 = arith.constant 0 : index
    %c0_210 = arith.constant 0 : index
    %190 = vector.load %arg17[%c5_208, %c0_209, %c0_210] : memref<6x8x20xbf16, #tpu.memory_space<vmem>>, vector<1x8x6xbf16>
    %191 = vector.shape_cast %190 : vector<1x8x6xbf16> to vector<8x6xbf16>
    %192 = arith.extf %191 : vector<8x6xbf16> to vector<8x6xf32>
    %c0_211 = arith.constant 0 : index
    %c30 = arith.constant 30 : index
    %193 = vector.load %arg18[%c0_211, %c30] : memref<40x96xf32, #tpu.memory_space<vmem>>, vector<8x6xf32>
    tpu.vector_store %arg18[%c0_211, %c30], %192 {strides = array<i32>} : memref<40x96xf32, #tpu.memory_space<vmem>>, vector<8x6xf32>,
    %c0_212 = arith.constant 0 : index
    %c0_213 = arith.constant 0 : index
    %c1_214 = arith.constant 1 : index
    %194 = vector.load %arg17[%c0_212, %c0_213, %c1_214] : memref<6x8x20xbf16, #tpu.memory_space<vmem>>, vector<1x8x6xbf16>
    %195 = vector.shape_cast %194 : vector<1x8x6xbf16> to vector<8x6xbf16>
    %196 = arith.extf %195 : vector<8x6xbf16> to vector<8x6xf32>
    %c8_215 = arith.constant 8 : index
    %c0_216 = arith.constant 0 : index
    %197 = vector.load %arg18[%c8_215, %c0_216] : memref<40x96xf32, #tpu.memory_space<vmem>>, vector<8x6xf32>
    tpu.vector_store %arg18[%c8_215, %c0_216], %196 {strides = array<i32>} : memref<40x96xf32, #tpu.memory_space<vmem>>, vector<8x6xf32>,
    %c1_217 = arith.constant 1 : index
    %c0_218 = arith.constant 0 : index
    %c1_219 = arith.constant 1 : index
    %198 = vector.load %arg17[%c1_217, %c0_218, %c1_219] : memref<6x8x20xbf16, #tpu.memory_space<vmem>>, vector<1x8x6xbf16>
    %199 = vector.shape_cast %198 : vector<1x8x6xbf16> to vector<8x6xbf16>
    %200 = arith.extf %199 : vector<8x6xbf16> to vector<8x6xf32>
    %c8_220 = arith.constant 8 : index
    %c6_221 = arith.constant 6 : index
    %201 = vector.load %arg18[%c8_220, %c6_221] : memref<40x96xf32, #tpu.memory_space<vmem>>, vector<8x6xf32>
    tpu.vector_store %arg18[%c8_220, %c6_221], %200 {strides = array<i32>} : memref<40x96xf32, #tpu.memory_space<vmem>>, vector<8x6xf32>,
    %c2_222 = arith.constant 2 : index
    %c0_223 = arith.constant 0 : index
    %c1_224 = arith.constant 1 : index
    %202 = vector.load %arg17[%c2_222, %c0_223, %c1_224] : memref<6x8x20xbf16, #tpu.memory_space<vmem>>, vector<1x8x6xbf16>
    %203 = vector.shape_cast %202 : vector<1x8x6xbf16> to vector<8x6xbf16>
    %204 = arith.extf %203 : vector<8x6xbf16> to vector<8x6xf32>
    %c8_225 = arith.constant 8 : index
    %c12_226 = arith.constant 12 : index
    %205 = vector.load %arg18[%c8_225, %c12_226] : memref<40x96xf32, #tpu.memory_space<vmem>>, vector<8x6xf32>
    tpu.vector_store %arg18[%c8_225, %c12_226], %204 {strides = array<i32>} : memref<40x96xf32, #tpu.memory_space<vmem>>, vector<8x6xf32>,
    %c3_227 = arith.constant 3 : index
    %c0_228 = arith.constant 0 : index
    %c1_229 = arith.constant 1 : index
    %206 = vector.load %arg17[%c3_227, %c0_228, %c1_229] : memref<6x8x20xbf16, #tpu.memory_space<vmem>>, vector<1x8x6xbf16>
    %207 = vector.shape_cast %206 : vector<1x8x6xbf16> to vector<8x6xbf16>
    %208 = arith.extf %207 : vector<8x6xbf16> to vector<8x6xf32>
    %c8_230 = arith.constant 8 : index
    %c18_231 = arith.constant 18 : index
    %209 = vector.load %arg18[%c8_230, %c18_231] : memref<40x96xf32, #tpu.memory_space<vmem>>, vector<8x6xf32>
    tpu.vector_store %arg18[%c8_230, %c18_231], %208 {strides = array<i32>} : memref<40x96xf32, #tpu.memory_space<vmem>>, vector<8x6xf32>,
    %c4_232 = arith.constant 4 : index
    %c0_233 = arith.constant 0 : index
    %c1_234 = arith.constant 1 : index
    %210 = vector.load %arg17[%c4_232, %c0_233, %c1_234] : memref<6x8x20xbf16, #tpu.memory_space<vmem>>, vector<1x8x6xbf16>
    %211 = vector.shape_cast %210 : vector<1x8x6xbf16> to vector<8x6xbf16>
    %212 = arith.extf %211 : vector<8x6xbf16> to vector<8x6xf32>
    %c8_235 = arith.constant 8 : index
    %c24_236 = arith.constant 24 : index
    %213 = vector.load %arg18[%c8_235, %c24_236] : memref<40x96xf32, #tpu.memory_space<vmem>>, vector<8x6xf32>
    tpu.vector_store %arg18[%c8_235, %c24_236], %212 {strides = array<i32>} : memref<40x96xf32, #tpu.memory_space<vmem>>, vector<8x6xf32>,
    %c5_237 = arith.constant 5 : index
    %c0_238 = arith.constant 0 : index
    %c1_239 = arith.constant 1 : index
    %214 = vector.load %arg17[%c5_237, %c0_238, %c1_239] : memref<6x8x20xbf16, #tpu.memory_space<vmem>>, vector<1x8x6xbf16>
    %215 = vector.shape_cast %214 : vector<1x8x6xbf16> to vector<8x6xbf16>
    %216 = arith.extf %215 : vector<8x6xbf16> to vector<8x6xf32>
    %c8_240 = arith.constant 8 : index
    %c30_241 = arith.constant 30 : index
    %217 = vector.load %arg18[%c8_240, %c30_241] : memref<40x96xf32, #tpu.memory_space<vmem>>, vector<8x6xf32>
    tpu.vector_store %arg18[%c8_240, %c30_241], %216 {strides = array<i32>} : memref<40x96xf32, #tpu.memory_space<vmem>>, vector<8x6xf32>,
    %c0_242 = arith.constant 0 : index
    %c0_243 = arith.constant 0 : index
    %c2_244 = arith.constant 2 : index
    %218 = vector.load %arg17[%c0_242, %c0_243, %c2_244] : memref<6x8x20xbf16, #tpu.memory_space<vmem>>, vector<1x8x6xbf16>
    %219 = vector.shape_cast %218 : vector<1x8x6xbf16> to vector<8x6xbf16>
    %220 = arith.extf %219 : vector<8x6xbf16> to vector<8x6xf32>
    %c16_245 = arith.constant 16 : index
    %c0_246 = arith.constant 0 : index
    %221 = vector.load %arg18[%c16_245, %c0_246] : memref<40x96xf32, #tpu.memory_space<vmem>>, vector<8x6xf32>
    tpu.vector_store %arg18[%c16_245, %c0_246], %220 {strides = array<i32>} : memref<40x96xf32, #tpu.memory_space<vmem>>, vector<8x6xf32>,
    %c1_247 = arith.constant 1 : index
    %c0_248 = arith.constant 0 : index
    %c2_249 = arith.constant 2 : index
    %222 = vector.load %arg17[%c1_247, %c0_248, %c2_249] : memref<6x8x20xbf16, #tpu.memory_space<vmem>>, vector<1x8x6xbf16>
    %223 = vector.shape_cast %222 : vector<1x8x6xbf16> to vector<8x6xbf16>
    %224 = arith.extf %223 : vector<8x6xbf16> to vector<8x6xf32>
    %c16_250 = arith.constant 16 : index
    %c6_251 = arith.constant 6 : index
    %225 = vector.load %arg18[%c16_250, %c6_251] : memref<40x96xf32, #tpu.memory_space<vmem>>, vector<8x6xf32>
    tpu.vector_store %arg18[%c16_250, %c6_251], %224 {strides = array<i32>} : memref<40x96xf32, #tpu.memory_space<vmem>>, vector<8x6xf32>,
    %c2_252 = arith.constant 2 : index
    %c0_253 = arith.constant 0 : index
    %c2_254 = arith.constant 2 : index
    %226 = vector.load %arg17[%c2_252, %c0_253, %c2_254] : memref<6x8x20xbf16, #tpu.memory_space<vmem>>, vector<1x8x6xbf16>
    %227 = vector.shape_cast %226 : vector<1x8x6xbf16> to vector<8x6xbf16>
    %228 = arith.extf %227 : vector<8x6xbf16> to vector<8x6xf32>
    %c16_255 = arith.constant 16 : index
    %c12_256 = arith.constant 12 : index
    %229 = vector.load %arg18[%c16_255, %c12_256] : memref<40x96xf32, #tpu.memory_space<vmem>>, vector<8x6xf32>
    tpu.vector_store %arg18[%c16_255, %c12_256], %228 {strides = array<i32>} : memref<40x96xf32, #tpu.memory_space<vmem>>, vector<8x6xf32>,
    %c3_257 = arith.constant 3 : index
    %c0_258 = arith.constant 0 : index
    %c2_259 = arith.constant 2 : index
    %230 = vector.load %arg17[%c3_257, %c0_258, %c2_259] : memref<6x8x20xbf16, #tpu.memory_space<vmem>>, vector<1x8x6xbf16>
    %231 = vector.shape_cast %230 : vector<1x8x6xbf16> to vector<8x6xbf16>
    %232 = arith.extf %231 : vector<8x6xbf16> to vector<8x6xf32>
    %c16_260 = arith.constant 16 : index
    %c18_261 = arith.constant 18 : index
    %233 = vector.load %arg18[%c16_260, %c18_261] : memref<40x96xf32, #tpu.memory_space<vmem>>, vector<8x6xf32>
    tpu.vector_store %arg18[%c16_260, %c18_261], %232 {strides = array<i32>} : memref<40x96xf32, #tpu.memory_space<vmem>>, vector<8x6xf32>,
    %c4_262 = arith.constant 4 : index
    %c0_263 = arith.constant 0 : index
    %c2_264 = arith.constant 2 : index
    %234 = vector.load %arg17[%c4_262, %c0_263, %c2_264] : memref<6x8x20xbf16, #tpu.memory_space<vmem>>, vector<1x8x6xbf16>
    %235 = vector.shape_cast %234 : vector<1x8x6xbf16> to vector<8x6xbf16>
    %236 = arith.extf %235 : vector<8x6xbf16> to vector<8x6xf32>
    %c16_265 = arith.constant 16 : index
    %c24_266 = arith.constant 24 : index
    %237 = vector.load %arg18[%c16_265, %c24_266] : memref<40x96xf32, #tpu.memory_space<vmem>>, vector<8x6xf32>
    tpu.vector_store %arg18[%c16_265, %c24_266], %236 {strides = array<i32>} : memref<40x96xf32, #tpu.memory_space<vmem>>, vector<8x6xf32>,
    %c5_267 = arith.constant 5 : index
    %c0_268 = arith.constant 0 : index
    %c2_269 = arith.constant 2 : index
    %238 = vector.load %arg17[%c5_267, %c0_268, %c2_269] : memref<6x8x20xbf16, #tpu.memory_space<vmem>>, vector<1x8x6xbf16>
    %239 = vector.shape_cast %238 : vector<1x8x6xbf16> to vector<8x6xbf16>
    %240 = arith.extf %239 : vector<8x6xbf16> to vector<8x6xf32>
    %c16_270 = arith.constant 16 : index
    %c30_271 = arith.constant 30 : index
    %241 = vector.load %arg18[%c16_270, %c30_271] : memref<40x96xf32, #tpu.memory_space<vmem>>, vector<8x6xf32>
    tpu.vector_store %arg18[%c16_270, %c30_271], %240 {strides = array<i32>} : memref<40x96xf32, #tpu.memory_space<vmem>>, vector<8x6xf32>,
    %c0_272 = arith.constant 0 : index
    %c0_273 = arith.constant 0 : index
    %c3_274 = arith.constant 3 : index
    %242 = vector.load %arg17[%c0_272, %c0_273, %c3_274] : memref<6x8x20xbf16, #tpu.memory_space<vmem>>, vector<1x8x6xbf16>
    %243 = vector.shape_cast %242 : vector<1x8x6xbf16> to vector<8x6xbf16>
    %244 = arith.extf %243 : vector<8x6xbf16> to vector<8x6xf32>
    %c24_275 = arith.constant 24 : index
    %c0_276 = arith.constant 0 : index
    %245 = vector.load %arg18[%c24_275, %c0_276] : memref<40x96xf32, #tpu.memory_space<vmem>>, vector<8x6xf32>
    tpu.vector_store %arg18[%c24_275, %c0_276], %244 {strides = array<i32>} : memref<40x96xf32, #tpu.memory_space<vmem>>, vector<8x6xf32>,
    %c1_277 = arith.constant 1 : index
    %c0_278 = arith.constant 0 : index
    %c3_279 = arith.constant 3 : index
    %246 = vector.load %arg17[%c1_277, %c0_278, %c3_279] : memref<6x8x20xbf16, #tpu.memory_space<vmem>>, vector<1x8x6xbf16>
    %247 = vector.shape_cast %246 : vector<1x8x6xbf16> to vector<8x6xbf16>
    %248 = arith.extf %247 : vector<8x6xbf16> to vector<8x6xf32>
    %c24_280 = arith.constant 24 : index
    %c6_281 = arith.constant 6 : index
    %249 = vector.load %arg18[%c24_280, %c6_281] : memref<40x96xf32, #tpu.memory_space<vmem>>, vector<8x6xf32>
    tpu.vector_store %arg18[%c24_280, %c6_281], %248 {strides = array<i32>} : memref<40x96xf32, #tpu.memory_space<vmem>>, vector<8x6xf32>,
    %c2_282 = arith.constant 2 : index
    %c0_283 = arith.constant 0 : index
    %c3_284 = arith.constant 3 : index
    %250 = vector.load %arg17[%c2_282, %c0_283, %c3_284] : memref<6x8x20xbf16, #tpu.memory_space<vmem>>, vector<1x8x6xbf16>
    %251 = vector.shape_cast %250 : vector<1x8x6xbf16> to vector<8x6xbf16>
    %252 = arith.extf %251 : vector<8x6xbf16> to vector<8x6xf32>
    %c24_285 = arith.constant 24 : index
    %c12_286 = arith.constant 12 : index
    %253 = vector.load %arg18[%c24_285, %c12_286] : memref<40x96xf32, #tpu.memory_space<vmem>>, vector<8x6xf32>
    tpu.vector_store %arg18[%c24_285, %c12_286], %252 {strides = array<i32>} : memref<40x96xf32, #tpu.memory_space<vmem>>, vector<8x6xf32>,
    %c3_287 = arith.constant 3 : index
    %c0_288 = arith.constant 0 : index
    %c3_289 = arith.constant 3 : index
    %254 = vector.load %arg17[%c3_287, %c0_288, %c3_289] : memref<6x8x20xbf16, #tpu.memory_space<vmem>>, vector<1x8x6xbf16>
    %255 = vector.shape_cast %254 : vector<1x8x6xbf16> to vector<8x6xbf16>
    %256 = arith.extf %255 : vector<8x6xbf16> to vector<8x6xf32>
    %c24_290 = arith.constant 24 : index
    %c18_291 = arith.constant 18 : index
    %257 = vector.load %arg18[%c24_290, %c18_291] : memref<40x96xf32, #tpu.memory_space<vmem>>, vector<8x6xf32>
    tpu.vector_store %arg18[%c24_290, %c18_291], %256 {strides = array<i32>} : memref<40x96xf32, #tpu.memory_space<vmem>>, vector<8x6xf32>,
    %c4_292 = arith.constant 4 : index
    %c0_293 = arith.constant 0 : index
    %c3_294 = arith.constant 3 : index
    %258 = vector.load %arg17[%c4_292, %c0_293, %c3_294] : memref<6x8x20xbf16, #tpu.memory_space<vmem>>, vector<1x8x6xbf16>
    %259 = vector.shape_cast %258 : vector<1x8x6xbf16> to vector<8x6xbf16>
    %260 = arith.extf %259 : vector<8x6xbf16> to vector<8x6xf32>
    %c24_295 = arith.constant 24 : index
    %c24_296 = arith.constant 24 : index
    %261 = vector.load %arg18[%c24_295, %c24_296] : memref<40x96xf32, #tpu.memory_space<vmem>>, vector<8x6xf32>
    tpu.vector_store %arg18[%c24_295, %c24_296], %260 {strides = array<i32>} : memref<40x96xf32, #tpu.memory_space<vmem>>, vector<8x6xf32>,
    %c5_297 = arith.constant 5 : index
    %c0_298 = arith.constant 0 : index
    %c3_299 = arith.constant 3 : index
    %262 = vector.load %arg17[%c5_297, %c0_298, %c3_299] : memref<6x8x20xbf16, #tpu.memory_space<vmem>>, vector<1x8x6xbf16>
    %263 = vector.shape_cast %262 : vector<1x8x6xbf16> to vector<8x6xbf16>
    %264 = arith.extf %263 : vector<8x6xbf16> to vector<8x6xf32>
    %c24_300 = arith.constant 24 : index
    %c30_301 = arith.constant 30 : index
    %265 = vector.load %arg18[%c24_300, %c30_301] : memref<40x96xf32, #tpu.memory_space<vmem>>, vector<8x6xf32>
    tpu.vector_store %arg18[%c24_300, %c30_301], %264 {strides = array<i32>} : memref<40x96xf32, #tpu.memory_space<vmem>>, vector<8x6xf32>,
    %c0_302 = arith.constant 0 : index
    %c0_303 = arith.constant 0 : index
    %c4_304 = arith.constant 4 : index
    %266 = vector.load %arg17[%c0_302, %c0_303, %c4_304] : memref<6x8x20xbf16, #tpu.memory_space<vmem>>, vector<1x8x6xbf16>
    %267 = vector.shape_cast %266 : vector<1x8x6xbf16> to vector<8x6xbf16>
    %268 = arith.extf %267 : vector<8x6xbf16> to vector<8x6xf32>
    %c32_305 = arith.constant 32 : index
    %c0_306 = arith.constant 0 : index
    %269 = vector.load %arg18[%c32_305, %c0_306] : memref<40x96xf32, #tpu.memory_space<vmem>>, vector<8x6xf32>
    tpu.vector_store %arg18[%c32_305, %c0_306], %268 {strides = array<i32>} : memref<40x96xf32, #tpu.memory_space<vmem>>, vector<8x6xf32>,
    %c1_307 = arith.constant 1 : index
    %c0_308 = arith.constant 0 : index
    %c4_309 = arith.constant 4 : index
    %270 = vector.load %arg17[%c1_307, %c0_308, %c4_309] : memref<6x8x20xbf16, #tpu.memory_space<vmem>>, vector<1x8x6xbf16>
    %271 = vector.shape_cast %270 : vector<1x8x6xbf16> to vector<8x6xbf16>
    %272 = arith.extf %271 : vector<8x6xbf16> to vector<8x6xf32>
    %c32_310 = arith.constant 32 : index
    %c6_311 = arith.constant 6 : index
    %273 = vector.load %arg18[%c32_310, %c6_311] : memref<40x96xf32, #tpu.memory_space<vmem>>, vector<8x6xf32>
    tpu.vector_store %arg18[%c32_310, %c6_311], %272 {strides = array<i32>} : memref<40x96xf32, #tpu.memory_space<vmem>>, vector<8x6xf32>,
    %c2_312 = arith.constant 2 : index
    %c0_313 = arith.constant 0 : index
    %c4_314 = arith.constant 4 : index
    %274 = vector.load %arg17[%c2_312, %c0_313, %c4_314] : memref<6x8x20xbf16, #tpu.memory_space<vmem>>, vector<1x8x6xbf16>
    %275 = vector.shape_cast %274 : vector<1x8x6xbf16> to vector<8x6xbf16>
    %276 = arith.extf %275 : vector<8x6xbf16> to vector<8x6xf32>
    %c32_315 = arith.constant 32 : index
    %c12_316 = arith.constant 12 : index
    %277 = vector.load %arg18[%c32_315, %c12_316] : memref<40x96xf32, #tpu.memory_space<vmem>>, vector<8x6xf32>
    tpu.vector_store %arg18[%c32_315, %c12_316], %276 {strides = array<i32>} : memref<40x96xf32, #tpu.memory_space<vmem>>, vector<8x6xf32>,
    %c3_317 = arith.constant 3 : index
    %c0_318 = arith.constant 0 : index
    %c4_319 = arith.constant 4 : index
    %278 = vector.load %arg17[%c3_317, %c0_318, %c4_319] : memref<6x8x20xbf16, #tpu.memory_space<vmem>>, vector<1x8x6xbf16>
    %279 = vector.shape_cast %278 : vector<1x8x6xbf16> to vector<8x6xbf16>
    %280 = arith.extf %279 : vector<8x6xbf16> to vector<8x6xf32>
    %c32_320 = arith.constant 32 : index
    %c18_321 = arith.constant 18 : index
    %281 = vector.load %arg18[%c32_320, %c18_321] : memref<40x96xf32, #tpu.memory_space<vmem>>, vector<8x6xf32>
    tpu.vector_store %arg18[%c32_320, %c18_321], %280 {strides = array<i32>} : memref<40x96xf32, #tpu.memory_space<vmem>>, vector<8x6xf32>,
    %c4_322 = arith.constant 4 : index
    %c0_323 = arith.constant 0 : index
    %c4_324 = arith.constant 4 : index
    %282 = vector.load %arg17[%c4_322, %c0_323, %c4_324] : memref<6x8x20xbf16, #tpu.memory_space<vmem>>, vector<1x8x6xbf16>
    %283 = vector.shape_cast %282 : vector<1x8x6xbf16> to vector<8x6xbf16>
    %284 = arith.extf %283 : vector<8x6xbf16> to vector<8x6xf32>
    %c32_325 = arith.constant 32 : index
    %c24_326 = arith.constant 24 : index
    %285 = vector.load %arg18[%c32_325, %c24_326] : memref<40x96xf32, #tpu.memory_space<vmem>>, vector<8x6xf32>
    tpu.vector_store %arg18[%c32_325, %c24_326], %284 {strides = array<i32>} : memref<40x96xf32, #tpu.memory_space<vmem>>, vector<8x6xf32>,
    %c5_327 = arith.constant 5 : index
    %c0_328 = arith.constant 0 : index
    %c4_329 = arith.constant 4 : index
    %286 = vector.load %arg17[%c5_327, %c0_328, %c4_329] : memref<6x8x20xbf16, #tpu.memory_space<vmem>>, vector<1x8x6xbf16>
    %287 = vector.shape_cast %286 : vector<1x8x6xbf16> to vector<8x6xbf16>
    %288 = arith.extf %287 : vector<8x6xbf16> to vector<8x6xf32>
    %c32_330 = arith.constant 32 : index
    %c30_331 = arith.constant 30 : index
    %289 = vector.load %arg18[%c32_330, %c30_331] : memref<40x96xf32, #tpu.memory_space<vmem>>, vector<8x6xf32>
    tpu.vector_store %arg18[%c32_330, %c30_331], %288 {strides = array<i32>} : memref<40x96xf32, #tpu.memory_space<vmem>>, vector<8x6xf32>,
    %c0_332 = arith.constant 0 : index
    %c0_333 = arith.constant 0 : index
    %290 = vector.load %arg18[%c0_332, %c0_333] : memref<40x96xf32, #tpu.memory_space<vmem>>, vector<40x36xf32>
    %291 = arith.truncf %290 : vector<40x36xf32> to vector<40x36xbf16>
    %c0_334 = arith.constant 0 : index
    %c0_335 = arith.constant 0 : index
    %292 = vector.load %arg10[%c0_334, %c0_335] : memref<36x12xbf16, #tpu.memory_space<vmem>>, vector<36x12xbf16>
    %cst_336 = arith.constant dense<0.000000e+00> : vector<40x12xf32>
    %293 = tpu.matmul %291, %292, %cst_336 {dimension_numbers = #tpu.dot_dimension_numbers<[1], [0], [0], [1], [0, 0, 1, 1], [], []>} : vector<40x36xbf16>, vector<36x12xbf16>, vector<40x12xf32> -> vector<40x12xf32>
    %294 = arith.truncf %293 : vector<40x12xf32> to vector<40x12xbf16>
    %c0_337 = arith.constant 0 : index
    %c0_338 = arith.constant 0 : index
    %295 = vector.load %arg2[%c0_337, %c0_338] : memref<8x40xbf16, #tpu.memory_space<vmem>>, vector<8x40xbf16>
    %cst_339 = arith.constant dense<0.000000e+00> : vector<8x12xf32>
    %296 = tpu.matmul %295, %294, %cst_339 {dimension_numbers = #tpu.dot_dimension_numbers<[1], [0], [0], [1], [0, 0, 1, 1], [], []>} : vector<8x40xbf16>, vector<40x12xbf16>, vector<8x12xf32> -> vector<8x12xf32>
    %c0_340 = arith.constant 0 : index
    %c0_341 = arith.constant 0 : index
    %297 = vector.load %arg6[%c0_340, %c0_341] : memref<8x1xf32, #tpu.memory_space<vmem>>, vector<8x1xf32>
    %298 = vector.broadcast %297 : vector<8x1xf32> to vector<8x12xf32>
    %299 = arith.addf %296, %298 : vector<8x12xf32>
    %cst_342 = arith.constant 0.000000e+00 : f32
    %300 = vector.broadcast %cst_342 : f32 to vector<8x12xf32>
    %301 = arith.cmpf oge, %299, %300 : vector<8x12xf32>
    %cst_343 = arith.constant 1.000000e-01 : f32
    %302 = vector.broadcast %cst_343 : f32 to vector<8x12xf32>
    %303 = arith.mulf %302, %299 : vector<8x12xf32>
    %304 = arith.select %301, %299, %303 : vector<8x12xi1>, vector<8x12xf32>
    %c0_344 = arith.constant 0 : index
    %c0_345 = arith.constant 0 : index
    %305 = vector.load %arg13[%c0_344, %c0_345] : memref<8x12xf32, #tpu.memory_space<vmem>>, vector<8x12xf32>
    tpu.vector_store %arg13[%c0_344, %c0_345], %304 {strides = array<i32>} : memref<8x12xf32, #tpu.memory_space<vmem>>, vector<8x12xf32>,
    %306 = arith.truncf %304 : vector<8x12xf32> to vector<8x12xbf16>
    %307 = vector.extract_strided_slice %306 {offsets = [0, 0], sizes = [8, 2], strides = [1, 1]} : vector<8x12xbf16> to vector<8x2xbf16>
    %c0_346 = arith.constant 0 : index
    %c0_347 = arith.constant 0 : index
    %c2_348 = arith.constant 2 : index
    %308 = vector.load %arg16[%c0_346, %c0_347, %c2_348] : memref<6x8x20xbf16, #tpu.memory_space<vmem>>, vector<1x8x2xbf16>
    %309 = vector.shape_cast %308 : vector<1x8x2xbf16> to vector<8x2xbf16>
    %310 = vector.shape_cast %307 : vector<8x2xbf16> to vector<1x8x2xbf16>
    tpu.vector_store %arg16[%c0_346, %c0_347, %c2_348], %310 {strides = array<i32>} : memref<6x8x20xbf16, #tpu.memory_space<vmem>>, vector<1x8x2xbf16>,
    %311 = vector.extract_strided_slice %306 {offsets = [0, 2], sizes = [8, 2], strides = [1, 1]} : vector<8x12xbf16> to vector<8x2xbf16>
    %c1_349 = arith.constant 1 : index
    %c0_350 = arith.constant 0 : index
    %c2_351 = arith.constant 2 : index
    %312 = vector.load %arg16[%c1_349, %c0_350, %c2_351] : memref<6x8x20xbf16, #tpu.memory_space<vmem>>, vector<1x8x2xbf16>
    %313 = vector.shape_cast %312 : vector<1x8x2xbf16> to vector<8x2xbf16>
    %314 = vector.shape_cast %311 : vector<8x2xbf16> to vector<1x8x2xbf16>
    tpu.vector_store %arg16[%c1_349, %c0_350, %c2_351], %314 {strides = array<i32>} : memref<6x8x20xbf16, #tpu.memory_space<vmem>>, vector<1x8x2xbf16>,
    %315 = vector.extract_strided_slice %306 {offsets = [0, 4], sizes = [8, 2], strides = [1, 1]} : vector<8x12xbf16> to vector<8x2xbf16>
    %c2_352 = arith.constant 2 : index
    %c0_353 = arith.constant 0 : index
    %c2_354 = arith.constant 2 : index
    %316 = vector.load %arg16[%c2_352, %c0_353, %c2_354] : memref<6x8x20xbf16, #tpu.memory_space<vmem>>, vector<1x8x2xbf16>
    %317 = vector.shape_cast %316 : vector<1x8x2xbf16> to vector<8x2xbf16>
    %318 = vector.shape_cast %315 : vector<8x2xbf16> to vector<1x8x2xbf16>
    tpu.vector_store %arg16[%c2_352, %c0_353, %c2_354], %318 {strides = array<i32>} : memref<6x8x20xbf16, #tpu.memory_space<vmem>>, vector<1x8x2xbf16>,
    %319 = vector.extract_strided_slice %306 {offsets = [0, 6], sizes = [8, 2], strides = [1, 1]} : vector<8x12xbf16> to vector<8x2xbf16>
    %c3_355 = arith.constant 3 : index
    %c0_356 = arith.constant 0 : index
    %c2_357 = arith.constant 2 : index
    %320 = vector.load %arg16[%c3_355, %c0_356, %c2_357] : memref<6x8x20xbf16, #tpu.memory_space<vmem>>, vector<1x8x2xbf16>
    %321 = vector.shape_cast %320 : vector<1x8x2xbf16> to vector<8x2xbf16>
    %322 = vector.shape_cast %319 : vector<8x2xbf16> to vector<1x8x2xbf16>
    tpu.vector_store %arg16[%c3_355, %c0_356, %c2_357], %322 {strides = array<i32>} : memref<6x8x20xbf16, #tpu.memory_space<vmem>>, vector<1x8x2xbf16>,
    %323 = vector.extract_strided_slice %306 {offsets = [0, 8], sizes = [8, 2], strides = [1, 1]} : vector<8x12xbf16> to vector<8x2xbf16>
    %c4_358 = arith.constant 4 : index
    %c0_359 = arith.constant 0 : index
    %c2_360 = arith.constant 2 : index
    %324 = vector.load %arg16[%c4_358, %c0_359, %c2_360] : memref<6x8x20xbf16, #tpu.memory_space<vmem>>, vector<1x8x2xbf16>
    %325 = vector.shape_cast %324 : vector<1x8x2xbf16> to vector<8x2xbf16>
    %326 = vector.shape_cast %323 : vector<8x2xbf16> to vector<1x8x2xbf16>
    tpu.vector_store %arg16[%c4_358, %c0_359, %c2_360], %326 {strides = array<i32>} : memref<6x8x20xbf16, #tpu.memory_space<vmem>>, vector<1x8x2xbf16>,
    %327 = vector.extract_strided_slice %306 {offsets = [0, 10], sizes = [8, 2], strides = [1, 1]} : vector<8x12xbf16> to vector<8x2xbf16>
    %c5_361 = arith.constant 5 : index
    %c0_362 = arith.constant 0 : index
    %c2_363 = arith.constant 2 : index
    %328 = vector.load %arg16[%c5_361, %c0_362, %c2_363] : memref<6x8x20xbf16, #tpu.memory_space<vmem>>, vector<1x8x2xbf16>
    %329 = vector.shape_cast %328 : vector<1x8x2xbf16> to vector<8x2xbf16>
    %330 = vector.shape_cast %327 : vector<8x2xbf16> to vector<1x8x2xbf16>
    tpu.vector_store %arg16[%c5_361, %c0_362, %c2_363], %330 {strides = array<i32>} : memref<6x8x20xbf16, #tpu.memory_space<vmem>>, vector<1x8x2xbf16>,
    %cst_364 = arith.constant 0.000000e+00 : bf16
    %331 = vector.broadcast %cst_364 : bf16 to vector<6x8x2xbf16>
    %c0_365 = arith.constant 0 : index
    %c0_366 = arith.constant 0 : index
    %c0_367 = arith.constant 0 : index
    %332 = vector.load %arg16[%c0_365, %c0_366, %c0_367] : memref<6x8x20xbf16, #tpu.memory_space<vmem>>, vector<6x8x2xbf16>
    tpu.vector_store %arg16[%c0_365, %c0_366, %c0_367], %331 {strides = array<i32>} : memref<6x8x20xbf16, #tpu.memory_space<vmem>>, vector<6x8x2xbf16>,
    %cst_368 = arith.constant 0.000000e+00 : bf16
    %333 = vector.broadcast %cst_368 : bf16 to vector<6x8x2xbf16>
    %c0_369 = arith.constant 0 : index
    %c0_370 = arith.constant 0 : index
    %c4_371 = arith.constant 4 : index
    %334 = vector.load %arg16[%c0_369, %c0_370, %c4_371] : memref<6x8x20xbf16, #tpu.memory_space<vmem>>, vector<6x8x2xbf16>
    tpu.vector_store %arg16[%c0_369, %c0_370, %c4_371], %333 {strides = array<i32>} : memref<6x8x20xbf16, #tpu.memory_space<vmem>>, vector<6x8x2xbf16>,
    %c0_372 = arith.constant 0 : index
    %c0_373 = arith.constant 0 : index
    %c0_374 = arith.constant 0 : index
    %335 = vector.load %arg16[%c0_372, %c0_373, %c0_374] : memref<6x8x20xbf16, #tpu.memory_space<vmem>>, vector<1x8x2xbf16>
    %336 = vector.shape_cast %335 : vector<1x8x2xbf16> to vector<8x2xbf16>
    %337 = arith.extf %336 : vector<8x2xbf16> to vector<8x2xf32>
    %c0_375 = arith.constant 0 : index
    %c0_376 = arith.constant 0 : index
    %338 = vector.load %arg18[%c0_375, %c0_376] : memref<40x96xf32, #tpu.memory_space<vmem>>, vector<8x2xf32>
    tpu.vector_store %arg18[%c0_375, %c0_376], %337 {strides = array<i32>} : memref<40x96xf32, #tpu.memory_space<vmem>>, vector<8x2xf32>,
    %c1_377 = arith.constant 1 : index
    %c0_378 = arith.constant 0 : index
    %c0_379 = arith.constant 0 : index
    %339 = vector.load %arg16[%c1_377, %c0_378, %c0_379] : memref<6x8x20xbf16, #tpu.memory_space<vmem>>, vector<1x8x2xbf16>
    %340 = vector.shape_cast %339 : vector<1x8x2xbf16> to vector<8x2xbf16>
    %341 = arith.extf %340 : vector<8x2xbf16> to vector<8x2xf32>
    %c0_380 = arith.constant 0 : index
    %c2_381 = arith.constant 2 : index
    %342 = vector.load %arg18[%c0_380, %c2_381] : memref<40x96xf32, #tpu.memory_space<vmem>>, vector<8x2xf32>
    tpu.vector_store %arg18[%c0_380, %c2_381], %341 {strides = array<i32>} : memref<40x96xf32, #tpu.memory_space<vmem>>, vector<8x2xf32>,
    %c2_382 = arith.constant 2 : index
    %c0_383 = arith.constant 0 : index
    %c0_384 = arith.constant 0 : index
    %343 = vector.load %arg16[%c2_382, %c0_383, %c0_384] : memref<6x8x20xbf16, #tpu.memory_space<vmem>>, vector<1x8x2xbf16>
    %344 = vector.shape_cast %343 : vector<1x8x2xbf16> to vector<8x2xbf16>
    %345 = arith.extf %344 : vector<8x2xbf16> to vector<8x2xf32>
    %c0_385 = arith.constant 0 : index
    %c4_386 = arith.constant 4 : index
    %346 = vector.load %arg18[%c0_385, %c4_386] : memref<40x96xf32, #tpu.memory_space<vmem>>, vector<8x2xf32>
    tpu.vector_store %arg18[%c0_385, %c4_386], %345 {strides = array<i32>} : memref<40x96xf32, #tpu.memory_space<vmem>>, vector<8x2xf32>,
    %c3_387 = arith.constant 3 : index
    %c0_388 = arith.constant 0 : index
    %c0_389 = arith.constant 0 : index
    %347 = vector.load %arg16[%c3_387, %c0_388, %c0_389] : memref<6x8x20xbf16, #tpu.memory_space<vmem>>, vector<1x8x2xbf16>
    %348 = vector.shape_cast %347 : vector<1x8x2xbf16> to vector<8x2xbf16>
    %349 = arith.extf %348 : vector<8x2xbf16> to vector<8x2xf32>
    %c0_390 = arith.constant 0 : index
    %c6_391 = arith.constant 6 : index
    %350 = vector.load %arg18[%c0_390, %c6_391] : memref<40x96xf32, #tpu.memory_space<vmem>>, vector<8x2xf32>
    tpu.vector_store %arg18[%c0_390, %c6_391], %349 {strides = array<i32>} : memref<40x96xf32, #tpu.memory_space<vmem>>, vector<8x2xf32>,
    %c4_392 = arith.constant 4 : index
    %c0_393 = arith.constant 0 : index
    %c0_394 = arith.constant 0 : index
    %351 = vector.load %arg16[%c4_392, %c0_393, %c0_394] : memref<6x8x20xbf16, #tpu.memory_space<vmem>>, vector<1x8x2xbf16>
    %352 = vector.shape_cast %351 : vector<1x8x2xbf16> to vector<8x2xbf16>
    %353 = arith.extf %352 : vector<8x2xbf16> to vector<8x2xf32>
    %c0_395 = arith.constant 0 : index
    %c8_396 = arith.constant 8 : index
    %354 = vector.load %arg18[%c0_395, %c8_396] : memref<40x96xf32, #tpu.memory_space<vmem>>, vector<8x2xf32>
    tpu.vector_store %arg18[%c0_395, %c8_396], %353 {strides = array<i32>} : memref<40x96xf32, #tpu.memory_space<vmem>>, vector<8x2xf32>,
    %c5_397 = arith.constant 5 : index
    %c0_398 = arith.constant 0 : index
    %c0_399 = arith.constant 0 : index
    %355 = vector.load %arg16[%c5_397, %c0_398, %c0_399] : memref<6x8x20xbf16, #tpu.memory_space<vmem>>, vector<1x8x2xbf16>
    %356 = vector.shape_cast %355 : vector<1x8x2xbf16> to vector<8x2xbf16>
    %357 = arith.extf %356 : vector<8x2xbf16> to vector<8x2xf32>
    %c0_400 = arith.constant 0 : index
    %c10 = arith.constant 10 : index
    %358 = vector.load %arg18[%c0_400, %c10] : memref<40x96xf32, #tpu.memory_space<vmem>>, vector<8x2xf32>
    tpu.vector_store %arg18[%c0_400, %c10], %357 {strides = array<i32>} : memref<40x96xf32, #tpu.memory_space<vmem>>, vector<8x2xf32>,
    %c0_401 = arith.constant 0 : index
    %c0_402 = arith.constant 0 : index
    %c1_403 = arith.constant 1 : index
    %359 = vector.load %arg16[%c0_401, %c0_402, %c1_403] : memref<6x8x20xbf16, #tpu.memory_space<vmem>>, vector<1x8x2xbf16>
    %360 = vector.shape_cast %359 : vector<1x8x2xbf16> to vector<8x2xbf16>
    %361 = arith.extf %360 : vector<8x2xbf16> to vector<8x2xf32>
    %c8_404 = arith.constant 8 : index
    %c0_405 = arith.constant 0 : index
    %362 = vector.load %arg18[%c8_404, %c0_405] : memref<40x96xf32, #tpu.memory_space<vmem>>, vector<8x2xf32>
    tpu.vector_store %arg18[%c8_404, %c0_405], %361 {strides = array<i32>} : memref<40x96xf32, #tpu.memory_space<vmem>>, vector<8x2xf32>,
    %c1_406 = arith.constant 1 : index
    %c0_407 = arith.constant 0 : index
    %c1_408 = arith.constant 1 : index
    %363 = vector.load %arg16[%c1_406, %c0_407, %c1_408] : memref<6x8x20xbf16, #tpu.memory_space<vmem>>, vector<1x8x2xbf16>
    %364 = vector.shape_cast %363 : vector<1x8x2xbf16> to vector<8x2xbf16>
    %365 = arith.extf %364 : vector<8x2xbf16> to vector<8x2xf32>
    %c8_409 = arith.constant 8 : index
    %c2_410 = arith.constant 2 : index
    %366 = vector.load %arg18[%c8_409, %c2_410] : memref<40x96xf32, #tpu.memory_space<vmem>>, vector<8x2xf32>
    tpu.vector_store %arg18[%c8_409, %c2_410], %365 {strides = array<i32>} : memref<40x96xf32, #tpu.memory_space<vmem>>, vector<8x2xf32>,
    %c2_411 = arith.constant 2 : index
    %c0_412 = arith.constant 0 : index
    %c1_413 = arith.constant 1 : index
    %367 = vector.load %arg16[%c2_411, %c0_412, %c1_413] : memref<6x8x20xbf16, #tpu.memory_space<vmem>>, vector<1x8x2xbf16>
    %368 = vector.shape_cast %367 : vector<1x8x2xbf16> to vector<8x2xbf16>
    %369 = arith.extf %368 : vector<8x2xbf16> to vector<8x2xf32>
    %c8_414 = arith.constant 8 : index
    %c4_415 = arith.constant 4 : index
    %370 = vector.load %arg18[%c8_414, %c4_415] : memref<40x96xf32, #tpu.memory_space<vmem>>, vector<8x2xf32>
    tpu.vector_store %arg18[%c8_414, %c4_415], %369 {strides = array<i32>} : memref<40x96xf32, #tpu.memory_space<vmem>>, vector<8x2xf32>,
    %c3_416 = arith.constant 3 : index
    %c0_417 = arith.constant 0 : index
    %c1_418 = arith.constant 1 : index
    %371 = vector.load %arg16[%c3_416, %c0_417, %c1_418] : memref<6x8x20xbf16, #tpu.memory_space<vmem>>, vector<1x8x2xbf16>
    %372 = vector.shape_cast %371 : vector<1x8x2xbf16> to vector<8x2xbf16>
    %373 = arith.extf %372 : vector<8x2xbf16> to vector<8x2xf32>
    %c8_419 = arith.constant 8 : index
    %c6_420 = arith.constant 6 : index
    %374 = vector.load %arg18[%c8_419, %c6_420] : memref<40x96xf32, #tpu.memory_space<vmem>>, vector<8x2xf32>
    tpu.vector_store %arg18[%c8_419, %c6_420], %373 {strides = array<i32>} : memref<40x96xf32, #tpu.memory_space<vmem>>, vector<8x2xf32>,
    %c4_421 = arith.constant 4 : index
    %c0_422 = arith.constant 0 : index
    %c1_423 = arith.constant 1 : index
    %375 = vector.load %arg16[%c4_421, %c0_422, %c1_423] : memref<6x8x20xbf16, #tpu.memory_space<vmem>>, vector<1x8x2xbf16>
    %376 = vector.shape_cast %375 : vector<1x8x2xbf16> to vector<8x2xbf16>
    %377 = arith.extf %376 : vector<8x2xbf16> to vector<8x2xf32>
    %c8_424 = arith.constant 8 : index
    %c8_425 = arith.constant 8 : index
    %378 = vector.load %arg18[%c8_424, %c8_425] : memref<40x96xf32, #tpu.memory_space<vmem>>, vector<8x2xf32>
    tpu.vector_store %arg18[%c8_424, %c8_425], %377 {strides = array<i32>} : memref<40x96xf32, #tpu.memory_space<vmem>>, vector<8x2xf32>,
    %c5_426 = arith.constant 5 : index
    %c0_427 = arith.constant 0 : index
    %c1_428 = arith.constant 1 : index
    %379 = vector.load %arg16[%c5_426, %c0_427, %c1_428] : memref<6x8x20xbf16, #tpu.memory_space<vmem>>, vector<1x8x2xbf16>
    %380 = vector.shape_cast %379 : vector<1x8x2xbf16> to vector<8x2xbf16>
    %381 = arith.extf %380 : vector<8x2xbf16> to vector<8x2xf32>
    %c8_429 = arith.constant 8 : index
    %c10_430 = arith.constant 10 : index
    %382 = vector.load %arg18[%c8_429, %c10_430] : memref<40x96xf32, #tpu.memory_space<vmem>>, vector<8x2xf32>
    tpu.vector_store %arg18[%c8_429, %c10_430], %381 {strides = array<i32>} : memref<40x96xf32, #tpu.memory_space<vmem>>, vector<8x2xf32>,
    %c0_431 = arith.constant 0 : index
    %c0_432 = arith.constant 0 : index
    %c2_433 = arith.constant 2 : index
    %383 = vector.load %arg16[%c0_431, %c0_432, %c2_433] : memref<6x8x20xbf16, #tpu.memory_space<vmem>>, vector<1x8x2xbf16>
    %384 = vector.shape_cast %383 : vector<1x8x2xbf16> to vector<8x2xbf16>
    %385 = arith.extf %384 : vector<8x2xbf16> to vector<8x2xf32>
    %c16_434 = arith.constant 16 : index
    %c0_435 = arith.constant 0 : index
    %386 = vector.load %arg18[%c16_434, %c0_435] : memref<40x96xf32, #tpu.memory_space<vmem>>, vector<8x2xf32>
    tpu.vector_store %arg18[%c16_434, %c0_435], %385 {strides = array<i32>} : memref<40x96xf32, #tpu.memory_space<vmem>>, vector<8x2xf32>,
    %c1_436 = arith.constant 1 : index
    %c0_437 = arith.constant 0 : index
    %c2_438 = arith.constant 2 : index
    %387 = vector.load %arg16[%c1_436, %c0_437, %c2_438] : memref<6x8x20xbf16, #tpu.memory_space<vmem>>, vector<1x8x2xbf16>
    %388 = vector.shape_cast %387 : vector<1x8x2xbf16> to vector<8x2xbf16>
    %389 = arith.extf %388 : vector<8x2xbf16> to vector<8x2xf32>
    %c16_439 = arith.constant 16 : index
    %c2_440 = arith.constant 2 : index
    %390 = vector.load %arg18[%c16_439, %c2_440] : memref<40x96xf32, #tpu.memory_space<vmem>>, vector<8x2xf32>
    tpu.vector_store %arg18[%c16_439, %c2_440], %389 {strides = array<i32>} : memref<40x96xf32, #tpu.memory_space<vmem>>, vector<8x2xf32>,
    %c2_441 = arith.constant 2 : index
    %c0_442 = arith.constant 0 : index
    %c2_443 = arith.constant 2 : index
    %391 = vector.load %arg16[%c2_441, %c0_442, %c2_443] : memref<6x8x20xbf16, #tpu.memory_space<vmem>>, vector<1x8x2xbf16>
    %392 = vector.shape_cast %391 : vector<1x8x2xbf16> to vector<8x2xbf16>
    %393 = arith.extf %392 : vector<8x2xbf16> to vector<8x2xf32>
    %c16_444 = arith.constant 16 : index
    %c4_445 = arith.constant 4 : index
    %394 = vector.load %arg18[%c16_444, %c4_445] : memref<40x96xf32, #tpu.memory_space<vmem>>, vector<8x2xf32>
    tpu.vector_store %arg18[%c16_444, %c4_445], %393 {strides = array<i32>} : memref<40x96xf32, #tpu.memory_space<vmem>>, vector<8x2xf32>,
    %c3_446 = arith.constant 3 : index
    %c0_447 = arith.constant 0 : index
    %c2_448 = arith.constant 2 : index
    %395 = vector.load %arg16[%c3_446, %c0_447, %c2_448] : memref<6x8x20xbf16, #tpu.memory_space<vmem>>, vector<1x8x2xbf16>
    %396 = vector.shape_cast %395 : vector<1x8x2xbf16> to vector<8x2xbf16>
    %397 = arith.extf %396 : vector<8x2xbf16> to vector<8x2xf32>
    %c16_449 = arith.constant 16 : index
    %c6_450 = arith.constant 6 : index
    %398 = vector.load %arg18[%c16_449, %c6_450] : memref<40x96xf32, #tpu.memory_space<vmem>>, vector<8x2xf32>
    tpu.vector_store %arg18[%c16_449, %c6_450], %397 {strides = array<i32>} : memref<40x96xf32, #tpu.memory_space<vmem>>, vector<8x2xf32>,
    %c4_451 = arith.constant 4 : index
    %c0_452 = arith.constant 0 : index
    %c2_453 = arith.constant 2 : index
    %399 = vector.load %arg16[%c4_451, %c0_452, %c2_453] : memref<6x8x20xbf16, #tpu.memory_space<vmem>>, vector<1x8x2xbf16>
    %400 = vector.shape_cast %399 : vector<1x8x2xbf16> to vector<8x2xbf16>
    %401 = arith.extf %400 : vector<8x2xbf16> to vector<8x2xf32>
    %c16_454 = arith.constant 16 : index
    %c8_455 = arith.constant 8 : index
    %402 = vector.load %arg18[%c16_454, %c8_455] : memref<40x96xf32, #tpu.memory_space<vmem>>, vector<8x2xf32>
    tpu.vector_store %arg18[%c16_454, %c8_455], %401 {strides = array<i32>} : memref<40x96xf32, #tpu.memory_space<vmem>>, vector<8x2xf32>,
    %c5_456 = arith.constant 5 : index
    %c0_457 = arith.constant 0 : index
    %c2_458 = arith.constant 2 : index
    %403 = vector.load %arg16[%c5_456, %c0_457, %c2_458] : memref<6x8x20xbf16, #tpu.memory_space<vmem>>, vector<1x8x2xbf16>
    %404 = vector.shape_cast %403 : vector<1x8x2xbf16> to vector<8x2xbf16>
    %405 = arith.extf %404 : vector<8x2xbf16> to vector<8x2xf32>
    %c16_459 = arith.constant 16 : index
    %c10_460 = arith.constant 10 : index
    %406 = vector.load %arg18[%c16_459, %c10_460] : memref<40x96xf32, #tpu.memory_space<vmem>>, vector<8x2xf32>
    tpu.vector_store %arg18[%c16_459, %c10_460], %405 {strides = array<i32>} : memref<40x96xf32, #tpu.memory_space<vmem>>, vector<8x2xf32>,
    %c0_461 = arith.constant 0 : index
    %c0_462 = arith.constant 0 : index
    %c3_463 = arith.constant 3 : index
    %407 = vector.load %arg16[%c0_461, %c0_462, %c3_463] : memref<6x8x20xbf16, #tpu.memory_space<vmem>>, vector<1x8x2xbf16>
    %408 = vector.shape_cast %407 : vector<1x8x2xbf16> to vector<8x2xbf16>
    %409 = arith.extf %408 : vector<8x2xbf16> to vector<8x2xf32>
    %c24_464 = arith.constant 24 : index
    %c0_465 = arith.constant 0 : index
    %410 = vector.load %arg18[%c24_464, %c0_465] : memref<40x96xf32, #tpu.memory_space<vmem>>, vector<8x2xf32>
    tpu.vector_store %arg18[%c24_464, %c0_465], %409 {strides = array<i32>} : memref<40x96xf32, #tpu.memory_space<vmem>>, vector<8x2xf32>,
    %c1_466 = arith.constant 1 : index
    %c0_467 = arith.constant 0 : index
    %c3_468 = arith.constant 3 : index
    %411 = vector.load %arg16[%c1_466, %c0_467, %c3_468] : memref<6x8x20xbf16, #tpu.memory_space<vmem>>, vector<1x8x2xbf16>
    %412 = vector.shape_cast %411 : vector<1x8x2xbf16> to vector<8x2xbf16>
    %413 = arith.extf %412 : vector<8x2xbf16> to vector<8x2xf32>
    %c24_469 = arith.constant 24 : index
    %c2_470 = arith.constant 2 : index
    %414 = vector.load %arg18[%c24_469, %c2_470] : memref<40x96xf32, #tpu.memory_space<vmem>>, vector<8x2xf32>
    tpu.vector_store %arg18[%c24_469, %c2_470], %413 {strides = array<i32>} : memref<40x96xf32, #tpu.memory_space<vmem>>, vector<8x2xf32>,
    %c2_471 = arith.constant 2 : index
    %c0_472 = arith.constant 0 : index
    %c3_473 = arith.constant 3 : index
    %415 = vector.load %arg16[%c2_471, %c0_472, %c3_473] : memref<6x8x20xbf16, #tpu.memory_space<vmem>>, vector<1x8x2xbf16>
    %416 = vector.shape_cast %415 : vector<1x8x2xbf16> to vector<8x2xbf16>
    %417 = arith.extf %416 : vector<8x2xbf16> to vector<8x2xf32>
    %c24_474 = arith.constant 24 : index
    %c4_475 = arith.constant 4 : index
    %418 = vector.load %arg18[%c24_474, %c4_475] : memref<40x96xf32, #tpu.memory_space<vmem>>, vector<8x2xf32>
    tpu.vector_store %arg18[%c24_474, %c4_475], %417 {strides = array<i32>} : memref<40x96xf32, #tpu.memory_space<vmem>>, vector<8x2xf32>,
    %c3_476 = arith.constant 3 : index
    %c0_477 = arith.constant 0 : index
    %c3_478 = arith.constant 3 : index
    %419 = vector.load %arg16[%c3_476, %c0_477, %c3_478] : memref<6x8x20xbf16, #tpu.memory_space<vmem>>, vector<1x8x2xbf16>
    %420 = vector.shape_cast %419 : vector<1x8x2xbf16> to vector<8x2xbf16>
    %421 = arith.extf %420 : vector<8x2xbf16> to vector<8x2xf32>
    %c24_479 = arith.constant 24 : index
    %c6_480 = arith.constant 6 : index
    %422 = vector.load %arg18[%c24_479, %c6_480] : memref<40x96xf32, #tpu.memory_space<vmem>>, vector<8x2xf32>
    tpu.vector_store %arg18[%c24_479, %c6_480], %421 {strides = array<i32>} : memref<40x96xf32, #tpu.memory_space<vmem>>, vector<8x2xf32>,
    %c4_481 = arith.constant 4 : index
    %c0_482 = arith.constant 0 : index
    %c3_483 = arith.constant 3 : index
    %423 = vector.load %arg16[%c4_481, %c0_482, %c3_483] : memref<6x8x20xbf16, #tpu.memory_space<vmem>>, vector<1x8x2xbf16>
    %424 = vector.shape_cast %423 : vector<1x8x2xbf16> to vector<8x2xbf16>
    %425 = arith.extf %424 : vector<8x2xbf16> to vector<8x2xf32>
    %c24_484 = arith.constant 24 : index
    %c8_485 = arith.constant 8 : index
    %426 = vector.load %arg18[%c24_484, %c8_485] : memref<40x96xf32, #tpu.memory_space<vmem>>, vector<8x2xf32>
    tpu.vector_store %arg18[%c24_484, %c8_485], %425 {strides = array<i32>} : memref<40x96xf32, #tpu.memory_space<vmem>>, vector<8x2xf32>,
    %c5_486 = arith.constant 5 : index
    %c0_487 = arith.constant 0 : index
    %c3_488 = arith.constant 3 : index
    %427 = vector.load %arg16[%c5_486, %c0_487, %c3_488] : memref<6x8x20xbf16, #tpu.memory_space<vmem>>, vector<1x8x2xbf16>
    %428 = vector.shape_cast %427 : vector<1x8x2xbf16> to vector<8x2xbf16>
    %429 = arith.extf %428 : vector<8x2xbf16> to vector<8x2xf32>
    %c24_489 = arith.constant 24 : index
    %c10_490 = arith.constant 10 : index
    %430 = vector.load %arg18[%c24_489, %c10_490] : memref<40x96xf32, #tpu.memory_space<vmem>>, vector<8x2xf32>
    tpu.vector_store %arg18[%c24_489, %c10_490], %429 {strides = array<i32>} : memref<40x96xf32, #tpu.memory_space<vmem>>, vector<8x2xf32>,
    %c0_491 = arith.constant 0 : index
    %c0_492 = arith.constant 0 : index
    %c4_493 = arith.constant 4 : index
    %431 = vector.load %arg16[%c0_491, %c0_492, %c4_493] : memref<6x8x20xbf16, #tpu.memory_space<vmem>>, vector<1x8x2xbf16>
    %432 = vector.shape_cast %431 : vector<1x8x2xbf16> to vector<8x2xbf16>
    %433 = arith.extf %432 : vector<8x2xbf16> to vector<8x2xf32>
    %c32_494 = arith.constant 32 : index
    %c0_495 = arith.constant 0 : index
    %434 = vector.load %arg18[%c32_494, %c0_495] : memref<40x96xf32, #tpu.memory_space<vmem>>, vector<8x2xf32>
    tpu.vector_store %arg18[%c32_494, %c0_495], %433 {strides = array<i32>} : memref<40x96xf32, #tpu.memory_space<vmem>>, vector<8x2xf32>,
    %c1_496 = arith.constant 1 : index
    %c0_497 = arith.constant 0 : index
    %c4_498 = arith.constant 4 : index
    %435 = vector.load %arg16[%c1_496, %c0_497, %c4_498] : memref<6x8x20xbf16, #tpu.memory_space<vmem>>, vector<1x8x2xbf16>
    %436 = vector.shape_cast %435 : vector<1x8x2xbf16> to vector<8x2xbf16>
    %437 = arith.extf %436 : vector<8x2xbf16> to vector<8x2xf32>
    %c32_499 = arith.constant 32 : index
    %c2_500 = arith.constant 2 : index
    %438 = vector.load %arg18[%c32_499, %c2_500] : memref<40x96xf32, #tpu.memory_space<vmem>>, vector<8x2xf32>
    tpu.vector_store %arg18[%c32_499, %c2_500], %437 {strides = array<i32>} : memref<40x96xf32, #tpu.memory_space<vmem>>, vector<8x2xf32>,
    %c2_501 = arith.constant 2 : index
    %c0_502 = arith.constant 0 : index
    %c4_503 = arith.constant 4 : index
    %439 = vector.load %arg16[%c2_501, %c0_502, %c4_503] : memref<6x8x20xbf16, #tpu.memory_space<vmem>>, vector<1x8x2xbf16>
    %440 = vector.shape_cast %439 : vector<1x8x2xbf16> to vector<8x2xbf16>
    %441 = arith.extf %440 : vector<8x2xbf16> to vector<8x2xf32>
    %c32_504 = arith.constant 32 : index
    %c4_505 = arith.constant 4 : index
    %442 = vector.load %arg18[%c32_504, %c4_505] : memref<40x96xf32, #tpu.memory_space<vmem>>, vector<8x2xf32>
    tpu.vector_store %arg18[%c32_504, %c4_505], %441 {strides = array<i32>} : memref<40x96xf32, #tpu.memory_space<vmem>>, vector<8x2xf32>,
    %c3_506 = arith.constant 3 : index
    %c0_507 = arith.constant 0 : index
    %c4_508 = arith.constant 4 : index
    %443 = vector.load %arg16[%c3_506, %c0_507, %c4_508] : memref<6x8x20xbf16, #tpu.memory_space<vmem>>, vector<1x8x2xbf16>
    %444 = vector.shape_cast %443 : vector<1x8x2xbf16> to vector<8x2xbf16>
    %445 = arith.extf %444 : vector<8x2xbf16> to vector<8x2xf32>
    %c32_509 = arith.constant 32 : index
    %c6_510 = arith.constant 6 : index
    %446 = vector.load %arg18[%c32_509, %c6_510] : memref<40x96xf32, #tpu.memory_space<vmem>>, vector<8x2xf32>
    tpu.vector_store %arg18[%c32_509, %c6_510], %445 {strides = array<i32>} : memref<40x96xf32, #tpu.memory_space<vmem>>, vector<8x2xf32>,
    %c4_511 = arith.constant 4 : index
    %c0_512 = arith.constant 0 : index
    %c4_513 = arith.constant 4 : index
    %447 = vector.load %arg16[%c4_511, %c0_512, %c4_513] : memref<6x8x20xbf16, #tpu.memory_space<vmem>>, vector<1x8x2xbf16>
    %448 = vector.shape_cast %447 : vector<1x8x2xbf16> to vector<8x2xbf16>
    %449 = arith.extf %448 : vector<8x2xbf16> to vector<8x2xf32>
    %c32_514 = arith.constant 32 : index
    %c8_515 = arith.constant 8 : index
    %450 = vector.load %arg18[%c32_514, %c8_515] : memref<40x96xf32, #tpu.memory_space<vmem>>, vector<8x2xf32>
    tpu.vector_store %arg18[%c32_514, %c8_515], %449 {strides = array<i32>} : memref<40x96xf32, #tpu.memory_space<vmem>>, vector<8x2xf32>,
    %c5_516 = arith.constant 5 : index
    %c0_517 = arith.constant 0 : index
    %c4_518 = arith.constant 4 : index
    %451 = vector.load %arg16[%c5_516, %c0_517, %c4_518] : memref<6x8x20xbf16, #tpu.memory_space<vmem>>, vector<1x8x2xbf16>
    %452 = vector.shape_cast %451 : vector<1x8x2xbf16> to vector<8x2xbf16>
    %453 = arith.extf %452 : vector<8x2xbf16> to vector<8x2xf32>
    %c32_519 = arith.constant 32 : index
    %c10_520 = arith.constant 10 : index
    %454 = vector.load %arg18[%c32_519, %c10_520] : memref<40x96xf32, #tpu.memory_space<vmem>>, vector<8x2xf32>
    tpu.vector_store %arg18[%c32_519, %c10_520], %453 {strides = array<i32>} : memref<40x96xf32, #tpu.memory_space<vmem>>, vector<8x2xf32>,
    %c0_521 = arith.constant 0 : index
    %c0_522 = arith.constant 0 : index
    %455 = vector.load %arg18[%c0_521, %c0_522] : memref<40x96xf32, #tpu.memory_space<vmem>>, vector<40x12xf32>
    %456 = arith.truncf %455 : vector<40x12xf32> to vector<40x12xbf16>
    %c0_523 = arith.constant 0 : index
    %c0_524 = arith.constant 0 : index
    %457 = vector.load %arg11[%c0_523, %c0_524] : memref<12x6xbf16, #tpu.memory_space<vmem>>, vector<12x6xbf16>
    %cst_525 = arith.constant dense<0.000000e+00> : vector<40x6xf32>
    %458 = tpu.matmul %456, %457, %cst_525 {dimension_numbers = #tpu.dot_dimension_numbers<[1], [0], [0], [1], [0, 0, 1, 1], [], []>} : vector<40x12xbf16>, vector<12x6xbf16>, vector<40x6xf32> -> vector<40x6xf32>
    %459 = arith.truncf %458 : vector<40x6xf32> to vector<40x6xbf16>
    %c0_526 = arith.constant 0 : index
    %c0_527 = arith.constant 0 : index
    %460 = vector.load %arg3[%c0_526, %c0_527] : memref<8x40xbf16, #tpu.memory_space<vmem>>, vector<8x40xbf16>
    %cst_528 = arith.constant dense<0.000000e+00> : vector<8x6xf32>
    %461 = tpu.matmul %460, %459, %cst_528 {dimension_numbers = #tpu.dot_dimension_numbers<[1], [0], [0], [1], [0, 0, 1, 1], [], []>} : vector<8x40xbf16>, vector<40x6xbf16>, vector<8x6xf32> -> vector<8x6xf32>
    %c0_529 = arith.constant 0 : index
    %c0_530 = arith.constant 0 : index
    %462 = vector.load %arg7[%c0_529, %c0_530] : memref<8x1xf32, #tpu.memory_space<vmem>>, vector<8x1xf32>
    %463 = vector.broadcast %462 : vector<8x1xf32> to vector<8x6xf32>
    %464 = arith.addf %461, %463 : vector<8x6xf32>
    %cst_531 = arith.constant 0.000000e+00 : f32
    %465 = vector.broadcast %cst_531 : f32 to vector<8x6xf32>
    %466 = arith.cmpf oge, %464, %465 : vector<8x6xf32>
    %cst_532 = arith.constant 1.000000e-01 : f32
    %467 = vector.broadcast %cst_532 : f32 to vector<8x6xf32>
    %468 = arith.mulf %467, %464 : vector<8x6xf32>
    %469 = arith.select %466, %464, %468 : vector<8x6xi1>, vector<8x6xf32>
    %c0_533 = arith.constant 0 : index
    %c0_534 = arith.constant 0 : index
    %470 = vector.load %arg14[%c0_533, %c0_534] : memref<8x6xf32, #tpu.memory_space<vmem>>, vector<8x6xf32>
    tpu.vector_store %arg14[%c0_533, %c0_534], %469 {strides = array<i32>} : memref<8x6xf32, #tpu.memory_space<vmem>>, vector<8x6xf32>,
    %471 = arith.truncf %469 : vector<8x6xf32> to vector<8x6xbf16>
    %472 = vector.extract_strided_slice %471 {offsets = [0, 0], sizes = [8, 1], strides = [1, 1]} : vector<8x6xbf16> to vector<8x1xbf16>
    %c0_535 = arith.constant 0 : index
    %c0_536 = arith.constant 0 : index
    %c1_537 = arith.constant 1 : index
    %473 = vector.load %arg17[%c0_535, %c0_536, %c1_537] : memref<6x8x20xbf16, #tpu.memory_space<vmem>>, vector<1x8x1xbf16>
    %474 = vector.shape_cast %473 : vector<1x8x1xbf16> to vector<8x1xbf16>
    %475 = vector.shape_cast %472 : vector<8x1xbf16> to vector<1x8x1xbf16>
    tpu.vector_store %arg17[%c0_535, %c0_536, %c1_537], %475 {strides = array<i32>} : memref<6x8x20xbf16, #tpu.memory_space<vmem>>, vector<1x8x1xbf16>,
    %476 = vector.extract_strided_slice %471 {offsets = [0, 1], sizes = [8, 1], strides = [1, 1]} : vector<8x6xbf16> to vector<8x1xbf16>
    %c1_538 = arith.constant 1 : index
    %c0_539 = arith.constant 0 : index
    %c1_540 = arith.constant 1 : index
    %477 = vector.load %arg17[%c1_538, %c0_539, %c1_540] : memref<6x8x20xbf16, #tpu.memory_space<vmem>>, vector<1x8x1xbf16>
    %478 = vector.shape_cast %477 : vector<1x8x1xbf16> to vector<8x1xbf16>
    %479 = vector.shape_cast %476 : vector<8x1xbf16> to vector<1x8x1xbf16>
    tpu.vector_store %arg17[%c1_538, %c0_539, %c1_540], %479 {strides = array<i32>} : memref<6x8x20xbf16, #tpu.memory_space<vmem>>, vector<1x8x1xbf16>,
    %480 = vector.extract_strided_slice %471 {offsets = [0, 2], sizes = [8, 1], strides = [1, 1]} : vector<8x6xbf16> to vector<8x1xbf16>
    %c2_541 = arith.constant 2 : index
    %c0_542 = arith.constant 0 : index
    %c1_543 = arith.constant 1 : index
    %481 = vector.load %arg17[%c2_541, %c0_542, %c1_543] : memref<6x8x20xbf16, #tpu.memory_space<vmem>>, vector<1x8x1xbf16>
    %482 = vector.shape_cast %481 : vector<1x8x1xbf16> to vector<8x1xbf16>
    %483 = vector.shape_cast %480 : vector<8x1xbf16> to vector<1x8x1xbf16>
    tpu.vector_store %arg17[%c2_541, %c0_542, %c1_543], %483 {strides = array<i32>} : memref<6x8x20xbf16, #tpu.memory_space<vmem>>, vector<1x8x1xbf16>,
    %484 = vector.extract_strided_slice %471 {offsets = [0, 3], sizes = [8, 1], strides = [1, 1]} : vector<8x6xbf16> to vector<8x1xbf16>
    %c3_544 = arith.constant 3 : index
    %c0_545 = arith.constant 0 : index
    %c1_546 = arith.constant 1 : index
    %485 = vector.load %arg17[%c3_544, %c0_545, %c1_546] : memref<6x8x20xbf16, #tpu.memory_space<vmem>>, vector<1x8x1xbf16>
    %486 = vector.shape_cast %485 : vector<1x8x1xbf16> to vector<8x1xbf16>
    %487 = vector.shape_cast %484 : vector<8x1xbf16> to vector<1x8x1xbf16>
    tpu.vector_store %arg17[%c3_544, %c0_545, %c1_546], %487 {strides = array<i32>} : memref<6x8x20xbf16, #tpu.memory_space<vmem>>, vector<1x8x1xbf16>,
    %488 = vector.extract_strided_slice %471 {offsets = [0, 4], sizes = [8, 1], strides = [1, 1]} : vector<8x6xbf16> to vector<8x1xbf16>
    %c4_547 = arith.constant 4 : index
    %c0_548 = arith.constant 0 : index
    %c1_549 = arith.constant 1 : index
    %489 = vector.load %arg17[%c4_547, %c0_548, %c1_549] : memref<6x8x20xbf16, #tpu.memory_space<vmem>>, vector<1x8x1xbf16>
    %490 = vector.shape_cast %489 : vector<1x8x1xbf16> to vector<8x1xbf16>
    %491 = vector.shape_cast %488 : vector<8x1xbf16> to vector<1x8x1xbf16>
    tpu.vector_store %arg17[%c4_547, %c0_548, %c1_549], %491 {strides = array<i32>} : memref<6x8x20xbf16, #tpu.memory_space<vmem>>, vector<1x8x1xbf16>,
    %492 = vector.extract_strided_slice %471 {offsets = [0, 5], sizes = [8, 1], strides = [1, 1]} : vector<8x6xbf16> to vector<8x1xbf16>
    %c5_550 = arith.constant 5 : index
    %c0_551 = arith.constant 0 : index
    %c1_552 = arith.constant 1 : index
    %493 = vector.load %arg17[%c5_550, %c0_551, %c1_552] : memref<6x8x20xbf16, #tpu.memory_space<vmem>>, vector<1x8x1xbf16>
    %494 = vector.shape_cast %493 : vector<1x8x1xbf16> to vector<8x1xbf16>
    %495 = vector.shape_cast %492 : vector<8x1xbf16> to vector<1x8x1xbf16>
    tpu.vector_store %arg17[%c5_550, %c0_551, %c1_552], %495 {strides = array<i32>} : memref<6x8x20xbf16, #tpu.memory_space<vmem>>, vector<1x8x1xbf16>,
    %cst_553 = arith.constant 0.000000e+00 : bf16
    %496 = vector.broadcast %cst_553 : bf16 to vector<6x8x1xbf16>
    %c0_554 = arith.constant 0 : index
    %c0_555 = arith.constant 0 : index
    %c0_556 = arith.constant 0 : index
    %497 = vector.load %arg17[%c0_554, %c0_555, %c0_556] : memref<6x8x20xbf16, #tpu.memory_space<vmem>>, vector<6x8x1xbf16>
    tpu.vector_store %arg17[%c0_554, %c0_555, %c0_556], %496 {strides = array<i32>} : memref<6x8x20xbf16, #tpu.memory_space<vmem>>, vector<6x8x1xbf16>,
    %cst_557 = arith.constant 0.000000e+00 : bf16
    %498 = vector.broadcast %cst_557 : bf16 to vector<6x8x1xbf16>
    %c0_558 = arith.constant 0 : index
    %c0_559 = arith.constant 0 : index
    %c2_560 = arith.constant 2 : index
    %499 = vector.load %arg17[%c0_558, %c0_559, %c2_560] : memref<6x8x20xbf16, #tpu.memory_space<vmem>>, vector<6x8x1xbf16>
    tpu.vector_store %arg17[%c0_558, %c0_559, %c2_560], %498 {strides = array<i32>} : memref<6x8x20xbf16, #tpu.memory_space<vmem>>, vector<6x8x1xbf16>,
    %c0_561 = arith.constant 0 : index
    %c0_562 = arith.constant 0 : index
    %c0_563 = arith.constant 0 : index
    %500 = vector.load %arg17[%c0_561, %c0_562, %c0_563] : memref<6x8x20xbf16, #tpu.memory_space<vmem>>, vector<1x8x1xbf16>
    %501 = vector.shape_cast %500 : vector<1x8x1xbf16> to vector<8x1xbf16>
    %502 = arith.extf %501 : vector<8x1xbf16> to vector<8x1xf32>
    %c0_564 = arith.constant 0 : index
    %c0_565 = arith.constant 0 : index
    %503 = vector.load %arg18[%c0_564, %c0_565] : memref<40x96xf32, #tpu.memory_space<vmem>>, vector<8x1xf32>
    tpu.vector_store %arg18[%c0_564, %c0_565], %502 {strides = array<i32>} : memref<40x96xf32, #tpu.memory_space<vmem>>, vector<8x1xf32>,
    %c1_566 = arith.constant 1 : index
    %c0_567 = arith.constant 0 : index
    %c0_568 = arith.constant 0 : index
    %504 = vector.load %arg17[%c1_566, %c0_567, %c0_568] : memref<6x8x20xbf16, #tpu.memory_space<vmem>>, vector<1x8x1xbf16>
    %505 = vector.shape_cast %504 : vector<1x8x1xbf16> to vector<8x1xbf16>
    %506 = arith.extf %505 : vector<8x1xbf16> to vector<8x1xf32>
    %c0_569 = arith.constant 0 : index
    %c1_570 = arith.constant 1 : index
    %507 = vector.load %arg18[%c0_569, %c1_570] : memref<40x96xf32, #tpu.memory_space<vmem>>, vector<8x1xf32>
    tpu.vector_store %arg18[%c0_569, %c1_570], %506 {strides = array<i32>} : memref<40x96xf32, #tpu.memory_space<vmem>>, vector<8x1xf32>,
    %c2_571 = arith.constant 2 : index
    %c0_572 = arith.constant 0 : index
    %c0_573 = arith.constant 0 : index
    %508 = vector.load %arg17[%c2_571, %c0_572, %c0_573] : memref<6x8x20xbf16, #tpu.memory_space<vmem>>, vector<1x8x1xbf16>
    %509 = vector.shape_cast %508 : vector<1x8x1xbf16> to vector<8x1xbf16>
    %510 = arith.extf %509 : vector<8x1xbf16> to vector<8x1xf32>
    %c0_574 = arith.constant 0 : index
    %c2_575 = arith.constant 2 : index
    %511 = vector.load %arg18[%c0_574, %c2_575] : memref<40x96xf32, #tpu.memory_space<vmem>>, vector<8x1xf32>
    tpu.vector_store %arg18[%c0_574, %c2_575], %510 {strides = array<i32>} : memref<40x96xf32, #tpu.memory_space<vmem>>, vector<8x1xf32>,
    %c3_576 = arith.constant 3 : index
    %c0_577 = arith.constant 0 : index
    %c0_578 = arith.constant 0 : index
    %512 = vector.load %arg17[%c3_576, %c0_577, %c0_578] : memref<6x8x20xbf16, #tpu.memory_space<vmem>>, vector<1x8x1xbf16>
    %513 = vector.shape_cast %512 : vector<1x8x1xbf16> to vector<8x1xbf16>
    %514 = arith.extf %513 : vector<8x1xbf16> to vector<8x1xf32>
    %c0_579 = arith.constant 0 : index
    %c3_580 = arith.constant 3 : index
    %515 = vector.load %arg18[%c0_579, %c3_580] : memref<40x96xf32, #tpu.memory_space<vmem>>, vector<8x1xf32>
    tpu.vector_store %arg18[%c0_579, %c3_580], %514 {strides = array<i32>} : memref<40x96xf32, #tpu.memory_space<vmem>>, vector<8x1xf32>,
    %c4_581 = arith.constant 4 : index
    %c0_582 = arith.constant 0 : index
    %c0_583 = arith.constant 0 : index
    %516 = vector.load %arg17[%c4_581, %c0_582, %c0_583] : memref<6x8x20xbf16, #tpu.memory_space<vmem>>, vector<1x8x1xbf16>
    %517 = vector.shape_cast %516 : vector<1x8x1xbf16> to vector<8x1xbf16>
    %518 = arith.extf %517 : vector<8x1xbf16> to vector<8x1xf32>
    %c0_584 = arith.constant 0 : index
    %c4_585 = arith.constant 4 : index
    %519 = vector.load %arg18[%c0_584, %c4_585] : memref<40x96xf32, #tpu.memory_space<vmem>>, vector<8x1xf32>
    tpu.vector_store %arg18[%c0_584, %c4_585], %518 {strides = array<i32>} : memref<40x96xf32, #tpu.memory_space<vmem>>, vector<8x1xf32>,
    %c5_586 = arith.constant 5 : index
    %c0_587 = arith.constant 0 : index
    %c0_588 = arith.constant 0 : index
    %520 = vector.load %arg17[%c5_586, %c0_587, %c0_588] : memref<6x8x20xbf16, #tpu.memory_space<vmem>>, vector<1x8x1xbf16>
    %521 = vector.shape_cast %520 : vector<1x8x1xbf16> to vector<8x1xbf16>
    %522 = arith.extf %521 : vector<8x1xbf16> to vector<8x1xf32>
    %c0_589 = arith.constant 0 : index
    %c5_590 = arith.constant 5 : index
    %523 = vector.load %arg18[%c0_589, %c5_590] : memref<40x96xf32, #tpu.memory_space<vmem>>, vector<8x1xf32>
    tpu.vector_store %arg18[%c0_589, %c5_590], %522 {strides = array<i32>} : memref<40x96xf32, #tpu.memory_space<vmem>>, vector<8x1xf32>,
    %c0_591 = arith.constant 0 : index
    %c0_592 = arith.constant 0 : index
    %c1_593 = arith.constant 1 : index
    %524 = vector.load %arg17[%c0_591, %c0_592, %c1_593] : memref<6x8x20xbf16, #tpu.memory_space<vmem>>, vector<1x8x1xbf16>
    %525 = vector.shape_cast %524 : vector<1x8x1xbf16> to vector<8x1xbf16>
    %526 = arith.extf %525 : vector<8x1xbf16> to vector<8x1xf32>
    %c8_594 = arith.constant 8 : index
    %c0_595 = arith.constant 0 : index
    %527 = vector.load %arg18[%c8_594, %c0_595] : memref<40x96xf32, #tpu.memory_space<vmem>>, vector<8x1xf32>
    tpu.vector_store %arg18[%c8_594, %c0_595], %526 {strides = array<i32>} : memref<40x96xf32, #tpu.memory_space<vmem>>, vector<8x1xf32>,
    %c1_596 = arith.constant 1 : index
    %c0_597 = arith.constant 0 : index
    %c1_598 = arith.constant 1 : index
    %528 = vector.load %arg17[%c1_596, %c0_597, %c1_598] : memref<6x8x20xbf16, #tpu.memory_space<vmem>>, vector<1x8x1xbf16>
    %529 = vector.shape_cast %528 : vector<1x8x1xbf16> to vector<8x1xbf16>
    %530 = arith.extf %529 : vector<8x1xbf16> to vector<8x1xf32>
    %c8_599 = arith.constant 8 : index
    %c1_600 = arith.constant 1 : index
    %531 = vector.load %arg18[%c8_599, %c1_600] : memref<40x96xf32, #tpu.memory_space<vmem>>, vector<8x1xf32>
    tpu.vector_store %arg18[%c8_599, %c1_600], %530 {strides = array<i32>} : memref<40x96xf32, #tpu.memory_space<vmem>>, vector<8x1xf32>,
    %c2_601 = arith.constant 2 : index
    %c0_602 = arith.constant 0 : index
    %c1_603 = arith.constant 1 : index
    %532 = vector.load %arg17[%c2_601, %c0_602, %c1_603] : memref<6x8x20xbf16, #tpu.memory_space<vmem>>, vector<1x8x1xbf16>
    %533 = vector.shape_cast %532 : vector<1x8x1xbf16> to vector<8x1xbf16>
    %534 = arith.extf %533 : vector<8x1xbf16> to vector<8x1xf32>
    %c8_604 = arith.constant 8 : index
    %c2_605 = arith.constant 2 : index
    %535 = vector.load %arg18[%c8_604, %c2_605] : memref<40x96xf32, #tpu.memory_space<vmem>>, vector<8x1xf32>
    tpu.vector_store %arg18[%c8_604, %c2_605], %534 {strides = array<i32>} : memref<40x96xf32, #tpu.memory_space<vmem>>, vector<8x1xf32>,
    %c3_606 = arith.constant 3 : index
    %c0_607 = arith.constant 0 : index
    %c1_608 = arith.constant 1 : index
    %536 = vector.load %arg17[%c3_606, %c0_607, %c1_608] : memref<6x8x20xbf16, #tpu.memory_space<vmem>>, vector<1x8x1xbf16>
    %537 = vector.shape_cast %536 : vector<1x8x1xbf16> to vector<8x1xbf16>
    %538 = arith.extf %537 : vector<8x1xbf16> to vector<8x1xf32>
    %c8_609 = arith.constant 8 : index
    %c3_610 = arith.constant 3 : index
    %539 = vector.load %arg18[%c8_609, %c3_610] : memref<40x96xf32, #tpu.memory_space<vmem>>, vector<8x1xf32>
    tpu.vector_store %arg18[%c8_609, %c3_610], %538 {strides = array<i32>} : memref<40x96xf32, #tpu.memory_space<vmem>>, vector<8x1xf32>,
    %c4_611 = arith.constant 4 : index
    %c0_612 = arith.constant 0 : index
    %c1_613 = arith.constant 1 : index
    %540 = vector.load %arg17[%c4_611, %c0_612, %c1_613] : memref<6x8x20xbf16, #tpu.memory_space<vmem>>, vector<1x8x1xbf16>
    %541 = vector.shape_cast %540 : vector<1x8x1xbf16> to vector<8x1xbf16>
    %542 = arith.extf %541 : vector<8x1xbf16> to vector<8x1xf32>
    %c8_614 = arith.constant 8 : index
    %c4_615 = arith.constant 4 : index
    %543 = vector.load %arg18[%c8_614, %c4_615] : memref<40x96xf32, #tpu.memory_space<vmem>>, vector<8x1xf32>
    tpu.vector_store %arg18[%c8_614, %c4_615], %542 {strides = array<i32>} : memref<40x96xf32, #tpu.memory_space<vmem>>, vector<8x1xf32>,
    %c5_616 = arith.constant 5 : index
    %c0_617 = arith.constant 0 : index
    %c1_618 = arith.constant 1 : index
    %544 = vector.load %arg17[%c5_616, %c0_617, %c1_618] : memref<6x8x20xbf16, #tpu.memory_space<vmem>>, vector<1x8x1xbf16>
    %545 = vector.shape_cast %544 : vector<1x8x1xbf16> to vector<8x1xbf16>
    %546 = arith.extf %545 : vector<8x1xbf16> to vector<8x1xf32>
    %c8_619 = arith.constant 8 : index
    %c5_620 = arith.constant 5 : index
    %547 = vector.load %arg18[%c8_619, %c5_620] : memref<40x96xf32, #tpu.memory_space<vmem>>, vector<8x1xf32>
    tpu.vector_store %arg18[%c8_619, %c5_620], %546 {strides = array<i32>} : memref<40x96xf32, #tpu.memory_space<vmem>>, vector<8x1xf32>,
    %c0_621 = arith.constant 0 : index
    %c0_622 = arith.constant 0 : index
    %c2_623 = arith.constant 2 : index
    %548 = vector.load %arg17[%c0_621, %c0_622, %c2_623] : memref<6x8x20xbf16, #tpu.memory_space<vmem>>, vector<1x8x1xbf16>
    %549 = vector.shape_cast %548 : vector<1x8x1xbf16> to vector<8x1xbf16>
    %550 = arith.extf %549 : vector<8x1xbf16> to vector<8x1xf32>
    %c16_624 = arith.constant 16 : index
    %c0_625 = arith.constant 0 : index
    %551 = vector.load %arg18[%c16_624, %c0_625] : memref<40x96xf32, #tpu.memory_space<vmem>>, vector<8x1xf32>
    tpu.vector_store %arg18[%c16_624, %c0_625], %550 {strides = array<i32>} : memref<40x96xf32, #tpu.memory_space<vmem>>, vector<8x1xf32>,
    %c1_626 = arith.constant 1 : index
    %c0_627 = arith.constant 0 : index
    %c2_628 = arith.constant 2 : index
    %552 = vector.load %arg17[%c1_626, %c0_627, %c2_628] : memref<6x8x20xbf16, #tpu.memory_space<vmem>>, vector<1x8x1xbf16>
    %553 = vector.shape_cast %552 : vector<1x8x1xbf16> to vector<8x1xbf16>
    %554 = arith.extf %553 : vector<8x1xbf16> to vector<8x1xf32>
    %c16_629 = arith.constant 16 : index
    %c1_630 = arith.constant 1 : index
    %555 = vector.load %arg18[%c16_629, %c1_630] : memref<40x96xf32, #tpu.memory_space<vmem>>, vector<8x1xf32>
    tpu.vector_store %arg18[%c16_629, %c1_630], %554 {strides = array<i32>} : memref<40x96xf32, #tpu.memory_space<vmem>>, vector<8x1xf32>,
    %c2_631 = arith.constant 2 : index
    %c0_632 = arith.constant 0 : index
    %c2_633 = arith.constant 2 : index
    %556 = vector.load %arg17[%c2_631, %c0_632, %c2_633] : memref<6x8x20xbf16, #tpu.memory_space<vmem>>, vector<1x8x1xbf16>
    %557 = vector.shape_cast %556 : vector<1x8x1xbf16> to vector<8x1xbf16>
    %558 = arith.extf %557 : vector<8x1xbf16> to vector<8x1xf32>
    %c16_634 = arith.constant 16 : index
    %c2_635 = arith.constant 2 : index
    %559 = vector.load %arg18[%c16_634, %c2_635] : memref<40x96xf32, #tpu.memory_space<vmem>>, vector<8x1xf32>
    tpu.vector_store %arg18[%c16_634, %c2_635], %558 {strides = array<i32>} : memref<40x96xf32, #tpu.memory_space<vmem>>, vector<8x1xf32>,
    %c3_636 = arith.constant 3 : index
    %c0_637 = arith.constant 0 : index
    %c2_638 = arith.constant 2 : index
    %560 = vector.load %arg17[%c3_636, %c0_637, %c2_638] : memref<6x8x20xbf16, #tpu.memory_space<vmem>>, vector<1x8x1xbf16>
    %561 = vector.shape_cast %560 : vector<1x8x1xbf16> to vector<8x1xbf16>
    %562 = arith.extf %561 : vector<8x1xbf16> to vector<8x1xf32>
    %c16_639 = arith.constant 16 : index
    %c3_640 = arith.constant 3 : index
    %563 = vector.load %arg18[%c16_639, %c3_640] : memref<40x96xf32, #tpu.memory_space<vmem>>, vector<8x1xf32>
    tpu.vector_store %arg18[%c16_639, %c3_640], %562 {strides = array<i32>} : memref<40x96xf32, #tpu.memory_space<vmem>>, vector<8x1xf32>,
    %c4_641 = arith.constant 4 : index
    %c0_642 = arith.constant 0 : index
    %c2_643 = arith.constant 2 : index
    %564 = vector.load %arg17[%c4_641, %c0_642, %c2_643] : memref<6x8x20xbf16, #tpu.memory_space<vmem>>, vector<1x8x1xbf16>
    %565 = vector.shape_cast %564 : vector<1x8x1xbf16> to vector<8x1xbf16>
    %566 = arith.extf %565 : vector<8x1xbf16> to vector<8x1xf32>
    %c16_644 = arith.constant 16 : index
    %c4_645 = arith.constant 4 : index
    %567 = vector.load %arg18[%c16_644, %c4_645] : memref<40x96xf32, #tpu.memory_space<vmem>>, vector<8x1xf32>
    tpu.vector_store %arg18[%c16_644, %c4_645], %566 {strides = array<i32>} : memref<40x96xf32, #tpu.memory_space<vmem>>, vector<8x1xf32>,
    %c5_646 = arith.constant 5 : index
    %c0_647 = arith.constant 0 : index
    %c2_648 = arith.constant 2 : index
    %568 = vector.load %arg17[%c5_646, %c0_647, %c2_648] : memref<6x8x20xbf16, #tpu.memory_space<vmem>>, vector<1x8x1xbf16>
    %569 = vector.shape_cast %568 : vector<1x8x1xbf16> to vector<8x1xbf16>
    %570 = arith.extf %569 : vector<8x1xbf16> to vector<8x1xf32>
    %c16_649 = arith.constant 16 : index
    %c5_650 = arith.constant 5 : index
    %571 = vector.load %arg18[%c16_649, %c5_650] : memref<40x96xf32, #tpu.memory_space<vmem>>, vector<8x1xf32>
    tpu.vector_store %arg18[%c16_649, %c5_650], %570 {strides = array<i32>} : memref<40x96xf32, #tpu.memory_space<vmem>>, vector<8x1xf32>,
    %c0_651 = arith.constant 0 : index
    %c0_652 = arith.constant 0 : index
    %572 = vector.load %arg18[%c0_651, %c0_652] : memref<40x96xf32, #tpu.memory_space<vmem>>, vector<24x6xf32>
    %573 = arith.truncf %572 : vector<24x6xf32> to vector<24x6xbf16>
    %c0_653 = arith.constant 0 : index
    %c0_654 = arith.constant 0 : index
    %574 = vector.load %arg4[%c0_653, %c0_654] : memref<8x24xbf16, #tpu.memory_space<vmem>>, vector<8x24xbf16>
    %cst_655 = arith.constant dense<0.000000e+00> : vector<8x6xf32>
    %575 = tpu.matmul %574, %573, %cst_655 {dimension_numbers = #tpu.dot_dimension_numbers<[1], [0], [0], [1], [0, 0, 1, 1], [], []>} : vector<8x24xbf16>, vector<24x6xbf16>, vector<8x6xf32> -> vector<8x6xf32>
    %c0_656 = arith.constant 0 : index
    %c0_657 = arith.constant 0 : index
    %576 = vector.load %arg8[%c0_656, %c0_657] : memref<8x1xf32, #tpu.memory_space<vmem>>, vector<8x1xf32>
    %577 = vector.broadcast %576 : vector<8x1xf32> to vector<8x6xf32>
    %578 = arith.addf %575, %577 : vector<8x6xf32>
    %579 = vector.extract_strided_slice %578 {offsets = [0, 0], sizes = [1, 6], strides = [1, 1]} : vector<8x6xf32> to vector<1x6xf32>
    %c0_658 = arith.constant 0 : index
    %c0_659 = arith.constant 0 : index
    %580 = vector.load %arg15[%c0_658, %c0_659] : memref<1x6xf32, #tpu.memory_space<vmem>>, vector<1x6xf32>
    tpu.vector_store %arg15[%c0_658, %c0_659], %579 {strides = array<i32>} : memref<1x6xf32, #tpu.memory_space<vmem>>, vector<1x6xf32>,
    return
  }
}

module attributes {stable_mosaic.version = 11 : i64} {
  func.func @_fused_branch_kernel(%arg0: memref<2x1x25xbf16, #tpu.memory_space<vmem>>, %arg1: memref<8x40xbf16, #tpu.memory_space<vmem>>, %arg2: memref<8x40xbf16, #tpu.memory_space<vmem>>, %arg3: memref<8x40xbf16, #tpu.memory_space<vmem>>, %arg4: memref<8x24xbf16, #tpu.memory_space<vmem>>, %arg5: memref<8x1xf32, #tpu.memory_space<vmem>>, %arg6: memref<8x1xf32, #tpu.memory_space<vmem>>, %arg7: memref<8x1xf32, #tpu.memory_space<vmem>>, %arg8: memref<8x1xf32, #tpu.memory_space<vmem>>, %arg9: memref<50x26xbf16, #tpu.memory_space<vmem>>, %arg10: memref<26x14xbf16, #tpu.memory_space<vmem>>, %arg11: memref<4x50xf32, #tpu.memory_space<vmem>>, %arg12: memref<8x26xf32, #tpu.memory_space<vmem>>, %arg13: memref<8x14xf32, #tpu.memory_space<vmem>>, %arg14: memref<1x14xf32, #tpu.memory_space<vmem>>, %arg15: memref<2x8x29xbf16, #tpu.memory_space<vmem>>, %arg16: memref<2x8x29xbf16, #tpu.memory_space<vmem>>, %arg17: memref<40x50xf32, #tpu.memory_space<vmem>>) attributes {dimension_semantics = [], scalar_prefetch = 0 : i64, scratch_operands = 3 : i64, tpu.core_type = #tpu.core_type<tc>} {
    %cst = arith.constant 0.000000e+00 : bf16
    %0 = vector.broadcast %cst : bf16 to vector<2x8x29xbf16>
    %c0 = arith.constant 0 : index
    %c0_0 = arith.constant 0 : index
    %c0_1 = arith.constant 0 : index
    %1 = vector.load %arg15[%c0, %c0_0, %c0_1] : memref<2x8x29xbf16, #tpu.memory_space<vmem>>, vector<2x8x29xbf16>
    tpu.vector_store %arg15[%c0, %c0_0, %c0_1], %0 {strides = array<i32>} : memref<2x8x29xbf16, #tpu.memory_space<vmem>>, vector<2x8x29xbf16>,
    %c0_2 = arith.constant 0 : index
    %c0_3 = arith.constant 0 : index
    %c0_4 = arith.constant 0 : index
    %2 = vector.load %arg0[%c0_2, %c0_3, %c0_4] : memref<2x1x25xbf16, #tpu.memory_space<vmem>>, vector<2x1x25xbf16>
    %c0_5 = arith.constant 0 : index
    %c0_6 = arith.constant 0 : index
    %c2 = arith.constant 2 : index
    %3 = vector.load %arg15[%c0_5, %c0_6, %c2] : memref<2x8x29xbf16, #tpu.memory_space<vmem>>, vector<2x1x25xbf16>
    tpu.vector_store %arg15[%c0_5, %c0_6, %c2], %2 {strides = array<i32>} : memref<2x8x29xbf16, #tpu.memory_space<vmem>>, vector<2x1x25xbf16>,
    %c0_7 = arith.constant 0 : index
    %c0_8 = arith.constant 0 : index
    %c0_9 = arith.constant 0 : index
    %4 = vector.load %arg15[%c0_7, %c0_8, %c0_9] : memref<2x8x29xbf16, #tpu.memory_space<vmem>>, vector<1x8x25xbf16>
    %5 = vector.shape_cast %4 : vector<1x8x25xbf16> to vector<8x25xbf16>
    %6 = arith.extf %5 : vector<8x25xbf16> to vector<8x25xf32>
    %c0_10 = arith.constant 0 : index
    %c0_11 = arith.constant 0 : index
    %7 = vector.load %arg17[%c0_10, %c0_11] : memref<40x50xf32, #tpu.memory_space<vmem>>, vector<8x25xf32>
    tpu.vector_store %arg17[%c0_10, %c0_11], %6 {strides = array<i32>} : memref<40x50xf32, #tpu.memory_space<vmem>>, vector<8x25xf32>,
    %c1 = arith.constant 1 : index
    %c0_12 = arith.constant 0 : index
    %c0_13 = arith.constant 0 : index
    %8 = vector.load %arg15[%c1, %c0_12, %c0_13] : memref<2x8x29xbf16, #tpu.memory_space<vmem>>, vector<1x8x25xbf16>
    %9 = vector.shape_cast %8 : vector<1x8x25xbf16> to vector<8x25xbf16>
    %10 = arith.extf %9 : vector<8x25xbf16> to vector<8x25xf32>
    %c0_14 = arith.constant 0 : index
    %c25 = arith.constant 25 : index
    %11 = vector.load %arg17[%c0_14, %c25] : memref<40x50xf32, #tpu.memory_space<vmem>>, vector<8x25xf32>
    tpu.vector_store %arg17[%c0_14, %c25], %10 {strides = array<i32>} : memref<40x50xf32, #tpu.memory_space<vmem>>, vector<8x25xf32>,
    %c0_15 = arith.constant 0 : index
    %c0_16 = arith.constant 0 : index
    %c1_17 = arith.constant 1 : index
    %12 = vector.load %arg15[%c0_15, %c0_16, %c1_17] : memref<2x8x29xbf16, #tpu.memory_space<vmem>>, vector<1x8x25xbf16>
    %13 = vector.shape_cast %12 : vector<1x8x25xbf16> to vector<8x25xbf16>
    %14 = arith.extf %13 : vector<8x25xbf16> to vector<8x25xf32>
    %c8 = arith.constant 8 : index
    %c0_18 = arith.constant 0 : index
    %15 = vector.load %arg17[%c8, %c0_18] : memref<40x50xf32, #tpu.memory_space<vmem>>, vector<8x25xf32>
    tpu.vector_store %arg17[%c8, %c0_18], %14 {strides = array<i32>} : memref<40x50xf32, #tpu.memory_space<vmem>>, vector<8x25xf32>,
    %c1_19 = arith.constant 1 : index
    %c0_20 = arith.constant 0 : index
    %c1_21 = arith.constant 1 : index
    %16 = vector.load %arg15[%c1_19, %c0_20, %c1_21] : memref<2x8x29xbf16, #tpu.memory_space<vmem>>, vector<1x8x25xbf16>
    %17 = vector.shape_cast %16 : vector<1x8x25xbf16> to vector<8x25xbf16>
    %18 = arith.extf %17 : vector<8x25xbf16> to vector<8x25xf32>
    %c8_22 = arith.constant 8 : index
    %c25_23 = arith.constant 25 : index
    %19 = vector.load %arg17[%c8_22, %c25_23] : memref<40x50xf32, #tpu.memory_space<vmem>>, vector<8x25xf32>
    tpu.vector_store %arg17[%c8_22, %c25_23], %18 {strides = array<i32>} : memref<40x50xf32, #tpu.memory_space<vmem>>, vector<8x25xf32>,
    %c0_24 = arith.constant 0 : index
    %c0_25 = arith.constant 0 : index
    %c2_26 = arith.constant 2 : index
    %20 = vector.load %arg15[%c0_24, %c0_25, %c2_26] : memref<2x8x29xbf16, #tpu.memory_space<vmem>>, vector<1x8x25xbf16>
    %21 = vector.shape_cast %20 : vector<1x8x25xbf16> to vector<8x25xbf16>
    %22 = arith.extf %21 : vector<8x25xbf16> to vector<8x25xf32>
    %c16 = arith.constant 16 : index
    %c0_27 = arith.constant 0 : index
    %23 = vector.load %arg17[%c16, %c0_27] : memref<40x50xf32, #tpu.memory_space<vmem>>, vector<8x25xf32>
    tpu.vector_store %arg17[%c16, %c0_27], %22 {strides = array<i32>} : memref<40x50xf32, #tpu.memory_space<vmem>>, vector<8x25xf32>,
    %c1_28 = arith.constant 1 : index
    %c0_29 = arith.constant 0 : index
    %c2_30 = arith.constant 2 : index
    %24 = vector.load %arg15[%c1_28, %c0_29, %c2_30] : memref<2x8x29xbf16, #tpu.memory_space<vmem>>, vector<1x8x25xbf16>
    %25 = vector.shape_cast %24 : vector<1x8x25xbf16> to vector<8x25xbf16>
    %26 = arith.extf %25 : vector<8x25xbf16> to vector<8x25xf32>
    %c16_31 = arith.constant 16 : index
    %c25_32 = arith.constant 25 : index
    %27 = vector.load %arg17[%c16_31, %c25_32] : memref<40x50xf32, #tpu.memory_space<vmem>>, vector<8x25xf32>
    tpu.vector_store %arg17[%c16_31, %c25_32], %26 {strides = array<i32>} : memref<40x50xf32, #tpu.memory_space<vmem>>, vector<8x25xf32>,
    %c0_33 = arith.constant 0 : index
    %c0_34 = arith.constant 0 : index
    %c3 = arith.constant 3 : index
    %28 = vector.load %arg15[%c0_33, %c0_34, %c3] : memref<2x8x29xbf16, #tpu.memory_space<vmem>>, vector<1x8x25xbf16>
    %29 = vector.shape_cast %28 : vector<1x8x25xbf16> to vector<8x25xbf16>
    %30 = arith.extf %29 : vector<8x25xbf16> to vector<8x25xf32>
    %c24 = arith.constant 24 : index
    %c0_35 = arith.constant 0 : index
    %31 = vector.load %arg17[%c24, %c0_35] : memref<40x50xf32, #tpu.memory_space<vmem>>, vector<8x25xf32>
    tpu.vector_store %arg17[%c24, %c0_35], %30 {strides = array<i32>} : memref<40x50xf32, #tpu.memory_space<vmem>>, vector<8x25xf32>,
    %c1_36 = arith.constant 1 : index
    %c0_37 = arith.constant 0 : index
    %c3_38 = arith.constant 3 : index
    %32 = vector.load %arg15[%c1_36, %c0_37, %c3_38] : memref<2x8x29xbf16, #tpu.memory_space<vmem>>, vector<1x8x25xbf16>
    %33 = vector.shape_cast %32 : vector<1x8x25xbf16> to vector<8x25xbf16>
    %34 = arith.extf %33 : vector<8x25xbf16> to vector<8x25xf32>
    %c24_39 = arith.constant 24 : index
    %c25_40 = arith.constant 25 : index
    %35 = vector.load %arg17[%c24_39, %c25_40] : memref<40x50xf32, #tpu.memory_space<vmem>>, vector<8x25xf32>
    tpu.vector_store %arg17[%c24_39, %c25_40], %34 {strides = array<i32>} : memref<40x50xf32, #tpu.memory_space<vmem>>, vector<8x25xf32>,
    %c0_41 = arith.constant 0 : index
    %c0_42 = arith.constant 0 : index
    %c4 = arith.constant 4 : index
    %36 = vector.load %arg15[%c0_41, %c0_42, %c4] : memref<2x8x29xbf16, #tpu.memory_space<vmem>>, vector<1x8x25xbf16>
    %37 = vector.shape_cast %36 : vector<1x8x25xbf16> to vector<8x25xbf16>
    %38 = arith.extf %37 : vector<8x25xbf16> to vector<8x25xf32>
    %c32 = arith.constant 32 : index
    %c0_43 = arith.constant 0 : index
    %39 = vector.load %arg17[%c32, %c0_43] : memref<40x50xf32, #tpu.memory_space<vmem>>, vector<8x25xf32>
    tpu.vector_store %arg17[%c32, %c0_43], %38 {strides = array<i32>} : memref<40x50xf32, #tpu.memory_space<vmem>>, vector<8x25xf32>,
    %c1_44 = arith.constant 1 : index
    %c0_45 = arith.constant 0 : index
    %c4_46 = arith.constant 4 : index
    %40 = vector.load %arg15[%c1_44, %c0_45, %c4_46] : memref<2x8x29xbf16, #tpu.memory_space<vmem>>, vector<1x8x25xbf16>
    %41 = vector.shape_cast %40 : vector<1x8x25xbf16> to vector<8x25xbf16>
    %42 = arith.extf %41 : vector<8x25xbf16> to vector<8x25xf32>
    %c32_47 = arith.constant 32 : index
    %c25_48 = arith.constant 25 : index
    %43 = vector.load %arg17[%c32_47, %c25_48] : memref<40x50xf32, #tpu.memory_space<vmem>>, vector<8x25xf32>
    tpu.vector_store %arg17[%c32_47, %c25_48], %42 {strides = array<i32>} : memref<40x50xf32, #tpu.memory_space<vmem>>, vector<8x25xf32>,
    %c0_49 = arith.constant 0 : index
    %c0_50 = arith.constant 0 : index
    %44 = vector.load %arg17[%c0_49, %c0_50] : memref<40x50xf32, #tpu.memory_space<vmem>>, vector<40x50xf32>
    %45 = arith.truncf %44 : vector<40x50xf32> to vector<40x50xbf16>
    %c0_51 = arith.constant 0 : index
    %c0_52 = arith.constant 0 : index
    %46 = vector.load %arg1[%c0_51, %c0_52] : memref<8x40xbf16, #tpu.memory_space<vmem>>, vector<8x40xbf16>
    %cst_53 = arith.constant dense<0.000000e+00> : vector<8x50xf32>
    %47 = tpu.matmul %46, %45, %cst_53 {dimension_numbers = #tpu.dot_dimension_numbers<[1], [0], [0], [1], [0, 0, 1, 1], [], []>} : vector<8x40xbf16>, vector<40x50xbf16>, vector<8x50xf32> -> vector<8x50xf32>
    %c0_54 = arith.constant 0 : index
    %c0_55 = arith.constant 0 : index
    %48 = vector.load %arg5[%c0_54, %c0_55] : memref<8x1xf32, #tpu.memory_space<vmem>>, vector<8x1xf32>
    %49 = vector.broadcast %48 : vector<8x1xf32> to vector<8x50xf32>
    %50 = arith.addf %47, %49 : vector<8x50xf32>
    %cst_56 = arith.constant 0.000000e+00 : f32
    %51 = vector.broadcast %cst_56 : f32 to vector<8x50xf32>
    %52 = arith.cmpf oge, %50, %51 : vector<8x50xf32>
    %cst_57 = arith.constant 1.000000e-01 : f32
    %53 = vector.broadcast %cst_57 : f32 to vector<8x50xf32>
    %54 = arith.mulf %53, %50 : vector<8x50xf32>
    %55 = arith.select %52, %50, %54 : vector<8x50xi1>, vector<8x50xf32>
    %56 = vector.extract_strided_slice %55 {offsets = [0, 0], sizes = [4, 50], strides = [1, 1]} : vector<8x50xf32> to vector<4x50xf32>
    %c0_58 = arith.constant 0 : index
    %c0_59 = arith.constant 0 : index
    %57 = vector.load %arg11[%c0_58, %c0_59] : memref<4x50xf32, #tpu.memory_space<vmem>>, vector<4x50xf32>
    tpu.vector_store %arg11[%c0_58, %c0_59], %56 {strides = array<i32>} : memref<4x50xf32, #tpu.memory_space<vmem>>, vector<4x50xf32>,
    %58 = arith.truncf %55 : vector<8x50xf32> to vector<8x50xbf16>
    %59 = vector.extract_strided_slice %58 {offsets = [0, 0], sizes = [8, 25], strides = [1, 1]} : vector<8x50xbf16> to vector<8x25xbf16>
    %c0_60 = arith.constant 0 : index
    %c0_61 = arith.constant 0 : index
    %c2_62 = arith.constant 2 : index
    %60 = vector.load %arg16[%c0_60, %c0_61, %c2_62] : memref<2x8x29xbf16, #tpu.memory_space<vmem>>, vector<1x8x25xbf16>
    %61 = vector.shape_cast %60 : vector<1x8x25xbf16> to vector<8x25xbf16>
    %62 = vector.shape_cast %59 : vector<8x25xbf16> to vector<1x8x25xbf16>
    tpu.vector_store %arg16[%c0_60, %c0_61, %c2_62], %62 {strides = array<i32>} : memref<2x8x29xbf16, #tpu.memory_space<vmem>>, vector<1x8x25xbf16>,
    %63 = vector.extract_strided_slice %58 {offsets = [0, 25], sizes = [8, 25], strides = [1, 1]} : vector<8x50xbf16> to vector<8x25xbf16>
    %c1_63 = arith.constant 1 : index
    %c0_64 = arith.constant 0 : index
    %c2_65 = arith.constant 2 : index
    %64 = vector.load %arg16[%c1_63, %c0_64, %c2_65] : memref<2x8x29xbf16, #tpu.memory_space<vmem>>, vector<1x8x25xbf16>
    %65 = vector.shape_cast %64 : vector<1x8x25xbf16> to vector<8x25xbf16>
    %66 = vector.shape_cast %63 : vector<8x25xbf16> to vector<1x8x25xbf16>
    tpu.vector_store %arg16[%c1_63, %c0_64, %c2_65], %66 {strides = array<i32>} : memref<2x8x29xbf16, #tpu.memory_space<vmem>>, vector<1x8x25xbf16>,
    %cst_66 = arith.constant 0.000000e+00 : bf16
    %67 = vector.broadcast %cst_66 : bf16 to vector<2x8x2xbf16>
    %c0_67 = arith.constant 0 : index
    %c0_68 = arith.constant 0 : index
    %c0_69 = arith.constant 0 : index
    %68 = vector.load %arg16[%c0_67, %c0_68, %c0_69] : memref<2x8x29xbf16, #tpu.memory_space<vmem>>, vector<2x8x2xbf16>
    tpu.vector_store %arg16[%c0_67, %c0_68, %c0_69], %67 {strides = array<i32>} : memref<2x8x29xbf16, #tpu.memory_space<vmem>>, vector<2x8x2xbf16>,
    %cst_70 = arith.constant 0.000000e+00 : bf16
    %69 = vector.broadcast %cst_70 : bf16 to vector<2x8x2xbf16>
    %c0_71 = arith.constant 0 : index
    %c0_72 = arith.constant 0 : index
    %c27 = arith.constant 27 : index
    %70 = vector.load %arg16[%c0_71, %c0_72, %c27] : memref<2x8x29xbf16, #tpu.memory_space<vmem>>, vector<2x8x2xbf16>
    tpu.vector_store %arg16[%c0_71, %c0_72, %c27], %69 {strides = array<i32>} : memref<2x8x29xbf16, #tpu.memory_space<vmem>>, vector<2x8x2xbf16>,
    %c0_73 = arith.constant 0 : index
    %c0_74 = arith.constant 0 : index
    %c0_75 = arith.constant 0 : index
    %71 = vector.load %arg16[%c0_73, %c0_74, %c0_75] : memref<2x8x29xbf16, #tpu.memory_space<vmem>>, vector<1x8x25xbf16>
    %72 = vector.shape_cast %71 : vector<1x8x25xbf16> to vector<8x25xbf16>
    %73 = arith.extf %72 : vector<8x25xbf16> to vector<8x25xf32>
    %c0_76 = arith.constant 0 : index
    %c0_77 = arith.constant 0 : index
    %74 = vector.load %arg17[%c0_76, %c0_77] : memref<40x50xf32, #tpu.memory_space<vmem>>, vector<8x25xf32>
    tpu.vector_store %arg17[%c0_76, %c0_77], %73 {strides = array<i32>} : memref<40x50xf32, #tpu.memory_space<vmem>>, vector<8x25xf32>,
    %c1_78 = arith.constant 1 : index
    %c0_79 = arith.constant 0 : index
    %c0_80 = arith.constant 0 : index
    %75 = vector.load %arg16[%c1_78, %c0_79, %c0_80] : memref<2x8x29xbf16, #tpu.memory_space<vmem>>, vector<1x8x25xbf16>
    %76 = vector.shape_cast %75 : vector<1x8x25xbf16> to vector<8x25xbf16>
    %77 = arith.extf %76 : vector<8x25xbf16> to vector<8x25xf32>
    %c0_81 = arith.constant 0 : index
    %c25_82 = arith.constant 25 : index
    %78 = vector.load %arg17[%c0_81, %c25_82] : memref<40x50xf32, #tpu.memory_space<vmem>>, vector<8x25xf32>
    tpu.vector_store %arg17[%c0_81, %c25_82], %77 {strides = array<i32>} : memref<40x50xf32, #tpu.memory_space<vmem>>, vector<8x25xf32>,
    %c0_83 = arith.constant 0 : index
    %c0_84 = arith.constant 0 : index
    %c1_85 = arith.constant 1 : index
    %79 = vector.load %arg16[%c0_83, %c0_84, %c1_85] : memref<2x8x29xbf16, #tpu.memory_space<vmem>>, vector<1x8x25xbf16>
    %80 = vector.shape_cast %79 : vector<1x8x25xbf16> to vector<8x25xbf16>
    %81 = arith.extf %80 : vector<8x25xbf16> to vector<8x25xf32>
    %c8_86 = arith.constant 8 : index
    %c0_87 = arith.constant 0 : index
    %82 = vector.load %arg17[%c8_86, %c0_87] : memref<40x50xf32, #tpu.memory_space<vmem>>, vector<8x25xf32>
    tpu.vector_store %arg17[%c8_86, %c0_87], %81 {strides = array<i32>} : memref<40x50xf32, #tpu.memory_space<vmem>>, vector<8x25xf32>,
    %c1_88 = arith.constant 1 : index
    %c0_89 = arith.constant 0 : index
    %c1_90 = arith.constant 1 : index
    %83 = vector.load %arg16[%c1_88, %c0_89, %c1_90] : memref<2x8x29xbf16, #tpu.memory_space<vmem>>, vector<1x8x25xbf16>
    %84 = vector.shape_cast %83 : vector<1x8x25xbf16> to vector<8x25xbf16>
    %85 = arith.extf %84 : vector<8x25xbf16> to vector<8x25xf32>
    %c8_91 = arith.constant 8 : index
    %c25_92 = arith.constant 25 : index
    %86 = vector.load %arg17[%c8_91, %c25_92] : memref<40x50xf32, #tpu.memory_space<vmem>>, vector<8x25xf32>
    tpu.vector_store %arg17[%c8_91, %c25_92], %85 {strides = array<i32>} : memref<40x50xf32, #tpu.memory_space<vmem>>, vector<8x25xf32>,
    %c0_93 = arith.constant 0 : index
    %c0_94 = arith.constant 0 : index
    %c2_95 = arith.constant 2 : index
    %87 = vector.load %arg16[%c0_93, %c0_94, %c2_95] : memref<2x8x29xbf16, #tpu.memory_space<vmem>>, vector<1x8x25xbf16>
    %88 = vector.shape_cast %87 : vector<1x8x25xbf16> to vector<8x25xbf16>
    %89 = arith.extf %88 : vector<8x25xbf16> to vector<8x25xf32>
    %c16_96 = arith.constant 16 : index
    %c0_97 = arith.constant 0 : index
    %90 = vector.load %arg17[%c16_96, %c0_97] : memref<40x50xf32, #tpu.memory_space<vmem>>, vector<8x25xf32>
    tpu.vector_store %arg17[%c16_96, %c0_97], %89 {strides = array<i32>} : memref<40x50xf32, #tpu.memory_space<vmem>>, vector<8x25xf32>,
    %c1_98 = arith.constant 1 : index
    %c0_99 = arith.constant 0 : index
    %c2_100 = arith.constant 2 : index
    %91 = vector.load %arg16[%c1_98, %c0_99, %c2_100] : memref<2x8x29xbf16, #tpu.memory_space<vmem>>, vector<1x8x25xbf16>
    %92 = vector.shape_cast %91 : vector<1x8x25xbf16> to vector<8x25xbf16>
    %93 = arith.extf %92 : vector<8x25xbf16> to vector<8x25xf32>
    %c16_101 = arith.constant 16 : index
    %c25_102 = arith.constant 25 : index
    %94 = vector.load %arg17[%c16_101, %c25_102] : memref<40x50xf32, #tpu.memory_space<vmem>>, vector<8x25xf32>
    tpu.vector_store %arg17[%c16_101, %c25_102], %93 {strides = array<i32>} : memref<40x50xf32, #tpu.memory_space<vmem>>, vector<8x25xf32>,
    %c0_103 = arith.constant 0 : index
    %c0_104 = arith.constant 0 : index
    %c3_105 = arith.constant 3 : index
    %95 = vector.load %arg16[%c0_103, %c0_104, %c3_105] : memref<2x8x29xbf16, #tpu.memory_space<vmem>>, vector<1x8x25xbf16>
    %96 = vector.shape_cast %95 : vector<1x8x25xbf16> to vector<8x25xbf16>
    %97 = arith.extf %96 : vector<8x25xbf16> to vector<8x25xf32>
    %c24_106 = arith.constant 24 : index
    %c0_107 = arith.constant 0 : index
    %98 = vector.load %arg17[%c24_106, %c0_107] : memref<40x50xf32, #tpu.memory_space<vmem>>, vector<8x25xf32>
    tpu.vector_store %arg17[%c24_106, %c0_107], %97 {strides = array<i32>} : memref<40x50xf32, #tpu.memory_space<vmem>>, vector<8x25xf32>,
    %c1_108 = arith.constant 1 : index
    %c0_109 = arith.constant 0 : index
    %c3_110 = arith.constant 3 : index
    %99 = vector.load %arg16[%c1_108, %c0_109, %c3_110] : memref<2x8x29xbf16, #tpu.memory_space<vmem>>, vector<1x8x25xbf16>
    %100 = vector.shape_cast %99 : vector<1x8x25xbf16> to vector<8x25xbf16>
    %101 = arith.extf %100 : vector<8x25xbf16> to vector<8x25xf32>
    %c24_111 = arith.constant 24 : index
    %c25_112 = arith.constant 25 : index
    %102 = vector.load %arg17[%c24_111, %c25_112] : memref<40x50xf32, #tpu.memory_space<vmem>>, vector<8x25xf32>
    tpu.vector_store %arg17[%c24_111, %c25_112], %101 {strides = array<i32>} : memref<40x50xf32, #tpu.memory_space<vmem>>, vector<8x25xf32>,
    %c0_113 = arith.constant 0 : index
    %c0_114 = arith.constant 0 : index
    %c4_115 = arith.constant 4 : index
    %103 = vector.load %arg16[%c0_113, %c0_114, %c4_115] : memref<2x8x29xbf16, #tpu.memory_space<vmem>>, vector<1x8x25xbf16>
    %104 = vector.shape_cast %103 : vector<1x8x25xbf16> to vector<8x25xbf16>
    %105 = arith.extf %104 : vector<8x25xbf16> to vector<8x25xf32>
    %c32_116 = arith.constant 32 : index
    %c0_117 = arith.constant 0 : index
    %106 = vector.load %arg17[%c32_116, %c0_117] : memref<40x50xf32, #tpu.memory_space<vmem>>, vector<8x25xf32>
    tpu.vector_store %arg17[%c32_116, %c0_117], %105 {strides = array<i32>} : memref<40x50xf32, #tpu.memory_space<vmem>>, vector<8x25xf32>,
    %c1_118 = arith.constant 1 : index
    %c0_119 = arith.constant 0 : index
    %c4_120 = arith.constant 4 : index
    %107 = vector.load %arg16[%c1_118, %c0_119, %c4_120] : memref<2x8x29xbf16, #tpu.memory_space<vmem>>, vector<1x8x25xbf16>
    %108 = vector.shape_cast %107 : vector<1x8x25xbf16> to vector<8x25xbf16>
    %109 = arith.extf %108 : vector<8x25xbf16> to vector<8x25xf32>
    %c32_121 = arith.constant 32 : index
    %c25_122 = arith.constant 25 : index
    %110 = vector.load %arg17[%c32_121, %c25_122] : memref<40x50xf32, #tpu.memory_space<vmem>>, vector<8x25xf32>
    tpu.vector_store %arg17[%c32_121, %c25_122], %109 {strides = array<i32>} : memref<40x50xf32, #tpu.memory_space<vmem>>, vector<8x25xf32>,
    %c0_123 = arith.constant 0 : index
    %c0_124 = arith.constant 0 : index
    %111 = vector.load %arg17[%c0_123, %c0_124] : memref<40x50xf32, #tpu.memory_space<vmem>>, vector<40x50xf32>
    %112 = arith.truncf %111 : vector<40x50xf32> to vector<40x50xbf16>
    %c0_125 = arith.constant 0 : index
    %c0_126 = arith.constant 0 : index
    %113 = vector.load %arg9[%c0_125, %c0_126] : memref<50x26xbf16, #tpu.memory_space<vmem>>, vector<50x26xbf16>
    %cst_127 = arith.constant dense<0.000000e+00> : vector<40x26xf32>
    %114 = tpu.matmul %112, %113, %cst_127 {dimension_numbers = #tpu.dot_dimension_numbers<[1], [0], [0], [1], [0, 0, 1, 1], [], []>} : vector<40x50xbf16>, vector<50x26xbf16>, vector<40x26xf32> -> vector<40x26xf32>
    %115 = arith.truncf %114 : vector<40x26xf32> to vector<40x26xbf16>
    %c0_128 = arith.constant 0 : index
    %c0_129 = arith.constant 0 : index
    %116 = vector.load %arg2[%c0_128, %c0_129] : memref<8x40xbf16, #tpu.memory_space<vmem>>, vector<8x40xbf16>
    %cst_130 = arith.constant dense<0.000000e+00> : vector<8x26xf32>
    %117 = tpu.matmul %116, %115, %cst_130 {dimension_numbers = #tpu.dot_dimension_numbers<[1], [0], [0], [1], [0, 0, 1, 1], [], []>} : vector<8x40xbf16>, vector<40x26xbf16>, vector<8x26xf32> -> vector<8x26xf32>
    %c0_131 = arith.constant 0 : index
    %c0_132 = arith.constant 0 : index
    %118 = vector.load %arg6[%c0_131, %c0_132] : memref<8x1xf32, #tpu.memory_space<vmem>>, vector<8x1xf32>
    %119 = vector.broadcast %118 : vector<8x1xf32> to vector<8x26xf32>
    %120 = arith.addf %117, %119 : vector<8x26xf32>
    %cst_133 = arith.constant 0.000000e+00 : f32
    %121 = vector.broadcast %cst_133 : f32 to vector<8x26xf32>
    %122 = arith.cmpf oge, %120, %121 : vector<8x26xf32>
    %cst_134 = arith.constant 1.000000e-01 : f32
    %123 = vector.broadcast %cst_134 : f32 to vector<8x26xf32>
    %124 = arith.mulf %123, %120 : vector<8x26xf32>
    %125 = arith.select %122, %120, %124 : vector<8x26xi1>, vector<8x26xf32>
    %c0_135 = arith.constant 0 : index
    %c0_136 = arith.constant 0 : index
    %126 = vector.load %arg12[%c0_135, %c0_136] : memref<8x26xf32, #tpu.memory_space<vmem>>, vector<8x26xf32>
    tpu.vector_store %arg12[%c0_135, %c0_136], %125 {strides = array<i32>} : memref<8x26xf32, #tpu.memory_space<vmem>>, vector<8x26xf32>,
    %127 = arith.truncf %125 : vector<8x26xf32> to vector<8x26xbf16>
    %128 = vector.extract_strided_slice %127 {offsets = [0, 0], sizes = [8, 13], strides = [1, 1]} : vector<8x26xbf16> to vector<8x13xbf16>
    %c0_137 = arith.constant 0 : index
    %c0_138 = arith.constant 0 : index
    %c2_139 = arith.constant 2 : index
    %129 = vector.load %arg15[%c0_137, %c0_138, %c2_139] : memref<2x8x29xbf16, #tpu.memory_space<vmem>>, vector<1x8x13xbf16>
    %130 = vector.shape_cast %129 : vector<1x8x13xbf16> to vector<8x13xbf16>
    %131 = vector.shape_cast %128 : vector<8x13xbf16> to vector<1x8x13xbf16>
    tpu.vector_store %arg15[%c0_137, %c0_138, %c2_139], %131 {strides = array<i32>} : memref<2x8x29xbf16, #tpu.memory_space<vmem>>, vector<1x8x13xbf16>,
    %132 = vector.extract_strided_slice %127 {offsets = [0, 13], sizes = [8, 13], strides = [1, 1]} : vector<8x26xbf16> to vector<8x13xbf16>
    %c1_140 = arith.constant 1 : index
    %c0_141 = arith.constant 0 : index
    %c2_142 = arith.constant 2 : index
    %133 = vector.load %arg15[%c1_140, %c0_141, %c2_142] : memref<2x8x29xbf16, #tpu.memory_space<vmem>>, vector<1x8x13xbf16>
    %134 = vector.shape_cast %133 : vector<1x8x13xbf16> to vector<8x13xbf16>
    %135 = vector.shape_cast %132 : vector<8x13xbf16> to vector<1x8x13xbf16>
    tpu.vector_store %arg15[%c1_140, %c0_141, %c2_142], %135 {strides = array<i32>} : memref<2x8x29xbf16, #tpu.memory_space<vmem>>, vector<1x8x13xbf16>,
    %cst_143 = arith.constant 0.000000e+00 : bf16
    %136 = vector.broadcast %cst_143 : bf16 to vector<2x8x2xbf16>
    %c0_144 = arith.constant 0 : index
    %c0_145 = arith.constant 0 : index
    %c0_146 = arith.constant 0 : index
    %137 = vector.load %arg15[%c0_144, %c0_145, %c0_146] : memref<2x8x29xbf16, #tpu.memory_space<vmem>>, vector<2x8x2xbf16>
    tpu.vector_store %arg15[%c0_144, %c0_145, %c0_146], %136 {strides = array<i32>} : memref<2x8x29xbf16, #tpu.memory_space<vmem>>, vector<2x8x2xbf16>,
    %cst_147 = arith.constant 0.000000e+00 : bf16
    %138 = vector.broadcast %cst_147 : bf16 to vector<2x8x2xbf16>
    %c0_148 = arith.constant 0 : index
    %c0_149 = arith.constant 0 : index
    %c15 = arith.constant 15 : index
    %139 = vector.load %arg15[%c0_148, %c0_149, %c15] : memref<2x8x29xbf16, #tpu.memory_space<vmem>>, vector<2x8x2xbf16>
    tpu.vector_store %arg15[%c0_148, %c0_149, %c15], %138 {strides = array<i32>} : memref<2x8x29xbf16, #tpu.memory_space<vmem>>, vector<2x8x2xbf16>,
    %c0_150 = arith.constant 0 : index
    %c0_151 = arith.constant 0 : index
    %c0_152 = arith.constant 0 : index
    %140 = vector.load %arg15[%c0_150, %c0_151, %c0_152] : memref<2x8x29xbf16, #tpu.memory_space<vmem>>, vector<1x8x13xbf16>
    %141 = vector.shape_cast %140 : vector<1x8x13xbf16> to vector<8x13xbf16>
    %142 = arith.extf %141 : vector<8x13xbf16> to vector<8x13xf32>
    %c0_153 = arith.constant 0 : index
    %c0_154 = arith.constant 0 : index
    %143 = vector.load %arg17[%c0_153, %c0_154] : memref<40x50xf32, #tpu.memory_space<vmem>>, vector<8x13xf32>
    tpu.vector_store %arg17[%c0_153, %c0_154], %142 {strides = array<i32>} : memref<40x50xf32, #tpu.memory_space<vmem>>, vector<8x13xf32>,
    %c1_155 = arith.constant 1 : index
    %c0_156 = arith.constant 0 : index
    %c0_157 = arith.constant 0 : index
    %144 = vector.load %arg15[%c1_155, %c0_156, %c0_157] : memref<2x8x29xbf16, #tpu.memory_space<vmem>>, vector<1x8x13xbf16>
    %145 = vector.shape_cast %144 : vector<1x8x13xbf16> to vector<8x13xbf16>
    %146 = arith.extf %145 : vector<8x13xbf16> to vector<8x13xf32>
    %c0_158 = arith.constant 0 : index
    %c13 = arith.constant 13 : index
    %147 = vector.load %arg17[%c0_158, %c13] : memref<40x50xf32, #tpu.memory_space<vmem>>, vector<8x13xf32>
    tpu.vector_store %arg17[%c0_158, %c13], %146 {strides = array<i32>} : memref<40x50xf32, #tpu.memory_space<vmem>>, vector<8x13xf32>,
    %c0_159 = arith.constant 0 : index
    %c0_160 = arith.constant 0 : index
    %c1_161 = arith.constant 1 : index
    %148 = vector.load %arg15[%c0_159, %c0_160, %c1_161] : memref<2x8x29xbf16, #tpu.memory_space<vmem>>, vector<1x8x13xbf16>
    %149 = vector.shape_cast %148 : vector<1x8x13xbf16> to vector<8x13xbf16>
    %150 = arith.extf %149 : vector<8x13xbf16> to vector<8x13xf32>
    %c8_162 = arith.constant 8 : index
    %c0_163 = arith.constant 0 : index
    %151 = vector.load %arg17[%c8_162, %c0_163] : memref<40x50xf32, #tpu.memory_space<vmem>>, vector<8x13xf32>
    tpu.vector_store %arg17[%c8_162, %c0_163], %150 {strides = array<i32>} : memref<40x50xf32, #tpu.memory_space<vmem>>, vector<8x13xf32>,
    %c1_164 = arith.constant 1 : index
    %c0_165 = arith.constant 0 : index
    %c1_166 = arith.constant 1 : index
    %152 = vector.load %arg15[%c1_164, %c0_165, %c1_166] : memref<2x8x29xbf16, #tpu.memory_space<vmem>>, vector<1x8x13xbf16>
    %153 = vector.shape_cast %152 : vector<1x8x13xbf16> to vector<8x13xbf16>
    %154 = arith.extf %153 : vector<8x13xbf16> to vector<8x13xf32>
    %c8_167 = arith.constant 8 : index
    %c13_168 = arith.constant 13 : index
    %155 = vector.load %arg17[%c8_167, %c13_168] : memref<40x50xf32, #tpu.memory_space<vmem>>, vector<8x13xf32>
    tpu.vector_store %arg17[%c8_167, %c13_168], %154 {strides = array<i32>} : memref<40x50xf32, #tpu.memory_space<vmem>>, vector<8x13xf32>,
    %c0_169 = arith.constant 0 : index
    %c0_170 = arith.constant 0 : index
    %c2_171 = arith.constant 2 : index
    %156 = vector.load %arg15[%c0_169, %c0_170, %c2_171] : memref<2x8x29xbf16, #tpu.memory_space<vmem>>, vector<1x8x13xbf16>
    %157 = vector.shape_cast %156 : vector<1x8x13xbf16> to vector<8x13xbf16>
    %158 = arith.extf %157 : vector<8x13xbf16> to vector<8x13xf32>
    %c16_172 = arith.constant 16 : index
    %c0_173 = arith.constant 0 : index
    %159 = vector.load %arg17[%c16_172, %c0_173] : memref<40x50xf32, #tpu.memory_space<vmem>>, vector<8x13xf32>
    tpu.vector_store %arg17[%c16_172, %c0_173], %158 {strides = array<i32>} : memref<40x50xf32, #tpu.memory_space<vmem>>, vector<8x13xf32>,
    %c1_174 = arith.constant 1 : index
    %c0_175 = arith.constant 0 : index
    %c2_176 = arith.constant 2 : index
    %160 = vector.load %arg15[%c1_174, %c0_175, %c2_176] : memref<2x8x29xbf16, #tpu.memory_space<vmem>>, vector<1x8x13xbf16>
    %161 = vector.shape_cast %160 : vector<1x8x13xbf16> to vector<8x13xbf16>
    %162 = arith.extf %161 : vector<8x13xbf16> to vector<8x13xf32>
    %c16_177 = arith.constant 16 : index
    %c13_178 = arith.constant 13 : index
    %163 = vector.load %arg17[%c16_177, %c13_178] : memref<40x50xf32, #tpu.memory_space<vmem>>, vector<8x13xf32>
    tpu.vector_store %arg17[%c16_177, %c13_178], %162 {strides = array<i32>} : memref<40x50xf32, #tpu.memory_space<vmem>>, vector<8x13xf32>,
    %c0_179 = arith.constant 0 : index
    %c0_180 = arith.constant 0 : index
    %c3_181 = arith.constant 3 : index
    %164 = vector.load %arg15[%c0_179, %c0_180, %c3_181] : memref<2x8x29xbf16, #tpu.memory_space<vmem>>, vector<1x8x13xbf16>
    %165 = vector.shape_cast %164 : vector<1x8x13xbf16> to vector<8x13xbf16>
    %166 = arith.extf %165 : vector<8x13xbf16> to vector<8x13xf32>
    %c24_182 = arith.constant 24 : index
    %c0_183 = arith.constant 0 : index
    %167 = vector.load %arg17[%c24_182, %c0_183] : memref<40x50xf32, #tpu.memory_space<vmem>>, vector<8x13xf32>
    tpu.vector_store %arg17[%c24_182, %c0_183], %166 {strides = array<i32>} : memref<40x50xf32, #tpu.memory_space<vmem>>, vector<8x13xf32>,
    %c1_184 = arith.constant 1 : index
    %c0_185 = arith.constant 0 : index
    %c3_186 = arith.constant 3 : index
    %168 = vector.load %arg15[%c1_184, %c0_185, %c3_186] : memref<2x8x29xbf16, #tpu.memory_space<vmem>>, vector<1x8x13xbf16>
    %169 = vector.shape_cast %168 : vector<1x8x13xbf16> to vector<8x13xbf16>
    %170 = arith.extf %169 : vector<8x13xbf16> to vector<8x13xf32>
    %c24_187 = arith.constant 24 : index
    %c13_188 = arith.constant 13 : index
    %171 = vector.load %arg17[%c24_187, %c13_188] : memref<40x50xf32, #tpu.memory_space<vmem>>, vector<8x13xf32>
    tpu.vector_store %arg17[%c24_187, %c13_188], %170 {strides = array<i32>} : memref<40x50xf32, #tpu.memory_space<vmem>>, vector<8x13xf32>,
    %c0_189 = arith.constant 0 : index
    %c0_190 = arith.constant 0 : index
    %c4_191 = arith.constant 4 : index
    %172 = vector.load %arg15[%c0_189, %c0_190, %c4_191] : memref<2x8x29xbf16, #tpu.memory_space<vmem>>, vector<1x8x13xbf16>
    %173 = vector.shape_cast %172 : vector<1x8x13xbf16> to vector<8x13xbf16>
    %174 = arith.extf %173 : vector<8x13xbf16> to vector<8x13xf32>
    %c32_192 = arith.constant 32 : index
    %c0_193 = arith.constant 0 : index
    %175 = vector.load %arg17[%c32_192, %c0_193] : memref<40x50xf32, #tpu.memory_space<vmem>>, vector<8x13xf32>
    tpu.vector_store %arg17[%c32_192, %c0_193], %174 {strides = array<i32>} : memref<40x50xf32, #tpu.memory_space<vmem>>, vector<8x13xf32>,
    %c1_194 = arith.constant 1 : index
    %c0_195 = arith.constant 0 : index
    %c4_196 = arith.constant 4 : index
    %176 = vector.load %arg15[%c1_194, %c0_195, %c4_196] : memref<2x8x29xbf16, #tpu.memory_space<vmem>>, vector<1x8x13xbf16>
    %177 = vector.shape_cast %176 : vector<1x8x13xbf16> to vector<8x13xbf16>
    %178 = arith.extf %177 : vector<8x13xbf16> to vector<8x13xf32>
    %c32_197 = arith.constant 32 : index
    %c13_198 = arith.constant 13 : index
    %179 = vector.load %arg17[%c32_197, %c13_198] : memref<40x50xf32, #tpu.memory_space<vmem>>, vector<8x13xf32>
    tpu.vector_store %arg17[%c32_197, %c13_198], %178 {strides = array<i32>} : memref<40x50xf32, #tpu.memory_space<vmem>>, vector<8x13xf32>,
    %c0_199 = arith.constant 0 : index
    %c0_200 = arith.constant 0 : index
    %180 = vector.load %arg17[%c0_199, %c0_200] : memref<40x50xf32, #tpu.memory_space<vmem>>, vector<40x26xf32>
    %181 = arith.truncf %180 : vector<40x26xf32> to vector<40x26xbf16>
    %c0_201 = arith.constant 0 : index
    %c0_202 = arith.constant 0 : index
    %182 = vector.load %arg10[%c0_201, %c0_202] : memref<26x14xbf16, #tpu.memory_space<vmem>>, vector<26x14xbf16>
    %cst_203 = arith.constant dense<0.000000e+00> : vector<40x14xf32>
    %183 = tpu.matmul %181, %182, %cst_203 {dimension_numbers = #tpu.dot_dimension_numbers<[1], [0], [0], [1], [0, 0, 1, 1], [], []>} : vector<40x26xbf16>, vector<26x14xbf16>, vector<40x14xf32> -> vector<40x14xf32>
    %184 = arith.truncf %183 : vector<40x14xf32> to vector<40x14xbf16>
    %c0_204 = arith.constant 0 : index
    %c0_205 = arith.constant 0 : index
    %185 = vector.load %arg3[%c0_204, %c0_205] : memref<8x40xbf16, #tpu.memory_space<vmem>>, vector<8x40xbf16>
    %cst_206 = arith.constant dense<0.000000e+00> : vector<8x14xf32>
    %186 = tpu.matmul %185, %184, %cst_206 {dimension_numbers = #tpu.dot_dimension_numbers<[1], [0], [0], [1], [0, 0, 1, 1], [], []>} : vector<8x40xbf16>, vector<40x14xbf16>, vector<8x14xf32> -> vector<8x14xf32>
    %c0_207 = arith.constant 0 : index
    %c0_208 = arith.constant 0 : index
    %187 = vector.load %arg7[%c0_207, %c0_208] : memref<8x1xf32, #tpu.memory_space<vmem>>, vector<8x1xf32>
    %188 = vector.broadcast %187 : vector<8x1xf32> to vector<8x14xf32>
    %189 = arith.addf %186, %188 : vector<8x14xf32>
    %cst_209 = arith.constant 0.000000e+00 : f32
    %190 = vector.broadcast %cst_209 : f32 to vector<8x14xf32>
    %191 = arith.cmpf oge, %189, %190 : vector<8x14xf32>
    %cst_210 = arith.constant 1.000000e-01 : f32
    %192 = vector.broadcast %cst_210 : f32 to vector<8x14xf32>
    %193 = arith.mulf %192, %189 : vector<8x14xf32>
    %194 = arith.select %191, %189, %193 : vector<8x14xi1>, vector<8x14xf32>
    %c0_211 = arith.constant 0 : index
    %c0_212 = arith.constant 0 : index
    %195 = vector.load %arg13[%c0_211, %c0_212] : memref<8x14xf32, #tpu.memory_space<vmem>>, vector<8x14xf32>
    tpu.vector_store %arg13[%c0_211, %c0_212], %194 {strides = array<i32>} : memref<8x14xf32, #tpu.memory_space<vmem>>, vector<8x14xf32>,
    %196 = arith.truncf %194 : vector<8x14xf32> to vector<8x14xbf16>
    %197 = vector.extract_strided_slice %196 {offsets = [0, 0], sizes = [8, 7], strides = [1, 1]} : vector<8x14xbf16> to vector<8x7xbf16>
    %c0_213 = arith.constant 0 : index
    %c0_214 = arith.constant 0 : index
    %c1_215 = arith.constant 1 : index
    %198 = vector.load %arg16[%c0_213, %c0_214, %c1_215] : memref<2x8x29xbf16, #tpu.memory_space<vmem>>, vector<1x8x7xbf16>
    %199 = vector.shape_cast %198 : vector<1x8x7xbf16> to vector<8x7xbf16>
    %200 = vector.shape_cast %197 : vector<8x7xbf16> to vector<1x8x7xbf16>
    tpu.vector_store %arg16[%c0_213, %c0_214, %c1_215], %200 {strides = array<i32>} : memref<2x8x29xbf16, #tpu.memory_space<vmem>>, vector<1x8x7xbf16>,
    %201 = vector.extract_strided_slice %196 {offsets = [0, 7], sizes = [8, 7], strides = [1, 1]} : vector<8x14xbf16> to vector<8x7xbf16>
    %c1_216 = arith.constant 1 : index
    %c0_217 = arith.constant 0 : index
    %c1_218 = arith.constant 1 : index
    %202 = vector.load %arg16[%c1_216, %c0_217, %c1_218] : memref<2x8x29xbf16, #tpu.memory_space<vmem>>, vector<1x8x7xbf16>
    %203 = vector.shape_cast %202 : vector<1x8x7xbf16> to vector<8x7xbf16>
    %204 = vector.shape_cast %201 : vector<8x7xbf16> to vector<1x8x7xbf16>
    tpu.vector_store %arg16[%c1_216, %c0_217, %c1_218], %204 {strides = array<i32>} : memref<2x8x29xbf16, #tpu.memory_space<vmem>>, vector<1x8x7xbf16>,
    %cst_219 = arith.constant 0.000000e+00 : bf16
    %205 = vector.broadcast %cst_219 : bf16 to vector<2x8x1xbf16>
    %c0_220 = arith.constant 0 : index
    %c0_221 = arith.constant 0 : index
    %c0_222 = arith.constant 0 : index
    %206 = vector.load %arg16[%c0_220, %c0_221, %c0_222] : memref<2x8x29xbf16, #tpu.memory_space<vmem>>, vector<2x8x1xbf16>
    tpu.vector_store %arg16[%c0_220, %c0_221, %c0_222], %205 {strides = array<i32>} : memref<2x8x29xbf16, #tpu.memory_space<vmem>>, vector<2x8x1xbf16>,
    %cst_223 = arith.constant 0.000000e+00 : bf16
    %207 = vector.broadcast %cst_223 : bf16 to vector<2x8x1xbf16>
    %c0_224 = arith.constant 0 : index
    %c0_225 = arith.constant 0 : index
    %c8_226 = arith.constant 8 : index
    %208 = vector.load %arg16[%c0_224, %c0_225, %c8_226] : memref<2x8x29xbf16, #tpu.memory_space<vmem>>, vector<2x8x1xbf16>
    tpu.vector_store %arg16[%c0_224, %c0_225, %c8_226], %207 {strides = array<i32>} : memref<2x8x29xbf16, #tpu.memory_space<vmem>>, vector<2x8x1xbf16>,
    %c0_227 = arith.constant 0 : index
    %c0_228 = arith.constant 0 : index
    %c0_229 = arith.constant 0 : index
    %209 = vector.load %arg16[%c0_227, %c0_228, %c0_229] : memref<2x8x29xbf16, #tpu.memory_space<vmem>>, vector<1x8x7xbf16>
    %210 = vector.shape_cast %209 : vector<1x8x7xbf16> to vector<8x7xbf16>
    %211 = arith.extf %210 : vector<8x7xbf16> to vector<8x7xf32>
    %c0_230 = arith.constant 0 : index
    %c0_231 = arith.constant 0 : index
    %212 = vector.load %arg17[%c0_230, %c0_231] : memref<40x50xf32, #tpu.memory_space<vmem>>, vector<8x7xf32>
    tpu.vector_store %arg17[%c0_230, %c0_231], %211 {strides = array<i32>} : memref<40x50xf32, #tpu.memory_space<vmem>>, vector<8x7xf32>,
    %c1_232 = arith.constant 1 : index
    %c0_233 = arith.constant 0 : index
    %c0_234 = arith.constant 0 : index
    %213 = vector.load %arg16[%c1_232, %c0_233, %c0_234] : memref<2x8x29xbf16, #tpu.memory_space<vmem>>, vector<1x8x7xbf16>
    %214 = vector.shape_cast %213 : vector<1x8x7xbf16> to vector<8x7xbf16>
    %215 = arith.extf %214 : vector<8x7xbf16> to vector<8x7xf32>
    %c0_235 = arith.constant 0 : index
    %c7 = arith.constant 7 : index
    %216 = vector.load %arg17[%c0_235, %c7] : memref<40x50xf32, #tpu.memory_space<vmem>>, vector<8x7xf32>
    tpu.vector_store %arg17[%c0_235, %c7], %215 {strides = array<i32>} : memref<40x50xf32, #tpu.memory_space<vmem>>, vector<8x7xf32>,
    %c0_236 = arith.constant 0 : index
    %c0_237 = arith.constant 0 : index
    %c1_238 = arith.constant 1 : index
    %217 = vector.load %arg16[%c0_236, %c0_237, %c1_238] : memref<2x8x29xbf16, #tpu.memory_space<vmem>>, vector<1x8x7xbf16>
    %218 = vector.shape_cast %217 : vector<1x8x7xbf16> to vector<8x7xbf16>
    %219 = arith.extf %218 : vector<8x7xbf16> to vector<8x7xf32>
    %c8_239 = arith.constant 8 : index
    %c0_240 = arith.constant 0 : index
    %220 = vector.load %arg17[%c8_239, %c0_240] : memref<40x50xf32, #tpu.memory_space<vmem>>, vector<8x7xf32>
    tpu.vector_store %arg17[%c8_239, %c0_240], %219 {strides = array<i32>} : memref<40x50xf32, #tpu.memory_space<vmem>>, vector<8x7xf32>,
    %c1_241 = arith.constant 1 : index
    %c0_242 = arith.constant 0 : index
    %c1_243 = arith.constant 1 : index
    %221 = vector.load %arg16[%c1_241, %c0_242, %c1_243] : memref<2x8x29xbf16, #tpu.memory_space<vmem>>, vector<1x8x7xbf16>
    %222 = vector.shape_cast %221 : vector<1x8x7xbf16> to vector<8x7xbf16>
    %223 = arith.extf %222 : vector<8x7xbf16> to vector<8x7xf32>
    %c8_244 = arith.constant 8 : index
    %c7_245 = arith.constant 7 : index
    %224 = vector.load %arg17[%c8_244, %c7_245] : memref<40x50xf32, #tpu.memory_space<vmem>>, vector<8x7xf32>
    tpu.vector_store %arg17[%c8_244, %c7_245], %223 {strides = array<i32>} : memref<40x50xf32, #tpu.memory_space<vmem>>, vector<8x7xf32>,
    %c0_246 = arith.constant 0 : index
    %c0_247 = arith.constant 0 : index
    %c2_248 = arith.constant 2 : index
    %225 = vector.load %arg16[%c0_246, %c0_247, %c2_248] : memref<2x8x29xbf16, #tpu.memory_space<vmem>>, vector<1x8x7xbf16>
    %226 = vector.shape_cast %225 : vector<1x8x7xbf16> to vector<8x7xbf16>
    %227 = arith.extf %226 : vector<8x7xbf16> to vector<8x7xf32>
    %c16_249 = arith.constant 16 : index
    %c0_250 = arith.constant 0 : index
    %228 = vector.load %arg17[%c16_249, %c0_250] : memref<40x50xf32, #tpu.memory_space<vmem>>, vector<8x7xf32>
    tpu.vector_store %arg17[%c16_249, %c0_250], %227 {strides = array<i32>} : memref<40x50xf32, #tpu.memory_space<vmem>>, vector<8x7xf32>,
    %c1_251 = arith.constant 1 : index
    %c0_252 = arith.constant 0 : index
    %c2_253 = arith.constant 2 : index
    %229 = vector.load %arg16[%c1_251, %c0_252, %c2_253] : memref<2x8x29xbf16, #tpu.memory_space<vmem>>, vector<1x8x7xbf16>
    %230 = vector.shape_cast %229 : vector<1x8x7xbf16> to vector<8x7xbf16>
    %231 = arith.extf %230 : vector<8x7xbf16> to vector<8x7xf32>
    %c16_254 = arith.constant 16 : index
    %c7_255 = arith.constant 7 : index
    %232 = vector.load %arg17[%c16_254, %c7_255] : memref<40x50xf32, #tpu.memory_space<vmem>>, vector<8x7xf32>
    tpu.vector_store %arg17[%c16_254, %c7_255], %231 {strides = array<i32>} : memref<40x50xf32, #tpu.memory_space<vmem>>, vector<8x7xf32>,
    %c0_256 = arith.constant 0 : index
    %c0_257 = arith.constant 0 : index
    %233 = vector.load %arg17[%c0_256, %c0_257] : memref<40x50xf32, #tpu.memory_space<vmem>>, vector<24x14xf32>
    %234 = arith.truncf %233 : vector<24x14xf32> to vector<24x14xbf16>
    %c0_258 = arith.constant 0 : index
    %c0_259 = arith.constant 0 : index
    %235 = vector.load %arg4[%c0_258, %c0_259] : memref<8x24xbf16, #tpu.memory_space<vmem>>, vector<8x24xbf16>
    %cst_260 = arith.constant dense<0.000000e+00> : vector<8x14xf32>
    %236 = tpu.matmul %235, %234, %cst_260 {dimension_numbers = #tpu.dot_dimension_numbers<[1], [0], [0], [1], [0, 0, 1, 1], [], []>} : vector<8x24xbf16>, vector<24x14xbf16>, vector<8x14xf32> -> vector<8x14xf32>
    %c0_261 = arith.constant 0 : index
    %c0_262 = arith.constant 0 : index
    %237 = vector.load %arg8[%c0_261, %c0_262] : memref<8x1xf32, #tpu.memory_space<vmem>>, vector<8x1xf32>
    %238 = vector.broadcast %237 : vector<8x1xf32> to vector<8x14xf32>
    %239 = arith.addf %236, %238 : vector<8x14xf32>
    %240 = vector.extract_strided_slice %239 {offsets = [0, 0], sizes = [1, 14], strides = [1, 1]} : vector<8x14xf32> to vector<1x14xf32>
    %c0_263 = arith.constant 0 : index
    %c0_264 = arith.constant 0 : index
    %241 = vector.load %arg14[%c0_263, %c0_264] : memref<1x14xf32, #tpu.memory_space<vmem>>, vector<1x14xf32>
    tpu.vector_store %arg14[%c0_263, %c0_264], %240 {strides = array<i32>} : memref<1x14xf32, #tpu.memory_space<vmem>>, vector<1x14xf32>,
    return
  }
}

</mosaic_0001>

<bundles_post_ra>
// kernel: discriminator_forward.7
= control target key start
LH: loop header
LB: loop body
LE: loop exit
PB: predicated region body
PF: predicated region fallthrough
CT: control target
= control target key end

     0   :  { %v60_v0 = vlaneseq  ;;  %vm43_vm0 = vcmask 232448   ;;  %v1033_v1 = vmov 1935823168   ;;  %v1034_v3 = vmov 0   ;;  %s1035_s17 = smov 2   ;;  %s1037_s18 = smov 24   ;;  %s1326_s0 = inlined_call_operand.vmem [shape: bf16[2,1,25], index: 0, kind: input, shape index: {}]   ;;  %s1327_s5 = inlined_call_operand.vmem [shape: f32[8,1], index: 5, kind: input, shape index: {}]   ;;  %s1328_s1 = inlined_call_operand.vmem [shape: bf16[8,40], index: 1, kind: input, shape index: {}]   ;;  %s1329_s11 = inlined_call_operand.vmem [shape: f32[4,50], index: 11, kind: output, shape index: {0}]   ;;  %s1330_s9 = inlined_call_operand.vmem [shape: bf16[50,26], index: 9, kind: input, shape index: {}]   ;;  %s1331_s6 = inlined_call_operand.vmem [shape: f32[8,1], index: 6, kind: input, shape index: {}]   ;;  %s1332_s2 = inlined_call_operand.vmem [shape: bf16[8,40], index: 2, kind: input, shape index: {}]   ;;  %s1333_s12 = inlined_call_operand.vmem [shape: f32[8,26], index: 12, kind: output, shape index: {1}]   ;;  %s1334_s10 = inlined_call_operand.vmem [shape: bf16[26,14], index: 10, kind: input, shape index: {}]   ;;  %s1335_s7 = inlined_call_operand.vmem [shape: f32[8,1], index: 7, kind: input, shape index: {}]   ;;  %s1336_s3 = inlined_call_operand.vmem [shape: bf16[8,40], index: 3, kind: input, shape index: {}]   ;;  %s1337_s13 = inlined_call_operand.vmem [shape: f32[8,14], index: 13, kind: output, shape index: {2}]   ;;  %s1338_s8 = inlined_call_operand.vmem [shape: f32[8,1], index: 8, kind: input, shape index: {}]   ;;  %s1339_s4 = inlined_call_operand.vmem [shape: bf16[8,24], index: 4, kind: input, shape index: {}]   ;;  %s1340_s14 = inlined_call_operand.vmem [shape: f32[1,14], index: 14, kind: output, shape index: {3}]  }
   0x1   :  { %v58_v2 = vunpack.c.l.s4 %v1033_v1  ;;  %44 = vst.msk [vmem:[#allocation2] sm:$0xf] %vm43_vm0, %v1034_v3  ;;  %45 = vst.msk [vmem:[#allocation2 + $0x4] sm:$0xf] %vm43_vm0, %v1034_v3  ;;  %1025 = vset.pattern.permute.xlu1 %v1034_v3  ;;  %1026 = vset.pattern.permute.xlu0 %v1034_v3  ;;  %vm84_vm1 = vcmask 213008   ;;  %vm95_vm4 = vcmask 203776  }
   0x2   :  { %v61_v4 = vshrl.u32 %v60_v0, 7  ;;  %v858_v6 = vld.sshfl [vmem:[%s1326_s0] sm:$0x1 pattern:$0x73625140]  ;;  %v1038_v23 = vmov 0.0  }
   0x3   :  { %v59_v5 = vunpack.c.0.s8 %v58_v2  ;;  %v859_v8 = vld.sshfl [vmem:[%s1326_s0 + $0x1] sm:$0x1 pattern:$0x73625140]  ;;  %vm85_vm2 = vsmask.f32 256  ;;  %925 = vmatprep.subr.bf16.mxu0 %v1038_v23  ;;  %935 = vmatprep.subr.bf16.mxu1 %v1038_v23 }
   0x4   :  { %vm86_vm3 = vmand %vm84_vm1, %vm85_vm2  ;;  %s1036_s0 = smov 127   ;;  %s1039_s19 = smov 25   ;;  %vm1046_vm5 = vmmov 0   ;;  %v171_v33 = vld [vmem:[%s1327_s5] sm:$0xff]  ;;  %vm104_vm6 = vcmask 408776   ;;  %vm181_vm7 = vcmask 1043456  }
   0x5   :  { %v62_v7 = vsub.s32 %v59_v5, %v61_v4  ;;  %s1040_s20 = smov 125   ;;  %s1041_s21 = smov 126   ;;  %931 = vmatprep.mubr.msk.bf16.mxu0 %vm1046_vm5, %v1038_v23  ;;  %943 = vmatprep.mubr.msk.bf16.mxu1 %vm1046_vm5, %v1038_v23  ;;  %v170_v52 = vld [vmem:[%s1328_s1] sm:$0xf]  ;;  %vm177_vm8 = vcmask 326656   ;;  %vm228_vm10 = vcmask 404480  }
   0x6   :  { %s1042_s22 = smov 22   ;;  %s1043_s23 = smov 23   ;;  %v1027_v62 = vld [vmem:[%s1330_s9] sm:$0xff]   ;;  %vm237_vm11 = vcmask 216080   ;;  %vm244_vm12 = vcmask 11264   ;;  %vm247_vm13 = vcmask 232664  }
   0x7   :  { %v63_v9 = vrot.slane %v858_v6, %v62_v7  ;;  %v77_v10 = vrot.slane %v859_v8, %v62_v7  ;;  %s1044_s24 = smov 21   ;;  %s1045_s25 = smov 124   ;;  %936 = vmatpush3.bf16.msra.mxu1 %v1027_v62  ;;  %v1028_v1 = vld [vmem:[%s1330_s9 + $0x8] sm:$0xff]   ;;  %v1029_v2 = vld [vmem:[%s1330_s9 + $0x10] sm:$0xff]   ;;  %vm362_vm14 = vcmask 1040384   ;;  %vm352_vm15 = vcmask 408576  }
   0x8   :  { %v87_v11 = vld [vmem:[#allocation2] sm:$0x1]  ;;  %v90_v14 = vld [vmem:[#allocation2 + $0x4] sm:$0x1]  ;;  %s1047_s30 = smov 105   ;;  %937 = vmatprep.subr.bf16.mxu1 %v1038_v23  ;;  %vm481_vm1 = vcmask 211968  }
   0x9   :  { %78 = vrot.lane.b32.xlu0 %v63_v9, %s1035_s17  ;;  %v1030_v4 = vld [vmem:[%s1330_s9 + $0x18] ss:$0 sps:$4 sm:$0x11]   ;;  %vm490_vm2 = vcmask 117776   ;;  %s1051_s15 = smov 11   ;;  %s1052_s16 = smov 10  }
   0xa   :  { %v364_v8 = vsel %vm362_vm14, %v1030_v4, 0  ;;  %s1054_s5 = smov 122   ;;  %s1055_s28 = smov 1   ;;  %vm751_vm14 = vcmask 113720  }
   0xb   :  { %938 = vmatpush3.bf16.msra.mxu1 %v1028_v1  ;;  %s1057_s1 = smov 6  }
   0xc   :  { %939 = vmatprep.subr.bf16.mxu1 %v1038_v23 }
   0xd   :  { %80 = vrot.lane.b32.xlu0 %v77_v10, %s1035_s17 }
   0xf   :  { %940 = vmatpush3.bf16.msra.mxu1 %v1029_v2 }
  0x10   :  { %941 = vmatprep.subr.bf16.mxu1 %v1038_v23 }
  0x13   :  { %942 = vmatpush3.bf16.msra.mxu1 %v364_v8 }
  0x14   :  { %981 = vmatprep.subr.bf16.mxu1 %v1038_v23 }
  0x7b   :  { %v79_v12 = vpop.permute.xlu0 %78 }
  0x7c   :  { %v88_v13 = vsel %vm86_vm3, %v79_v12, %v87_v11 }
  0x7d   :  { %89 = vst [vmem:[#allocation2] sm:$0x1] %v88_v13 }
  0x7f   :  { %v81_v15 = vpop.permute.xlu0 %80 }
  0x80   :  { %v91_v16 = vsel %vm86_vm3, %v81_v15, %v90_v14  ;;  %vm498_vm3 = vcmask 134264  }
  0x81   :  { %92 = vst [vmem:[#allocation2 + $0x4] sm:$0x1] %v91_v16 }
  0x88   :  { %v106_v17 = vld [vmem:[#allocation2] sm:$0xff]  }
  0x89   :  { %v883_v18 = vld [vmem:[#allocation2] sm:$0xff]   ;;  %v107_v19 = vunpack.c.l.bf16 %v106_v17  ;;  %v114_v20 = vunpack.c.h.bf16 %v106_v17 }
  0x8a   :  { %v134_v21 = vld [vmem:[#allocation2] sm:$0xff]   ;;  %v884_v22 = vunpack.c.l.bf16 %v883_v18  ;;  %v885_v24 = vunpack.c.h.bf16 %v883_v18 }
  0x8b   :  { %109 = vrot.lane.b32.xlu1 %v107_v19, %s1036_s0  ;;  %116 = vrot.lane.b32.xlu0 %v114_v20, %s1037_s18  ;;  %v135_v25 = vunpack.c.l.bf16 %v134_v21  ;;  %v120_v26 = vld [vmem:[#allocation2] sm:$0xff]   ;;  %v142_v28 = vunpack.c.h.bf16 %v134_v21 }
  0x8c   :  { %96 = vst.msk [vmem:[#allocation4] sm:$0xff] %vm95_vm4, %v884_v22  ;;  %v121_v27 = vunpack.c.l.bf16 %v120_v26  ;;  %v155_v29 = vld [vmem:[#allocation2] sm:$0xff]   ;;  %v128_v30 = vunpack.c.h.bf16 %v120_v26 }
  0x8d   :  { %v156_v31 = vunpack.c.h.bf16 %v155_v29  ;;  %v149_v32 = vunpack.c.l.bf16 %v155_v29  ;;  %v426_v22 = vld [vmem:[%s1331_s6] sm:$0xff]  ;;  %s1058_s6 = smov 5  }
  0x8f   :  { %101 = vrot.lane.b32.xlu1 %v885_v24, %s1039_s19  ;;  %137 = vrot.lane.b32.xlu0 %v135_v25, %s1040_s20 }
  0x93   :  { %123 = vrot.lane.b32.xlu1 %v121_v27, %s1041_s21  ;;  %144 = vrot.lane.b32.xlu0 %v142_v28, %s1042_s22 }
  0x97   :  { %130 = vrot.lane.b32.xlu1 %v128_v30, %s1043_s23  ;;  %158 = vrot.lane.b32.xlu0 %v156_v31, %s1044_s24 }
  0x9b   :  { %151 = vrot.lane.b32.xlu1 %v149_v32, %s1045_s25 }
  0x9f   :  { %174 = vperm.xlu1 %1025, %v171_v33  }
  0xfd   :  { %v110_v34 = vpop.permute.xlu1 %109  ;;  %v117_v35 = vpop.permute.xlu0 %116 }
  0xfe   :  { %112 = vst.msk [vmem:[#allocation4 + $0x8] sm:$0xff] %vm95_vm4, %v110_v34 }
  0xff   :  { %119 = vst.msk [vmem:[#allocation4 + $0x8] sm:$0xff] %vm104_vm6, %v117_v35 }
 0x101   :  { %v102_v36 = vpop.permute.xlu1 %101  ;;  %v138_v37 = vpop.permute.xlu0 %137 }
 0x102   :  { %105 = vst.msk [vmem:[#allocation4] sm:$0xff] %vm104_vm6, %v102_v36 }
 0x103   :  { %140 = vst.msk [vmem:[#allocation4 + $0x18] sm:$0xff] %vm95_vm4, %v138_v37 }
 0x105   :  { %v124_v38 = vpop.permute.xlu1 %123  ;;  %v145_v39 = vpop.permute.xlu0 %144 }
 0x106   :  { %126 = vst.msk [vmem:[#allocation4 + $0x10] sm:$0xff] %vm95_vm4, %v124_v38  ;;  %v163_v42 = vld [vmem:[#allocation4 + $0x8] sm:$0xff] }
 0x107   :  { %147 = vst.msk [vmem:[#allocation4 + $0x18] sm:$0xff] %vm104_vm6, %v145_v39 }
 0x109   :  { %v131_v40 = vpop.permute.xlu1 %130  ;;  %v162_v41 = vld [vmem:[#allocation4] sm:$0xff]  ;;  %v159_v45 = vpop.permute.xlu0 %158 }
 0x10a   :  { %133 = vst.msk [vmem:[#allocation4 + $0x10] sm:$0xff] %vm104_vm6, %v131_v40  ;;  %v167_v43 = vpack.c.bf16 %v163_v42, %v162_v41 }
 0x10c   :  { %926 = vmatpush3.bf16.msra.mxu0 %v167_v43 }
 0x10d   :  { %v152_v44 = vpop.permute.xlu1 %151  ;;  %927 = vmatprep.subr.bf16.mxu0 %v1038_v23 }
 0x10e   :  { %154 = vst.msk [vmem:[#allocation4 + $0x20] sm:$0xff] %vm95_vm4, %v152_v44  ;;  %v165_v47 = vld [vmem:[#allocation4 + $0x18] sm:$0xff] }
 0x10f   :  { %161 = vst.msk [vmem:[#allocation4 + $0x20] sm:$0xff] %vm104_vm6, %v159_v45 }
 0x111   :  { %v164_v46 = vld [vmem:[#allocation4 + $0x10] sm:$0xff] }
 0x112   :  { %v168_v48 = vpack.c.bf16 %v165_v47, %v164_v46 }
 0x114   :  { %928 = vmatpush3.bf16.msra.mxu0 %v168_v48 }
 0x115   :  { %929 = vmatprep.subr.bf16.mxu0 %v1038_v23 }
 0x116   :  { %v166_v49 = vld [vmem:[#allocation4 + $0x20] sm:$0xff] }
 0x117   :  { %v169_v50 = vpack.c.bf16 %v166_v49, %v166_v49 }
 0x119   :  { %v183_v51 = vsel %vm181_vm7, %v169_v50, 0 }
 0x11a   :  { %930 = vmatpush3.bf16.msra.mxu0 %v183_v51 }
 0x11b   :  { %955 = vmatprep.subr.bf16.mxu0 %v1038_v23 }
 0x11d   :  { %932 = vmatmul.mubr.msk.bf16.vlgmr.msra.gmra.mrb[0].mxu0 %vm177_vm8, %v170_v52 }
 0x11e   :  { %961 = vmatprep.mubr.msk.bf16.mxu0 %vm1046_vm5, %v1038_v23  ;;  %v175_v53 = vpop.permute.xlu1 %174 }
 0x1f0   :  { %v219_v54 = vpop.f32.mrb[0].mxu0 }
 0x1f1   :  { %v220_v55 = vadd.f32 %v219_v54, %v175_v53  ;;  %v933_v56 = vpop.f32.mrb[1].mxu0 }
 0x1f2   :  { %v222_v57 = vpop.f32.mrb[2].mxu0 }
 0x1f3   :  { %vm225_vm9 = vcmp.ge.f32.partialorder %v220_v55, 0.0  ;;  %v226_v58 = vmul.f32 0.1, %v220_v55  ;;  %v934_v59 = vpop.f32.mrb[3].mxu0  ;;  %v425_v57 = vld [vmem:[%s1332_s2] sm:$0xf] }
 0x1f5   :  { %v227_v60 = vsel %vm225_vm9, %v220_v55, %v226_v58  ;;  %vm511_vm9 = vcmask 212072  }
 0x1f6   :  { %v879_v61 = vpack.c.bf16 %v227_v60, %v227_v60  ;;  %229 = vst.msk [vmem:[%s1329_s11] sm:$0xf] %vm228_vm10, %v227_v60  ;;  %s1053_s11 = smov 9  }
 0x1f8   :  { %239 = vrot.lane.b32.xlu1 %v879_v61, %s1047_s30  ;;  %234 = vrot.lane.b32.xlu0 %v879_v61, %s1035_s17  ;;  %s1049_s30 = smov 13  }
 0x26a   :  { %v240_v63 = vpop.permute.xlu1 %239  ;;  %v235_v0 = vpop.permute.xlu0 %234 }
 0x26b   :  { %243 = vst.msk [vmem:[#allocation3 + $0x4] sm:$0xf] %vm237_vm11, %v240_v63  ;;  %238 = vst.msk [vmem:[#allocation3] sm:$0xf] %vm237_vm11, %v235_v0  ;;  %vm720_vm11 = vcmask 113664  }
 0x26c   :  { %246 = vst.msk [vmem:[#allocation3 + $0x4] sm:$0xf] %vm244_vm12, %v1034_v3  ;;  %245 = vst.msk [vmem:[#allocation3] sm:$0xf] %vm244_vm12, %v1034_v3 }
 0x26d   :  { %249 = vst.msk [vmem:[#allocation3 + $0x4] sm:$0xf] %vm247_vm13, %v1034_v3  ;;  %248 = vst.msk [vmem:[#allocation3] sm:$0xf] %vm247_vm13, %v1034_v3  ;;  %vm743_vm13 = vcmask 56320  }
 0x274   :  { %v260_v5 = vld [vmem:[#allocation3] sm:$0xff]  }
 0x275   :  { %v887_v6 = vld [vmem:[#allocation3] sm:$0xff]   ;;  %v261_v9 = vunpack.c.l.bf16 %v260_v5  ;;  %v268_v11 = vunpack.c.h.bf16 %v260_v5 }
 0x276   :  { %v274_v7 = vld [vmem:[#allocation3] sm:$0xff]   ;;  %v889_v10 = vunpack.c.h.bf16 %v887_v6  ;;  %v888_v13 = vunpack.c.l.bf16 %v887_v6  ;;  %v1031_v6 = vld [vmem:[%s1334_s10] sm:$0xff]  }
 0x277   :  { %263 = vrot.lane.b32.xlu0 %v261_v9, %s1036_s0  ;;  %v275_v12 = vunpack.c.l.bf16 %v274_v7  ;;  %v288_v14 = vld [vmem:[#allocation3] sm:$0xff]   ;;  %v282_v16 = vunpack.c.h.bf16 %v274_v7 }
 0x278   :  { %256 = vrot.lane.b32.xlu1 %v889_v10, %s1039_s19  ;;  %252 = vst.msk [vmem:[#allocation4] sm:$0xff] %vm95_vm4, %v888_v13  ;;  %v289_v15 = vunpack.c.l.bf16 %v288_v14  ;;  %v302_v17 = vld [vmem:[#allocation3] sm:$0xf]  ;;  %v296_v18 = vunpack.c.h.bf16 %v288_v14  ;;  %v309_v20 = vld [vmem:[#allocation3 + $0x4] sm:$0xf] }
 0x279   :  { %v303_v19 = vunpack.c.l.bf16 %v302_v17  ;;  %v310_v21 = vunpack.c.l.bf16 %v309_v20  ;;  %v1032_v7 = vld [vmem:[%s1334_s10 + $0x8] sm:$0x1f]   ;;  %s1050_s10 = smov 12  }
 0x27b   :  { %270 = vrot.lane.b32.xlu0 %v268_v11, %s1037_s18 }
 0x27c   :  { %277 = vrot.lane.b32.xlu1 %v275_v12, %s1041_s21 }
 0x27f   :  { %291 = vrot.lane.b32.xlu0 %v289_v15, %s1040_s20 }
 0x280   :  { %284 = vrot.lane.b32.xlu1 %v282_v16, %s1043_s23  ;;  %s1048_s23 = smov 117  }
 0x283   :  { %298 = vrot.lane.b32.xlu0 %v296_v18, %s1042_s22 }
 0x284   :  { %305 = vrot.lane.b32.xlu1 %v303_v19, %s1045_s25 }
 0x287   :  { %312 = vrot.lane.b32.xlu0 %v310_v21, %s1044_s24 }
 0x288   :  { %429 = vperm.xlu1 %1025, %v426_v22  }
 0x2e9   :  { %v264_v24 = vpop.permute.xlu0 %263 }
 0x2ea   :  { %v257_v25 = vpop.permute.xlu1 %256  ;;  %266 = vst.msk [vmem:[#allocation4 + $0x8] sm:$0xff] %vm95_vm4, %v264_v24 }
 0x2eb   :  { %259 = vst.msk [vmem:[#allocation4] sm:$0xff] %vm104_vm6, %v257_v25 }
 0x2ed   :  { %v271_v26 = vpop.permute.xlu0 %270 }
 0x2ee   :  { %v278_v27 = vpop.permute.xlu1 %277  ;;  %273 = vst.msk [vmem:[#allocation4 + $0x8] sm:$0xff] %vm104_vm6, %v271_v26  ;;  %v665_v26 = vld [vmem:[%s1335_s7] sm:$0xff] }
 0x2ef   :  { %280 = vst.msk [vmem:[#allocation4 + $0x10] sm:$0xff] %vm95_vm4, %v278_v27 }
 0x2f1   :  { %v292_v28 = vpop.permute.xlu0 %291 }
 0x2f2   :  { %v285_v29 = vpop.permute.xlu1 %284  ;;  %294 = vst.msk [vmem:[#allocation4 + $0x18] sm:$0xff] %vm95_vm4, %v292_v28  ;;  %v316_v30 = vld [vmem:[#allocation4] sm:$0xff] }
 0x2f3   :  { %287 = vst.msk [vmem:[#allocation4 + $0x10] sm:$0xff] %vm104_vm6, %v285_v29 }
 0x2f5   :  { %v299_v31 = vpop.permute.xlu0 %298  ;;  %v317_v32 = vld [vmem:[#allocation4 + $0x8] sm:$0xff] }
 0x2f6   :  { %v306_v33 = vpop.permute.xlu1 %305  ;;  %301 = vst.msk [vmem:[#allocation4 + $0x18] sm:$0xff] %vm104_vm6, %v299_v31  ;;  %v321_v34 = vpack.c.bf16 %v317_v32, %v316_v30 }
 0x2f7   :  { %308 = vst.msk [vmem:[#allocation4 + $0x20] sm:$0xff] %vm95_vm4, %v306_v33  ;;  %vm601_vm4 = vcmask 1044480  }
 0x2f8   :  { %944 = vmatmul.mubr.msk.bf16.vlgmr.msra.gmra.mrb[0].mxu1 %vm352_vm15, %v321_v34  ;;  %v603_v11 = vsel %vm601_vm4, %v1032_v7, 0 }
 0x2f9   :  { %v313_v35 = vpop.permute.xlu0 %312  ;;  %947 = vmatprep.mubr.msk.bf16.mxu1 %vm1046_vm5, %v1038_v23 }
 0x2fa   :  { %315 = vst.msk [vmem:[#allocation4 + $0x20] sm:$0xff] %vm104_vm6, %v313_v35  ;;  %v318_v36 = vld [vmem:[#allocation4 + $0x10] sm:$0xff]  ;;  %vm503_vm6 = vcmask 105472  }
 0x2fd   :  { %v319_v37 = vld [vmem:[#allocation4 + $0x18] sm:$0xff] }
 0x2fe   :  { %v322_v38 = vpack.c.bf16 %v319_v37, %v318_v36 }
 0x300   :  { %948 = vmatmul.mubr.msk.bf16.gmra.mrb[4].mxu1 %vm352_vm15, %v322_v38 }
 0x301   :  { %951 = vmatprep.mubr.msk.bf16.mxu1 %vm1046_vm5, %v1038_v23  ;;  %v320_v39 = vld [vmem:[#allocation4 + $0x20] sm:$0xff] }
 0x302   :  { %v323_v40 = vpack.c.bf16 %v320_v39, %v320_v39 }
 0x307   :  { %v430_v58 = vpop.permute.xlu1 %429 }
 0x308   :  { %952 = vmatmul.mubr.msk.bf16.gmra.mrb[8].mxu1 %vm352_vm15, %v323_v40  ;;  %vm793_vm15 = vcmask 195584  }
 0x309   :  { %987 = vmatprep.mubr.msk.bf16.mxu1 %vm1046_vm5, %v1038_v23 }
 0x3cb   :  { %v400_v41 = vpop.f32.mrb[0].mxu1 }
 0x3cc   :  { %v945_v42 = vpop.f32.mrb[1].mxu1 }
 0x3cd   :  { %v403_v43 = vpop.f32.mrb[2].mxu1 }
 0x3ce   :  { %v422_v44 = vpack.c.bf16 %v403_v43, %v400_v41  ;;  %v946_v45 = vpop.f32.mrb[3].mxu1 }
 0x3d0   :  { %956 = vmatpush3.bf16.msra.mxu0 %v422_v44 }
 0x3d1   :  { %957 = vmatprep.subr.bf16.mxu0 %v1038_v23 }
 0x3d3   :  { %v408_v46 = vpop.f32.mrb[4].mxu1 }
 0x3d4   :  { %v949_v47 = vpop.f32.mrb[5].mxu1 }
 0x3d5   :  { %v411_v48 = vpop.f32.mrb[6].mxu1 }
 0x3d6   :  { %v423_v49 = vpack.c.bf16 %v411_v48, %v408_v46  ;;  %v950_v50 = vpop.f32.mrb[7].mxu1 }
 0x3d8   :  { %958 = vmatpush3.bf16.msra.mxu0 %v423_v49 }
 0x3d9   :  { %959 = vmatprep.subr.bf16.mxu0 %v1038_v23 }
 0x3db   :  { %v416_v51 = vpop.f32.mrb[8].mxu1 }
 0x3dc   :  { %v424_v52 = vpack.c.bf16 %v416_v51, %v416_v51  ;;  %v953_v53 = vpop.f32.mrb[9].mxu1 }
 0x3dd   :  { %v419_v54 = vpop.f32.mrb[10].mxu1 }
 0x3de   :  { %v436_v55 = vsel %vm181_vm7, %v424_v52, 0  ;;  %v954_v56 = vpop.f32.mrb[11].mxu1 }
 0x3df   :  { %960 = vmatpush3.bf16.msra.mxu0 %v436_v55 }
 0x3e0   :  { %965 = vmatprep.subr.bf16.mxu0 %v1038_v23 }
 0x3e2   :  { %962 = vmatmul.mubr.msk.bf16.vlgmr.msra.gmra.mrb[4].mxu0 %vm177_vm8, %v425_v57 }
 0x3e3   :  { %969 = vmatprep.mubr.msk.bf16.mxu0 %vm1046_vm5, %v1038_v23  ;;  %966 = vmatpush3.bf16.msra.mxu0 %v1031_v6 }
 0x3e4   :  { %967 = vmatprep.subr.bf16.mxu0 %v1038_v23 }
 0x3e7   :  { %968 = vmatpush3.bf16.msra.mxu0 %v603_v11 }
 0x4b5   :  { %v472_v59 = vpop.f32.mrb[4].mxu0 }
 0x4b6   :  { %v473_v60 = vadd.f32 %v472_v59, %v430_v58  ;;  %v963_v61 = vpop.f32.mrb[5].mxu0 }
 0x4b7   :  { %v475_v62 = vpop.f32.mrb[6].mxu0 }
 0x4b8   :  { %vm478_vm0 = vcmp.ge.f32.partialorder %v473_v60, 0.0  ;;  %v479_v63 = vmul.f32 0.1, %v473_v60  ;;  %v964_v0 = vpop.f32.mrb[7].mxu0 }
 0x4ba   :  { %v480_v1 = vsel %vm478_vm0, %v473_v60, %v479_v63  ;;  %v664_v60 = vld [vmem:[%s1336_s3] sm:$0xf]  ;;  %vm840_vm0 = vcmask 106496  }
 0x4bb   :  { %v880_v2 = vpack.c.bf16 %v480_v1, %v480_v1  ;;  %482 = vst.msk [vmem:[%s1333_s12] sm:$0xff] %vm481_vm1, %v480_v1 }
 0x4bd   :  { %492 = vrot.lane.b32.xlu1 %v880_v2, %s1048_s23  ;;  %487 = vrot.lane.b32.xlu0 %v880_v2, %s1035_s17 }
 0x52f   :  { %v493_v4 = vpop.permute.xlu1 %492  ;;  %v488_v5 = vpop.permute.xlu0 %487 }
 0x530   :  { %495 = vst.msk [vmem:[#allocation2 + $0x4] sm:$0xf] %vm490_vm2, %v493_v4  ;;  %491 = vst.msk [vmem:[#allocation2] sm:$0xf] %vm490_vm2, %v488_v5 }
 0x531   :  { %497 = vst.msk [vmem:[#allocation2 + $0x4] sm:$0xf] %vm244_vm12, %v1034_v3  ;;  %496 = vst.msk [vmem:[#allocation2] sm:$0xf] %vm244_vm12, %v1034_v3  ;;  %vm738_vm12 = vcmask 68672  }
 0x532   :  { %499 = vst.msk [vmem:[#allocation2] sm:$0xf] %vm498_vm3, %v1034_v3  ;;  %500 = vst.msk [vmem:[#allocation2 + $0x4] sm:$0xf] %vm498_vm3, %v1034_v3 }
 0x539   :  { %v513_v8 = vld [vmem:[#allocation2] sm:$0xf]  ;;  %v562_v24 = vld [vmem:[#allocation2 + $0x4] sm:$0xf] }
 0x53a   :  { %v891_v9 = vld [vmem:[#allocation2] sm:$0xff]   ;;  %v514_v12 = vunpack.c.l.bf16 %v513_v8  ;;  %v563_v25 = vunpack.c.l.bf16 %v562_v24 }
 0x53b   :  { %v520_v10 = vld [vmem:[#allocation2] sm:$0xff]   ;;  %v893_v13 = vunpack.c.h.bf16 %v891_v9  ;;  %v892_v14 = vunpack.c.l.bf16 %v891_v9 }
 0x53c   :  { %516 = vrot.lane.b32.xlu0 %v514_v12, %s1036_s0  ;;  %v521_v15 = vunpack.c.h.bf16 %v520_v10  ;;  %v528_v16 = vunpack.c.l.bf16 %v520_v10  ;;  %v541_v17 = vld [vmem:[#allocation2] sm:$0xff]  }
 0x53d   :  { %508 = vrot.lane.b32.xlu1 %v893_v13, %s1049_s30  ;;  %504 = vst.msk [vmem:[#allocation4] sm:$0xff] %vm503_vm6, %v892_v14  ;;  %v542_v18 = vunpack.c.l.bf16 %v541_v17  ;;  %v535_v19 = vunpack.c.h.bf16 %v541_v17  ;;  %v548_v20 = vld [vmem:[#allocation2] sm:$0xff]  }
 0x53e   :  { %v549_v21 = vunpack.c.h.bf16 %v548_v20  ;;  %v556_v22 = vunpack.c.l.bf16 %v548_v20 }
 0x540   :  { %523 = vrot.lane.b32.xlu0 %v521_v15, %s1050_s10 }
 0x541   :  { %530 = vrot.lane.b32.xlu1 %v528_v16, %s1041_s21 }
 0x544   :  { %544 = vrot.lane.b32.xlu0 %v542_v18, %s1040_s20  ;;  %v787_v18 = vld [vmem:[%s1338_s8] sm:$0xff] }
 0x545   :  { %537 = vrot.lane.b32.xlu1 %v535_v19, %s1051_s15 }
 0x548   :  { %551 = vrot.lane.b32.xlu0 %v549_v21, %s1052_s16 }
 0x549   :  { %558 = vrot.lane.b32.xlu1 %v556_v22, %s1045_s25 }
 0x54c   :  { %565 = vrot.lane.b32.xlu0 %v563_v25, %s1053_s11 }
 0x54d   :  { %668 = vperm.xlu1 %1025, %v665_v26  }
 0x5ae   :  { %v517_v27 = vpop.permute.xlu0 %516 }
 0x5af   :  { %v509_v28 = vpop.permute.xlu1 %508  ;;  %519 = vst.msk [vmem:[#allocation4 + $0x8] sm:$0xff] %vm503_vm6, %v517_v27 }
 0x5b0   :  { %512 = vst.msk [vmem:[#allocation4] sm:$0xff] %vm511_vm9, %v509_v28 }
 0x5b2   :  { %v524_v29 = vpop.permute.xlu0 %523 }
 0x5b3   :  { %v531_v30 = vpop.permute.xlu1 %530  ;;  %526 = vst.msk [vmem:[#allocation4 + $0x8] sm:$0xff] %vm511_vm9, %v524_v29 }
 0x5b4   :  { %533 = vst.msk [vmem:[#allocation4 + $0x10] sm:$0xff] %vm503_vm6, %v531_v30 }
 0x5b6   :  { %v545_v31 = vpop.permute.xlu0 %544 }
 0x5b7   :  { %v538_v32 = vpop.permute.xlu1 %537  ;;  %547 = vst.msk [vmem:[#allocation4 + $0x18] sm:$0xff] %vm503_vm6, %v545_v31  ;;  %v569_v33 = vld [vmem:[#allocation4] sm:$0xff]  ;;  %v786_v31 = vld [vmem:[%s1339_s4] sm:$0xf] }
 0x5b8   :  { %540 = vst.msk [vmem:[#allocation4 + $0x10] sm:$0xff] %vm511_vm9, %v538_v32 }
 0x5ba   :  { %v552_v34 = vpop.permute.xlu0 %551  ;;  %v570_v35 = vld [vmem:[#allocation4 + $0x8] sm:$0xff] }
 0x5bb   :  { %v559_v36 = vpop.permute.xlu1 %558  ;;  %554 = vst.msk [vmem:[#allocation4 + $0x18] sm:$0xff] %vm511_vm9, %v552_v34  ;;  %v574_v37 = vpack.c.bf16 %v570_v35, %v569_v33 }
 0x5bc   :  { %561 = vst.msk [vmem:[#allocation4 + $0x20] sm:$0xff] %vm503_vm6, %v559_v36 }
 0x5bd   :  { %970 = vmatmul.mubr.msk.bf16.vlgmr.msra.gmra.mrb[8].mxu0 %vm481_vm1, %v574_v37 }
 0x5be   :  { %v566_v38 = vpop.permute.xlu0 %565  ;;  %973 = vmatprep.mubr.msk.bf16.mxu0 %vm1046_vm5, %v1038_v23 }
 0x5bf   :  { %568 = vst.msk [vmem:[#allocation4 + $0x20] sm:$0xff] %vm511_vm9, %v566_v38  ;;  %v571_v39 = vld [vmem:[#allocation4 + $0x10] sm:$0xff] }
 0x5c2   :  { %v572_v40 = vld [vmem:[#allocation4 + $0x18] sm:$0xff] }
 0x5c3   :  { %v575_v41 = vpack.c.bf16 %v572_v40, %v571_v39 }
 0x5c5   :  { %974 = vmatmul.mubr.msk.bf16.gmra.mrb[12].mxu0 %vm481_vm1, %v575_v41 }
 0x5c6   :  { %977 = vmatprep.mubr.msk.bf16.mxu0 %vm1046_vm5, %v1038_v23  ;;  %v573_v42 = vld [vmem:[#allocation4 + $0x20] sm:$0xff] }
 0x5c7   :  { %v576_v43 = vpack.c.bf16 %v573_v42, %v573_v42 }
 0x5cc   :  { %v669_v61 = vpop.permute.xlu1 %668 }
 0x5cd   :  { %978 = vmatmul.mubr.msk.bf16.gmra.mrb[16].mxu0 %vm481_vm1, %v576_v43 }
 0x690   :  { %v639_v44 = vpop.f32.mrb[8].mxu0 }
 0x691   :  { %v971_v45 = vpop.f32.mrb[9].mxu0 }
 0x692   :  { %v642_v46 = vpop.f32.mrb[10].mxu0 }
 0x693   :  { %v661_v47 = vpack.c.bf16 %v642_v46, %v639_v44  ;;  %v972_v48 = vpop.f32.mrb[11].mxu0 }
 0x695   :  { %982 = vmatpush3.bf16.msra.mxu1 %v661_v47 }
 0x696   :  { %983 = vmatprep.subr.bf16.mxu1 %v1038_v23 }
 0x698   :  { %v647_v49 = vpop.f32.mrb[12].mxu0 }
 0x699   :  { %v975_v50 = vpop.f32.mrb[13].mxu0 }
 0x69a   :  { %v650_v51 = vpop.f32.mrb[14].mxu0 }
 0x69b   :  { %v662_v52 = vpack.c.bf16 %v650_v51, %v647_v49  ;;  %v976_v53 = vpop.f32.mrb[15].mxu0 }
 0x69d   :  { %984 = vmatpush3.bf16.msra.mxu1 %v662_v52 }
 0x69e   :  { %985 = vmatprep.subr.bf16.mxu1 %v1038_v23 }
 0x6a0   :  { %v655_v54 = vpop.f32.mrb[16].mxu0 }
 0x6a1   :  { %v663_v55 = vpack.c.bf16 %v655_v54, %v655_v54  ;;  %v979_v56 = vpop.f32.mrb[17].mxu0 }
 0x6a2   :  { %v658_v57 = vpop.f32.mrb[18].mxu0 }
 0x6a3   :  { %v675_v58 = vsel %vm181_vm7, %v663_v55, 0  ;;  %v980_v59 = vpop.f32.mrb[19].mxu0 }
 0x6a4   :  { %986 = vmatpush3.bf16.msra.mxu1 %v675_v58 }
 0x6a5   :  { %991 = vmatprep.subr.bf16.mxu1 %v1038_v23 }
 0x6a7   :  { %988 = vmatmul.mubr.msk.bf16.vlgmr.msra.gmra.mrb[12].mxu1 %vm177_vm8, %v664_v60  ;;  %vm735_vm8 = vcmask 3072  }
 0x6a8   :  { %995 = vmatprep.mubr.msk.bf16.mxu1 %vm1046_vm5, %v1038_v23  ;;  %vm729_vm5 = vcmask 60424  }
 0x77a   :  { %v711_v62 = vpop.f32.mrb[12].mxu1 }
 0x77b   :  { %v712_v63 = vadd.f32 %v711_v62, %v669_v61  ;;  %v989_v0 = vpop.f32.mrb[13].mxu1 }
 0x77c   :  { %v714_v1 = vpop.f32.mrb[14].mxu1 }
 0x77d   :  { %vm717_vm10 = vcmp.ge.f32.partialorder %v712_v63, 0.0  ;;  %v718_v2 = vmul.f32 0.1, %v712_v63  ;;  %v990_v4 = vpop.f32.mrb[15].mxu1 }
 0x77f   :  { %v719_v5 = vsel %vm717_vm10, %v712_v63, %v718_v2 }
 0x780   :  { %v881_v6 = vpack.c.bf16 %v719_v5, %v719_v5  ;;  %721 = vst.msk [vmem:[%s1337_s13] sm:$0xff] %vm720_vm11, %v719_v5  ;;  %s1056_s13 = smov 7  }
 0x782   :  { %731 = vrot.lane.b32.xlu1 %v881_v6, %s1054_s5  ;;  %726 = vrot.lane.b32.xlu0 %v881_v6, %s1055_s28 }
 0x7f4   :  { %v732_v7 = vpop.permute.xlu1 %731  ;;  %v727_v8 = vpop.permute.xlu0 %726 }
 0x7f5   :  { %734 = vst.msk [vmem:[#allocation3 + $0x4] sm:$0xf] %vm729_vm5, %v732_v7  ;;  %730 = vst.msk [vmem:[#allocation3] sm:$0xf] %vm729_vm5, %v727_v8 }
 0x7f6   :  { %737 = vst.msk [vmem:[#allocation3 + $0x4] sm:$0xf] %vm735_vm8, %v1034_v3  ;;  %736 = vst.msk [vmem:[#allocation3] sm:$0xf] %vm735_vm8, %v1034_v3 }
 0x7f7   :  { %739 = vst.msk [vmem:[#allocation3] sm:$0xf] %vm738_vm12, %v1034_v3  ;;  %740 = vst.msk [vmem:[#allocation3 + $0x4] sm:$0xf] %vm738_vm12, %v1034_v3 }
 0x7fe   :  { %v753_v9 = vld [vmem:[#allocation3] sm:$0xf]  ;;  %v774_v17 = vld [vmem:[#allocation3 + $0x4] sm:$0xf] }
 0x7ff   :  { %v895_v10 = vld [vmem:[#allocation3] sm:$0xff]   ;;  %v754_v12 = vunpack.c.l.bf16 %v753_v9  ;;  %v775_v3 = vunpack.c.l.bf16 %v774_v17 }
 0x800   :  { %v760_v11 = vld [vmem:[#allocation3] sm:$0xff]   ;;  %v897_v13 = vunpack.c.h.bf16 %v895_v10  ;;  %v896_v14 = vunpack.c.l.bf16 %v895_v10 }
 0x801   :  { %756 = vrot.lane.b32.xlu0 %v754_v12, %s1036_s0  ;;  %v761_v15 = vunpack.c.h.bf16 %v760_v11  ;;  %v768_v16 = vunpack.c.l.bf16 %v760_v11 }
 0x802   :  { %748 = vrot.lane.b32.xlu1 %v897_v13, %s1056_s13  ;;  %744 = vst.msk [vmem:[#allocation4] sm:$0xff] %vm743_vm13, %v896_v14 }
 0x805   :  { %763 = vrot.lane.b32.xlu0 %v761_v15, %s1057_s1 }
 0x806   :  { %770 = vrot.lane.b32.xlu1 %v768_v16, %s1041_s21 }
 0x809   :  { %777 = vrot.lane.b32.xlu0 %v775_v3, %s1058_s6 }
 0x80a   :  { %790 = vperm.xlu1 %1025, %v787_v18  }
 0x873   :  { %v757_v19 = vpop.permute.xlu0 %756 }
 0x874   :  { %v749_v20 = vpop.permute.xlu1 %748  ;;  %759 = vst.msk [vmem:[#allocation4 + $0x8] sm:$0xff] %vm743_vm13, %v757_v19 }
 0x875   :  { %752 = vst.msk [vmem:[#allocation4] sm:$0xff] %vm751_vm14, %v749_v20 }
 0x877   :  { %v764_v21 = vpop.permute.xlu0 %763 }
 0x878   :  { %v771_v22 = vpop.permute.xlu1 %770  ;;  %766 = vst.msk [vmem:[#allocation4 + $0x8] sm:$0xff] %vm751_vm14, %v764_v21 }
 0x879   :  { %773 = vst.msk [vmem:[#allocation4 + $0x10] sm:$0xff] %vm743_vm13, %v771_v22 }
 0x87b   :  { %v778_v24 = vpop.permute.xlu0 %777 }
 0x87c   :  { %780 = vst.msk [vmem:[#allocation4 + $0x10] sm:$0xff] %vm751_vm14, %v778_v24  ;;  %v781_v25 = vld [vmem:[#allocation4] sm:$0xff] }
 0x87f   :  { %v782_v26 = vld [vmem:[#allocation4 + $0x8] sm:$0xff] }
 0x880   :  { %v784_v27 = vpack.c.bf16 %v782_v26, %v781_v25 }
 0x882   :  { %992 = vmatpush3.bf16.msra.mxu1 %v784_v27 }
 0x883   :  { %993 = vmatprep.subr.bf16.mxu1 %v1038_v23  ;;  %v783_v28 = vld [vmem:[#allocation4 + $0x10] sm:$0xff] }
 0x884   :  { %v785_v29 = vpack.c.bf16 %v783_v28, %v783_v28 }
 0x886   :  { %v798_v30 = vsel %vm181_vm7, %v785_v29, 0 }
 0x887   :  { %994 = vmatpush3.bf16.msra.mxu1 %v798_v30 }
 0x889   :  { %v791_v32 = vpop.permute.xlu1 %790 }
 0x88a   :  { %996 = vmatmul.mubr.msk.bf16.vlgmr.msra.gmra.mrb[16].mxu1 %vm793_vm15, %v786_v31 }
 0x95d   :  { %v834_v33 = vpop.f32.mrb[16].mxu1 }
 0x95e   :  { %v835_v34 = vadd.f32 %v834_v33, %v791_v32  ;;  %v997_v35 = vpop.f32.mrb[17].mxu1 }
 0x95f   :  { %v837_v36 = vpop.f32.mrb[18].mxu1 }
 0x960   :  { %841 = vst.msk [vmem:[%s1340_s14] sm:$0x1] %vm840_vm0, %v835_v34  ;;  %v998_v23 = vpop.f32.mrb[19].mxu1 }

// kernel: discriminator_forward.6
= control target key start
LH: loop header
LB: loop body
LE: loop exit
PB: predicated region body
PF: predicated region fallthrough
CT: control target
= control target key end

     0   :  { %v60_v0 = vlaneseq  ;;  %vm43_vm0 = vcmask 420864   ;;  %v1066_v1 = vmov 1935823168   ;;  %v1067_v3 = vmov 0   ;;  %s1068_s17 = smov 2   ;;  %s1070_s18 = smov 47   ;;  %s1373_s0 = inlined_call_operand.vmem [shape: bf16[2,1,48], index: 0, kind: input, shape index: {}]   ;;  %s1374_s5 = inlined_call_operand.vmem [shape: f32[8,1], index: 5, kind: input, shape index: {}]   ;;  %s1375_s1 = inlined_call_operand.vmem [shape: bf16[8,40], index: 1, kind: input, shape index: {}]   ;;  %s1376_s11 = inlined_call_operand.vmem [shape: f32[4,96], index: 11, kind: output, shape index: {0}]   ;;  %s1377_s9 = inlined_call_operand.vmem [shape: bf16[96,48], index: 9, kind: input, shape index: {}]   ;;  %s1378_s6 = inlined_call_operand.vmem [shape: f32[8,1], index: 6, kind: input, shape index: {}]   ;;  %s1379_s2 = inlined_call_operand.vmem [shape: bf16[8,40], index: 2, kind: input, shape index: {}]   ;;  %s1380_s12 = inlined_call_operand.vmem [shape: f32[8,48], index: 12, kind: output, shape index: {1}]   ;;  %s1381_s10 = inlined_call_operand.vmem [shape: bf16[48,24], index: 10, kind: input, shape index: {}]   ;;  %s1382_s7 = inlined_call_operand.vmem [shape: f32[8,1], index: 7, kind: input, shape index: {}]   ;;  %s1383_s3 = inlined_call_operand.vmem [shape: bf16[8,40], index: 3, kind: input, shape index: {}]   ;;  %s1384_s13 = inlined_call_operand.vmem [shape: f32[8,24], index: 13, kind: output, shape index: {2}]   ;;  %s1385_s8 = inlined_call_operand.vmem [shape: f32[8,1], index: 8, kind: input, shape index: {}]   ;;  %s1386_s4 = inlined_call_operand.vmem [shape: bf16[8,24], index: 4, kind: input, shape index: {}]   ;;  %s1387_s14 = inlined_call_operand.vmem [shape: f32[1,24], index: 14, kind: output, shape index: {3}]  }
   0x1   :  { %v58_v2 = vunpack.c.l.s4 %v1066_v1  ;;  %44 = vst.msk [vmem:[#allocation2] sm:$0xf] %vm43_vm0, %v1067_v3  ;;  %45 = vst.msk [vmem:[#allocation2 + $0x4] sm:$0xf] %vm43_vm0, %v1067_v3  ;;  %1055 = vset.pattern.permute.xlu1 %v1067_v3  ;;  %1056 = vset.pattern.permute.xlu0 %v1067_v3  ;;  %vm84_vm1 = vcmask 401424   ;;  %vm95_vm4 = vcmask 392192  }
   0x2   :  { %v61_v4 = vshrl.u32 %v60_v0, 7  ;;  %v876_v6 = vld.sshfl [vmem:[%s1373_s0] sm:$0x1 pattern:$0x73625140]  ;;  %v1071_v23 = vmov 0.0  }
   0x3   :  { %v59_v5 = vunpack.c.0.s8 %v58_v2  ;;  %v877_v8 = vld.sshfl [vmem:[%s1373_s0 + $0x1] sm:$0x1 pattern:$0x73625140]  ;;  %vm85_vm2 = vsmask.f32 256  ;;  %949 = vmatprep.subr.bf16.mxu0 %v1071_v23  ;;  %959 = vmatprep.subr.bf16.mxu1 %v1071_v23 }
   0x4   :  { %vm86_vm3 = vmand %vm84_vm1, %vm85_vm2  ;;  %s1069_s0 = smov 127   ;;  %s1072_s19 = smov 48   ;;  %vm1079_vm5 = vmmov 0   ;;  %v171_v33 = vld [vmem:[%s1374_s5] sm:$0xff]  ;;  %vm104_vm6 = vcmask 785792   ;;  %vm181_vm7 = vcmask 1043456  }
   0x5   :  { %v62_v7 = vsub.s32 %v59_v5, %v61_v4  ;;  %s1073_s20 = smov 125   ;;  %s1074_s21 = smov 126   ;;  %955 = vmatprep.mubr.msk.bf16.mxu0 %vm1079_vm5, %v1071_v23  ;;  %971 = vmatprep.mubr.msk.bf16.mxu1 %vm1079_vm5, %v1071_v23  ;;  %v170_v52 = vld [vmem:[%s1375_s1] sm:$0xf]  ;;  %vm177_vm8 = vcmask 326656   ;;  %vm228_vm10 = vcmask 781312  }
   0x6   :  { %s1075_s22 = smov 45   ;;  %s1076_s23 = smov 46   ;;  %v1057_v62 = vld [vmem:[%s1377_s9] sm:$0xff]   ;;  %v1058_v63 = vld [vmem:[%s1377_s9 + $0x8] sm:$0xff]   ;;  %v1059_v0 = vld [vmem:[%s1377_s9 + $0x10] sm:$0xff]   ;;  %vm237_vm11 = vcmask 404496  }
   0x7   :  { %v63_v9 = vrot.slane %v876_v6, %v62_v7  ;;  %v77_v10 = vrot.slane %v877_v8, %v62_v7  ;;  %s1077_s24 = smov 44   ;;  %s1078_s25 = smov 124   ;;  %960 = vmatpush3.bf16.msra.mxu1 %v1057_v62  ;;  %vm244_vm12 = vcmask 11264   ;;  %vm247_vm13 = vcmask 421264   ;;  %v1060_v4 = vld [vmem:[%s1377_s9 + $0x18] sm:$0xff]   ;;  %v1061_v5 = vld [vmem:[%s1377_s9 + $0x20] sm:$0xff]  }
   0x8   :  { %v87_v11 = vld [vmem:[#allocation2] sm:$0x1]  ;;  %v90_v14 = vld [vmem:[#allocation2 + $0x4] sm:$0x1]  ;;  %s1080_s30 = smov 82   ;;  %961 = vmatprep.subr.bf16.mxu1 %v1071_v23  ;;  %v1062_v6 = vld [vmem:[%s1377_s9 + $0x28] sm:$0xff]  }
   0x9   :  { %78 = vrot.lane.b32.xlu0 %v63_v9, %s1068_s17  ;;  %vm372_vm14 = vcmask 785408   ;;  %vm505_vm0 = vcmask 207888   ;;  %vm513_vm1 = vcmask 224464   ;;  %vm518_vm2 = vcmask 195584   ;;  %s1082_s28 = smov 24   ;;  %s1085_s1 = smov 21  }
   0xa   :  { %s1086_s15 = smov 20   ;;  %s1087_s16 = smov 117  }
   0xb   :  { %962 = vmatpush3.bf16.msra.mxu1 %v1058_v63  ;;  %s1088_s9 = smov 1  }
   0xc   :  { %963 = vmatprep.subr.bf16.mxu1 %v1071_v23 }
   0xd   :  { %80 = vrot.lane.b32.xlu0 %v77_v10, %s1068_s17 }
   0xf   :  { %964 = vmatpush3.bf16.msra.mxu1 %v1059_v0 }
  0x10   :  { %965 = vmatprep.subr.bf16.mxu1 %v1071_v23 }
  0x13   :  { %966 = vmatpush3.bf16.msra.mxu1 %v1060_v4 }
  0x14   :  { %967 = vmatprep.subr.bf16.mxu1 %v1071_v23 }
  0x17   :  { %968 = vmatpush3.bf16.msra.mxu1 %v1061_v5 }
  0x18   :  { %969 = vmatprep.subr.bf16.mxu1 %v1071_v23 }
  0x1b   :  { %970 = vmatpush3.bf16.msra.mxu1 %v1062_v6 }
  0x1c   :  { %1011 = vmatprep.subr.bf16.mxu1 %v1071_v23 }
  0x7b   :  { %v79_v12 = vpop.permute.xlu0 %78 }
  0x7c   :  { %v88_v13 = vsel %vm86_vm3, %v79_v12, %v87_v11 }
  0x7d   :  { %89 = vst [vmem:[#allocation2] sm:$0x1] %v88_v13 }
  0x7f   :  { %v81_v15 = vpop.permute.xlu0 %80 }
  0x80   :  { %v91_v16 = vsel %vm86_vm3, %v81_v15, %v90_v14  ;;  %vm526_vm3 = vcmask 392384  }
  0x81   :  { %92 = vst [vmem:[#allocation2 + $0x4] sm:$0x1] %v91_v16 }
  0x88   :  { %v106_v17 = vld [vmem:[#allocation2] sm:$0xff]  }
  0x89   :  { %v904_v18 = vld [vmem:[#allocation2] sm:$0xff]   ;;  %v107_v19 = vunpack.c.l.bf16 %v106_v17  ;;  %v114_v20 = vunpack.c.h.bf16 %v106_v17 }
  0x8a   :  { %v134_v21 = vld [vmem:[#allocation2] sm:$0xff]   ;;  %v905_v22 = vunpack.c.l.bf16 %v904_v18  ;;  %v906_v24 = vunpack.c.h.bf16 %v904_v18 }
  0x8b   :  { %109 = vrot.lane.b32.xlu1 %v107_v19, %s1069_s0  ;;  %116 = vrot.lane.b32.xlu0 %v114_v20, %s1070_s18  ;;  %v135_v25 = vunpack.c.l.bf16 %v134_v21  ;;  %v120_v26 = vld [vmem:[#allocation2] sm:$0xff]   ;;  %v142_v28 = vunpack.c.h.bf16 %v134_v21 }
  0x8c   :  { %96 = vst.msk [vmem:[#allocation4] sm:$0xff] %vm95_vm4, %v905_v22  ;;  %v121_v27 = vunpack.c.l.bf16 %v120_v26  ;;  %v155_v29 = vld [vmem:[#allocation2] sm:$0xff]   ;;  %v128_v30 = vunpack.c.h.bf16 %v120_v26 }
  0x8d   :  { %v156_v31 = vunpack.c.h.bf16 %v155_v29  ;;  %v149_v32 = vunpack.c.l.bf16 %v155_v29 }
  0x8f   :  { %101 = vrot.lane.b32.xlu1 %v906_v24, %s1072_s19  ;;  %137 = vrot.lane.b32.xlu0 %v135_v25, %s1073_s20  ;;  %v442_v24 = vld [vmem:[%s1378_s6] sm:$0xff] }
  0x93   :  { %123 = vrot.lane.b32.xlu1 %v121_v27, %s1074_s21  ;;  %144 = vrot.lane.b32.xlu0 %v142_v28, %s1075_s22 }
  0x97   :  { %130 = vrot.lane.b32.xlu1 %v128_v30, %s1076_s23  ;;  %158 = vrot.lane.b32.xlu0 %v156_v31, %s1077_s24 }
  0x9b   :  { %151 = vrot.lane.b32.xlu1 %v149_v32, %s1078_s25 }
  0x9f   :  { %174 = vperm.xlu1 %1055, %v171_v33  }
  0xfd   :  { %v110_v34 = vpop.permute.xlu1 %109  ;;  %v117_v35 = vpop.permute.xlu0 %116 }
  0xfe   :  { %112 = vst.msk [vmem:[#allocation4 + $0x8] sm:$0xff] %vm95_vm4, %v110_v34 }
  0xff   :  { %119 = vst.msk [vmem:[#allocation4 + $0x8] sm:$0xff] %vm104_vm6, %v117_v35 }
 0x101   :  { %v102_v36 = vpop.permute.xlu1 %101  ;;  %v138_v37 = vpop.permute.xlu0 %137 }
 0x102   :  { %105 = vst.msk [vmem:[#allocation4] sm:$0xff] %vm104_vm6, %v102_v36 }
 0x103   :  { %140 = vst.msk [vmem:[#allocation4 + $0x18] sm:$0xff] %vm95_vm4, %v138_v37 }
 0x105   :  { %v124_v38 = vpop.permute.xlu1 %123  ;;  %v145_v39 = vpop.permute.xlu0 %144 }
 0x106   :  { %126 = vst.msk [vmem:[#allocation4 + $0x10] sm:$0xff] %vm95_vm4, %v124_v38  ;;  %v163_v42 = vld [vmem:[#allocation4 + $0x8] sm:$0xff] }
 0x107   :  { %147 = vst.msk [vmem:[#allocation4 + $0x18] sm:$0xff] %vm104_vm6, %v145_v39 }
 0x109   :  { %v131_v40 = vpop.permute.xlu1 %130  ;;  %v162_v41 = vld [vmem:[#allocation4] sm:$0xff]  ;;  %v159_v45 = vpop.permute.xlu0 %158 }
 0x10a   :  { %133 = vst.msk [vmem:[#allocation4 + $0x10] sm:$0xff] %vm104_vm6, %v131_v40  ;;  %v167_v43 = vpack.c.bf16 %v163_v42, %v162_v41 }
 0x10c   :  { %950 = vmatpush3.bf16.msra.mxu0 %v167_v43 }
 0x10d   :  { %v152_v44 = vpop.permute.xlu1 %151  ;;  %951 = vmatprep.subr.bf16.mxu0 %v1071_v23 }
 0x10e   :  { %154 = vst.msk [vmem:[#allocation4 + $0x20] sm:$0xff] %vm95_vm4, %v152_v44  ;;  %v165_v47 = vld [vmem:[#allocation4 + $0x18] sm:$0xff] }
 0x10f   :  { %161 = vst.msk [vmem:[#allocation4 + $0x20] sm:$0xff] %vm104_vm6, %v159_v45 }
 0x111   :  { %v164_v46 = vld [vmem:[#allocation4 + $0x10] sm:$0xff] }
 0x112   :  { %v168_v48 = vpack.c.bf16 %v165_v47, %v164_v46 }
 0x114   :  { %952 = vmatpush3.bf16.msra.mxu0 %v168_v48 }
 0x115   :  { %953 = vmatprep.subr.bf16.mxu0 %v1071_v23 }
 0x116   :  { %v166_v49 = vld [vmem:[#allocation4 + $0x20] sm:$0xff] }
 0x117   :  { %v169_v50 = vpack.c.bf16 %v166_v49, %v166_v49 }
 0x119   :  { %v183_v51 = vsel %vm181_vm7, %v169_v50, 0 }
 0x11a   :  { %954 = vmatpush3.bf16.msra.mxu0 %v183_v51 }
 0x11b   :  { %983 = vmatprep.subr.bf16.mxu0 %v1071_v23 }
 0x11d   :  { %956 = vmatmul.mubr.msk.bf16.vlgmr.msra.gmra.mrb[0].mxu0 %vm177_vm8, %v170_v52 }
 0x11e   :  { %989 = vmatprep.mubr.msk.bf16.mxu0 %vm1079_vm5, %v1071_v23  ;;  %v175_v53 = vpop.permute.xlu1 %174 }
 0x1f0   :  { %v219_v54 = vpop.f32.mrb[0].mxu0 }
 0x1f1   :  { %v220_v55 = vadd.f32 %v219_v54, %v175_v53  ;;  %v957_v56 = vpop.f32.mrb[1].mxu0 }
 0x1f2   :  { %v222_v57 = vpop.f32.mrb[2].mxu0 }
 0x1f3   :  { %vm225_vm9 = vcmp.ge.f32.partialorder %v220_v55, 0.0  ;;  %v226_v58 = vmul.f32 0.1, %v220_v55  ;;  %v958_v59 = vpop.f32.mrb[3].mxu0 }
 0x1f5   :  { %v227_v60 = vsel %vm225_vm9, %v220_v55, %v226_v58  ;;  %v441_v58 = vld [vmem:[%s1379_s2] sm:$0xf]  ;;  %vm762_vm9 = vcmask 97280  }
 0x1f6   :  { %v900_v61 = vpack.c.bf16 %v227_v60, %v227_v60  ;;  %229 = vst.msk [vmem:[%s1376_s11] sm:$0xf] %vm228_vm10, %v227_v60  ;;  %s1083_s11 = smov 23   ;;  %vm770_vm10 = vcmask 195680  }
 0x1f8   :  { %239 = vrot.lane.b32.xlu1 %v900_v61, %s1080_s30  ;;  %234 = vrot.lane.b32.xlu0 %v900_v61, %s1068_s17 }
 0x26a   :  { %v240_v1 = vpop.permute.xlu1 %239  ;;  %v235_v2 = vpop.permute.xlu0 %234 }
 0x26b   :  { %243 = vst.msk [vmem:[#allocation3 + $0x4] sm:$0xf] %vm237_vm11, %v240_v1  ;;  %238 = vst.msk [vmem:[#allocation3] sm:$0xf] %vm237_vm11, %v235_v2  ;;  %vm858_vm11 = vcmask 188416  }
 0x26c   :  { %246 = vst.msk [vmem:[#allocation3 + $0x4] sm:$0xf] %vm244_vm12, %v1067_v3  ;;  %245 = vst.msk [vmem:[#allocation3] sm:$0xf] %vm244_vm12, %v1067_v3 }
 0x26d   :  { %249 = vst.msk [vmem:[#allocation3 + $0x4] sm:$0xf] %vm247_vm13, %v1067_v3  ;;  %248 = vst.msk [vmem:[#allocation3] sm:$0xf] %vm247_vm13, %v1067_v3 }
 0x274   :  { %v260_v7 = vld [vmem:[#allocation3] sm:$0xff]  }
 0x275   :  { %v908_v8 = vld [vmem:[#allocation3] sm:$0xff]   ;;  %v261_v10 = vunpack.c.l.bf16 %v260_v7  ;;  %v268_v12 = vunpack.c.h.bf16 %v260_v7  ;;  %v1063_v7 = vld [vmem:[%s1381_s10] sm:$0xff]  }
 0x276   :  { %v274_v9 = vld [vmem:[#allocation3] sm:$0xff]   ;;  %v910_v11 = vunpack.c.h.bf16 %v908_v8  ;;  %v909_v14 = vunpack.c.l.bf16 %v908_v8 }
 0x277   :  { %263 = vrot.lane.b32.xlu0 %v261_v10, %s1069_s0  ;;  %v275_v13 = vunpack.c.l.bf16 %v274_v9  ;;  %v288_v15 = vld [vmem:[#allocation3] sm:$0xff]   ;;  %v282_v17 = vunpack.c.h.bf16 %v274_v9  ;;  %v1065_v9 = vld [vmem:[%s1381_s10 + $0x10] sm:$0xff]  }
 0x278   :  { %256 = vrot.lane.b32.xlu1 %v910_v11, %s1072_s19  ;;  %252 = vst.msk [vmem:[#allocation4] sm:$0xff] %vm95_vm4, %v909_v14  ;;  %v289_v16 = vunpack.c.l.bf16 %v288_v15  ;;  %v302_v18 = vld [vmem:[#allocation3] sm:$0xf]  ;;  %v296_v19 = vunpack.c.h.bf16 %v288_v15  ;;  %v309_v21 = vld [vmem:[#allocation3 + $0x4] sm:$0xf]  ;;  %s1090_s19 = smov 11  }
 0x279   :  { %v303_v20 = vunpack.c.l.bf16 %v302_v18  ;;  %v310_v22 = vunpack.c.l.bf16 %v309_v21  ;;  %v1064_v8 = vld [vmem:[%s1381_s10 + $0x8] sm:$0xff]   ;;  %s1084_s10 = smov 22  }
 0x27b   :  { %270 = vrot.lane.b32.xlu0 %v268_v12, %s1070_s18 }
 0x27c   :  { %277 = vrot.lane.b32.xlu1 %v275_v13, %s1074_s21 }
 0x27f   :  { %291 = vrot.lane.b32.xlu0 %v289_v16, %s1073_s20 }
 0x280   :  { %284 = vrot.lane.b32.xlu1 %v282_v17, %s1076_s23  ;;  %s1081_s23 = smov 106  }
 0x283   :  { %298 = vrot.lane.b32.xlu0 %v296_v19, %s1075_s22  ;;  %s1091_s22 = smov 10  }
 0x284   :  { %305 = vrot.lane.b32.xlu1 %v303_v20, %s1078_s25 }
 0x287   :  { %312 = vrot.lane.b32.xlu0 %v310_v22, %s1077_s24 }
 0x288   :  { %445 = vperm.xlu1 %1055, %v442_v24  }
 0x2e9   :  { %v264_v25 = vpop.permute.xlu0 %263 }
 0x2ea   :  { %v257_v26 = vpop.permute.xlu1 %256  ;;  %266 = vst.msk [vmem:[#allocation4 + $0x8] sm:$0xff] %vm95_vm4, %v264_v25 }
 0x2eb   :  { %259 = vst.msk [vmem:[#allocation4] sm:$0xff] %vm104_vm6, %v257_v26 }
 0x2ed   :  { %v271_v27 = vpop.permute.xlu0 %270 }
 0x2ee   :  { %v278_v28 = vpop.permute.xlu1 %277  ;;  %273 = vst.msk [vmem:[#allocation4 + $0x8] sm:$0xff] %vm104_vm6, %v271_v27  ;;  %v685_v27 = vld [vmem:[%s1382_s7] sm:$0xff] }
 0x2ef   :  { %280 = vst.msk [vmem:[#allocation4 + $0x10] sm:$0xff] %vm95_vm4, %v278_v28 }
 0x2f1   :  { %v292_v29 = vpop.permute.xlu0 %291 }
 0x2f2   :  { %v285_v30 = vpop.permute.xlu1 %284  ;;  %294 = vst.msk [vmem:[#allocation4 + $0x18] sm:$0xff] %vm95_vm4, %v292_v29  ;;  %v316_v31 = vld [vmem:[#allocation4] sm:$0xff] }
 0x2f3   :  { %287 = vst.msk [vmem:[#allocation4 + $0x10] sm:$0xff] %vm104_vm6, %v285_v30 }
 0x2f5   :  { %v299_v32 = vpop.permute.xlu0 %298  ;;  %v317_v33 = vld [vmem:[#allocation4 + $0x8] sm:$0xff] }
 0x2f6   :  { %v306_v34 = vpop.permute.xlu1 %305  ;;  %301 = vst.msk [vmem:[#allocation4 + $0x18] sm:$0xff] %vm104_vm6, %v299_v32  ;;  %v321_v35 = vpack.c.bf16 %v317_v33, %v316_v31 }
 0x2f7   :  { %308 = vst.msk [vmem:[#allocation4 + $0x20] sm:$0xff] %vm95_vm4, %v306_v34 }
 0x2f8   :  { %972 = vmatmul.mubr.msk.bf16.vlgmr.msra.gmra.mrb[0].mxu1 %vm372_vm14, %v321_v35 }
 0x2f9   :  { %v313_v36 = vpop.permute.xlu0 %312  ;;  %975 = vmatprep.mubr.msk.bf16.mxu1 %vm1079_vm5, %v1071_v23 }
 0x2fa   :  { %315 = vst.msk [vmem:[#allocation4 + $0x20] sm:$0xff] %vm104_vm6, %v313_v36  ;;  %v318_v37 = vld [vmem:[#allocation4 + $0x10] sm:$0xff]  ;;  %vm754_vm6 = vcmask 3072  }
 0x2fd   :  { %v319_v38 = vld [vmem:[#allocation4 + $0x18] sm:$0xff] }
 0x2fe   :  { %v322_v39 = vpack.c.bf16 %v319_v38, %v318_v37 }
 0x300   :  { %976 = vmatmul.mubr.msk.bf16.gmra.mrb[4].mxu1 %vm372_vm14, %v322_v39 }
 0x301   :  { %979 = vmatprep.mubr.msk.bf16.mxu1 %vm1079_vm5, %v1071_v23  ;;  %v320_v40 = vld [vmem:[#allocation4 + $0x20] sm:$0xff] }
 0x302   :  { %v323_v41 = vpack.c.bf16 %v320_v40, %v320_v40 }
 0x307   :  { %v446_v59 = vpop.permute.xlu1 %445 }
 0x308   :  { %980 = vmatmul.mubr.msk.bf16.gmra.mrb[8].mxu1 %vm372_vm14, %v323_v41 }
 0x309   :  { %1017 = vmatprep.mubr.msk.bf16.mxu1 %vm1079_vm5, %v1071_v23 }
 0x3cb   :  { %v416_v42 = vpop.f32.mrb[0].mxu1 }
 0x3cc   :  { %v973_v43 = vpop.f32.mrb[1].mxu1 }
 0x3cd   :  { %v419_v44 = vpop.f32.mrb[2].mxu1 }
 0x3ce   :  { %v438_v45 = vpack.c.bf16 %v419_v44, %v416_v42  ;;  %v974_v46 = vpop.f32.mrb[3].mxu1 }
 0x3d0   :  { %984 = vmatpush3.bf16.msra.mxu0 %v438_v45 }
 0x3d1   :  { %985 = vmatprep.subr.bf16.mxu0 %v1071_v23 }
 0x3d3   :  { %v424_v47 = vpop.f32.mrb[4].mxu1 }
 0x3d4   :  { %v977_v48 = vpop.f32.mrb[5].mxu1 }
 0x3d5   :  { %v427_v49 = vpop.f32.mrb[6].mxu1 }
 0x3d6   :  { %v439_v50 = vpack.c.bf16 %v427_v49, %v424_v47  ;;  %v978_v51 = vpop.f32.mrb[7].mxu1 }
 0x3d8   :  { %986 = vmatpush3.bf16.msra.mxu0 %v439_v50 }
 0x3d9   :  { %987 = vmatprep.subr.bf16.mxu0 %v1071_v23 }
 0x3db   :  { %v432_v52 = vpop.f32.mrb[8].mxu1 }
 0x3dc   :  { %v440_v53 = vpack.c.bf16 %v432_v52, %v432_v52  ;;  %v981_v54 = vpop.f32.mrb[9].mxu1 }
 0x3dd   :  { %v435_v55 = vpop.f32.mrb[10].mxu1 }
 0x3de   :  { %v452_v56 = vsel %vm181_vm7, %v440_v53, 0  ;;  %v982_v57 = vpop.f32.mrb[11].mxu1 }
 0x3df   :  { %988 = vmatpush3.bf16.msra.mxu0 %v452_v56 }
 0x3e0   :  { %993 = vmatprep.subr.bf16.mxu0 %v1071_v23 }
 0x3e2   :  { %990 = vmatmul.mubr.msk.bf16.vlgmr.msra.gmra.mrb[4].mxu0 %vm177_vm8, %v441_v58 }
 0x3e3   :  { %999 = vmatprep.mubr.msk.bf16.mxu0 %vm1079_vm5, %v1071_v23  ;;  %994 = vmatpush3.bf16.msra.mxu0 %v1063_v7 }
 0x3e4   :  { %995 = vmatprep.subr.bf16.mxu0 %v1071_v23 }
 0x3e7   :  { %996 = vmatpush3.bf16.msra.mxu0 %v1064_v8 }
 0x3e8   :  { %997 = vmatprep.subr.bf16.mxu0 %v1071_v23 }
 0x3eb   :  { %998 = vmatpush3.bf16.msra.mxu0 %v1065_v9 }
 0x4b5   :  { %v488_v60 = vpop.f32.mrb[4].mxu0 }
 0x4b6   :  { %v489_v61 = vadd.f32 %v488_v60, %v446_v59  ;;  %v991_v62 = vpop.f32.mrb[5].mxu0 }
 0x4b7   :  { %v491_v63 = vpop.f32.mrb[6].mxu0 }
 0x4b8   :  { %vm494_vm15 = vcmp.ge.f32.partialorder %v489_v61, 0.0  ;;  %v495_v0 = vmul.f32 0.1, %v489_v61  ;;  %v992_v1 = vpop.f32.mrb[7].mxu0 }
 0x4ba   :  { %v496_v2 = vsel %vm494_vm15, %v489_v61, %v495_v0  ;;  %v684_v61 = vld [vmem:[%s1383_s3] sm:$0xf] }
 0x4bb   :  { %v901_v4 = vpack.c.bf16 %v496_v2, %v496_v2  ;;  %497 = vst.msk [vmem:[%s1380_s12] sm:$0xff] %vm95_vm4, %v496_v2 }
 0x4bd   :  { %507 = vrot.lane.b32.xlu1 %v901_v4, %s1081_s23  ;;  %502 = vrot.lane.b32.xlu0 %v901_v4, %s1068_s17 }
 0x52f   :  { %v508_v5 = vpop.permute.xlu1 %507  ;;  %v503_v6 = vpop.permute.xlu0 %502 }
 0x530   :  { %510 = vst.msk [vmem:[#allocation2 + $0x4] sm:$0xf] %vm505_vm0, %v508_v5  ;;  %506 = vst.msk [vmem:[#allocation2] sm:$0xf] %vm505_vm0, %v503_v6 }
 0x531   :  { %512 = vst.msk [vmem:[#allocation2 + $0x4] sm:$0xf] %vm244_vm12, %v1067_v3  ;;  %511 = vst.msk [vmem:[#allocation2] sm:$0xf] %vm244_vm12, %v1067_v3 }
 0x532   :  { %514 = vst.msk [vmem:[#allocation2] sm:$0xf] %vm513_vm1, %v1067_v3  ;;  %515 = vst.msk [vmem:[#allocation2 + $0x4] sm:$0xf] %vm513_vm1, %v1067_v3 }
 0x539   :  { %v528_v10 = vld [vmem:[#allocation2] sm:$0xf]  ;;  %v577_v25 = vld [vmem:[#allocation2 + $0x4] sm:$0xf] }
 0x53a   :  { %v912_v11 = vld [vmem:[#allocation2] sm:$0xff]   ;;  %v529_v13 = vunpack.c.l.bf16 %v528_v10  ;;  %v578_v26 = vunpack.c.l.bf16 %v577_v25 }
 0x53b   :  { %v535_v12 = vld [vmem:[#allocation2] sm:$0xff]   ;;  %v914_v14 = vunpack.c.h.bf16 %v912_v11  ;;  %v913_v15 = vunpack.c.l.bf16 %v912_v11 }
 0x53c   :  { %531 = vrot.lane.b32.xlu0 %v529_v13, %s1069_s0  ;;  %v536_v16 = vunpack.c.h.bf16 %v535_v12  ;;  %v543_v17 = vunpack.c.l.bf16 %v535_v12  ;;  %v556_v18 = vld [vmem:[#allocation2] sm:$0xff]  }
 0x53d   :  { %523 = vrot.lane.b32.xlu1 %v914_v14, %s1082_s28  ;;  %519 = vst.msk [vmem:[#allocation4] sm:$0xff] %vm518_vm2, %v913_v15  ;;  %v557_v19 = vunpack.c.l.bf16 %v556_v18  ;;  %v550_v20 = vunpack.c.h.bf16 %v556_v18  ;;  %v563_v21 = vld [vmem:[#allocation2] sm:$0xff]  }
 0x53e   :  { %v564_v22 = vunpack.c.h.bf16 %v563_v21  ;;  %v571_v24 = vunpack.c.l.bf16 %v563_v21 }
 0x540   :  { %538 = vrot.lane.b32.xlu0 %v536_v16, %s1083_s11 }
 0x541   :  { %545 = vrot.lane.b32.xlu1 %v543_v17, %s1074_s21 }
 0x544   :  { %559 = vrot.lane.b32.xlu0 %v557_v19, %s1073_s20  ;;  %v806_v19 = vld [vmem:[%s1385_s8] sm:$0xff] }
 0x545   :  { %552 = vrot.lane.b32.xlu1 %v550_v20, %s1084_s10 }
 0x548   :  { %566 = vrot.lane.b32.xlu0 %v564_v22, %s1085_s1 }
 0x549   :  { %573 = vrot.lane.b32.xlu1 %v571_v24, %s1078_s25 }
 0x54c   :  { %580 = vrot.lane.b32.xlu0 %v578_v26, %s1086_s15 }
 0x54d   :  { %688 = vperm.xlu1 %1055, %v685_v27  }
 0x5ae   :  { %v532_v28 = vpop.permute.xlu0 %531 }
 0x5af   :  { %v524_v29 = vpop.permute.xlu1 %523  ;;  %534 = vst.msk [vmem:[#allocation4 + $0x8] sm:$0xff] %vm518_vm2, %v532_v28 }
 0x5b0   :  { %527 = vst.msk [vmem:[#allocation4] sm:$0xff] %vm526_vm3, %v524_v29 }
 0x5b2   :  { %v539_v30 = vpop.permute.xlu0 %538 }
 0x5b3   :  { %v546_v31 = vpop.permute.xlu1 %545  ;;  %541 = vst.msk [vmem:[#allocation4 + $0x8] sm:$0xff] %vm526_vm3, %v539_v30 }
 0x5b4   :  { %548 = vst.msk [vmem:[#allocation4 + $0x10] sm:$0xff] %vm518_vm2, %v546_v31 }
 0x5b6   :  { %v560_v32 = vpop.permute.xlu0 %559 }
 0x5b7   :  { %v553_v33 = vpop.permute.xlu1 %552  ;;  %562 = vst.msk [vmem:[#allocation4 + $0x18] sm:$0xff] %vm518_vm2, %v560_v32  ;;  %v584_v34 = vld [vmem:[#allocation4] sm:$0xff]  ;;  %v805_v32 = vld [vmem:[%s1386_s4] sm:$0xf] }
 0x5b8   :  { %555 = vst.msk [vmem:[#allocation4 + $0x10] sm:$0xff] %vm526_vm3, %v553_v33 }
 0x5ba   :  { %v567_v35 = vpop.permute.xlu0 %566  ;;  %v585_v36 = vld [vmem:[#allocation4 + $0x8] sm:$0xff] }
 0x5bb   :  { %v574_v37 = vpop.permute.xlu1 %573  ;;  %569 = vst.msk [vmem:[#allocation4 + $0x18] sm:$0xff] %vm526_vm3, %v567_v35  ;;  %v589_v38 = vpack.c.bf16 %v585_v36, %v584_v34 }
 0x5bc   :  { %576 = vst.msk [vmem:[#allocation4 + $0x20] sm:$0xff] %vm518_vm2, %v574_v37 }
 0x5bd   :  { %1000 = vmatmul.mubr.msk.bf16.vlgmr.msra.gmra.mrb[8].mxu0 %vm95_vm4, %v589_v38 }
 0x5be   :  { %v581_v39 = vpop.permute.xlu0 %580  ;;  %1003 = vmatprep.mubr.msk.bf16.mxu0 %vm1079_vm5, %v1071_v23 }
 0x5bf   :  { %583 = vst.msk [vmem:[#allocation4 + $0x20] sm:$0xff] %vm526_vm3, %v581_v39  ;;  %v586_v40 = vld [vmem:[#allocation4 + $0x10] sm:$0xff] }
 0x5c2   :  { %v587_v41 = vld [vmem:[#allocation4 + $0x18] sm:$0xff] }
 0x5c3   :  { %v590_v42 = vpack.c.bf16 %v587_v41, %v586_v40 }
 0x5c5   :  { %1004 = vmatmul.mubr.msk.bf16.gmra.mrb[12].mxu0 %vm95_vm4, %v590_v42 }
 0x5c6   :  { %1007 = vmatprep.mubr.msk.bf16.mxu0 %vm1079_vm5, %v1071_v23  ;;  %v588_v43 = vld [vmem:[#allocation4 + $0x20] sm:$0xff] }
 0x5c7   :  { %v591_v44 = vpack.c.bf16 %v588_v43, %v588_v43 }
 0x5cc   :  { %v689_v62 = vpop.permute.xlu1 %688 }
 0x5cd   :  { %1008 = vmatmul.mubr.msk.bf16.gmra.mrb[16].mxu0 %vm95_vm4, %v591_v44 }
 0x690   :  { %v659_v45 = vpop.f32.mrb[8].mxu0 }
 0x691   :  { %v1001_v46 = vpop.f32.mrb[9].mxu0 }
 0x692   :  { %v662_v47 = vpop.f32.mrb[10].mxu0 }
 0x693   :  { %v681_v48 = vpack.c.bf16 %v662_v47, %v659_v45  ;;  %v1002_v49 = vpop.f32.mrb[11].mxu0 }
 0x695   :  { %1012 = vmatpush3.bf16.msra.mxu1 %v681_v48 }
 0x696   :  { %1013 = vmatprep.subr.bf16.mxu1 %v1071_v23 }
 0x698   :  { %v667_v50 = vpop.f32.mrb[12].mxu0 }
 0x699   :  { %v1005_v51 = vpop.f32.mrb[13].mxu0 }
 0x69a   :  { %v670_v52 = vpop.f32.mrb[14].mxu0 }
 0x69b   :  { %v682_v53 = vpack.c.bf16 %v670_v52, %v667_v50  ;;  %v1006_v54 = vpop.f32.mrb[15].mxu0 }
 0x69d   :  { %1014 = vmatpush3.bf16.msra.mxu1 %v682_v53 }
 0x69e   :  { %1015 = vmatprep.subr.bf16.mxu1 %v1071_v23 }
 0x6a0   :  { %v675_v55 = vpop.f32.mrb[16].mxu0 }
 0x6a1   :  { %v683_v56 = vpack.c.bf16 %v675_v55, %v675_v55  ;;  %v1009_v57 = vpop.f32.mrb[17].mxu0 }
 0x6a2   :  { %v678_v58 = vpop.f32.mrb[18].mxu0 }
 0x6a3   :  { %v695_v59 = vsel %vm181_vm7, %v683_v56, 0  ;;  %v1010_v60 = vpop.f32.mrb[19].mxu0 }
 0x6a4   :  { %1016 = vmatpush3.bf16.msra.mxu1 %v695_v59 }
 0x6a5   :  { %1021 = vmatprep.subr.bf16.mxu1 %v1071_v23 }
 0x6a7   :  { %1018 = vmatmul.mubr.msk.bf16.vlgmr.msra.gmra.mrb[12].mxu1 %vm177_vm8, %v684_v61  ;;  %vm757_vm8 = vcmask 109672  }
 0x6a8   :  { %1025 = vmatprep.mubr.msk.bf16.mxu1 %vm1079_vm5, %v1071_v23  ;;  %vm748_vm5 = vcmask 101384  }
 0x77a   :  { %v731_v63 = vpop.f32.mrb[12].mxu1 }
 0x77b   :  { %v732_v0 = vadd.f32 %v731_v63, %v689_v62  ;;  %v1019_v1 = vpop.f32.mrb[13].mxu1 }
 0x77c   :  { %v734_v2 = vpop.f32.mrb[14].mxu1 }
 0x77d   :  { %vm737_vm4 = vcmp.ge.f32.partialorder %v732_v0, 0.0  ;;  %v738_v4 = vmul.f32 0.1, %v732_v0  ;;  %v1020_v5 = vpop.f32.mrb[15].mxu1 }
 0x77f   :  { %v739_v6 = vsel %vm737_vm4, %v732_v0, %v738_v4 }
 0x780   :  { %v902_v7 = vpack.c.bf16 %v739_v6, %v739_v6  ;;  %740 = vst.msk [vmem:[%s1384_s13] sm:$0xff] %vm518_vm2, %v739_v6  ;;  %s1089_s13 = smov 12  }
 0x782   :  { %750 = vrot.lane.b32.xlu1 %v902_v7, %s1087_s16  ;;  %745 = vrot.lane.b32.xlu0 %v902_v7, %s1088_s9 }
 0x7f4   :  { %v751_v8 = vpop.permute.xlu1 %750  ;;  %v746_v9 = vpop.permute.xlu0 %745 }
 0x7f5   :  { %753 = vst.msk [vmem:[#allocation3 + $0x4] sm:$0xf] %vm748_vm5, %v751_v8  ;;  %749 = vst.msk [vmem:[#allocation3] sm:$0xf] %vm748_vm5, %v746_v9 }
 0x7f6   :  { %756 = vst.msk [vmem:[#allocation3 + $0x4] sm:$0xf] %vm754_vm6, %v1067_v3  ;;  %755 = vst.msk [vmem:[#allocation3] sm:$0xf] %vm754_vm6, %v1067_v3 }
 0x7f7   :  { %758 = vst.msk [vmem:[#allocation3] sm:$0xf] %vm757_vm8, %v1067_v3  ;;  %759 = vst.msk [vmem:[#allocation3 + $0x4] sm:$0xf] %vm757_vm8, %v1067_v3 }
 0x7fe   :  { %v772_v10 = vld [vmem:[#allocation3] sm:$0xf]  ;;  %v793_v18 = vld [vmem:[#allocation3 + $0x4] sm:$0xf] }
 0x7ff   :  { %v916_v11 = vld [vmem:[#allocation3] sm:$0xff]   ;;  %v773_v13 = vunpack.c.l.bf16 %v772_v10  ;;  %v794_v3 = vunpack.c.l.bf16 %v793_v18 }
 0x800   :  { %v779_v12 = vld [vmem:[#allocation3] sm:$0xff]   ;;  %v918_v14 = vunpack.c.h.bf16 %v916_v11  ;;  %v917_v15 = vunpack.c.l.bf16 %v916_v11 }
 0x801   :  { %775 = vrot.lane.b32.xlu0 %v773_v13, %s1069_s0  ;;  %v780_v16 = vunpack.c.h.bf16 %v779_v12  ;;  %v787_v17 = vunpack.c.l.bf16 %v779_v12 }
 0x802   :  { %767 = vrot.lane.b32.xlu1 %v918_v14, %s1089_s13  ;;  %763 = vst.msk [vmem:[#allocation4] sm:$0xff] %vm762_vm9, %v917_v15 }
 0x805   :  { %782 = vrot.lane.b32.xlu0 %v780_v16, %s1090_s19 }
 0x806   :  { %789 = vrot.lane.b32.xlu1 %v787_v17, %s1074_s21 }
 0x809   :  { %796 = vrot.lane.b32.xlu0 %v794_v3, %s1091_s22 }
 0x80a   :  { %809 = vperm.xlu1 %1055, %v806_v19  }
 0x873   :  { %v776_v20 = vpop.permute.xlu0 %775 }
 0x874   :  { %v768_v21 = vpop.permute.xlu1 %767  ;;  %778 = vst.msk [vmem:[#allocation4 + $0x8] sm:$0xff] %vm762_vm9, %v776_v20 }
 0x875   :  { %771 = vst.msk [vmem:[#allocation4] sm:$0xff] %vm770_vm10, %v768_v21 }
 0x877   :  { %v783_v22 = vpop.permute.xlu0 %782 }
 0x878   :  { %v790_v24 = vpop.permute.xlu1 %789  ;;  %785 = vst.msk [vmem:[#allocation4 + $0x8] sm:$0xff] %vm770_vm10, %v783_v22 }
 0x879   :  { %792 = vst.msk [vmem:[#allocation4 + $0x10] sm:$0xff] %vm762_vm9, %v790_v24 }
 0x87b   :  { %v797_v25 = vpop.permute.xlu0 %796 }
 0x87c   :  { %799 = vst.msk [vmem:[#allocation4 + $0x10] sm:$0xff] %vm770_vm10, %v797_v25  ;;  %v800_v26 = vld [vmem:[#allocation4] sm:$0xff] }
 0x87f   :  { %v801_v27 = vld [vmem:[#allocation4 + $0x8] sm:$0xff] }
 0x880   :  { %v803_v28 = vpack.c.bf16 %v801_v27, %v800_v26 }
 0x882   :  { %1022 = vmatpush3.bf16.msra.mxu1 %v803_v28 }
 0x883   :  { %1023 = vmatprep.subr.bf16.mxu1 %v1071_v23  ;;  %v802_v29 = vld [vmem:[#allocation4 + $0x10] sm:$0xff] }
 0x884   :  { %v804_v30 = vpack.c.bf16 %v802_v29, %v802_v29 }
 0x886   :  { %v816_v31 = vsel %vm181_vm7, %v804_v30, 0 }
 0x887   :  { %1024 = vmatpush3.bf16.msra.mxu1 %v816_v31 }
 0x889   :  { %v810_v33 = vpop.permute.xlu1 %809 }
 0x88a   :  { %1026 = vmatmul.mubr.msk.bf16.vlgmr.msra.gmra.mrb[16].mxu1 %vm518_vm2, %v805_v32 }
 0x95d   :  { %v852_v34 = vpop.f32.mrb[16].mxu1 }
 0x95e   :  { %v853_v35 = vadd.f32 %v852_v34, %v810_v33  ;;  %v1027_v36 = vpop.f32.mrb[17].mxu1 }
 0x95f   :  { %v855_v37 = vpop.f32.mrb[18].mxu1 }
 0x960   :  { %859 = vst.msk [vmem:[%s1387_s14] sm:$0x1] %vm858_vm11, %v853_v35  ;;  %v1028_v23 = vpop.f32.mrb[19].mxu1 }

// kernel: discriminator_forward.4
= control target key start
LH: loop header
LB: loop body
LE: loop exit
PB: predicated region body
PF: predicated region fallthrough
CT: control target
= control target key end

     0   :  { %v69_v0 = vlaneseq  ;;  %vm46_vm0 = vcmask 224256   ;;  %v1525_v1 = vmov 1935823168   ;;  %v1526_v3 = vmov 0   ;;  %s1527_s26 = smov 2   ;;  %s1529_s19 = smov 127   ;;  %s1981_s0 = inlined_call_operand.vmem [shape: bf16[4,1,24], index: 0, kind: input, shape index: {}]   ;;  %s1982_s9 = inlined_call_operand.vmem [shape: bf16[96,32], index: 9, kind: input, shape index: {}]   ;;  %s1983_s5 = inlined_call_operand.vmem [shape: f32[8,1], index: 5, kind: input, shape index: {}]   ;;  %s1984_s1 = inlined_call_operand.vmem [shape: bf16[8,40], index: 1, kind: input, shape index: {}]   ;;  %s1985_s12 = inlined_call_operand.vmem [shape: f32[4,32], index: 12, kind: output, shape index: {0}]   ;;  %s1986_s10 = inlined_call_operand.vmem [shape: bf16[32,12], index: 10, kind: input, shape index: {}]   ;;  %s1987_s6 = inlined_call_operand.vmem [shape: f32[8,1], index: 6, kind: input, shape index: {}]   ;;  %s1988_s2 = inlined_call_operand.vmem [shape: bf16[8,40], index: 2, kind: input, shape index: {}]   ;;  %s1989_s13 = inlined_call_operand.vmem [shape: f32[8,12], index: 13, kind: output, shape index: {1}]   ;;  %s1990_s11 = inlined_call_operand.vmem [shape: bf16[12,4], index: 11, kind: input, shape index: {}]   ;;  %s1991_s7 = inlined_call_operand.vmem [shape: f32[8,1], index: 7, kind: input, shape index: {}]   ;;  %s1992_s3 = inlined_call_operand.vmem [shape: bf16[8,40], index: 3, kind: input, shape index: {}]   ;;  %s1993_s14 = inlined_call_operand.vmem [shape: f32[8,4], index: 14, kind: output, shape index: {2}]   ;;  %s1994_s8 = inlined_call_operand.vmem [shape: f32[8,1], index: 8, kind: input, shape index: {}]   ;;  %s1995_s4 = inlined_call_operand.vmem [shape: bf16[8,24], index: 4, kind: input, shape index: {}]   ;;  %s1996_s15 = inlined_call_operand.vmem [shape: f32[1,4], index: 15, kind: output, shape index: {3}]  }
   0x1   :  { %v67_v2 = vunpack.c.l.s4 %v1525_v1  ;;  %47 = vst.msk [vmem:[#allocation2] sm:$0xf] %vm46_vm0, %v1526_v3  ;;  %48 = vst.msk [vmem:[#allocation2 + $0x4] sm:$0xf] %vm46_vm0, %v1526_v3  ;;  %1504 = vset.pattern.permute.xlu1 %v1526_v3  ;;  %1505 = vset.pattern.permute.xlu0 %v1526_v3  ;;  %v1528_v15 = vmov 0.0   ;;  %v1516_v16 = vld [vmem:[%s1982_s9] sm:$0xff]  }
   0x2   :  { %49 = vst.msk [vmem:[#allocation2 + $0x8] sm:$0xf] %vm46_vm0, %v1526_v3  ;;  %50 = vst.msk [vmem:[#allocation2 + $0xc] sm:$0xf] %vm46_vm0, %v1526_v3  ;;  %v70_v4 = vshrl.u32 %v69_v0, 7  ;;  %1371 = vmatprep.subr.bf16.mxu0 %v1528_v15  ;;  %1395 = vmatprep.subr.bf16.mxu1 %v1528_v15  ;;  %vm127_vm1 = vcmask 204816  }
   0x3   :  { %v1286_v5 = vld.sshfl [vmem:[%s1981_s0] sm:$0x1 pattern:$0x73625140]  ;;  %v68_v6 = vunpack.c.0.s8 %v67_v2  ;;  %1372 = vmatpush3.bf16.msra.mxu0 %v1516_v16  ;;  %vm128_vm2 = vsmask.f32 256 }
   0x4   :  { %v1288_v7 = vld.sshfl [vmem:[%s1981_s0 + $0x2] sm:$0x1 pattern:$0x73625140]  ;;  %1373 = vmatprep.subr.bf16.mxu0 %v1528_v15  ;;  %vm1674_vm3 = vmand %vm127_vm1, %vm128_vm2  ;;  %v1517_v26 = vld [vmem:[%s1982_s9 + $0x8] sm:$0xff]   ;;  %s1530_s20 = smov 24  }
   0x5   :  { %v71_v8 = vsub.s32 %v68_v6, %v70_v4  ;;  %v1287_v9 = vld.sshfl [vmem:[%s1981_s0 + $0x1] sm:$0x1 pattern:$0x73625140]  ;;  %v1518_v31 = vld [vmem:[%s1982_s9 + $0x10] sm:$0xff]   ;;  %v1519_v32 = vld [vmem:[%s1982_s9 + $0x18] sm:$0xff]  }
   0x6   :  { %v1289_v10 = vld.sshfl [vmem:[%s1981_s0 + $0x3] sm:$0x1 pattern:$0x73625140]  ;;  %vm144_vm4 = vcmask 195584   ;;  %v1521_v43 = vld [vmem:[%s1982_s9 + $0x28] sm:$0xff]  }
   0x7   :  { %v72_v11 = vrot.slane %v1286_v5, %v71_v8  ;;  %v100_v12 = vrot.slane %v1288_v7, %v71_v8  ;;  %v86_v13 = vrot.slane %v1287_v9, %v71_v8  ;;  %v114_v14 = vrot.slane %v1289_v10, %v71_v8  ;;  %1374 = vmatpush3.bf16.msra.mxu0 %v1517_v26  ;;  %v1520_v39 = vld [vmem:[%s1982_s9 + $0x20] sm:$0xff]   ;;  %s1531_s25 = smov 23   ;;  %s1532_s27 = smov 48  }
   0x8   :  { %v130_v18 = vld [vmem:[#allocation2] sm:$0x1]  ;;  %v133_v24 = vld [vmem:[#allocation2 + $0x4] sm:$0x1]  ;;  %1375 = vmatprep.subr.bf16.mxu0 %v1528_v15  ;;  %s1533_s28 = smov 47   ;;  %s1534_s0 = smov 72  }
   0x9   :  { %115 = vrot.lane.b32.xlu0 %v72_v11, %s1527_s26  ;;  %119 = vrot.lane.b32.xlu1 %v100_v12, %s1527_s26  ;;  %v136_v19 = vld [vmem:[#allocation2 + $0x8] sm:$0x1]  ;;  %v139_v25 = vld [vmem:[#allocation2 + $0xc] sm:$0x1]  ;;  %vm1535_vm5 = vmmov 0   ;;  %s1536_s9 = smov 71  }
   0xa   :  { %1383 = vmatprep.mubr.msk.bf16.mxu0 %vm1535_vm5, %v1528_v15  ;;  %1401 = vmatprep.mubr.msk.bf16.mxu1 %vm1535_vm5, %v1528_v15  ;;  %s1537_s29 = smov 126   ;;  %s1538_s30 = smov 125   ;;  %vm153_vm6 = vcmask 392384   ;;  %vm162_vm7 = vcmask 589184   ;;  %vm171_vm8 = vcmask 785984   ;;  %vm341_vm9 = vcmask 785408  }
   0xb   :  { %1376 = vmatpush3.bf16.msra.mxu0 %v1518_v31  ;;  %s1539_s16 = smov 22   ;;  %s1540_s17 = smov 21   ;;  %vm421_vm10 = vcmask 1043456   ;;  %vm417_vm11 = vcmask 326656   ;;  %vm468_vm13 = vcmask 257024   ;;  %vm477_vm14 = vcmask 76816  }
   0xc   :  { %1377 = vmatprep.subr.bf16.mxu0 %v1528_v15  ;;  %s1541_s18 = smov 46   ;;  %s1542_s21 = smov 45   ;;  %vm494_vm15 = vcmask 11264   ;;  %vm499_vm0 = vcmask 93264   ;;  %vm506_vm1 = vcmask 64512   ;;  %vm514_vm2 = vcmask 130112  }
   0xd   :  { %117 = vrot.lane.b32.xlu0 %v86_v13, %s1527_s26  ;;  %121 = vrot.lane.b32.xlu1 %v114_v14, %s1527_s26  ;;  %s1543_s22 = smov 70   ;;  %s1544_s23 = smov 69  }
   0xe   :  { %s1545_s24 = smov 124  }
   0xf   :  { %1378 = vmatpush3.bf16.msra.mxu0 %v1519_v32 }
  0x10   :  { %1379 = vmatprep.subr.bf16.mxu0 %v1528_v15 }
  0x13   :  { %1380 = vmatpush3.bf16.msra.mxu0 %v1520_v39 }
  0x14   :  { %1381 = vmatprep.subr.bf16.mxu0 %v1528_v15 }
  0x17   :  { %1382 = vmatpush3.bf16.msra.mxu0 %v1521_v43 }
  0x18   :  { %1431 = vmatprep.subr.bf16.mxu0 %v1528_v15 }
  0x7b   :  { %v116_v20 = vpop.permute.xlu0 %115  ;;  %v120_v21 = vpop.permute.xlu1 %119 }
  0x7c   :  { %v131_v22 = vsel %vm1674_vm3, %v116_v20, %v130_v18  ;;  %v137_v23 = vsel %vm1674_vm3, %v120_v21, %v136_v19 }
  0x7d   :  { %132 = vst [vmem:[#allocation2] sm:$0x1] %v131_v22  ;;  %138 = vst [vmem:[#allocation2 + $0x8] sm:$0x1] %v137_v23 }
  0x7f   :  { %v118_v27 = vpop.permute.xlu0 %117  ;;  %v122_v28 = vpop.permute.xlu1 %121 }
  0x80   :  { %v134_v29 = vsel %vm1674_vm3, %v118_v27, %v133_v24  ;;  %v140_v30 = vsel %vm1674_vm3, %v122_v28, %v139_v25  ;;  %vm522_vm3 = vcmask 195712  }
  0x81   :  { %135 = vst [vmem:[#allocation2 + $0x4] sm:$0x1] %v134_v29  ;;  %141 = vst [vmem:[#allocation2 + $0xc] sm:$0x1] %v140_v30  ;;  %v411_v30 = vld [vmem:[%s1983_s5] sm:$0xff]  ;;  %s1553_s5 = smov 7  }
  0x88   :  { %v173_v33 = vld [vmem:[#allocation2] sm:$0xff]   ;;  %v156_v37 = vld [vmem:[#allocation2 + $0x8] sm:$0xff]  }
  0x89   :  { %v1319_v34 = vld [vmem:[#allocation2] sm:$0xff]   ;;  %v174_v35 = vunpack.c.l.bf16 %v173_v33  ;;  %v157_v38 = vunpack.c.l.bf16 %v156_v37  ;;  %v181_v40 = vunpack.c.h.bf16 %v173_v33  ;;  %v187_v42 = vld [vmem:[#allocation2 + $0x8] sm:$0xff]   ;;  %v166_v45 = vunpack.c.h.bf16 %v156_v37 }
  0x8a   :  { %v1321_v36 = vunpack.c.h.bf16 %v1319_v34  ;;  %v1320_v41 = vunpack.c.l.bf16 %v1319_v34  ;;  %v188_v44 = vunpack.c.l.bf16 %v187_v42  ;;  %v201_v46 = vld [vmem:[#allocation2] sm:$0xff]   ;;  %v195_v47 = vunpack.c.h.bf16 %v187_v42  ;;  %v215_v52 = vld [vmem:[#allocation2 + $0x8] sm:$0xff]  }
  0x8b   :  { %176 = vrot.lane.b32.xlu0 %v174_v35, %s1529_s19  ;;  %v202_v48 = vunpack.c.l.bf16 %v201_v46  ;;  %v229_v49 = vld [vmem:[#allocation2] sm:$0xff]   ;;  %v209_v51 = vunpack.c.h.bf16 %v201_v46  ;;  %v216_v54 = vunpack.c.l.bf16 %v215_v52  ;;  %v243_v55 = vld [vmem:[#allocation2 + $0x8] sm:$0xff]   ;;  %v223_v57 = vunpack.c.h.bf16 %v215_v52 }
  0x8c   :  { %150 = vrot.lane.b32.xlu1 %v1321_v36, %s1530_s20  ;;  %145 = vst.msk [vmem:[#allocation4] sm:$0xff] %vm144_vm4, %v1320_v41  ;;  %v230_v50 = vunpack.c.l.bf16 %v229_v49  ;;  %v237_v53 = vunpack.c.h.bf16 %v229_v49  ;;  %v244_v56 = vunpack.c.l.bf16 %v243_v55  ;;  %v257_v58 = vld [vmem:[#allocation2] ss:$12 sps:$4 sm:$0xff]   ;;  %v251_v59 = vunpack.c.h.bf16 %v243_v55  ;;  %v264_v61 = vld [vmem:[#allocation2 + $0x4] sm:$0xff]  }
  0x8d   :  { %v258_v60 = vunpack.c.l.bf16 %v257_v58  ;;  %v265_v62 = vunpack.c.l.bf16 %v264_v61  ;;  %v272_v63 = vunpack.c.h.bf16 %v264_v61  ;;  %v279_v0 = vunpack.c.h.bf16 %v257_v58 }
  0x8f   :  { %183 = vrot.lane.b32.xlu0 %v181_v40, %s1531_s25 }
  0x90   :  { %159 = vrot.lane.b32.xlu1 %v157_v38, %s1532_s27  ;;  %s1546_s27 = smov 20  }
  0x93   :  { %190 = vrot.lane.b32.xlu0 %v188_v44, %s1533_s28  ;;  %s1547_s28 = smov 44  }
  0x94   :  { %168 = vrot.lane.b32.xlu1 %v166_v45, %s1534_s0  ;;  %s1548_s0 = smov 68  }
  0x97   :  { %197 = vrot.lane.b32.xlu0 %v195_v47, %s1536_s9  ;;  %v410_v47 = vld [vmem:[%s1984_s1] sm:$0xf]  ;;  %s1561_s9 = smov 12   ;;  %s1563_s1 = smov 3  }
  0x98   :  { %204 = vrot.lane.b32.xlu1 %v202_v48, %s1537_s29 }
  0x9b   :  { %232 = vrot.lane.b32.xlu0 %v230_v50, %s1538_s30 }
  0x9c   :  { %211 = vrot.lane.b32.xlu1 %v209_v51, %s1539_s16 }
  0x9f   :  { %239 = vrot.lane.b32.xlu0 %v237_v53, %s1540_s17 }
  0xa0   :  { %218 = vrot.lane.b32.xlu1 %v216_v54, %s1541_s18 }
  0xa3   :  { %246 = vrot.lane.b32.xlu0 %v244_v56, %s1542_s21  ;;  %s1554_s21 = smov 16  }
  0xa4   :  { %225 = vrot.lane.b32.xlu1 %v223_v57, %s1543_s22 }
  0xa7   :  { %253 = vrot.lane.b32.xlu0 %v251_v59, %s1544_s23  ;;  %s1549_s23 = smov 122  }
  0xa8   :  { %260 = vrot.lane.b32.xlu1 %v258_v60, %s1545_s24 }
  0xab   :  { %267 = vrot.lane.b32.xlu0 %v265_v62, %s1546_s27 }
  0xac   :  { %274 = vrot.lane.b32.xlu1 %v272_v63, %s1547_s28  ;;  %s1550_s28 = smov 106  }
  0xaf   :  { %281 = vrot.lane.b32.xlu0 %v279_v0, %s1548_s0  ;;  %s1551_s0 = smov 114  }
  0xb0   :  { %414 = vperm.xlu1 %1504, %v411_v30  }
  0xfd   :  { %v177_v1 = vpop.permute.xlu0 %176 }
  0xfe   :  { %v151_v2 = vpop.permute.xlu1 %150  ;;  %179 = vst.msk [vmem:[#allocation4 + $0x8] sm:$0xff] %vm144_vm4, %v177_v1 }
  0xff   :  { %154 = vst.msk [vmem:[#allocation4] sm:$0xff] %vm153_vm6, %v151_v2 }
 0x101   :  { %v184_v4 = vpop.permute.xlu0 %183 }
 0x102   :  { %v160_v5 = vpop.permute.xlu1 %159  ;;  %186 = vst.msk [vmem:[#allocation4 + $0x8] sm:$0xff] %vm153_vm6, %v184_v4 }
 0x103   :  { %163 = vst.msk [vmem:[#allocation4] sm:$0xff] %vm162_vm7, %v160_v5 }
 0x105   :  { %v191_v6 = vpop.permute.xlu0 %190 }
 0x106   :  { %v169_v7 = vpop.permute.xlu1 %168  ;;  %193 = vst.msk [vmem:[#allocation4 + $0x8] sm:$0xff] %vm162_vm7, %v191_v6 }
 0x107   :  { %172 = vst.msk [vmem:[#allocation4] sm:$0xff] %vm171_vm8, %v169_v7  ;;  %v1522_v7 = vld [vmem:[%s1986_s10] sm:$0xff]  }
 0x109   :  { %v198_v8 = vpop.permute.xlu0 %197 }
 0x10a   :  { %v205_v9 = vpop.permute.xlu1 %204  ;;  %200 = vst.msk [vmem:[#allocation4 + $0x8] sm:$0xff] %vm171_vm8, %v198_v8 }
 0x10b   :  { %207 = vst.msk [vmem:[#allocation4 + $0x10] sm:$0xff] %vm144_vm4, %v205_v9 }
 0x10d   :  { %v233_v10 = vpop.permute.xlu0 %232 }
 0x10e   :  { %v212_v11 = vpop.permute.xlu1 %211  ;;  %235 = vst.msk [vmem:[#allocation4 + $0x18] sm:$0xff] %vm144_vm4, %v233_v10  ;;  %v285_v13 = vld [vmem:[#allocation4] sm:$0xff] }
 0x10f   :  { %214 = vst.msk [vmem:[#allocation4 + $0x10] sm:$0xff] %vm153_vm6, %v212_v11  ;;  %v1523_v11 = vld [vmem:[%s1986_s10 + $0x8] sm:$0xff]   ;;  %s1556_s10 = smov 6  }
 0x111   :  { %v240_v12 = vpop.permute.xlu0 %239  ;;  %v286_v14 = vld [vmem:[#allocation4 + $0x8] sm:$0xff] }
 0x112   :  { %v219_v16 = vpop.permute.xlu1 %218  ;;  %242 = vst.msk [vmem:[#allocation4 + $0x18] sm:$0xff] %vm153_vm6, %v240_v12  ;;  %v290_v17 = vpack.c.bf16 %v286_v14, %v285_v13 }
 0x113   :  { %221 = vst.msk [vmem:[#allocation4 + $0x10] sm:$0xff] %vm162_vm7, %v219_v16 }
 0x114   :  { %1384 = vmatmul.mubr.msk.bf16.vlgmr.msra.gmra.mrb[0].mxu0 %vm341_vm9, %v290_v17 }
 0x115   :  { %v247_v18 = vpop.permute.xlu0 %246  ;;  %1387 = vmatprep.mubr.msk.bf16.mxu0 %vm1535_vm5, %v1528_v15 }
 0x116   :  { %v226_v19 = vpop.permute.xlu1 %225  ;;  %249 = vst.msk [vmem:[#allocation4 + $0x18] sm:$0xff] %vm162_vm7, %v247_v18 }
 0x117   :  { %228 = vst.msk [vmem:[#allocation4 + $0x10] sm:$0xff] %vm171_vm8, %v226_v19 }
 0x119   :  { %v254_v20 = vpop.permute.xlu0 %253 }
 0x11a   :  { %v261_v21 = vpop.permute.xlu1 %260  ;;  %256 = vst.msk [vmem:[#allocation4 + $0x18] sm:$0xff] %vm171_vm8, %v254_v20 }
 0x11b   :  { %263 = vst.msk [vmem:[#allocation4 + $0x20] sm:$0xff] %vm144_vm4, %v261_v21 }
 0x11d   :  { %v268_v22 = vpop.permute.xlu0 %267 }
 0x11e   :  { %v275_v23 = vpop.permute.xlu1 %274  ;;  %270 = vst.msk [vmem:[#allocation4 + $0x20] sm:$0xff] %vm153_vm6, %v268_v22  ;;  %v287_v25 = vld [vmem:[#allocation4 + $0x10] sm:$0xff]  ;;  %vm530_vm6 = vcmask 261312  }
 0x11f   :  { %277 = vst.msk [vmem:[#allocation4 + $0x20] sm:$0xff] %vm162_vm7, %v275_v23  ;;  %vm668_vm7 = vcmask 261120  }
 0x121   :  { %v282_v24 = vpop.permute.xlu0 %281  ;;  %v288_v26 = vld [vmem:[#allocation4 + $0x18] sm:$0xff] }
 0x122   :  { %284 = vst.msk [vmem:[#allocation4 + $0x20] sm:$0xff] %vm171_vm8, %v282_v24  ;;  %v291_v27 = vpack.c.bf16 %v288_v26, %v287_v25 }
 0x124   :  { %1388 = vmatmul.mubr.msk.bf16.gmra.mrb[4].mxu0 %vm341_vm9, %v291_v27 }
 0x125   :  { %1391 = vmatprep.mubr.msk.bf16.mxu0 %vm1535_vm5, %v1528_v15 }
 0x129   :  { %v289_v28 = vld [vmem:[#allocation4 + $0x20] sm:$0xff] }
 0x12a   :  { %v292_v29 = vpack.c.bf16 %v289_v28, %v289_v28 }
 0x12c   :  { %1392 = vmatmul.mubr.msk.bf16.gmra.mrb[8].mxu0 %vm341_vm9, %v292_v29  ;;  %vm793_vm9 = vcmask 97280  }
 0x12d   :  { %1433 = vmatprep.mubr.msk.bf16.mxu0 %vm1535_vm5, %v1528_v15 }
 0x12f   :  { %v415_v48 = vpop.permute.xlu1 %414 }
 0x1e7   :  { %v385_v31 = vpop.f32.mrb[0].mxu0 }
 0x1e8   :  { %v1385_v32 = vpop.f32.mrb[1].mxu0 }
 0x1e9   :  { %v388_v33 = vpop.f32.mrb[2].mxu0 }
 0x1ea   :  { %v407_v34 = vpack.c.bf16 %v388_v33, %v385_v31  ;;  %v1386_v35 = vpop.f32.mrb[3].mxu0  ;;  %v738_v31 = vld [vmem:[%s1987_s6] sm:$0xff] }
 0x1ec   :  { %1396 = vmatpush3.bf16.msra.mxu1 %v407_v34 }
 0x1ed   :  { %1397 = vmatprep.subr.bf16.mxu1 %v1528_v15 }
 0x1f7   :  { %v393_v36 = vpop.f32.mrb[4].mxu0 }
 0x1f8   :  { %v1389_v37 = vpop.f32.mrb[5].mxu0 }
 0x1f9   :  { %v396_v38 = vpop.f32.mrb[6].mxu0 }
 0x1fa   :  { %v408_v39 = vpack.c.bf16 %v396_v38, %v393_v36  ;;  %v1390_v40 = vpop.f32.mrb[7].mxu0 }
 0x1fc   :  { %1398 = vmatpush3.bf16.msra.mxu1 %v408_v39 }
 0x1fd   :  { %1399 = vmatprep.subr.bf16.mxu1 %v1528_v15 }
 0x1ff   :  { %v401_v41 = vpop.f32.mrb[8].mxu0 }
 0x200   :  { %v409_v42 = vpack.c.bf16 %v401_v41, %v401_v41  ;;  %v1393_v43 = vpop.f32.mrb[9].mxu0 }
 0x201   :  { %v404_v44 = vpop.f32.mrb[10].mxu0 }
 0x202   :  { %v1394_v45 = vpop.f32.mrb[11].mxu0  ;;  %v423_v46 = vsel %vm421_vm10, %v409_v42, 0 }
 0x203   :  { %1400 = vmatpush3.bf16.msra.mxu1 %v423_v46 }
 0x204   :  { %1405 = vmatprep.subr.bf16.mxu1 %v1528_v15 }
 0x206   :  { %1402 = vmatmul.mubr.msk.bf16.vlgmr.msra.gmra.mrb[0].mxu1 %vm417_vm11, %v410_v47 }
 0x207   :  { %1409 = vmatprep.mubr.msk.bf16.mxu1 %vm1535_vm5, %v1528_v15  ;;  %1406 = vmatpush3.bf16.msra.mxu1 %v1522_v7 }
 0x208   :  { %1407 = vmatprep.subr.bf16.mxu1 %v1528_v15 }
 0x20b   :  { %1408 = vmatpush3.bf16.msra.mxu1 %v1523_v11 }
 0x20c   :  { %1421 = vmatprep.subr.bf16.mxu1 %v1528_v15 }
 0x2d9   :  { %v459_v49 = vpop.f32.mrb[0].mxu1 }
 0x2da   :  { %v460_v50 = vadd.f32 %v459_v49, %v415_v48  ;;  %v1403_v51 = vpop.f32.mrb[1].mxu1 }
 0x2db   :  { %v462_v52 = vpop.f32.mrb[2].mxu1 }
 0x2dc   :  { %vm465_vm12 = vcmp.ge.f32.partialorder %v460_v50, 0.0  ;;  %v466_v53 = vmul.f32 0.1, %v460_v50  ;;  %v1404_v54 = vpop.f32.mrb[3].mxu1 }
 0x2de   :  { %v467_v55 = vsel %vm465_vm12, %v460_v50, %v466_v53  ;;  %vm802_vm12 = vcmask 35856  }
 0x2df   :  { %469 = vst.msk [vmem:[%s1985_s12] sm:$0xf] %vm468_vm13, %v467_v55  ;;  %v1315_v56 = vpack.c.bf16 %v467_v55, %v467_v55  ;;  %s1552_s12 = smov 8   ;;  %vm820_vm13 = vcmask 52264  }
 0x2e1   :  { %479 = vrot.lane.b32.xlu1 %v1315_v56, %s1549_s23  ;;  %474 = vrot.lane.b32.xlu0 %v1315_v56, %s1527_s26  ;;  %s1555_s23 = smov 15  }
 0x2e5   :  { %489 = vrot.lane.b32.xlu1 %v1315_v56, %s1550_s28  ;;  %484 = vrot.lane.b32.xlu0 %v1315_v56, %s1551_s0  ;;  %s1558_s28 = smov 14   ;;  %s1560_s0 = smov 4  }
 0x353   :  { %v480_v57 = vpop.permute.xlu1 %479  ;;  %v475_v58 = vpop.permute.xlu0 %474 }
 0x354   :  { %483 = vst.msk [vmem:[#allocation3 + $0x4] sm:$0xf] %vm477_vm14, %v480_v57  ;;  %478 = vst.msk [vmem:[#allocation3] sm:$0xf] %vm477_vm14, %v475_v58 }
 0x355   :  { %496 = vst.msk [vmem:[#allocation3 + $0x4] sm:$0xf] %vm494_vm15, %v1526_v3  ;;  %495 = vst.msk [vmem:[#allocation3] sm:$0xf] %vm494_vm15, %v1526_v3 }
 0x356   :  { %501 = vst.msk [vmem:[#allocation3 + $0x4] sm:$0xf] %vm499_vm0, %v1526_v3  ;;  %500 = vst.msk [vmem:[#allocation3] sm:$0xf] %vm499_vm0, %v1526_v3 }
 0x357   :  { %v490_v59 = vpop.permute.xlu1 %489  ;;  %v485_v60 = vpop.permute.xlu0 %484 }
 0x358   :  { %493 = vst.msk [vmem:[#allocation3 + $0xc] sm:$0xf] %vm477_vm14, %v490_v59  ;;  %488 = vst.msk [vmem:[#allocation3 + $0x8] sm:$0xf] %vm477_vm14, %v485_v60  ;;  %vm985_vm14 = vcmask 1045504  }
 0x359   :  { %498 = vst.msk [vmem:[#allocation3 + $0xc] sm:$0xf] %vm494_vm15, %v1526_v3  ;;  %497 = vst.msk [vmem:[#allocation3 + $0x8] sm:$0xf] %vm494_vm15, %v1526_v3 }
 0x35a   :  { %503 = vst.msk [vmem:[#allocation3 + $0xc] sm:$0xf] %vm499_vm0, %v1526_v3  ;;  %502 = vst.msk [vmem:[#allocation3 + $0x8] sm:$0xf] %vm499_vm0, %v1526_v3  ;;  %vm827_vm0 = vcmask 23552  }
 0x35d   :  { %v532_v61 = vld [vmem:[#allocation3] sm:$0xff]  }
 0x35e   :  { %v1323_v62 = vld [vmem:[#allocation3] sm:$0xff]   ;;  %v533_v63 = vunpack.c.l.bf16 %v532_v61  ;;  %v540_v1 = vunpack.c.h.bf16 %v532_v61 }
 0x35f   :  { %v1325_v0 = vunpack.c.h.bf16 %v1323_v62  ;;  %v1324_v2 = vunpack.c.l.bf16 %v1323_v62  ;;  %v560_v10 = vld [vmem:[#allocation3] sm:$0xff]  }
 0x360   :  { %535 = vrot.lane.b32.xlu0 %v533_v63, %s1529_s19  ;;  %v561_v13 = vunpack.c.l.bf16 %v560_v10  ;;  %v588_v14 = vld [vmem:[#allocation3] sm:$0xff]   ;;  %v568_v17 = vunpack.c.h.bf16 %v560_v10 }
 0x361   :  { %511 = vrot.lane.b32.xlu1 %v1325_v0, %s1552_s12  ;;  %v516_v4 = vld [vmem:[#allocation3 + $0x8] sm:$0xff]   ;;  %507 = vst.msk [vmem:[#allocation4] sm:$0xff] %vm506_vm1, %v1324_v2  ;;  %v589_v16 = vunpack.c.l.bf16 %v588_v14  ;;  %v596_v19 = vunpack.c.h.bf16 %v588_v14  ;;  %v616_v24 = vld [vmem:[#allocation3] sm:$0xff]  }
 0x362   :  { %v546_v5 = vld [vmem:[#allocation3 + $0x8] sm:$0xff]   ;;  %v517_v6 = vunpack.c.l.bf16 %v516_v4  ;;  %v525_v9 = vunpack.c.h.bf16 %v516_v4  ;;  %v617_v26 = vunpack.c.l.bf16 %v616_v24  ;;  %v624_v28 = vunpack.c.h.bf16 %v616_v24 }
 0x363   :  { %v547_v8 = vunpack.c.l.bf16 %v546_v5  ;;  %v554_v12 = vunpack.c.h.bf16 %v546_v5  ;;  %v574_v18 = vld [vmem:[#allocation3 + $0x8] sm:$0xff]  }
 0x364   :  { %542 = vrot.lane.b32.xlu0 %v540_v1, %s1553_s5  ;;  %v575_v20 = vunpack.c.l.bf16 %v574_v18  ;;  %v602_v21 = vld [vmem:[#allocation3 + $0x8] sm:$0xff]   ;;  %v582_v23 = vunpack.c.h.bf16 %v574_v18 }
 0x365   :  { %519 = vrot.lane.b32.xlu1 %v517_v6, %s1554_s21  ;;  %v603_v22 = vunpack.c.l.bf16 %v602_v21  ;;  %v610_v25 = vunpack.c.h.bf16 %v602_v21  ;;  %v630_v27 = vld [vmem:[#allocation3 + $0x8] sm:$0xff]  }
 0x366   :  { %v631_v29 = vunpack.c.l.bf16 %v630_v27  ;;  %v638_v30 = vunpack.c.h.bf16 %v630_v27  ;;  %v1524_v27 = vld [vmem:[%s1990_s11] sm:$0x3f]   ;;  %s1564_s11 = smov 9  }
 0x368   :  { %549 = vrot.lane.b32.xlu0 %v547_v8, %s1555_s23  ;;  %s1565_s23 = smov 1  }
 0x369   :  { %527 = vrot.lane.b32.xlu1 %v525_v9, %s1530_s20  ;;  %s1557_s20 = smov 5  }
 0x36c   :  { %556 = vrot.lane.b32.xlu0 %v554_v12, %s1531_s25  ;;  %s1559_s25 = smov 13   ;;  %v737_v12 = vld [vmem:[%s1988_s2] sm:$0xf] }
 0x36d   :  { %563 = vrot.lane.b32.xlu1 %v561_v13, %s1537_s29 }
 0x370   :  { %591 = vrot.lane.b32.xlu0 %v589_v16, %s1538_s30 }
 0x371   :  { %570 = vrot.lane.b32.xlu1 %v568_v17, %s1556_s10 }
 0x374   :  { %598 = vrot.lane.b32.xlu0 %v596_v19, %s1557_s20 }
 0x375   :  { %577 = vrot.lane.b32.xlu1 %v575_v20, %s1558_s28 }
 0x378   :  { %605 = vrot.lane.b32.xlu0 %v603_v22, %s1559_s25 }
 0x379   :  { %584 = vrot.lane.b32.xlu1 %v582_v23, %s1539_s16 }
 0x37c   :  { %612 = vrot.lane.b32.xlu0 %v610_v25, %s1540_s17 }
 0x37d   :  { %619 = vrot.lane.b32.xlu1 %v617_v26, %s1545_s24 }
 0x380   :  { %626 = vrot.lane.b32.xlu0 %v624_v28, %s1560_s0 }
 0x381   :  { %633 = vrot.lane.b32.xlu1 %v631_v29, %s1561_s9 }
 0x384   :  { %640 = vrot.lane.b32.xlu0 %v638_v30, %s1546_s27  ;;  %s1562_s27 = smov 121  }
 0x385   :  { %741 = vperm.xlu1 %1504, %v738_v31  }
 0x3d2   :  { %v536_v32 = vpop.permute.xlu0 %535 }
 0x3d3   :  { %v512_v33 = vpop.permute.xlu1 %511  ;;  %538 = vst.msk [vmem:[#allocation4 + $0x8] sm:$0xff] %vm506_vm1, %v536_v32 }
 0x3d4   :  { %515 = vst.msk [vmem:[#allocation4] sm:$0xff] %vm514_vm2, %v512_v33  ;;  %v987_v33 = vsel %vm985_vm14, %v1524_v27, 0  ;;  %vm1268_vm14 = vcmask 24576  }
 0x3d5   :  { %1432 = vmatpush3.bf16.msra.mxu0 %v987_v33 }
 0x3d6   :  { %v543_v34 = vpop.permute.xlu0 %542 }
 0x3d7   :  { %v520_v35 = vpop.permute.xlu1 %519  ;;  %545 = vst.msk [vmem:[#allocation4 + $0x8] sm:$0xff] %vm514_vm2, %v543_v34 }
 0x3d8   :  { %523 = vst.msk [vmem:[#allocation4] sm:$0xff] %vm522_vm3, %v520_v35 }
 0x3da   :  { %v550_v36 = vpop.permute.xlu0 %549 }
 0x3db   :  { %v528_v37 = vpop.permute.xlu1 %527  ;;  %552 = vst.msk [vmem:[#allocation4 + $0x8] sm:$0xff] %vm522_vm3, %v550_v36 }
 0x3dc   :  { %531 = vst.msk [vmem:[#allocation4] sm:$0xff] %vm530_vm6, %v528_v37 }
 0x3de   :  { %v557_v38 = vpop.permute.xlu0 %556 }
 0x3df   :  { %v564_v39 = vpop.permute.xlu1 %563  ;;  %559 = vst.msk [vmem:[#allocation4 + $0x8] sm:$0xff] %vm530_vm6, %v557_v38 }
 0x3e0   :  { %566 = vst.msk [vmem:[#allocation4 + $0x10] sm:$0xff] %vm506_vm1, %v564_v39 }
 0x3e2   :  { %v592_v40 = vpop.permute.xlu0 %591 }
 0x3e3   :  { %v571_v41 = vpop.permute.xlu1 %570  ;;  %594 = vst.msk [vmem:[#allocation4 + $0x18] sm:$0xff] %vm506_vm1, %v592_v40  ;;  %v644_v42 = vld [vmem:[#allocation4] sm:$0xff] }
 0x3e4   :  { %573 = vst.msk [vmem:[#allocation4 + $0x10] sm:$0xff] %vm514_vm2, %v571_v41 }
 0x3e6   :  { %v599_v43 = vpop.permute.xlu0 %598  ;;  %v645_v45 = vld [vmem:[#allocation4 + $0x8] sm:$0xff] }
 0x3e7   :  { %v578_v44 = vpop.permute.xlu1 %577  ;;  %601 = vst.msk [vmem:[#allocation4 + $0x18] sm:$0xff] %vm514_vm2, %v599_v43  ;;  %v649_v46 = vpack.c.bf16 %v645_v45, %v644_v42 }
 0x3e8   :  { %580 = vst.msk [vmem:[#allocation4 + $0x10] sm:$0xff] %vm522_vm3, %v578_v44 }
 0x3e9   :  { %1410 = vmatmul.mubr.msk.bf16.vlgmr.msra.gmra.mrb[4].mxu1 %vm668_vm7, %v649_v46 }
 0x3ea   :  { %v606_v47 = vpop.permute.xlu0 %605  ;;  %1413 = vmatprep.mubr.msk.bf16.mxu1 %vm1535_vm5, %v1528_v15 }
 0x3eb   :  { %v585_v48 = vpop.permute.xlu1 %584  ;;  %608 = vst.msk [vmem:[#allocation4 + $0x18] sm:$0xff] %vm522_vm3, %v606_v47 }
 0x3ec   :  { %587 = vst.msk [vmem:[#allocation4 + $0x10] sm:$0xff] %vm530_vm6, %v585_v48 }
 0x3ee   :  { %v613_v49 = vpop.permute.xlu0 %612 }
 0x3ef   :  { %v620_v50 = vpop.permute.xlu1 %619  ;;  %615 = vst.msk [vmem:[#allocation4 + $0x18] sm:$0xff] %vm530_vm6, %v613_v49 }
 0x3f0   :  { %622 = vst.msk [vmem:[#allocation4 + $0x20] sm:$0xff] %vm506_vm1, %v620_v50  ;;  %vm843_vm1 = vcmask 72752  }
 0x3f2   :  { %v627_v51 = vpop.permute.xlu0 %626 }
 0x3f3   :  { %v634_v52 = vpop.permute.xlu1 %633  ;;  %629 = vst.msk [vmem:[#allocation4 + $0x20] sm:$0xff] %vm514_vm2, %v627_v51  ;;  %v646_v53 = vld [vmem:[#allocation4 + $0x10] sm:$0xff]  ;;  %vm851_vm2 = vcmask 97352  }
 0x3f4   :  { %636 = vst.msk [vmem:[#allocation4 + $0x20] sm:$0xff] %vm522_vm3, %v634_v52 }
 0x3f6   :  { %v641_v54 = vpop.permute.xlu0 %640  ;;  %v647_v55 = vld [vmem:[#allocation4 + $0x18] sm:$0xff] }
 0x3f7   :  { %643 = vst.msk [vmem:[#allocation4 + $0x20] sm:$0xff] %vm530_vm6, %v641_v54  ;;  %v650_v56 = vpack.c.bf16 %v647_v55, %v646_v53  ;;  %vm1104_vm6 = vcmask 31744  }
 0x3f9   :  { %1414 = vmatmul.mubr.msk.bf16.gmra.mrb[8].mxu1 %vm668_vm7, %v650_v56 }
 0x3fa   :  { %1417 = vmatprep.mubr.msk.bf16.mxu1 %vm1535_vm5, %v1528_v15 }
 0x3fe   :  { %v648_v57 = vld [vmem:[#allocation4 + $0x20] sm:$0xff] }
 0x3ff   :  { %v651_v58 = vpack.c.bf16 %v648_v57, %v648_v57 }
 0x401   :  { %1418 = vmatmul.mubr.msk.bf16.gmra.mrb[12].mxu1 %vm668_vm7, %v651_v58  ;;  %vm1113_vm7 = vcmask 11272  }
 0x402   :  { %1427 = vmatprep.mubr.msk.bf16.mxu1 %vm1535_vm5, %v1528_v15 }
 0x404   :  { %v742_v13 = vpop.permute.xlu1 %741 }
 0x4bc   :  { %v712_v59 = vpop.f32.mrb[4].mxu1 }
 0x4bd   :  { %v1411_v60 = vpop.f32.mrb[5].mxu1 }
 0x4be   :  { %v715_v61 = vpop.f32.mrb[6].mxu1 }
 0x4bf   :  { %v734_v62 = vpack.c.bf16 %v715_v61, %v712_v59  ;;  %v1412_v63 = vpop.f32.mrb[7].mxu1 }
 0x4c1   :  { %1422 = vmatpush3.bf16.msra.mxu1 %v734_v62 }
 0x4c2   :  { %1423 = vmatprep.subr.bf16.mxu1 %v1528_v15 }
 0x4cc   :  { %v720_v0 = vpop.f32.mrb[8].mxu1 }
 0x4cd   :  { %v1415_v1 = vpop.f32.mrb[9].mxu1 }
 0x4ce   :  { %v723_v2 = vpop.f32.mrb[10].mxu1 }
 0x4cf   :  { %v735_v4 = vpack.c.bf16 %v723_v2, %v720_v0  ;;  %v1416_v5 = vpop.f32.mrb[11].mxu1 }
 0x4d1   :  { %1424 = vmatpush3.bf16.msra.mxu1 %v735_v4 }
 0x4d2   :  { %1425 = vmatprep.subr.bf16.mxu1 %v1528_v15 }
 0x4d4   :  { %v728_v6 = vpop.f32.mrb[12].mxu1 }
 0x4d5   :  { %v736_v7 = vpack.c.bf16 %v728_v6, %v728_v6  ;;  %v1419_v8 = vpop.f32.mrb[13].mxu1 }
 0x4d6   :  { %v731_v9 = vpop.f32.mrb[14].mxu1 }
 0x4d7   :  { %v748_v10 = vsel %vm421_vm10, %v736_v7, 0  ;;  %v1420_v11 = vpop.f32.mrb[15].mxu1 }
 0x4d8   :  { %1426 = vmatpush3.bf16.msra.mxu1 %v748_v10 }
 0x4d9   :  { %1445 = vmatprep.subr.bf16.mxu1 %v1528_v15 }
 0x4db   :  { %1428 = vmatmul.mubr.msk.bf16.vlgmr.msra.gmra.mrb[16].mxu1 %vm417_vm11, %v737_v12 }
 0x4dc   :  { %1451 = vmatprep.mubr.msk.bf16.mxu1 %vm1535_vm5, %v1528_v15 }
 0x5ae   :  { %v784_v14 = vpop.f32.mrb[16].mxu1 }
 0x5af   :  { %v785_v16 = vadd.f32 %v784_v14, %v742_v13  ;;  %v1429_v17 = vpop.f32.mrb[17].mxu1 }
 0x5b0   :  { %v787_v18 = vpop.f32.mrb[18].mxu1 }
 0x5b1   :  { %vm790_vm8 = vcmp.ge.f32.partialorder %v785_v16, 0.0  ;;  %v791_v19 = vmul.f32 0.1, %v785_v16  ;;  %v1430_v20 = vpop.f32.mrb[19].mxu1 }
 0x5b3   :  { %v792_v21 = vsel %vm790_vm8, %v785_v16, %v791_v19  ;;  %vm1129_vm8 = vcmask 19472  }
 0x5b4   :  { %794 = vst.msk [vmem:[%s1989_s13] sm:$0xff] %vm793_vm9, %v792_v21  ;;  %v1316_v22 = vpack.c.bf16 %v792_v21, %v792_v21 }
 0x5b6   :  { %804 = vrot.lane.b32.xlu1 %v1316_v22, %s1529_s19  ;;  %799 = vrot.lane.b32.xlu0 %v1316_v22, %s1527_s26 }
 0x5ba   :  { %812 = vrot.lane.b32.xlu1 %v1316_v22, %s1562_s27  ;;  %808 = vrot.lane.b32.xlu0 %v1316_v22, %s1545_s24 }
 0x628   :  { %v805_v23 = vpop.permute.xlu1 %804  ;;  %v800_v24 = vpop.permute.xlu0 %799 }
 0x629   :  { %807 = vst.msk [vmem:[#allocation2 + $0x4] sm:$0xf] %vm802_vm12, %v805_v23  ;;  %803 = vst.msk [vmem:[#allocation2] sm:$0xf] %vm802_vm12, %v800_v24  ;;  %v1049_v24 = vld [vmem:[%s1991_s7] sm:$0xff] }
 0x62a   :  { %817 = vst.msk [vmem:[#allocation2 + $0x4] sm:$0xf] %vm494_vm15, %v1526_v3  ;;  %816 = vst.msk [vmem:[#allocation2] sm:$0xf] %vm494_vm15, %v1526_v3 }
 0x62b   :  { %821 = vst.msk [vmem:[#allocation2] sm:$0xf] %vm820_vm13, %v1526_v3  ;;  %822 = vst.msk [vmem:[#allocation2 + $0x4] sm:$0xf] %vm820_vm13, %v1526_v3 }
 0x62c   :  { %v813_v25 = vpop.permute.xlu1 %812  ;;  %v809_v26 = vpop.permute.xlu0 %808 }
 0x62d   :  { %815 = vst.msk [vmem:[#allocation2 + $0xc] sm:$0xf] %vm802_vm12, %v813_v25  ;;  %811 = vst.msk [vmem:[#allocation2 + $0x8] sm:$0xf] %vm802_vm12, %v809_v26  ;;  %vm1152_vm12 = vcmask 23568  }
 0x62e   :  { %819 = vst.msk [vmem:[#allocation2 + $0xc] sm:$0xf] %vm494_vm15, %v1526_v3  ;;  %818 = vst.msk [vmem:[#allocation2 + $0x8] sm:$0xf] %vm494_vm15, %v1526_v3  ;;  %vm835_vm15 = vcmask 48152  }
 0x62f   :  { %823 = vst.msk [vmem:[#allocation2 + $0x8] sm:$0xf] %vm820_vm13, %v1526_v3  ;;  %824 = vst.msk [vmem:[#allocation2 + $0xc] sm:$0xf] %vm820_vm13, %v1526_v3  ;;  %vm1160_vm13 = vcmask 31768  }
 0x632   :  { %v853_v28 = vld [vmem:[#allocation2] sm:$0xf]  ;;  %v916_v0 = vld [vmem:[#allocation2 + $0x4] sm:$0xf] }
 0x633   :  { %v1327_v29 = vld [vmem:[#allocation2] sm:$0xff]   ;;  %v854_v30 = vunpack.c.l.bf16 %v853_v28  ;;  %v917_v4 = vunpack.c.l.bf16 %v916_v0 }
 0x634   :  { %v1329_v31 = vunpack.c.h.bf16 %v1327_v29  ;;  %v1328_v32 = vunpack.c.l.bf16 %v1327_v29  ;;  %v881_v41 = vld [vmem:[#allocation2] sm:$0xff]  }
 0x635   :  { %856 = vrot.lane.b32.xlu0 %v854_v30, %s1529_s19  ;;  %v882_v43 = vunpack.c.l.bf16 %v881_v41  ;;  %v909_v44 = vld [vmem:[#allocation2] sm:$0xff]   ;;  %v889_v46 = vunpack.c.h.bf16 %v881_v41 }
 0x636   :  { %832 = vrot.lane.b32.xlu1 %v1329_v31, %s1563_s1  ;;  %828 = vst.msk [vmem:[#allocation4] sm:$0xff] %vm827_vm0, %v1328_v32  ;;  %v860_v34 = vld [vmem:[#allocation2 + $0x4] sm:$0xff]   ;;  %v910_v45 = vunpack.c.l.bf16 %v909_v44  ;;  %v933_v53 = vld [vmem:[#allocation2] ss:$12 sps:$4 sm:$0xff]   ;;  %v941_v55 = vunpack.c.h.bf16 %v909_v44 }
 0x637   :  { %v867_v35 = vld [vmem:[#allocation2 + $0x8] sm:$0xff]   ;;  %v861_v36 = vunpack.c.l.bf16 %v860_v34  ;;  %v838_v37 = vunpack.c.h.bf16 %v860_v34  ;;  %v934_v54 = vunpack.c.l.bf16 %v933_v53  ;;  %v955_v57 = vunpack.c.h.bf16 %v933_v53  ;;  %v1048_v41 = vld [vmem:[%s1992_s3] sm:$0xf] }
 0x638   :  { %v868_v38 = vunpack.c.l.bf16 %v867_v35  ;;  %v846_v39 = vunpack.c.h.bf16 %v867_v35  ;;  %v874_v40 = vld [vmem:[#allocation2 + $0x8] sm:$0xff]  }
 0x639   :  { %863 = vrot.lane.b32.xlu0 %v861_v36, %s1527_s26  ;;  %v875_v42 = vunpack.c.h.bf16 %v874_v40  ;;  %v919_v47 = vld [vmem:[#allocation2 + $0x8] sm:$0xff]   ;;  %v896_v48 = vunpack.c.l.bf16 %v874_v40 }
 0x63a   :  { %840 = vrot.lane.b32.xlu1 %v838_v37, %s1556_s10  ;;  %v920_v49 = vunpack.c.l.bf16 %v919_v47  ;;  %v926_v50 = vld [vmem:[#allocation2 + $0x8] sm:$0xff]   ;;  %v903_v51 = vunpack.c.h.bf16 %v919_v47 }
 0x63b   :  { %v927_v52 = vunpack.c.h.bf16 %v926_v50  ;;  %v948_v56 = vunpack.c.l.bf16 %v926_v50 }
 0x63d   :  { %870 = vrot.lane.b32.xlu0 %v868_v38, %s1557_s20 }
 0x63e   :  { %848 = vrot.lane.b32.xlu1 %v846_v39, %s1564_s11 }
 0x641   :  { %877 = vrot.lane.b32.xlu0 %v875_v42, %s1552_s12 }
 0x642   :  { %884 = vrot.lane.b32.xlu1 %v882_v43, %s1537_s29 }
 0x645   :  { %912 = vrot.lane.b32.xlu0 %v910_v45, %s1538_s30 }
 0x646   :  { %891 = vrot.lane.b32.xlu1 %v889_v46, %s1565_s23 }
 0x649   :  { %898 = vrot.lane.b32.xlu0 %v896_v48, %s1560_s0 }
 0x64a   :  { %922 = vrot.lane.b32.xlu1 %v920_v49, %s1563_s1 }
 0x64d   :  { %905 = vrot.lane.b32.xlu0 %v903_v51, %s1553_s5 }
 0x64e   :  { %929 = vrot.lane.b32.xlu1 %v927_v52, %s1556_s10 }
 0x651   :  { %936 = vrot.lane.b32.xlu0 %v934_v54, %s1545_s24 }
 0x652   :  { %943 = vrot.lane.b32.xlu1 %v941_v55, %s1529_s19 }
 0x655   :  { %950 = vrot.lane.b32.xlu0 %v948_v56, %s1527_s26 }
 0x656   :  { %957 = vrot.lane.b32.xlu1 %v955_v57, %s1557_s20 }
 0x659   :  { %1052 = vperm.xlu0 %1505, %v1049_v24  }
 0x6a7   :  { %v857_v58 = vpop.permute.xlu0 %856 }
 0x6a8   :  { %v833_v59 = vpop.permute.xlu1 %832  ;;  %859 = vst.msk [vmem:[#allocation4 + $0x8] sm:$0xff] %vm827_vm0, %v857_v58 }
 0x6a9   :  { %836 = vst.msk [vmem:[#allocation4] sm:$0xff] %vm835_vm15, %v833_v59 }
 0x6ab   :  { %v864_v60 = vpop.permute.xlu0 %863 }
 0x6ac   :  { %v841_v61 = vpop.permute.xlu1 %840  ;;  %866 = vst.msk [vmem:[#allocation4 + $0x8] sm:$0xff] %vm835_vm15, %v864_v60 }
 0x6ad   :  { %844 = vst.msk [vmem:[#allocation4] sm:$0xff] %vm843_vm1, %v841_v61 }
 0x6af   :  { %v871_v62 = vpop.permute.xlu0 %870 }
 0x6b0   :  { %v849_v63 = vpop.permute.xlu1 %848  ;;  %873 = vst.msk [vmem:[#allocation4 + $0x8] sm:$0xff] %vm843_vm1, %v871_v62 }
 0x6b1   :  { %852 = vst.msk [vmem:[#allocation4] sm:$0xff] %vm851_vm2, %v849_v63 }
 0x6b3   :  { %v878_v1 = vpop.permute.xlu0 %877 }
 0x6b4   :  { %v885_v2 = vpop.permute.xlu1 %884  ;;  %880 = vst.msk [vmem:[#allocation4 + $0x8] sm:$0xff] %vm851_vm2, %v878_v1 }
 0x6b5   :  { %887 = vst.msk [vmem:[#allocation4 + $0x10] sm:$0xff] %vm827_vm0, %v885_v2 }
 0x6b7   :  { %v913_v5 = vpop.permute.xlu0 %912 }
 0x6b8   :  { %v892_v6 = vpop.permute.xlu1 %891  ;;  %915 = vst.msk [vmem:[#allocation4 + $0x18] sm:$0xff] %vm827_vm0, %v913_v5  ;;  %v961_v9 = vld [vmem:[#allocation4] sm:$0xff] }
 0x6b9   :  { %894 = vst.msk [vmem:[#allocation4 + $0x10] sm:$0xff] %vm835_vm15, %v892_v6  ;;  %918 = vst.msk [vmem:[#allocation4 + $0x18] sm:$0xff] %vm835_vm15, %v917_v4 }
 0x6bb   :  { %v899_v7 = vpop.permute.xlu0 %898  ;;  %v962_v10 = vld [vmem:[#allocation4 + $0x8] sm:$0xff] }
 0x6bc   :  { %v923_v8 = vpop.permute.xlu1 %922  ;;  %901 = vst.msk [vmem:[#allocation4 + $0x10] sm:$0xff] %vm843_vm1, %v899_v7  ;;  %v966_v11 = vpack.c.bf16 %v962_v10, %v961_v9 }
 0x6bd   :  { %925 = vst.msk [vmem:[#allocation4 + $0x18] sm:$0xff] %vm843_vm1, %v923_v8  ;;  %v1216_v8 = vld [vmem:[%s1994_s8] sm:$0xff] }
 0x6be   :  { %1434 = vmatmul.mubr.msk.bf16.vlgmr.msra.gmra.mrb[12].mxu0 %vm793_vm9, %v966_v11 }
 0x6bf   :  { %v906_v12 = vpop.permute.xlu0 %905  ;;  %1437 = vmatprep.mubr.msk.bf16.mxu0 %vm1535_vm5, %v1528_v15 }
 0x6c0   :  { %v930_v13 = vpop.permute.xlu1 %929  ;;  %908 = vst.msk [vmem:[#allocation4 + $0x10] sm:$0xff] %vm851_vm2, %v906_v12 }
 0x6c1   :  { %932 = vst.msk [vmem:[#allocation4 + $0x18] sm:$0xff] %vm851_vm2, %v930_v13 }
 0x6c3   :  { %v937_v14 = vpop.permute.xlu0 %936 }
 0x6c4   :  { %v944_v16 = vpop.permute.xlu1 %943  ;;  %939 = vst.msk [vmem:[#allocation4 + $0x20] sm:$0xff] %vm827_vm0, %v937_v14 }
 0x6c5   :  { %946 = vst.msk [vmem:[#allocation4 + $0x20] sm:$0xff] %vm835_vm15, %v944_v16 }
 0x6c7   :  { %v951_v17 = vpop.permute.xlu0 %950  ;;  %v963_v19 = vld [vmem:[#allocation4 + $0x10] sm:$0xff] }
 0x6c8   :  { %v958_v18 = vpop.permute.xlu1 %957  ;;  %v964_v20 = vld [vmem:[#allocation4 + $0x18] sm:$0xff]  ;;  %953 = vst.msk [vmem:[#allocation4 + $0x20] sm:$0xff] %vm843_vm1, %v951_v17 }
 0x6c9   :  { %v967_v21 = vpack.c.bf16 %v964_v20, %v963_v19  ;;  %960 = vst.msk [vmem:[#allocation4 + $0x20] sm:$0xff] %vm851_vm2, %v958_v18 }
 0x6cb   :  { %1438 = vmatmul.mubr.msk.bf16.gmra.mrb[16].mxu0 %vm793_vm9, %v967_v21 }
 0x6cc   :  { %1441 = vmatprep.mubr.msk.bf16.mxu0 %vm1535_vm5, %v1528_v15 }
 0x6d0   :  { %v965_v22 = vld [vmem:[#allocation4 + $0x20] sm:$0xff] }
 0x6d1   :  { %v968_v23 = vpack.c.bf16 %v965_v22, %v965_v22 }
 0x6d3   :  { %1442 = vmatmul.mubr.msk.bf16.gmra.mrb[20].mxu0 %vm793_vm9, %v968_v23  ;;  %vm1144_vm9 = vcmask 15368  }
 0x6d8   :  { %v1053_v42 = vpop.permute.xlu0 %1052 }
 0x791   :  { %v1023_v25 = vpop.f32.mrb[12].mxu0 }
 0x792   :  { %v1435_v26 = vpop.f32.mrb[13].mxu0 }
 0x793   :  { %v1026_v27 = vpop.f32.mrb[14].mxu0 }
 0x794   :  { %v1045_v28 = vpack.c.bf16 %v1026_v27, %v1023_v25  ;;  %v1436_v29 = vpop.f32.mrb[15].mxu0 }
 0x796   :  { %1446 = vmatpush3.bf16.msra.mxu1 %v1045_v28 }
 0x797   :  { %1447 = vmatprep.subr.bf16.mxu1 %v1528_v15 }
 0x79e   :  { %v1031_v30 = vpop.f32.mrb[16].mxu0 }
 0x79f   :  { %v1439_v31 = vpop.f32.mrb[17].mxu0 }
 0x7a0   :  { %v1034_v32 = vpop.f32.mrb[18].mxu0 }
 0x7a1   :  { %v1046_v33 = vpack.c.bf16 %v1034_v32, %v1031_v30  ;;  %v1440_v34 = vpop.f32.mrb[19].mxu0  ;;  %v1215_v30 = vld [vmem:[%s1995_s4] sm:$0xf] }
 0x7a3   :  { %1448 = vmatpush3.bf16.msra.mxu1 %v1046_v33 }
 0x7a4   :  { %1449 = vmatprep.subr.bf16.mxu1 %v1528_v15 }
 0x7a6   :  { %v1039_v35 = vpop.f32.mrb[20].mxu0 }
 0x7a7   :  { %v1047_v36 = vpack.c.bf16 %v1039_v35, %v1039_v35  ;;  %v1443_v37 = vpop.f32.mrb[21].mxu0 }
 0x7a8   :  { %v1042_v38 = vpop.f32.mrb[22].mxu0 }
 0x7a9   :  { %v1059_v39 = vsel %vm421_vm10, %v1047_v36, 0  ;;  %v1444_v40 = vpop.f32.mrb[23].mxu0 }
 0x7aa   :  { %1450 = vmatpush3.bf16.msra.mxu1 %v1059_v39 }
 0x7ab   :  { %1455 = vmatprep.subr.bf16.mxu1 %v1528_v15 }
 0x7ad   :  { %1452 = vmatmul.mubr.msk.bf16.vlgmr.msra.gmra.mrb[20].mxu1 %vm417_vm11, %v1048_v41  ;;  %vm1124_vm11 = vcmask 3072  }
 0x7ae   :  { %1459 = vmatprep.mubr.msk.bf16.mxu1 %vm1535_vm5, %v1528_v15  ;;  %vm1136_vm5 = vcmask 7168  }
 0x880   :  { %v1095_v43 = vpop.f32.mrb[20].mxu1 }
 0x881   :  { %v1096_v44 = vadd.f32 %v1095_v43, %v1053_v42  ;;  %v1453_v45 = vpop.f32.mrb[21].mxu1 }
 0x882   :  { %v1098_v46 = vpop.f32.mrb[22].mxu1 }
 0x883   :  { %vm1101_vm3 = vcmp.ge.f32.partialorder %v1096_v44, 0.0  ;;  %v1102_v47 = vmul.f32 0.1, %v1096_v44  ;;  %v1454_v48 = vpop.f32.mrb[23].mxu1 }
 0x885   :  { %v1103_v49 = vsel %vm1101_vm3, %v1096_v44, %v1102_v47 }
 0x886   :  { %1105 = vst.msk [vmem:[%s1993_s14] sm:$0xff] %vm1104_vm6, %v1103_v49  ;;  %v1106_v50 = vpack.c.bf16 %v1103_v49, %v1103_v49 }
 0x888   :  { %1110 = vrot.lane.b32.xlu1 %v1106_v50, %s1565_s23  ;;  %1120 = vrot.lane.b32.xlu0 %v1106_v50, %s1537_s29  ;;  %1115 = vst.msk [vmem:[#allocation3 + $0x4] sm:$0xf] %vm1113_vm7, %v1106_v50 }
 0x889   :  { %1126 = vst.msk [vmem:[#allocation3 + $0x4] sm:$0xf] %vm1124_vm11, %v1526_v3 }
 0x88a   :  { %1131 = vst.msk [vmem:[#allocation3 + $0x4] sm:$0xf] %vm1129_vm8, %v1526_v3 }
 0x88c   :  { %1116 = vrot.lane.b32.xlu1 %v1106_v50, %s1529_s19 }
 0x891   :  { %v1169_v9 = vld [vmem:[#allocation3 + $0x4] sm:$0xf] }
 0x892   :  { %v1170_v10 = vunpack.c.l.bf16 %v1169_v9 }
 0x8fa   :  { %v1111_v51 = vpop.permute.xlu1 %1110  ;;  %v1121_v52 = vpop.permute.xlu0 %1120 }
 0x8fb   :  { %1114 = vst.msk [vmem:[#allocation3] sm:$0xf] %vm1113_vm7, %v1111_v51  ;;  %1123 = vst.msk [vmem:[#allocation3 + $0xc] sm:$0xf] %vm1113_vm7, %v1121_v52 }
 0x8fc   :  { %1125 = vst.msk [vmem:[#allocation3] sm:$0xf] %vm1124_vm11, %v1526_v3  ;;  %1128 = vst.msk [vmem:[#allocation3 + $0xc] sm:$0xf] %vm1124_vm11, %v1526_v3 }
 0x8fd   :  { %1130 = vst.msk [vmem:[#allocation3] sm:$0xf] %vm1129_vm8, %v1526_v3  ;;  %1133 = vst.msk [vmem:[#allocation3 + $0xc] sm:$0xf] %vm1129_vm8, %v1526_v3 }
 0x8fe   :  { %v1117_v53 = vpop.permute.xlu1 %1116 }
 0x8ff   :  { %1119 = vst.msk [vmem:[#allocation3 + $0x8] sm:$0xf] %vm1113_vm7, %v1117_v53 }
 0x900   :  { %1127 = vst.msk [vmem:[#allocation3 + $0x8] sm:$0xf] %vm1124_vm11, %v1526_v3 }
 0x901   :  { %1132 = vst.msk [vmem:[#allocation3 + $0x8] sm:$0xf] %vm1129_vm8, %v1526_v3 }
 0x904   :  { %v1162_v54 = vld [vmem:[#allocation3] sm:$0xf] }
 0x905   :  { %v1331_v55 = vld [vmem:[#allocation3] sm:$0xff]   ;;  %v1163_v56 = vunpack.c.l.bf16 %v1162_v54 }
 0x906   :  { %v1332_v57 = vunpack.c.l.bf16 %v1331_v55  ;;  %v1333_v58 = vunpack.c.h.bf16 %v1331_v55  ;;  %v1186_v0 = vld [vmem:[#allocation3] sm:$0xff]  }
 0x907   :  { %1165 = vrot.lane.b32.xlu1 %v1163_v56, %s1529_s19  ;;  %v1187_v4 = vunpack.c.l.bf16 %v1186_v0  ;;  %v1194_v6 = vunpack.c.h.bf16 %v1186_v0 }
 0x908   :  { %1137 = vst.msk [vmem:[#allocation4] sm:$0xff] %vm1136_vm5, %v1332_v57  ;;  %v1172_v59 = vld [vmem:[#allocation3 + $0x8] sm:$0xff]  }
 0x909   :  { %v1146_v60 = vld [vmem:[#allocation3 + $0x8] sm:$0xff]   ;;  %v1173_v61 = vunpack.c.l.bf16 %v1172_v59  ;;  %v1180_v63 = vunpack.c.h.bf16 %v1172_v59 }
 0x90a   :  { %v1147_v62 = vunpack.c.l.bf16 %v1146_v60  ;;  %v1155_v3 = vunpack.c.h.bf16 %v1146_v60  ;;  %v1335_v5 = vld [vmem:[#allocation3 + $0x8] sm:$0xff]  }
 0x90b   :  { %v1506_v1 = vpack.i.bf16 %v1173_v61, %v1333_v58  ;;  %v1337_v7 = vunpack.c.h.bf16 %v1335_v5  ;;  %v1336_v21 = vunpack.c.l.bf16 %v1335_v5 }
 0x90c   :  { %v1511_v2 = vpack.i.bf16 %v1180_v63, %v1147_v62 }
 0x90d   :  { %1507 = vrot.lane.b32.xlu0 %v1506_v1, %s1565_s23 }
 0x90e   :  { %1512 = vrot.lane.b32.xlu1 %v1511_v2, %s1527_s26 }
 0x911   :  { %1157 = vrot.lane.b32.xlu0 %v1155_v3, %s1563_s1 }
 0x912   :  { %1189 = vrot.lane.b32.xlu1 %v1187_v4, %s1537_s29 }
 0x915   :  { %1196 = vrot.lane.b32.xlu0 %v1194_v6, %s1529_s19 }
 0x916   :  { %1206 = vrot.lane.b32.xlu1 %v1337_v7, %s1565_s23 }
 0x919   :  { %1219 = vperm.xlu0 %1505, %v1216_v8  }
 0x979   :  { %v1166_v11 = vpop.permute.xlu1 %1165 }
 0x97a   :  { %1168 = vst.msk [vmem:[#allocation4 + $0x8] sm:$0xff] %vm1136_vm5, %v1166_v11 }
 0x97b   :  { %1171 = vst.msk [vmem:[#allocation4 + $0x8] sm:$0xff] %vm1144_vm9, %v1170_v10 }
 0x97f   :  { %v1508_v12 = vpop.permute.xlu0 %1507 }
 0x980   :  { %v1513_v13 = vpop.permute.xlu1 %1512  ;;  %v1510_v14 = vunpack.i.h.bf16 %v1508_v12  ;;  %v1509_v16 = vunpack.i.l.bf16 %v1508_v12 }
 0x981   :  { %v1515_v17 = vunpack.i.h.bf16 %v1513_v13  ;;  %v1514_v18 = vunpack.i.l.bf16 %v1513_v13 }
 0x982   :  { %1145 = vst.msk [vmem:[#allocation4] sm:$0xff] %vm1144_vm9, %v1509_v16 }
 0x983   :  { %1178 = vst.msk [vmem:[#allocation4 + $0x8] sm:$0xff] %vm1152_vm12, %v1510_v14  ;;  %v1158_v19 = vpop.permute.xlu0 %1157  ;;  %1153 = vst.msk [vmem:[#allocation4] sm:$0xff] %vm1152_vm12, %v1514_v18 }
 0x984   :  { %1185 = vst.msk [vmem:[#allocation4 + $0x8] sm:$0xff] %vm1160_vm13, %v1515_v17  ;;  %v1190_v20 = vpop.permute.xlu1 %1189  ;;  %1161 = vst.msk [vmem:[#allocation4] sm:$0xff] %vm1160_vm13, %v1158_v19 }
 0x985   :  { %1192 = vst.msk [vmem:[#allocation4 + $0x10] sm:$0xff] %vm1136_vm5, %v1190_v20 }
 0x987   :  { %v1197_v22 = vpop.permute.xlu0 %1196 }
 0x988   :  { %v1207_v23 = vpop.permute.xlu1 %1206  ;;  %1199 = vst.msk [vmem:[#allocation4 + $0x10] sm:$0xff] %vm1144_vm9, %v1197_v22 }
 0x989   :  { %1202 = vst.msk [vmem:[#allocation4 + $0x10] sm:$0xff] %vm1152_vm12, %v1336_v21 }
 0x98a   :  { %1209 = vst.msk [vmem:[#allocation4 + $0x10] sm:$0xff] %vm1160_vm13, %v1207_v23 }
 0x98b   :  { %v1211_v24 = vld [vmem:[#allocation4 + $0x8] sm:$0xff]  ;;  %v1210_v25 = vld [vmem:[#allocation4] sm:$0xff] }
 0x98c   :  { %v1213_v26 = vpack.c.bf16 %v1211_v24, %v1210_v25 }
 0x98e   :  { %1456 = vmatpush3.bf16.msra.mxu1 %v1213_v26 }
 0x98f   :  { %1457 = vmatprep.subr.bf16.mxu1 %v1528_v15 }
 0x991   :  { %v1212_v27 = vld [vmem:[#allocation4 + $0x10] sm:$0xff] }
 0x992   :  { %v1214_v28 = vpack.c.bf16 %v1212_v27, %v1212_v27 }
 0x994   :  { %v1226_v29 = vsel %vm421_vm10, %v1214_v28, 0 }
 0x995   :  { %1458 = vmatpush3.bf16.msra.mxu1 %v1226_v29 }
 0x998   :  { %1460 = vmatmul.mubr.msk.bf16.vlgmr.msra.gmra.mrb[24].mxu1 %vm144_vm4, %v1215_v30  ;;  %v1220_v31 = vpop.permute.xlu0 %1219 }
 0xa6b   :  { %v1262_v32 = vpop.f32.mrb[24].mxu1 }
 0xa6c   :  { %v1263_v33 = vadd.f32 %v1262_v32, %v1220_v31  ;;  %v1461_v34 = vpop.f32.mrb[25].mxu1 }
 0xa6d   :  { %v1265_v35 = vpop.f32.mrb[26].mxu1 }
 0xa6e   :  { %1269 = vst.msk [vmem:[%s1996_s15] sm:$0x1] %vm1268_vm14, %v1263_v33  ;;  %v1462_v15 = vpop.f32.mrb[27].mxu1 }

// kernel: discriminator_forward.5
= control target key start
LH: loop header
LB: loop body
LE: loop exit
PB: predicated region body
PF: predicated region fallthrough
CT: control target
= control target key end

     0   :  { %v75_v0 = vlaneseq  ;;  %vm46_vm0 = vcmask 158720   ;;  %v1941_v1 = vmov 1935823168   ;;  %v1942_v3 = vmov 0   ;;  %s1943_s26 = smov 2   ;;  %s1945_s19 = smov 127   ;;  %s2528_s0 = inlined_call_operand.vmem [shape: bf16[6,1,16], index: 0, kind: input, shape index: {}]   ;;  %s2529_s9 = inlined_call_operand.vmem [shape: bf16[96,36], index: 9, kind: input, shape index: {}]   ;;  %s2530_s5 = inlined_call_operand.vmem [shape: f32[8,1], index: 5, kind: input, shape index: {}]   ;;  %s2531_s1 = inlined_call_operand.vmem [shape: bf16[8,40], index: 1, kind: input, shape index: {}]   ;;  %s2532_s12 = inlined_call_operand.vmem [shape: f32[4,36], index: 12, kind: output, shape index: {0}]   ;;  %s2533_s10 = inlined_call_operand.vmem [shape: bf16[36,12], index: 10, kind: input, shape index: {}]   ;;  %s2534_s6 = inlined_call_operand.vmem [shape: f32[8,1], index: 6, kind: input, shape index: {}]   ;;  %s2535_s2 = inlined_call_operand.vmem [shape: bf16[8,40], index: 2, kind: input, shape index: {}]   ;;  %s2536_s13 = inlined_call_operand.vmem [shape: f32[8,12], index: 13, kind: output, shape index: {1}]   ;;  %s2537_s11 = inlined_call_operand.vmem [shape: bf16[12,6], index: 11, kind: input, shape index: {}]   ;;  %s2538_s7 = inlined_call_operand.vmem [shape: f32[8,1], index: 7, kind: input, shape index: {}]   ;;  %s2539_s3 = inlined_call_operand.vmem [shape: bf16[8,40], index: 3, kind: input, shape index: {}]   ;;  %s2540_s14 = inlined_call_operand.vmem [shape: f32[8,6], index: 14, kind: output, shape index: {2}]   ;;  %s2541_s8 = inlined_call_operand.vmem [shape: f32[8,1], index: 8, kind: input, shape index: {}]   ;;  %s2542_s4 = inlined_call_operand.vmem [shape: bf16[8,24], index: 4, kind: input, shape index: {}]   ;;  %s2543_s15 = inlined_call_operand.vmem [shape: f32[1,6], index: 15, kind: output, shape index: {3}]  }
   0x1   :  { %v73_v2 = vunpack.c.l.s4 %v1941_v1  ;;  %47 = vst.msk [vmem:[#allocation2] sm:$0xf] %vm46_vm0, %v1942_v3  ;;  %48 = vst.msk [vmem:[#allocation2 + $0x4] sm:$0xf] %vm46_vm0, %v1942_v3  ;;  %1879 = vset.pattern.permute.xlu1 %v1942_v3  ;;  %1930 = vset.pattern.permute.xlu0 %v1942_v3  ;;  %vm167_vm1 = vcmask 139280   ;;  %v1944_v36 = vmov 0.0  }
   0x2   :  { %49 = vst.msk [vmem:[#allocation2 + $0x8] sm:$0xf] %vm46_vm0, %v1942_v3  ;;  %50 = vst.msk [vmem:[#allocation2 + $0xc] sm:$0xf] %vm46_vm0, %v1942_v3  ;;  %v76_v4 = vshrl.u32 %v75_v0, 7  ;;  %1726 = vmatprep.subr.bf16.mxu0 %v1944_v36  ;;  %v1931_v37 = vld [vmem:[%s2529_s9] sm:$0xff]   ;;  %1750 = vmatprep.subr.bf16.mxu1 %v1944_v36 }
   0x3   :  { %51 = vst.msk [vmem:[#allocation2 + $0x10] sm:$0xf] %vm46_vm0, %v1942_v3  ;;  %52 = vst.msk [vmem:[#allocation2 + $0x14] sm:$0xf] %vm46_vm0, %v1942_v3  ;;  %v74_v6 = vunpack.c.0.s8 %v73_v2  ;;  %vm168_vm2 = vsmask.f32 256  ;;  %1727 = vmatpush3.bf16.msra.mxu0 %v1931_v37 }
   0x4   :  { %v1633_v5 = vld.sshfl [vmem:[%s2528_s0] sm:$0x1 pattern:$0x73625140]  ;;  %vm2112_vm3 = vmand %vm167_vm1, %vm168_vm2  ;;  %1728 = vmatprep.subr.bf16.mxu0 %v1944_v36  ;;  %v1932_v40 = vld [vmem:[%s2529_s9 + $0x8] sm:$0xff]   ;;  %s1946_s20 = smov 16  }
   0x5   :  { %v1635_v7 = vld.sshfl [vmem:[%s2528_s0 + $0x2] sm:$0x1 pattern:$0x73625140]  ;;  %v77_v8 = vsub.s32 %v74_v6, %v76_v4  ;;  %v1933_v47 = vld [vmem:[%s2529_s9 + $0x10] sm:$0xff]   ;;  %v1934_v50 = vld [vmem:[%s2529_s9 + $0x18] sm:$0xff]  }
   0x6   :  { %v1634_v9 = vld.sshfl [vmem:[%s2528_s0 + $0x1] sm:$0x1 pattern:$0x73625140]  ;;  %s1947_s25 = smov 15   ;;  %s1948_s27 = smov 32  }
   0x7   :  { %v1636_v10 = vld.sshfl [vmem:[%s2528_s0 + $0x3] sm:$0x1 pattern:$0x73625140]  ;;  %v78_v11 = vrot.slane %v1633_v5, %v77_v8  ;;  %v106_v12 = vrot.slane %v1635_v7, %v77_v8  ;;  %v92_v13 = vrot.slane %v1634_v9, %v77_v8  ;;  %1729 = vmatpush3.bf16.msra.mxu0 %v1932_v40  ;;  %vm190_vm4 = vcmask 130048   ;;  %s1949_s30 = smov 31  }
   0x8   :  { %v120_v14 = vrot.slane %v1636_v10, %v77_v8  ;;  %v1637_v15 = vld.sshfl [vmem:[%s2528_s0 + $0x4] sm:$0x1 pattern:$0x73625140]  ;;  %v170_v20 = vld [vmem:[#allocation2] sm:$0x1]  ;;  %1730 = vmatprep.subr.bf16.mxu0 %v1944_v36 }
   0x9   :  { %149 = vrot.lane.b32.xlu0 %v78_v11, %s1943_s26  ;;  %153 = vrot.lane.b32.xlu1 %v106_v12, %s1943_s26  ;;  %v1638_v16 = vld.sshfl [vmem:[%s2528_s0 + $0x5] sm:$0x1 pattern:$0x73625140]  ;;  %v134_v17 = vrot.slane %v1637_v15, %v77_v8  ;;  %v176_v21 = vld [vmem:[#allocation2 + $0x8] sm:$0x1] }
   0xa   :  { %v148_v18 = vrot.slane %v1638_v16, %v77_v8  ;;  %v173_v26 = vld [vmem:[#allocation2 + $0x4] sm:$0x1]  ;;  %v179_v27 = vld [vmem:[#allocation2 + $0xc] sm:$0x1]  ;;  %v182_v32 = vld [vmem:[#allocation2 + $0x10] sm:$0x1] }
   0xb   :  { %v185_v33 = vld [vmem:[#allocation2 + $0x14] sm:$0x1]  ;;  %1731 = vmatpush3.bf16.msra.mxu0 %v1933_v47  ;;  %v1935_v55 = vld [vmem:[%s2529_s9 + $0x20] sm:$0xff]   ;;  %s1950_s0 = smov 48   ;;  %v1936_v59 = vld [vmem:[%s2529_s9 + $0x28] sm:$0xff]   ;;  %s1951_s18 = smov 47  }
   0xc   :  { %1732 = vmatprep.subr.bf16.mxu0 %v1944_v36  ;;  %s1952_s21 = smov 64   ;;  %s1953_s22 = smov 63   ;;  %vm1955_vm5 = vmmov 0   ;;  %vm199_vm6 = vcmask 261248   ;;  %vm208_vm7 = vcmask 392448   ;;  %vm217_vm8 = vcmask 523648  }
   0xd   :  { %151 = vrot.lane.b32.xlu0 %v92_v13, %s1943_s26  ;;  %155 = vrot.lane.b32.xlu1 %v120_v14, %s1943_s26  ;;  %s1954_s23 = smov 80   ;;  %s1956_s9 = smov 79   ;;  %vm226_vm9 = vcmask 654848   ;;  %vm235_vm10 = vcmask 786048   ;;  %vm461_vm11 = vcmask 785408   ;;  %vm541_vm12 = vcmask 1043456  }
   0xe   :  { %1738 = vmatprep.mubr.msk.bf16.mxu0 %vm1955_vm5, %v1944_v36  ;;  %1756 = vmatprep.mubr.msk.bf16.mxu1 %vm1955_vm5, %v1944_v36  ;;  %s1957_s24 = smov 126   ;;  %s1959_s28 = smov 14   ;;  %vm537_vm13 = vcmask 326656   ;;  %vm588_vm15 = vcmask 289792   ;;  %vm597_vm0 = vcmask 60432   ;;  %vm624_vm1 = vcmask 11264  }
   0xf   :  { %1733 = vmatpush3.bf16.msra.mxu0 %v1934_v50  ;;  %s1960_s29 = smov 13   ;;  %s1963_s16 = smov 46   ;;  %vm631_vm2 = vcmask 76864  }
  0x10   :  { %1734 = vmatprep.subr.bf16.mxu0 %v1944_v36  ;;  %s1964_s17 = smov 45  }
  0x11   :  { %157 = vrot.lane.b32.xlu0 %v134_v17, %s1943_s26  ;;  %159 = vrot.lane.b32.xlu1 %v148_v18, %s1943_s26 }
  0x13   :  { %1735 = vmatpush3.bf16.msra.mxu0 %v1935_v55 }
  0x14   :  { %1736 = vmatprep.subr.bf16.mxu0 %v1944_v36 }
  0x17   :  { %1737 = vmatpush3.bf16.msra.mxu0 %v1936_v59 }
  0x18   :  { %1778 = vmatprep.subr.bf16.mxu0 %v1944_v36 }
  0x7b   :  { %v150_v22 = vpop.permute.xlu0 %149  ;;  %v154_v23 = vpop.permute.xlu1 %153 }
  0x7c   :  { %v171_v24 = vsel %vm2112_vm3, %v150_v22, %v170_v20  ;;  %v177_v25 = vsel %vm2112_vm3, %v154_v23, %v176_v21 }
  0x7d   :  { %172 = vst [vmem:[#allocation2] sm:$0x1] %v171_v24  ;;  %178 = vst [vmem:[#allocation2 + $0x8] sm:$0x1] %v177_v25 }
  0x7f   :  { %v152_v28 = vpop.permute.xlu0 %151  ;;  %v156_v29 = vpop.permute.xlu1 %155 }
  0x80   :  { %v174_v30 = vsel %vm2112_vm3, %v152_v28, %v173_v26  ;;  %v180_v31 = vsel %vm2112_vm3, %v156_v29, %v179_v27 }
  0x81   :  { %175 = vst [vmem:[#allocation2 + $0x4] sm:$0x1] %v174_v30  ;;  %181 = vst [vmem:[#allocation2 + $0xc] sm:$0x1] %v180_v31 }
  0x83   :  { %v158_v34 = vpop.permute.xlu0 %157  ;;  %v160_v35 = vpop.permute.xlu1 %159 }
  0x84   :  { %v183_v38 = vsel %vm2112_vm3, %v158_v34, %v182_v32  ;;  %v186_v39 = vsel %vm2112_vm3, %v160_v35, %v185_v33  ;;  %vm640_vm3 = vcmask 48128  }
  0x85   :  { %184 = vst [vmem:[#allocation2 + $0x10] sm:$0x1] %v183_v38  ;;  %187 = vst [vmem:[#allocation2 + $0x14] sm:$0x1] %v186_v39 }
  0x88   :  { %v237_v41 = vld [vmem:[#allocation2] sm:$0xff]   ;;  %v202_v45 = vld [vmem:[#allocation2 + $0x8] sm:$0xff]  }
  0x89   :  { %v1669_v42 = vld [vmem:[#allocation2] sm:$0xff]   ;;  %v238_v43 = vunpack.c.l.bf16 %v237_v41  ;;  %v203_v46 = vunpack.c.l.bf16 %v202_v45  ;;  %v245_v48 = vunpack.c.h.bf16 %v237_v41  ;;  %v251_v49 = vld [vmem:[#allocation2 + $0x8] sm:$0xff]   ;;  %v212_v54 = vunpack.c.h.bf16 %v202_v45 }
  0x8a   :  { %v1671_v44 = vunpack.c.h.bf16 %v1669_v42  ;;  %v1670_v52 = vunpack.c.l.bf16 %v1669_v42  ;;  %v252_v53 = vunpack.c.l.bf16 %v251_v49  ;;  %v259_v58 = vunpack.c.h.bf16 %v251_v49  ;;  %v279_v62 = vld [vmem:[#allocation2] sm:$0xff]   ;;  %v293_v5 = vld [vmem:[#allocation2 + $0x8] sm:$0xff]  }
  0x8b   :  { %240 = vrot.lane.b32.xlu0 %v238_v43, %s1945_s19  ;;  %v280_v0 = vunpack.c.l.bf16 %v279_v62  ;;  %v321_v1 = vld [vmem:[#allocation2] sm:$0xff]   ;;  %v287_v4 = vunpack.c.h.bf16 %v279_v62  ;;  %v294_v7 = vunpack.c.l.bf16 %v293_v5  ;;  %v335_v8 = vld [vmem:[#allocation2 + $0x8] sm:$0xff]   ;;  %v301_v10 = vunpack.c.h.bf16 %v293_v5 }
  0x8c   :  { %196 = vrot.lane.b32.xlu1 %v1671_v44, %s1946_s20  ;;  %v220_v51 = vld [vmem:[#allocation2 + $0x10] sm:$0xff]   ;;  %191 = vst.msk [vmem:[#allocation4] sm:$0xff] %vm190_vm4, %v1670_v52  ;;  %v322_v2 = vunpack.c.l.bf16 %v321_v1  ;;  %v329_v6 = vunpack.c.h.bf16 %v321_v1  ;;  %v336_v9 = vunpack.c.l.bf16 %v335_v8  ;;  %v343_v12 = vunpack.c.h.bf16 %v335_v8  ;;  %v370_v20 = vld [vmem:[#allocation2 + $0x4] sm:$0xff]  }
  0x8d   :  { %v221_v56 = vunpack.c.l.bf16 %v220_v51  ;;  %v265_v57 = vld [vmem:[#allocation2 + $0x10] sm:$0xff]   ;;  %v230_v61 = vunpack.c.h.bf16 %v220_v51  ;;  %v371_v21 = vunpack.c.l.bf16 %v370_v20  ;;  %v378_v22 = vunpack.c.h.bf16 %v370_v20  ;;  %v531_v1 = vld [vmem:[%s2530_s5] sm:$0xff]  ;;  %s1978_s5 = smov 106  }
  0x8e   :  { %v266_v60 = vunpack.c.l.bf16 %v265_v57  ;;  %v273_v63 = vunpack.c.h.bf16 %v265_v57  ;;  %v307_v11 = vld [vmem:[#allocation2 + $0x10] sm:$0xff]  }
  0x8f   :  { %247 = vrot.lane.b32.xlu0 %v245_v48, %s1947_s25  ;;  %v308_v13 = vunpack.c.l.bf16 %v307_v11  ;;  %v349_v14 = vld [vmem:[#allocation2 + $0x10] sm:$0xff]   ;;  %v315_v16 = vunpack.c.h.bf16 %v307_v11 }
  0x90   :  { %205 = vrot.lane.b32.xlu1 %v203_v46, %s1948_s27  ;;  %s1958_s27 = smov 125   ;;  %v350_v15 = vunpack.c.l.bf16 %v349_v14  ;;  %v363_v17 = vld [vmem:[#allocation2] ss:$20 sps:$4 sm:$0xff]   ;;  %v357_v18 = vunpack.c.h.bf16 %v349_v14  ;;  %v384_v23 = vld [vmem:[#allocation2 + $0xc] sm:$0xff]  }
  0x91   :  { %v364_v19 = vunpack.c.l.bf16 %v363_v17  ;;  %v385_v24 = vunpack.c.l.bf16 %v384_v23  ;;  %v392_v25 = vunpack.c.h.bf16 %v384_v23  ;;  %v399_v26 = vunpack.c.h.bf16 %v363_v17 }
  0x93   :  { %254 = vrot.lane.b32.xlu0 %v252_v53, %s1949_s30  ;;  %s1961_s30 = smov 30  }
  0x94   :  { %214 = vrot.lane.b32.xlu1 %v212_v54, %s1950_s0  ;;  %s1962_s0 = smov 29  }
  0x97   :  { %261 = vrot.lane.b32.xlu0 %v259_v58, %s1951_s18  ;;  %s1965_s18 = smov 62  }
  0x98   :  { %223 = vrot.lane.b32.xlu1 %v221_v56, %s1952_s21  ;;  %s1966_s21 = smov 61  }
  0x9b   :  { %268 = vrot.lane.b32.xlu0 %v266_v60, %s1953_s22  ;;  %s1967_s22 = smov 78  }
  0x9c   :  { %232 = vrot.lane.b32.xlu1 %v230_v61, %s1954_s23  ;;  %s1968_s23 = smov 77  }
  0x9f   :  { %275 = vrot.lane.b32.xlu0 %v273_v63, %s1956_s9  ;;  %s1969_s9 = smov 124  }
  0xa0   :  { %282 = vrot.lane.b32.xlu1 %v280_v0, %s1957_s24 }
  0xa3   :  { %324 = vrot.lane.b32.xlu0 %v322_v2, %s1958_s27 }
  0xa4   :  { %289 = vrot.lane.b32.xlu1 %v287_v4, %s1959_s28 }
  0xa7   :  { %331 = vrot.lane.b32.xlu0 %v329_v6, %s1960_s29  ;;  %s1970_s29 = smov 12  }
  0xa8   :  { %296 = vrot.lane.b32.xlu1 %v294_v7, %s1961_s30 }
  0xab   :  { %338 = vrot.lane.b32.xlu0 %v336_v9, %s1962_s0 }
  0xac   :  { %303 = vrot.lane.b32.xlu1 %v301_v10, %s1963_s16  ;;  %s1971_s16 = smov 28  }
  0xaf   :  { %345 = vrot.lane.b32.xlu0 %v343_v12, %s1964_s17  ;;  %s1972_s17 = smov 44  }
  0xb0   :  { %310 = vrot.lane.b32.xlu1 %v308_v13, %s1965_s18  ;;  %s1973_s18 = smov 60  }
  0xb3   :  { %352 = vrot.lane.b32.xlu0 %v350_v15, %s1966_s21  ;;  %s1974_s21 = smov 76  }
  0xb4   :  { %317 = vrot.lane.b32.xlu1 %v315_v16, %s1967_s22  ;;  %s1976_s22 = smov 118  }
  0xb7   :  { %359 = vrot.lane.b32.xlu0 %v357_v18, %s1968_s23  ;;  %s1977_s23 = smov 100  }
  0xb8   :  { %366 = vrot.lane.b32.xlu1 %v364_v19, %s1969_s9  ;;  %v530_v19 = vld [vmem:[%s2531_s1] sm:$0xf]  ;;  %s1984_s1 = smov 24  }
  0xbb   :  { %373 = vrot.lane.b32.xlu0 %v371_v21, %s1970_s29 }
  0xbc   :  { %380 = vrot.lane.b32.xlu1 %v378_v22, %s1971_s16 }
  0xbf   :  { %387 = vrot.lane.b32.xlu0 %v385_v24, %s1972_s17  ;;  %s2544_s17 = smov 5  }
  0xc0   :  { %394 = vrot.lane.b32.xlu1 %v392_v25, %s1973_s18  ;;  %s1983_s18 = smov 17  }
  0xc3   :  { %401 = vrot.lane.b32.xlu0 %v399_v26, %s1974_s21  ;;  %s1975_s21 = smov 112  }
  0xc4   :  { %534 = vperm.xlu1 %1879, %v531_v1  }
  0xfd   :  { %v241_v27 = vpop.permute.xlu0 %240 }
  0xfe   :  { %v197_v28 = vpop.permute.xlu1 %196  ;;  %243 = vst.msk [vmem:[#allocation4 + $0x8] sm:$0xff] %vm190_vm4, %v241_v27 }
  0xff   :  { %200 = vst.msk [vmem:[#allocation4] sm:$0xff] %vm199_vm6, %v197_v28 }
 0x101   :  { %v248_v29 = vpop.permute.xlu0 %247 }
 0x102   :  { %v206_v30 = vpop.permute.xlu1 %205  ;;  %250 = vst.msk [vmem:[#allocation4 + $0x8] sm:$0xff] %vm199_vm6, %v248_v29 }
 0x103   :  { %209 = vst.msk [vmem:[#allocation4] sm:$0xff] %vm208_vm7, %v206_v30 }
 0x105   :  { %v255_v31 = vpop.permute.xlu0 %254 }
 0x106   :  { %v215_v32 = vpop.permute.xlu1 %214  ;;  %257 = vst.msk [vmem:[#allocation4 + $0x8] sm:$0xff] %vm208_vm7, %v255_v31 }
 0x107   :  { %218 = vst.msk [vmem:[#allocation4] sm:$0xff] %vm217_vm8, %v215_v32 }
 0x109   :  { %v262_v33 = vpop.permute.xlu0 %261 }
 0x10a   :  { %v224_v34 = vpop.permute.xlu1 %223  ;;  %264 = vst.msk [vmem:[#allocation4 + $0x8] sm:$0xff] %vm217_vm8, %v262_v33 }
 0x10b   :  { %227 = vst.msk [vmem:[#allocation4] sm:$0xff] %vm226_vm9, %v224_v34 }
 0x10d   :  { %v269_v35 = vpop.permute.xlu0 %268 }
 0x10e   :  { %v233_v37 = vpop.permute.xlu1 %232  ;;  %271 = vst.msk [vmem:[#allocation4 + $0x8] sm:$0xff] %vm226_vm9, %v269_v35 }
 0x10f   :  { %236 = vst.msk [vmem:[#allocation4] sm:$0xff] %vm235_vm10, %v233_v37 }
 0x111   :  { %v276_v38 = vpop.permute.xlu0 %275 }
 0x112   :  { %v283_v39 = vpop.permute.xlu1 %282  ;;  %278 = vst.msk [vmem:[#allocation4 + $0x8] sm:$0xff] %vm235_vm10, %v276_v38 }
 0x113   :  { %285 = vst.msk [vmem:[#allocation4 + $0x10] sm:$0xff] %vm190_vm4, %v283_v39 }
 0x115   :  { %v325_v40 = vpop.permute.xlu0 %324 }
 0x116   :  { %v290_v41 = vpop.permute.xlu1 %289  ;;  %327 = vst.msk [vmem:[#allocation4 + $0x18] sm:$0xff] %vm190_vm4, %v325_v40  ;;  %v405_v43 = vld [vmem:[#allocation4] sm:$0xff] }
 0x117   :  { %292 = vst.msk [vmem:[#allocation4 + $0x10] sm:$0xff] %vm199_vm6, %v290_v41 }
 0x119   :  { %v332_v42 = vpop.permute.xlu0 %331  ;;  %v406_v44 = vld [vmem:[#allocation4 + $0x8] sm:$0xff] }
 0x11a   :  { %v297_v45 = vpop.permute.xlu1 %296  ;;  %334 = vst.msk [vmem:[#allocation4 + $0x18] sm:$0xff] %vm199_vm6, %v332_v42  ;;  %v410_v46 = vpack.c.bf16 %v406_v44, %v405_v43 }
 0x11b   :  { %299 = vst.msk [vmem:[#allocation4 + $0x10] sm:$0xff] %vm208_vm7, %v297_v45 }
 0x11c   :  { %1739 = vmatmul.mubr.msk.bf16.vlgmr.msra.gmra.mrb[0].mxu0 %vm461_vm11, %v410_v46 }
 0x11d   :  { %v339_v47 = vpop.permute.xlu0 %338  ;;  %1742 = vmatprep.mubr.msk.bf16.mxu0 %vm1955_vm5, %v1944_v36 }
 0x11e   :  { %v304_v48 = vpop.permute.xlu1 %303  ;;  %341 = vst.msk [vmem:[#allocation4 + $0x18] sm:$0xff] %vm208_vm7, %v339_v47 }
 0x11f   :  { %306 = vst.msk [vmem:[#allocation4 + $0x10] sm:$0xff] %vm217_vm8, %v304_v48  ;;  %v1937_v48 = vld [vmem:[%s2533_s10] sm:$0xff]  }
 0x121   :  { %v346_v49 = vpop.permute.xlu0 %345 }
 0x122   :  { %v311_v50 = vpop.permute.xlu1 %310  ;;  %348 = vst.msk [vmem:[#allocation4 + $0x18] sm:$0xff] %vm217_vm8, %v346_v49 }
 0x123   :  { %313 = vst.msk [vmem:[#allocation4 + $0x10] sm:$0xff] %vm226_vm9, %v311_v50 }
 0x125   :  { %v353_v51 = vpop.permute.xlu0 %352 }
 0x126   :  { %v318_v52 = vpop.permute.xlu1 %317  ;;  %355 = vst.msk [vmem:[#allocation4 + $0x18] sm:$0xff] %vm226_vm9, %v353_v51 }
 0x127   :  { %320 = vst.msk [vmem:[#allocation4 + $0x10] sm:$0xff] %vm235_vm10, %v318_v52  ;;  %v1938_v52 = vld [vmem:[%s2533_s10 + $0x8] sm:$0xff]  }
 0x129   :  { %v360_v53 = vpop.permute.xlu0 %359 }
 0x12a   :  { %v367_v54 = vpop.permute.xlu1 %366  ;;  %362 = vst.msk [vmem:[#allocation4 + $0x18] sm:$0xff] %vm235_vm10, %v360_v53  ;;  %v1939_v53 = vld [vmem:[%s2533_s10 + $0x10] ss:$0 sps:$4 sm:$0x33]   ;;  %s1986_s10 = smov 4  }
 0x12b   :  { %369 = vst.msk [vmem:[#allocation4 + $0x20] sm:$0xff] %vm190_vm4, %v367_v54  ;;  %vm888_vm4 = vcmask 1041408  }
 0x12d   :  { %v374_v55 = vpop.permute.xlu0 %373 }
 0x12e   :  { %v381_v56 = vpop.permute.xlu1 %380  ;;  %376 = vst.msk [vmem:[#allocation4 + $0x20] sm:$0xff] %vm199_vm6, %v374_v55  ;;  %v407_v58 = vld [vmem:[#allocation4 + $0x10] sm:$0xff]  ;;  %vm648_vm6 = vcmask 97328  }
 0x12f   :  { %383 = vst.msk [vmem:[#allocation4 + $0x20] sm:$0xff] %vm208_vm7, %v381_v56  ;;  %vm656_vm7 = vcmask 146528  }
 0x131   :  { %v388_v57 = vpop.permute.xlu0 %387  ;;  %v408_v59 = vld [vmem:[#allocation4 + $0x18] sm:$0xff] }
 0x132   :  { %v395_v60 = vpop.permute.xlu1 %394  ;;  %390 = vst.msk [vmem:[#allocation4 + $0x20] sm:$0xff] %vm217_vm8, %v388_v57  ;;  %v411_v61 = vpack.c.bf16 %v408_v59, %v407_v58  ;;  %v890_v57 = vsel %vm888_vm4, %v1939_v53, 0  ;;  %vm664_vm8 = vcmask 195728   ;;  %vm1050_vm4 = vcmask 15360  }
 0x133   :  { %397 = vst.msk [vmem:[#allocation4 + $0x20] sm:$0xff] %vm226_vm9, %v395_v60  ;;  %vm672_vm9 = vcmask 244928  }
 0x134   :  { %1743 = vmatmul.mubr.msk.bf16.gmra.mrb[4].mxu0 %vm461_vm11, %v411_v61 }
 0x135   :  { %v402_v62 = vpop.permute.xlu0 %401  ;;  %1746 = vmatprep.mubr.msk.bf16.mxu0 %vm1955_vm5, %v1944_v36 }
 0x136   :  { %404 = vst.msk [vmem:[#allocation4 + $0x20] sm:$0xff] %vm235_vm10, %v402_v62  ;;  %vm680_vm10 = vcmask 294128  }
 0x13d   :  { %v409_v63 = vld [vmem:[#allocation4 + $0x20] sm:$0xff] }
 0x13e   :  { %v412_v0 = vpack.c.bf16 %v409_v63, %v409_v63 }
 0x140   :  { %1747 = vmatmul.mubr.msk.bf16.gmra.mrb[8].mxu0 %vm461_vm11, %v412_v0  ;;  %vm878_vm11 = vcmask 293888  }
 0x141   :  { %1784 = vmatprep.mubr.msk.bf16.mxu0 %vm1955_vm5, %v1944_v36 }
 0x143   :  { %v535_v20 = vpop.permute.xlu1 %534 }
 0x1ef   :  { %v505_v2 = vpop.f32.mrb[0].mxu0 }
 0x1f0   :  { %v1740_v4 = vpop.f32.mrb[1].mxu0 }
 0x1f1   :  { %v508_v5 = vpop.f32.mrb[2].mxu0 }
 0x1f2   :  { %v527_v6 = vpack.c.bf16 %v508_v5, %v505_v2  ;;  %v1741_v7 = vpop.f32.mrb[3].mxu0 }
 0x1f4   :  { %1751 = vmatpush3.bf16.msra.mxu1 %v527_v6 }
 0x1f5   :  { %1752 = vmatprep.subr.bf16.mxu1 %v1944_v36 }
 0x207   :  { %v513_v8 = vpop.f32.mrb[4].mxu0 }
 0x208   :  { %v1744_v9 = vpop.f32.mrb[5].mxu0 }
 0x209   :  { %v516_v10 = vpop.f32.mrb[6].mxu0 }
 0x20a   :  { %v528_v11 = vpack.c.bf16 %v516_v10, %v513_v8  ;;  %v1745_v12 = vpop.f32.mrb[7].mxu0 }
 0x20c   :  { %1753 = vmatpush3.bf16.msra.mxu1 %v528_v11 }
 0x20d   :  { %1754 = vmatprep.subr.bf16.mxu1 %v1944_v36 }
 0x213   :  { %v521_v13 = vpop.f32.mrb[8].mxu0 }
 0x214   :  { %v529_v14 = vpack.c.bf16 %v521_v13, %v521_v13  ;;  %v1748_v15 = vpop.f32.mrb[9].mxu0 }
 0x215   :  { %v524_v16 = vpop.f32.mrb[10].mxu0 }
 0x216   :  { %v1749_v17 = vpop.f32.mrb[11].mxu0  ;;  %v543_v18 = vsel %vm541_vm12, %v529_v14, 0 }
 0x217   :  { %1755 = vmatpush3.bf16.msra.mxu1 %v543_v18 }
 0x218   :  { %1760 = vmatprep.subr.bf16.mxu1 %v1944_v36 }
 0x21a   :  { %1757 = vmatmul.mubr.msk.bf16.vlgmr.msra.gmra.mrb[0].mxu1 %vm537_vm13, %v530_v19 }
 0x21b   :  { %1766 = vmatprep.mubr.msk.bf16.mxu1 %vm1955_vm5, %v1944_v36  ;;  %1761 = vmatpush3.bf16.msra.mxu1 %v1937_v48 }
 0x21c   :  { %1762 = vmatprep.subr.bf16.mxu1 %v1944_v36 }
 0x21f   :  { %1763 = vmatpush3.bf16.msra.mxu1 %v1938_v52 }
 0x220   :  { %1764 = vmatprep.subr.bf16.mxu1 %v1944_v36 }
 0x223   :  { %1765 = vmatpush3.bf16.msra.mxu1 %v890_v57 }
 0x224   :  { %1788 = vmatprep.subr.bf16.mxu1 %v1944_v36 }
 0x2ed   :  { %v579_v21 = vpop.f32.mrb[0].mxu1 }
 0x2ee   :  { %v580_v22 = vadd.f32 %v579_v21, %v535_v20  ;;  %v1758_v23 = vpop.f32.mrb[1].mxu1 }
 0x2ef   :  { %v582_v24 = vpop.f32.mrb[2].mxu1 }
 0x2f0   :  { %vm585_vm14 = vcmp.ge.f32.partialorder %v580_v22, 0.0  ;;  %v586_v25 = vmul.f32 0.1, %v580_v22  ;;  %v1759_v26 = vpop.f32.mrb[3].mxu1 }
 0x2f2   :  { %v587_v27 = vsel %vm585_vm14, %v580_v22, %v586_v25  ;;  %v952_v22 = vld [vmem:[%s2534_s6] sm:$0xff] }
 0x2f3   :  { %589 = vst.msk [vmem:[%s2532_s12] sm:$0xf] %vm588_vm15, %v587_v27  ;;  %v1665_v28 = vpack.c.bf16 %v587_v27, %v587_v27  ;;  %s1979_s12 = smov 6   ;;  %vm1007_vm15 = vcmask 97280  }
 0x2f5   :  { %599 = vrot.lane.b32.xlu1 %v1665_v28, %s1969_s9  ;;  %594 = vrot.lane.b32.xlu0 %v1665_v28, %s1943_s26 }
 0x2f9   :  { %609 = vrot.lane.b32.xlu1 %v1665_v28, %s1975_s21  ;;  %604 = vrot.lane.b32.xlu0 %v1665_v28, %s1976_s22  ;;  %s1981_s21 = smov 11   ;;  %s1982_s22 = smov 18  }
 0x2fd   :  { %619 = vrot.lane.b32.xlu1 %v1665_v28, %s1977_s23  ;;  %614 = vrot.lane.b32.xlu0 %v1665_v28, %s1978_s5  ;;  %s1991_s23 = smov 21   ;;  %s1992_s5 = smov 27  }
 0x367   :  { %v600_v29 = vpop.permute.xlu1 %599  ;;  %v595_v30 = vpop.permute.xlu0 %594 }
 0x368   :  { %603 = vst.msk [vmem:[#allocation3 + $0x4] sm:$0xf] %vm597_vm0, %v600_v29  ;;  %598 = vst.msk [vmem:[#allocation3] sm:$0xf] %vm597_vm0, %v595_v30 }
 0x369   :  { %626 = vst.msk [vmem:[#allocation3 + $0x4] sm:$0xf] %vm624_vm1, %v1942_v3  ;;  %625 = vst.msk [vmem:[#allocation3] sm:$0xf] %vm624_vm1, %v1942_v3 }
 0x36a   :  { %633 = vst.msk [vmem:[#allocation3 + $0x4] sm:$0xf] %vm631_vm2, %v1942_v3  ;;  %632 = vst.msk [vmem:[#allocation3] sm:$0xf] %vm631_vm2, %v1942_v3 }
 0x36b   :  { %v610_v31 = vpop.permute.xlu1 %609  ;;  %v605_v32 = vpop.permute.xlu0 %604 }
 0x36c   :  { %613 = vst.msk [vmem:[#allocation3 + $0xc] sm:$0xf] %vm597_vm0, %v610_v31  ;;  %608 = vst.msk [vmem:[#allocation3 + $0x8] sm:$0xf] %vm597_vm0, %v605_v32 }
 0x36d   :  { %628 = vst.msk [vmem:[#allocation3 + $0xc] sm:$0xf] %vm624_vm1, %v1942_v3  ;;  %627 = vst.msk [vmem:[#allocation3 + $0x8] sm:$0xf] %vm624_vm1, %v1942_v3 }
 0x36e   :  { %635 = vst.msk [vmem:[#allocation3 + $0xc] sm:$0xf] %vm631_vm2, %v1942_v3  ;;  %634 = vst.msk [vmem:[#allocation3 + $0x8] sm:$0xf] %vm631_vm2, %v1942_v3 }
 0x36f   :  { %v620_v33 = vpop.permute.xlu1 %619  ;;  %v615_v34 = vpop.permute.xlu0 %614 }
 0x370   :  { %623 = vst.msk [vmem:[#allocation3 + $0x14] sm:$0xf] %vm597_vm0, %v620_v33  ;;  %618 = vst.msk [vmem:[#allocation3 + $0x10] sm:$0xf] %vm597_vm0, %v615_v34  ;;  %vm1016_vm0 = vcmask 27664  }
 0x371   :  { %630 = vst.msk [vmem:[#allocation3 + $0x14] sm:$0xf] %vm624_vm1, %v1942_v3  ;;  %629 = vst.msk [vmem:[#allocation3 + $0x10] sm:$0xf] %vm624_vm1, %v1942_v3  ;;  %v682_v35 = vld [vmem:[#allocation3] sm:$0xff]  }
 0x372   :  { %v1673_v37 = vld [vmem:[#allocation3] sm:$0xff]   ;;  %637 = vst.msk [vmem:[#allocation3 + $0x14] sm:$0xf] %vm631_vm2, %v1942_v3  ;;  %636 = vst.msk [vmem:[#allocation3 + $0x10] sm:$0xf] %vm631_vm2, %v1942_v3  ;;  %v683_v38 = vunpack.c.l.bf16 %v682_v35  ;;  %v690_v40 = vunpack.c.h.bf16 %v682_v35  ;;  %vm1041_vm2 = vcmask 44064  }
 0x373   :  { %v1675_v39 = vunpack.c.h.bf16 %v1673_v37  ;;  %v1674_v41 = vunpack.c.l.bf16 %v1673_v37  ;;  %v724_v56 = vld [vmem:[#allocation3] sm:$0xff]  }
 0x374   :  { %685 = vrot.lane.b32.xlu0 %v683_v38, %s1945_s19  ;;  %v725_v59 = vunpack.c.l.bf16 %v724_v56  ;;  %v766_v60 = vld [vmem:[#allocation3] sm:$0xff]   ;;  %v732_v62 = vunpack.c.h.bf16 %v724_v56 }
 0x375   :  { %645 = vrot.lane.b32.xlu1 %v1675_v39, %s1979_s12  ;;  %v650_v42 = vld [vmem:[#allocation3 + $0x8] sm:$0xff]   ;;  %641 = vst.msk [vmem:[#allocation4] sm:$0xff] %vm640_vm3, %v1674_v41  ;;  %v767_v61 = vunpack.c.l.bf16 %v766_v60  ;;  %v774_v0 = vunpack.c.h.bf16 %v766_v60  ;;  %v808_v12 = vld [vmem:[#allocation3] sm:$0xff]  }
 0x376   :  { %v696_v43 = vld [vmem:[#allocation3 + $0x8] sm:$0xff]   ;;  %v651_v44 = vunpack.c.l.bf16 %v650_v42  ;;  %v659_v46 = vunpack.c.h.bf16 %v650_v42  ;;  %v809_v14 = vunpack.c.l.bf16 %v808_v12  ;;  %v816_v16 = vunpack.c.h.bf16 %v808_v12 }
 0x377   :  { %v697_v45 = vunpack.c.l.bf16 %v696_v43  ;;  %v704_v49 = vunpack.c.h.bf16 %v696_v43  ;;  %v738_v63 = vld [vmem:[#allocation3 + $0x8] sm:$0xff]  }
 0x378   :  { %692 = vrot.lane.b32.xlu0 %v690_v40, %s2544_s17  ;;  %v739_v1 = vunpack.c.l.bf16 %v738_v63  ;;  %v780_v2 = vld [vmem:[#allocation3 + $0x8] sm:$0xff]   ;;  %s1988_s17 = smov 10   ;;  %v746_v5 = vunpack.c.h.bf16 %v738_v63 }
 0x379   :  { %653 = vrot.lane.b32.xlu1 %v651_v44, %s1970_s29  ;;  %v666_v47 = vld [vmem:[#allocation3 + $0x10] sm:$0xff]   ;;  %v781_v4 = vunpack.c.l.bf16 %v780_v2  ;;  %v788_v7 = vunpack.c.h.bf16 %v780_v2  ;;  %v822_v15 = vld [vmem:[#allocation3 + $0x8] sm:$0xff]  }
 0x37a   :  { %v667_v50 = vunpack.c.l.bf16 %v666_v47  ;;  %v710_v51 = vld [vmem:[#allocation3 + $0x10] sm:$0xff]   ;;  %v675_v55 = vunpack.c.h.bf16 %v666_v47  ;;  %v823_v17 = vunpack.c.l.bf16 %v822_v15  ;;  %v830_v19 = vunpack.c.h.bf16 %v822_v15 }
 0x37b   :  { %v711_v54 = vunpack.c.l.bf16 %v710_v51  ;;  %v718_v58 = vunpack.c.h.bf16 %v710_v51  ;;  %v752_v6 = vld [vmem:[#allocation3 + $0x10] sm:$0xff]  }
 0x37c   :  { %699 = vrot.lane.b32.xlu0 %v697_v45, %s1981_s21  ;;  %s1985_s21 = smov 23   ;;  %v753_v8 = vunpack.c.l.bf16 %v752_v6  ;;  %v794_v9 = vld [vmem:[#allocation3 + $0x10] sm:$0xff]   ;;  %v760_v11 = vunpack.c.h.bf16 %v752_v6 }
 0x37d   :  { %661 = vrot.lane.b32.xlu1 %v659_v46, %s1982_s22  ;;  %s1990_s22 = smov 22   ;;  %v795_v10 = vunpack.c.l.bf16 %v794_v9  ;;  %v802_v13 = vunpack.c.h.bf16 %v794_v9  ;;  %v836_v18 = vld [vmem:[#allocation3 + $0x10] sm:$0xff]  }
 0x37e   :  { %v837_v20 = vunpack.c.l.bf16 %v836_v18  ;;  %v844_v21 = vunpack.c.h.bf16 %v836_v18 }
 0x380   :  { %706 = vrot.lane.b32.xlu0 %v704_v49, %s1983_s18  ;;  %s1995_s18 = smov 26  }
 0x381   :  { %669 = vrot.lane.b32.xlu1 %v667_v50, %s1984_s1 }
 0x384   :  { %713 = vrot.lane.b32.xlu0 %v711_v54, %s1985_s21  ;;  %s1996_s21 = smov 122  }
 0x385   :  { %677 = vrot.lane.b32.xlu1 %v675_v55, %s1961_s30  ;;  %s1987_s30 = smov 3  }
 0x388   :  { %720 = vrot.lane.b32.xlu0 %v718_v58, %s1962_s0  ;;  %s1989_s0 = smov 9  }
 0x389   :  { %727 = vrot.lane.b32.xlu1 %v725_v59, %s1957_s24 }
 0x38c   :  { %769 = vrot.lane.b32.xlu0 %v767_v61, %s1958_s27 }
 0x38d   :  { %734 = vrot.lane.b32.xlu1 %v732_v62, %s1986_s10 }
 0x390   :  { %776 = vrot.lane.b32.xlu0 %v774_v0, %s1987_s30 }
 0x391   :  { %741 = vrot.lane.b32.xlu1 %v739_v1, %s1988_s17 }
 0x394   :  { %783 = vrot.lane.b32.xlu0 %v781_v4, %s1989_s0 }
 0x395   :  { %748 = vrot.lane.b32.xlu1 %v746_v5, %s1946_s20  ;;  %s1993_s20 = smov 8  }
 0x398   :  { %790 = vrot.lane.b32.xlu0 %v788_v7, %s1947_s25  ;;  %s1994_s25 = smov 20  }
 0x399   :  { %755 = vrot.lane.b32.xlu1 %v753_v8, %s1990_s22  ;;  %s1997_s22 = smov 120  }
 0x39c   :  { %797 = vrot.lane.b32.xlu0 %v795_v10, %s1991_s23 }
 0x39d   :  { %762 = vrot.lane.b32.xlu1 %v760_v11, %s1971_s16  ;;  %s1999_s16 = smov 7  }
 0x3a0   :  { %804 = vrot.lane.b32.xlu0 %v802_v13, %s1992_s5 }
 0x3a1   :  { %811 = vrot.lane.b32.xlu1 %v809_v14, %s1969_s9  ;;  %v951_v14 = vld [vmem:[%s2535_s2] sm:$0xf] }
 0x3a4   :  { %818 = vrot.lane.b32.xlu0 %v816_v16, %s1943_s26 }
 0x3a5   :  { %825 = vrot.lane.b32.xlu1 %v823_v17, %s1993_s20 }
 0x3a8   :  { %832 = vrot.lane.b32.xlu0 %v830_v19, %s1959_s28 }
 0x3a9   :  { %839 = vrot.lane.b32.xlu1 %v837_v20, %s1994_s25  ;;  %s2548_s25 = smov 5  }
 0x3ac   :  { %846 = vrot.lane.b32.xlu0 %v844_v21, %s1995_s18 }
 0x3ad   :  { %955 = vperm.xlu1 %1879, %v952_v22  }
 0x3e6   :  { %v686_v23 = vpop.permute.xlu0 %685 }
 0x3e7   :  { %v646_v24 = vpop.permute.xlu1 %645  ;;  %688 = vst.msk [vmem:[#allocation4 + $0x8] sm:$0xff] %vm640_vm3, %v686_v23 }
 0x3e8   :  { %649 = vst.msk [vmem:[#allocation4] sm:$0xff] %vm648_vm6, %v646_v24 }
 0x3ea   :  { %v693_v25 = vpop.permute.xlu0 %692 }
 0x3eb   :  { %v654_v26 = vpop.permute.xlu1 %653  ;;  %695 = vst.msk [vmem:[#allocation4 + $0x8] sm:$0xff] %vm648_vm6, %v693_v25 }
 0x3ec   :  { %657 = vst.msk [vmem:[#allocation4] sm:$0xff] %vm656_vm7, %v654_v26 }
 0x3ee   :  { %v700_v27 = vpop.permute.xlu0 %699 }
 0x3ef   :  { %v662_v28 = vpop.permute.xlu1 %661  ;;  %702 = vst.msk [vmem:[#allocation4 + $0x8] sm:$0xff] %vm656_vm7, %v700_v27 }
 0x3f0   :  { %665 = vst.msk [vmem:[#allocation4] sm:$0xff] %vm664_vm8, %v662_v28 }
 0x3f2   :  { %v707_v29 = vpop.permute.xlu0 %706 }
 0x3f3   :  { %v670_v30 = vpop.permute.xlu1 %669  ;;  %709 = vst.msk [vmem:[#allocation4 + $0x8] sm:$0xff] %vm664_vm8, %v707_v29 }
 0x3f4   :  { %673 = vst.msk [vmem:[#allocation4] sm:$0xff] %vm672_vm9, %v670_v30 }
 0x3f6   :  { %v714_v31 = vpop.permute.xlu0 %713 }
 0x3f7   :  { %v678_v32 = vpop.permute.xlu1 %677  ;;  %716 = vst.msk [vmem:[#allocation4 + $0x8] sm:$0xff] %vm672_vm9, %v714_v31 }
 0x3f8   :  { %681 = vst.msk [vmem:[#allocation4] sm:$0xff] %vm680_vm10, %v678_v32 }
 0x3fa   :  { %v721_v33 = vpop.permute.xlu0 %720 }
 0x3fb   :  { %v728_v34 = vpop.permute.xlu1 %727  ;;  %723 = vst.msk [vmem:[#allocation4 + $0x8] sm:$0xff] %vm680_vm10, %v721_v33 }
 0x3fc   :  { %730 = vst.msk [vmem:[#allocation4 + $0x10] sm:$0xff] %vm640_vm3, %v728_v34 }
 0x3fe   :  { %v770_v35 = vpop.permute.xlu0 %769 }
 0x3ff   :  { %v735_v37 = vpop.permute.xlu1 %734  ;;  %772 = vst.msk [vmem:[#allocation4 + $0x18] sm:$0xff] %vm640_vm3, %v770_v35  ;;  %v850_v38 = vld [vmem:[#allocation4] sm:$0xff] }
 0x400   :  { %737 = vst.msk [vmem:[#allocation4 + $0x10] sm:$0xff] %vm648_vm6, %v735_v37 }
 0x402   :  { %v777_v39 = vpop.permute.xlu0 %776  ;;  %v851_v41 = vld [vmem:[#allocation4 + $0x8] sm:$0xff] }
 0x403   :  { %v742_v40 = vpop.permute.xlu1 %741  ;;  %779 = vst.msk [vmem:[#allocation4 + $0x18] sm:$0xff] %vm648_vm6, %v777_v39  ;;  %v855_v42 = vpack.c.bf16 %v851_v41, %v850_v38 }
 0x404   :  { %744 = vst.msk [vmem:[#allocation4 + $0x10] sm:$0xff] %vm656_vm7, %v742_v40 }
 0x405   :  { %1767 = vmatmul.mubr.msk.bf16.vlgmr.msra.gmra.mrb[4].mxu1 %vm878_vm11, %v855_v42 }
 0x406   :  { %v784_v43 = vpop.permute.xlu0 %783  ;;  %1770 = vmatprep.mubr.msk.bf16.mxu1 %vm1955_vm5, %v1944_v36 }
 0x407   :  { %v749_v44 = vpop.permute.xlu1 %748  ;;  %786 = vst.msk [vmem:[#allocation4 + $0x18] sm:$0xff] %vm656_vm7, %v784_v43 }
 0x408   :  { %751 = vst.msk [vmem:[#allocation4 + $0x10] sm:$0xff] %vm664_vm8, %v749_v44 }
 0x40a   :  { %v791_v45 = vpop.permute.xlu0 %790 }
 0x40b   :  { %v756_v46 = vpop.permute.xlu1 %755  ;;  %793 = vst.msk [vmem:[#allocation4 + $0x18] sm:$0xff] %vm664_vm8, %v791_v45 }
 0x40c   :  { %758 = vst.msk [vmem:[#allocation4 + $0x10] sm:$0xff] %vm672_vm9, %v756_v46 }
 0x40e   :  { %v798_v47 = vpop.permute.xlu0 %797 }
 0x40f   :  { %v763_v48 = vpop.permute.xlu1 %762  ;;  %800 = vst.msk [vmem:[#allocation4 + $0x18] sm:$0xff] %vm672_vm9, %v798_v47 }
 0x410   :  { %765 = vst.msk [vmem:[#allocation4 + $0x10] sm:$0xff] %vm680_vm10, %v763_v48 }
 0x412   :  { %v805_v49 = vpop.permute.xlu0 %804 }
 0x413   :  { %v812_v50 = vpop.permute.xlu1 %811  ;;  %807 = vst.msk [vmem:[#allocation4 + $0x18] sm:$0xff] %vm680_vm10, %v805_v49 }
 0x414   :  { %814 = vst.msk [vmem:[#allocation4 + $0x20] sm:$0xff] %vm640_vm3, %v812_v50 }
 0x416   :  { %v819_v51 = vpop.permute.xlu0 %818 }
 0x417   :  { %v826_v52 = vpop.permute.xlu1 %825  ;;  %821 = vst.msk [vmem:[#allocation4 + $0x20] sm:$0xff] %vm648_vm6, %v819_v51  ;;  %v852_v53 = vld [vmem:[#allocation4 + $0x10] sm:$0xff]  ;;  %vm1058_vm6 = vcmask 31760  }
 0x418   :  { %828 = vst.msk [vmem:[#allocation4 + $0x20] sm:$0xff] %vm656_vm7, %v826_v52  ;;  %vm1066_vm7 = vcmask 48160  }
 0x41a   :  { %v833_v54 = vpop.permute.xlu0 %832  ;;  %v853_v56 = vld [vmem:[#allocation4 + $0x18] sm:$0xff] }
 0x41b   :  { %v840_v55 = vpop.permute.xlu1 %839  ;;  %835 = vst.msk [vmem:[#allocation4 + $0x20] sm:$0xff] %vm664_vm8, %v833_v54  ;;  %v856_v57 = vpack.c.bf16 %v853_v56, %v852_v53  ;;  %v1940_v56 = vld [vmem:[%s2537_s11] sm:$0x3f]   ;;  %vm1074_vm8 = vcmask 64560  }
 0x41c   :  { %842 = vst.msk [vmem:[#allocation4 + $0x20] sm:$0xff] %vm672_vm9, %v840_v55  ;;  %vm1082_vm9 = vcmask 80960  }
 0x41d   :  { %1771 = vmatmul.mubr.msk.bf16.gmra.mrb[8].mxu1 %vm878_vm11, %v856_v57 }
 0x41e   :  { %v847_v58 = vpop.permute.xlu0 %846  ;;  %1774 = vmatprep.mubr.msk.bf16.mxu1 %vm1955_vm5, %v1944_v36 }
 0x41f   :  { %849 = vst.msk [vmem:[#allocation4 + $0x20] sm:$0xff] %vm680_vm10, %v847_v58  ;;  %vm1090_vm10 = vcmask 97360  }
 0x426   :  { %v854_v59 = vld [vmem:[#allocation4 + $0x20] sm:$0xff] }
 0x427   :  { %v857_v60 = vpack.c.bf16 %v854_v59, %v854_v59 }
 0x429   :  { %1775 = vmatmul.mubr.msk.bf16.gmra.mrb[12].mxu1 %vm878_vm11, %v857_v60 }
 0x42a   :  { %1790 = vmatprep.mubr.msk.bf16.mxu1 %vm1955_vm5, %v1944_v36 }
 0x42c   :  { %v956_v15 = vpop.permute.xlu1 %955 }
 0x4d8   :  { %v926_v61 = vpop.f32.mrb[4].mxu1 }
 0x4d9   :  { %v1768_v62 = vpop.f32.mrb[5].mxu1 }
 0x4da   :  { %v929_v63 = vpop.f32.mrb[6].mxu1 }
 0x4db   :  { %v948_v0 = vpack.c.bf16 %v929_v63, %v926_v61  ;;  %v1769_v1 = vpop.f32.mrb[7].mxu1 }
 0x4dd   :  { %1779 = vmatpush3.bf16.msra.mxu0 %v948_v0 }
 0x4de   :  { %1780 = vmatprep.subr.bf16.mxu0 %v1944_v36 }
 0x4f0   :  { %v934_v2 = vpop.f32.mrb[8].mxu1 }
 0x4f1   :  { %v1772_v4 = vpop.f32.mrb[9].mxu1 }
 0x4f2   :  { %v937_v5 = vpop.f32.mrb[10].mxu1 }
 0x4f3   :  { %v949_v6 = vpack.c.bf16 %v937_v5, %v934_v2  ;;  %v1773_v7 = vpop.f32.mrb[11].mxu1 }
 0x4f5   :  { %1781 = vmatpush3.bf16.msra.mxu0 %v949_v6 }
 0x4f6   :  { %1782 = vmatprep.subr.bf16.mxu0 %v1944_v36 }
 0x4fc   :  { %v942_v8 = vpop.f32.mrb[12].mxu1 }
 0x4fd   :  { %v950_v9 = vpack.c.bf16 %v942_v8, %v942_v8  ;;  %v1776_v10 = vpop.f32.mrb[13].mxu1 }
 0x4fe   :  { %v945_v11 = vpop.f32.mrb[14].mxu1 }
 0x4ff   :  { %v962_v12 = vsel %vm541_vm12, %v950_v9, 0  ;;  %v1777_v13 = vpop.f32.mrb[15].mxu1 }
 0x500   :  { %1783 = vmatpush3.bf16.msra.mxu0 %v962_v12 }
 0x501   :  { %1802 = vmatprep.subr.bf16.mxu0 %v1944_v36 }
 0x503   :  { %1785 = vmatmul.mubr.msk.bf16.vlgmr.msra.gmra.mrb[12].mxu0 %vm537_vm13, %v951_v14 }
 0x504   :  { %1808 = vmatprep.mubr.msk.bf16.mxu0 %vm1955_vm5, %v1944_v36 }
 0x5d6   :  { %v998_v16 = vpop.f32.mrb[12].mxu0 }
 0x5d7   :  { %v999_v17 = vadd.f32 %v998_v16, %v956_v15  ;;  %v1786_v18 = vpop.f32.mrb[13].mxu0 }
 0x5d8   :  { %v1001_v19 = vpop.f32.mrb[14].mxu0 }
 0x5d9   :  { %vm1004_vm14 = vcmp.ge.f32.partialorder %v999_v17, 0.0  ;;  %v1005_v20 = vmul.f32 0.1, %v999_v17  ;;  %v1787_v21 = vpop.f32.mrb[15].mxu0 }
 0x5db   :  { %v1006_v22 = vsel %vm1004_vm14, %v999_v17, %v1005_v20  ;;  %v1340_v17 = vld [vmem:[%s2538_s7] sm:$0xff]  ;;  %vm1403_vm14 = vcmask 11272  }
 0x5dc   :  { %1008 = vst.msk [vmem:[%s2536_s13] sm:$0xff] %vm1007_vm15, %v1006_v22  ;;  %v1009_v23 = vpack.c.bf16 %v1006_v22, %v1006_v22  ;;  %s1998_s13 = smov 1  }
 0x5de   :  { %1019 = vrot.lane.b32.xlu1 %v1009_v23, %s1957_s24  ;;  %1013 = vrot.lane.b32.xlu0 %v1009_v23, %s1943_s26  ;;  %1018 = vst.msk [vmem:[#allocation2 + $0x4] sm:$0xf] %vm1016_vm0, %v1009_v23 }
 0x5df   :  { %1036 = vst.msk [vmem:[#allocation2 + $0x4] sm:$0xf] %vm624_vm1, %v1942_v3 }
 0x5e0   :  { %1043 = vst.msk [vmem:[#allocation2 + $0x4] sm:$0xf] %vm1041_vm2, %v1942_v3 }
 0x5e2   :  { %1027 = vrot.lane.b32.xlu1 %v1009_v23, %s1996_s21  ;;  %1023 = vrot.lane.b32.xlu0 %v1009_v23, %s1969_s9 }
 0x5e6   :  { %1031 = vrot.lane.b32.xlu0 %v1009_v23, %s1997_s22 }
 0x650   :  { %v1020_v24 = vpop.permute.xlu1 %1019  ;;  %v1014_v25 = vpop.permute.xlu0 %1013 }
 0x651   :  { %1022 = vst.msk [vmem:[#allocation2 + $0x8] sm:$0xf] %vm1016_vm0, %v1020_v24  ;;  %1017 = vst.msk [vmem:[#allocation2] sm:$0xf] %vm1016_vm0, %v1014_v25 }
 0x652   :  { %1037 = vst.msk [vmem:[#allocation2 + $0x8] sm:$0xf] %vm624_vm1, %v1942_v3  ;;  %1035 = vst.msk [vmem:[#allocation2] sm:$0xf] %vm624_vm1, %v1942_v3 }
 0x653   :  { %1042 = vst.msk [vmem:[#allocation2] sm:$0xf] %vm1041_vm2, %v1942_v3  ;;  %1044 = vst.msk [vmem:[#allocation2 + $0x8] sm:$0xf] %vm1041_vm2, %v1942_v3 }
 0x654   :  { %v1028_v26 = vpop.permute.xlu1 %1027  ;;  %v1024_v27 = vpop.permute.xlu0 %1023 }
 0x655   :  { %1030 = vst.msk [vmem:[#allocation2 + $0x10] sm:$0xf] %vm1016_vm0, %v1028_v26  ;;  %1026 = vst.msk [vmem:[#allocation2 + $0xc] sm:$0xf] %vm1016_vm0, %v1024_v27 }
 0x656   :  { %1039 = vst.msk [vmem:[#allocation2 + $0x10] sm:$0xf] %vm624_vm1, %v1942_v3  ;;  %1038 = vst.msk [vmem:[#allocation2 + $0xc] sm:$0xf] %vm624_vm1, %v1942_v3 }
 0x657   :  { %1045 = vst.msk [vmem:[#allocation2 + $0xc] sm:$0xf] %vm1041_vm2, %v1942_v3  ;;  %1046 = vst.msk [vmem:[#allocation2 + $0x10] sm:$0xf] %vm1041_vm2, %v1942_v3 }
 0x658   :  { %v1032_v28 = vpop.permute.xlu0 %1031 }
 0x659   :  { %1034 = vst.msk [vmem:[#allocation2 + $0x14] sm:$0xf] %vm1016_vm0, %v1032_v28  ;;  %vm1454_vm0 = vcmask 23568  }
 0x65a   :  { %1040 = vst.msk [vmem:[#allocation2 + $0x14] sm:$0xf] %vm624_vm1, %v1942_v3  ;;  %v1092_v29 = vld [vmem:[#allocation2] sm:$0xff]   ;;  %vm1276_vm1 = vcmask 1045504  }
 0x65b   :  { %v1677_v30 = vld [vmem:[#allocation2] sm:$0xff]   ;;  %v1093_v32 = vunpack.c.l.bf16 %v1092_v29  ;;  %v1180_v33 = vunpack.c.h.bf16 %v1092_v29  ;;  %1047 = vst.msk [vmem:[#allocation2 + $0x14] sm:$0xf] %vm1041_vm2, %v1942_v3  ;;  %v1278_v57 = vsel %vm1276_vm1, %v1940_v56, 0  ;;  %vm1462_vm2 = vcmask 31768  }
 0x65c   :  { %v1099_v31 = vld [vmem:[#allocation2 + $0x4] sm:$0xff]   ;;  %v1678_v34 = vunpack.c.l.bf16 %v1677_v30  ;;  %v1679_v39 = vunpack.c.h.bf16 %v1677_v30  ;;  %1789 = vmatpush3.bf16.msra.mxu1 %v1278_v57  ;;  %v1214_v10 = vld [vmem:[#allocation2] sm:$0xf]  ;;  %vm1478_vm1 = vcmask 48168  }
 0x65d   :  { %v1100_v35 = vunpack.c.l.bf16 %v1099_v31  ;;  %v1187_v37 = vunpack.c.h.bf16 %v1099_v31  ;;  %v1880_v38 = vpack.i.bf16 %v1180_v33, %v1093_v32  ;;  %v1134_v63 = vld [vmem:[#allocation2] sm:$0xff]   ;;  %v1215_v11 = vunpack.c.l.bf16 %v1214_v10 }
 0x65e   :  { %1051 = vst.msk [vmem:[#allocation4] sm:$0xff] %vm1050_vm4, %v1678_v34  ;;  %v1144_v40 = vld [vmem:[#allocation2 + $0x8] sm:$0xff]   ;;  %v1135_v1 = vunpack.c.l.bf16 %v1134_v63  ;;  %v1222_v12 = vunpack.c.h.bf16 %v1134_v63  ;;  %v1141_v32 = vld [vmem:[#allocation2 + $0x4] sm:$0xf] }
 0x65f   :  { %v1890_v41 = vpack.i.bf16 %v1187_v37, %v1100_v35  ;;  %v1060_v42 = vld [vmem:[#allocation2 + $0x8] sm:$0xff]   ;;  %1881 = vrot.lane.b32.xlu1 %v1880_v38, %s1945_s19  ;;  %v1145_v44 = vunpack.c.l.bf16 %v1144_v40  ;;  %v1152_v46 = vunpack.c.h.bf16 %v1144_v40  ;;  %v1142_v35 = vunpack.c.l.bf16 %v1141_v32 }
 0x660   :  { %v1106_v43 = vld [vmem:[#allocation2 + $0x8] sm:$0xff]   ;;  %v1061_v45 = vunpack.c.l.bf16 %v1060_v42  ;;  %v1194_v48 = vunpack.c.h.bf16 %v1060_v42 }
 0x661   :  { %v1107_v47 = vunpack.c.l.bf16 %v1106_v43  ;;  %v1885_v49 = vpack.i.bf16 %v1145_v44, %v1679_v39  ;;  %v1113_v52 = vld [vmem:[#allocation2 + $0xc] sm:$0xff]   ;;  %v1069_v53 = vunpack.c.h.bf16 %v1106_v43 }
 0x662   :  { %v1895_v50 = vpack.i.bf16 %v1152_v46, %v1061_v45  ;;  %v1114_v54 = vunpack.c.l.bf16 %v1113_v52  ;;  %v1120_v55 = vld [vmem:[#allocation2 + $0x10] sm:$0xff]   ;;  %v1077_v58 = vunpack.c.h.bf16 %v1113_v52  ;;  %v2395_v13 = vld [vmem:[#allocation2 + $0x8] sm:$0xff]  }
 0x663   :  { %1886 = vrot.lane.b32.xlu0 %v1885_v49, %s1943_s26  ;;  %1891 = vrot.lane.b32.xlu1 %v1890_v41, %s1998_s13  ;;  %v1900_v51 = vpack.i.bf16 %v1194_v48, %v1107_v47  ;;  %v1121_v59 = vunpack.c.l.bf16 %v1120_v55  ;;  %v1127_v60 = vld [vmem:[#allocation2 + $0x10] sm:$0xff]   ;;  %v1085_v61 = vunpack.c.h.bf16 %v1120_v55  ;;  %v1683_v14 = vunpack.c.h.bf16 %v2395_v13 }
 0x664   :  { %v1128_v62 = vunpack.c.h.bf16 %v1127_v60  ;;  %v1172_v0 = vld [vmem:[#allocation2] ss:$20 sps:$4 sm:$0xff]   ;;  %v1159_v5 = vunpack.c.l.bf16 %v1127_v60 }
 0x665   :  { %v1173_v2 = vunpack.c.l.bf16 %v1172_v0  ;;  %v1200_v4 = vld [vmem:[#allocation2 + $0x10] sm:$0xff]   ;;  %v1246_v16 = vunpack.c.h.bf16 %v1172_v0 }
 0x666   :  { %v1201_v6 = vunpack.c.l.bf16 %v1200_v4  ;;  %v1207_v7 = vld [vmem:[#allocation2 + $0x10] sm:$0xff]   ;;  %v1166_v8 = vunpack.c.h.bf16 %v1200_v4 }
 0x667   :  { %1896 = vrot.lane.b32.xlu0 %v1895_v50, %s1986_s10  ;;  %1901 = vrot.lane.b32.xlu1 %v1900_v51, %s1987_s30  ;;  %v1208_v9 = vunpack.c.h.bf16 %v1207_v7  ;;  %v1239_v15 = vunpack.c.l.bf16 %v1207_v7  ;;  %v1682_v51 = vunpack.c.l.bf16 %v2395_v13 }
 0x66b   :  { %1071 = vrot.lane.b32.xlu0 %v1069_v53, %s1979_s12  ;;  %1116 = vrot.lane.b32.xlu1 %v1114_v54, %s2548_s25 }
 0x66f   :  { %1079 = vrot.lane.b32.xlu0 %v1077_v58, %s1993_s20  ;;  %1123 = vrot.lane.b32.xlu1 %v1121_v59, %s1999_s16 }
 0x673   :  { %1087 = vrot.lane.b32.xlu0 %v1085_v61, %s1988_s17  ;;  %1130 = vrot.lane.b32.xlu1 %v1128_v62, %s1989_s0 }
 0x677   :  { %1137 = vrot.lane.b32.xlu0 %v1135_v1, %s1957_s24  ;;  %1175 = vrot.lane.b32.xlu1 %v1173_v2, %s1958_s27 }
 0x67b   :  { %1161 = vrot.lane.b32.xlu0 %v1159_v5, %s1979_s12  ;;  %1203 = vrot.lane.b32.xlu1 %v1201_v6, %s2548_s25 }
 0x67f   :  { %1168 = vrot.lane.b32.xlu0 %v1166_v8, %s1993_s20  ;;  %1210 = vrot.lane.b32.xlu1 %v1208_v9, %s1999_s16 }
 0x683   :  { %1217 = vrot.lane.b32.xlu0 %v1215_v11, %s1969_s9  ;;  %1224 = vrot.lane.b32.xlu1 %v1222_v12, %s1957_s24 }
 0x687   :  { %1234 = vrot.lane.b32.xlu0 %v1683_v14, %s1943_s26  ;;  %1241 = vrot.lane.b32.xlu1 %v1239_v15, %s1986_s10  ;;  %v1339_v15 = vld [vmem:[%s2539_s3] sm:$0xf] }
 0x68b   :  { %1248 = vrot.lane.b32.xlu0 %v1246_v16, %s1979_s12  ;;  %1343 = vperm.xlu1 %1879, %v1340_v17  }
 0x6d1   :  { %v1882_v18 = vpop.permute.xlu1 %1881 }
 0x6d2   :  { %v1883_v19 = vunpack.i.l.bf16 %v1882_v18  ;;  %v1884_v37 = vunpack.i.h.bf16 %v1882_v18 }
 0x6d4   :  { %1098 = vst.msk [vmem:[#allocation4 + $0x8] sm:$0xff] %vm1050_vm4, %v1883_v19 }
 0x6d5   :  { %v1887_v20 = vpop.permute.xlu0 %1886  ;;  %v1892_v21 = vpop.permute.xlu1 %1891 }
 0x6d6   :  { %v1888_v22 = vunpack.i.l.bf16 %v1887_v20  ;;  %v1893_v23 = vunpack.i.l.bf16 %v1892_v21  ;;  %v1889_v40 = vunpack.i.h.bf16 %v1887_v20  ;;  %v1894_v41 = vunpack.i.h.bf16 %v1892_v21 }
 0x6d8   :  { %1059 = vst.msk [vmem:[#allocation4] sm:$0xff] %vm1058_vm6, %v1888_v22  ;;  %1105 = vst.msk [vmem:[#allocation4 + $0x8] sm:$0xff] %vm1058_vm6, %v1893_v23 }
 0x6d9   :  { %v1897_v24 = vpop.permute.xlu0 %1896  ;;  %v1902_v25 = vpop.permute.xlu1 %1901 }
 0x6da   :  { %v1898_v26 = vunpack.i.l.bf16 %v1897_v24  ;;  %v1903_v27 = vunpack.i.l.bf16 %v1902_v25  ;;  %v1899_v42 = vunpack.i.h.bf16 %v1897_v24  ;;  %v1904_v43 = vunpack.i.h.bf16 %v1902_v25 }
 0x6dc   :  { %1067 = vst.msk [vmem:[#allocation4] sm:$0xff] %vm1066_vm7, %v1898_v26  ;;  %1112 = vst.msk [vmem:[#allocation4 + $0x8] sm:$0xff] %vm1066_vm7, %v1903_v27 }
 0x6dd   :  { %v1072_v28 = vpop.permute.xlu0 %1071  ;;  %v1117_v29 = vpop.permute.xlu1 %1116 }
 0x6de   :  { %1075 = vst.msk [vmem:[#allocation4] sm:$0xff] %vm1074_vm8, %v1072_v28  ;;  %1119 = vst.msk [vmem:[#allocation4 + $0x8] sm:$0xff] %vm1074_vm8, %v1117_v29 }
 0x6e1   :  { %v1080_v30 = vpop.permute.xlu0 %1079  ;;  %v1124_v31 = vpop.permute.xlu1 %1123 }
 0x6e2   :  { %1083 = vst.msk [vmem:[#allocation4] sm:$0xff] %vm1082_vm9, %v1080_v30  ;;  %1126 = vst.msk [vmem:[#allocation4 + $0x8] sm:$0xff] %vm1082_vm9, %v1124_v31 }
 0x6e5   :  { %v1088_v33 = vpop.permute.xlu0 %1087  ;;  %v1131_v34 = vpop.permute.xlu1 %1130 }
 0x6e6   :  { %1091 = vst.msk [vmem:[#allocation4] sm:$0xff] %vm1090_vm10, %v1088_v33  ;;  %1133 = vst.msk [vmem:[#allocation4 + $0x8] sm:$0xff] %vm1090_vm10, %v1131_v34 }
 0x6e9   :  { %v1138_v38 = vpop.permute.xlu0 %1137  ;;  %v1176_v39 = vpop.permute.xlu1 %1175 }
 0x6ea   :  { %1140 = vst.msk [vmem:[#allocation4 + $0x10] sm:$0xff] %vm1050_vm4, %v1138_v38  ;;  %1178 = vst.msk [vmem:[#allocation4 + $0x18] sm:$0xff] %vm1050_vm4, %v1176_v39 }
 0x6eb   :  { %1143 = vst.msk [vmem:[#allocation4 + $0x10] sm:$0xff] %vm1058_vm6, %v1142_v35  ;;  %1185 = vst.msk [vmem:[#allocation4 + $0x18] sm:$0xff] %vm1058_vm6, %v1884_v37 }
 0x6ec   :  { %1150 = vst.msk [vmem:[#allocation4 + $0x10] sm:$0xff] %vm1066_vm7, %v1889_v40  ;;  %1192 = vst.msk [vmem:[#allocation4 + $0x18] sm:$0xff] %vm1066_vm7, %v1894_v41 }
 0x6ed   :  { %1157 = vst.msk [vmem:[#allocation4 + $0x10] sm:$0xff] %vm1074_vm8, %v1899_v42  ;;  %v1162_v44 = vpop.permute.xlu0 %1161  ;;  %1199 = vst.msk [vmem:[#allocation4 + $0x18] sm:$0xff] %vm1074_vm8, %v1904_v43  ;;  %v1204_v45 = vpop.permute.xlu1 %1203  ;;  %v1252_v46 = vld [vmem:[#allocation4] sm:$0xff]  ;;  %v1253_v47 = vld [vmem:[#allocation4 + $0x8] sm:$0xff] }
 0x6ee   :  { %1164 = vst.msk [vmem:[#allocation4 + $0x10] sm:$0xff] %vm1082_vm9, %v1162_v44  ;;  %1206 = vst.msk [vmem:[#allocation4 + $0x18] sm:$0xff] %vm1082_vm9, %v1204_v45  ;;  %v1257_v48 = vpack.c.bf16 %v1253_v47, %v1252_v46 }
 0x6f0   :  { %1791 = vmatmul.mubr.msk.bf16.vlgmr.msra.gmra.mrb[16].mxu1 %vm1007_vm15, %v1257_v48 }
 0x6f1   :  { %v1169_v49 = vpop.permute.xlu0 %1168  ;;  %v1211_v50 = vpop.permute.xlu1 %1210  ;;  %1794 = vmatprep.mubr.msk.bf16.mxu1 %vm1955_vm5, %v1944_v36 }
 0x6f2   :  { %1171 = vst.msk [vmem:[#allocation4 + $0x10] sm:$0xff] %vm1090_vm10, %v1169_v49  ;;  %1213 = vst.msk [vmem:[#allocation4 + $0x18] sm:$0xff] %vm1090_vm10, %v1211_v50 }
 0x6f5   :  { %v1218_v52 = vpop.permute.xlu0 %1217  ;;  %v1225_v53 = vpop.permute.xlu1 %1224 }
 0x6f6   :  { %1220 = vst.msk [vmem:[#allocation4 + $0x20] sm:$0xff] %vm1050_vm4, %v1218_v52  ;;  %vm1470_vm4 = vcmask 39968  }
 0x6f7   :  { %1227 = vst.msk [vmem:[#allocation4 + $0x20] sm:$0xff] %vm1058_vm6, %v1225_v53  ;;  %vm1568_vm6 = vcmask 195584  }
 0x6f8   :  { %1230 = vst.msk [vmem:[#allocation4 + $0x20] sm:$0xff] %vm1066_vm7, %v1682_v51  ;;  %vm1615_vm7 = vcmask 40960  }
 0x6f9   :  { %v1235_v54 = vpop.permute.xlu0 %1234  ;;  %v1242_v55 = vpop.permute.xlu1 %1241  ;;  %v1254_v56 = vld [vmem:[#allocation4 + $0x10] sm:$0xff]  ;;  %v1255_v57 = vld [vmem:[#allocation4 + $0x18] sm:$0xff] }
 0x6fa   :  { %1237 = vst.msk [vmem:[#allocation4 + $0x20] sm:$0xff] %vm1074_vm8, %v1235_v54  ;;  %v1258_v58 = vpack.c.bf16 %v1255_v57, %v1254_v56 }
 0x6fb   :  { %1244 = vst.msk [vmem:[#allocation4 + $0x20] sm:$0xff] %vm1082_vm9, %v1242_v55 }
 0x6fc   :  { %1795 = vmatmul.mubr.msk.bf16.gmra.mrb[20].mxu1 %vm1007_vm15, %v1258_v58 }
 0x6fd   :  { %v1249_v59 = vpop.permute.xlu0 %1248  ;;  %1798 = vmatprep.mubr.msk.bf16.mxu1 %vm1955_vm5, %v1944_v36 }
 0x6fe   :  { %1251 = vst.msk [vmem:[#allocation4 + $0x20] sm:$0xff] %vm1090_vm10, %v1249_v59 }
 0x705   :  { %v1256_v60 = vld [vmem:[#allocation4 + $0x20] sm:$0xff] }
 0x706   :  { %v1259_v61 = vpack.c.bf16 %v1256_v60, %v1256_v60  ;;  %v1562_v60 = vld [vmem:[%s2541_s8] sm:$0xff] }
 0x708   :  { %1799 = vmatmul.mubr.msk.bf16.gmra.mrb[24].mxu1 %vm1007_vm15, %v1259_v61  ;;  %vm1429_vm15 = vcmask 19472  }
 0x70a   :  { %v1344_v16 = vpop.permute.xlu1 %1343 }
 0x7c3   :  { %v1314_v62 = vpop.f32.mrb[16].mxu1 }
 0x7c4   :  { %v1792_v63 = vpop.f32.mrb[17].mxu1 }
 0x7c5   :  { %v1317_v0 = vpop.f32.mrb[18].mxu1 }
 0x7c6   :  { %v1336_v1 = vpack.c.bf16 %v1317_v0, %v1314_v62  ;;  %v1793_v2 = vpop.f32.mrb[19].mxu1 }
 0x7c8   :  { %1803 = vmatpush3.bf16.msra.mxu0 %v1336_v1 }
 0x7c9   :  { %1804 = vmatprep.subr.bf16.mxu0 %v1944_v36 }
 0x7cf   :  { %v1322_v4 = vpop.f32.mrb[20].mxu1 }
 0x7d0   :  { %v1796_v5 = vpop.f32.mrb[21].mxu1 }
 0x7d1   :  { %v1325_v6 = vpop.f32.mrb[22].mxu1 }
 0x7d2   :  { %v1337_v7 = vpack.c.bf16 %v1325_v6, %v1322_v4  ;;  %v1797_v8 = vpop.f32.mrb[23].mxu1 }
 0x7d4   :  { %1805 = vmatpush3.bf16.msra.mxu0 %v1337_v7 }
 0x7d5   :  { %1806 = vmatprep.subr.bf16.mxu0 %v1944_v36 }
 0x7db   :  { %v1330_v9 = vpop.f32.mrb[24].mxu1 }
 0x7dc   :  { %v1338_v10 = vpack.c.bf16 %v1330_v9, %v1330_v9  ;;  %v1800_v11 = vpop.f32.mrb[25].mxu1 }
 0x7dd   :  { %v1333_v12 = vpop.f32.mrb[26].mxu1 }
 0x7de   :  { %v1350_v13 = vsel %vm541_vm12, %v1338_v10, 0  ;;  %v1801_v14 = vpop.f32.mrb[27].mxu1 }
 0x7df   :  { %1807 = vmatpush3.bf16.msra.mxu0 %v1350_v13 }
 0x7e0   :  { %1812 = vmatprep.subr.bf16.mxu0 %v1944_v36 }
 0x7e2   :  { %1809 = vmatmul.mubr.msk.bf16.vlgmr.msra.gmra.mrb[16].mxu0 %vm537_vm13, %v1339_v15  ;;  %vm1422_vm13 = vcmask 3072  }
 0x7e3   :  { %1816 = vmatprep.mubr.msk.bf16.mxu0 %vm1955_vm5, %v1944_v36  ;;  %vm1438_vm5 = vcmask 7168  }
 0x8b5   :  { %v1386_v17 = vpop.f32.mrb[16].mxu0 }
 0x8b6   :  { %v1387_v18 = vadd.f32 %v1386_v17, %v1344_v16  ;;  %v1810_v19 = vpop.f32.mrb[17].mxu0 }
 0x8b7   :  { %v1389_v20 = vpop.f32.mrb[18].mxu0 }
 0x8b8   :  { %vm1392_vm11 = vcmp.ge.f32.partialorder %v1387_v18, 0.0  ;;  %v1393_v21 = vmul.f32 0.1, %v1387_v18  ;;  %v1811_v22 = vpop.f32.mrb[19].mxu0 }
 0x8ba   :  { %v1394_v23 = vsel %vm1392_vm11, %v1387_v18, %v1393_v21 }
 0x8bb   :  { %1395 = vst.msk [vmem:[%s2540_s14] sm:$0xff] %vm640_vm3, %v1394_v23  ;;  %v1396_v24 = vpack.c.bf16 %v1394_v23, %v1394_v23  ;;  %vm1446_vm3 = vcmask 15368  }
 0x8bd   :  { %1406 = vrot.lane.b32.xlu1 %v1396_v24, %s1945_s19  ;;  %1400 = vrot.lane.b32.xlu0 %v1396_v24, %s1998_s13  ;;  %1405 = vst.msk [vmem:[#allocation3 + $0x4] sm:$0xf] %vm1403_vm14, %v1396_v24 }
 0x8be   :  { %1424 = vst.msk [vmem:[#allocation3 + $0x4] sm:$0xf] %vm1422_vm13, %v1942_v3 }
 0x8bf   :  { %1431 = vst.msk [vmem:[#allocation3 + $0x4] sm:$0xf] %vm1429_vm15, %v1942_v3 }
 0x8c1   :  { %1414 = vrot.lane.b32.xlu1 %v1396_v24, %s1958_s27  ;;  %1410 = vrot.lane.b32.xlu0 %v1396_v24, %s1957_s24 }
 0x8c5   :  { %1418 = vrot.lane.b32.xlu0 %v1396_v24, %s1969_s9 }
 0x8c6   :  { %v1487_v61 = vld [vmem:[#allocation3 + $0x4] sm:$0xf] }
 0x8c7   :  { %v1488_v63 = vunpack.c.l.bf16 %v1487_v61 }
 0x92f   :  { %v1407_v25 = vpop.permute.xlu1 %1406  ;;  %v1401_v26 = vpop.permute.xlu0 %1400 }
 0x930   :  { %1409 = vst.msk [vmem:[#allocation3 + $0x8] sm:$0xf] %vm1403_vm14, %v1407_v25  ;;  %1404 = vst.msk [vmem:[#allocation3] sm:$0xf] %vm1403_vm14, %v1401_v26 }
 0x931   :  { %1425 = vst.msk [vmem:[#allocation3 + $0x8] sm:$0xf] %vm1422_vm13, %v1942_v3  ;;  %1423 = vst.msk [vmem:[#allocation3] sm:$0xf] %vm1422_vm13, %v1942_v3 }
 0x932   :  { %1430 = vst.msk [vmem:[#allocation3] sm:$0xf] %vm1429_vm15, %v1942_v3  ;;  %1432 = vst.msk [vmem:[#allocation3 + $0x8] sm:$0xf] %vm1429_vm15, %v1942_v3 }
 0x933   :  { %v1415_v27 = vpop.permute.xlu1 %1414  ;;  %v1411_v28 = vpop.permute.xlu0 %1410 }
 0x934   :  { %1417 = vst.msk [vmem:[#allocation3 + $0x10] sm:$0xf] %vm1403_vm14, %v1415_v27  ;;  %1413 = vst.msk [vmem:[#allocation3 + $0xc] sm:$0xf] %vm1403_vm14, %v1411_v28  ;;  %v1561_v27 = vld [vmem:[%s2542_s4] sm:$0xf] }
 0x935   :  { %1427 = vst.msk [vmem:[#allocation3 + $0x10] sm:$0xf] %vm1422_vm13, %v1942_v3  ;;  %1426 = vst.msk [vmem:[#allocation3 + $0xc] sm:$0xf] %vm1422_vm13, %v1942_v3 }
 0x936   :  { %1433 = vst.msk [vmem:[#allocation3 + $0xc] sm:$0xf] %vm1429_vm15, %v1942_v3  ;;  %1434 = vst.msk [vmem:[#allocation3 + $0x10] sm:$0xf] %vm1429_vm15, %v1942_v3 }
 0x937   :  { %v1419_v29 = vpop.permute.xlu0 %1418 }
 0x938   :  { %1421 = vst.msk [vmem:[#allocation3 + $0x14] sm:$0xf] %vm1403_vm14, %v1419_v29 }
 0x939   :  { %1428 = vst.msk [vmem:[#allocation3 + $0x14] sm:$0xf] %vm1422_vm13, %v1942_v3  ;;  %v1480_v30 = vld [vmem:[#allocation3] sm:$0xff]  }
 0x93a   :  { %v1685_v31 = vld [vmem:[#allocation3] sm:$0xff]   ;;  %v1481_v32 = vunpack.c.l.bf16 %v1480_v30  ;;  %v1526_v33 = vunpack.c.h.bf16 %v1480_v30  ;;  %1435 = vst.msk [vmem:[#allocation3 + $0x14] sm:$0xf] %vm1429_vm15, %v1942_v3 }
 0x93b   :  { %v1686_v34 = vunpack.c.l.bf16 %v1685_v31  ;;  %v1687_v37 = vunpack.c.h.bf16 %v1685_v31  ;;  %v1518_v43 = vld [vmem:[#allocation3] sm:$0xf] }
 0x93c   :  { %v1905_v35 = vpack.i.bf16 %v1526_v33, %v1481_v32  ;;  %v1519_v49 = vunpack.c.l.bf16 %v1518_v43 }
 0x93d   :  { %1439 = vst.msk [vmem:[#allocation4] sm:$0xff] %vm1438_vm5, %v1686_v34  ;;  %v1490_v38 = vld [vmem:[#allocation3 + $0x8] sm:$0xff]  }
 0x93e   :  { %v1448_v39 = vld [vmem:[#allocation3 + $0x8] sm:$0xff]   ;;  %1906 = vrot.lane.b32.xlu1 %v1905_v35, %s1945_s19  ;;  %v1491_v40 = vunpack.c.l.bf16 %v1490_v38  ;;  %v1498_v42 = vunpack.c.h.bf16 %v1490_v38 }
 0x93f   :  { %v1449_v41 = vunpack.c.l.bf16 %v1448_v39  ;;  %v1457_v46 = vunpack.c.h.bf16 %v1448_v39  ;;  %v1689_v55 = vld [vmem:[#allocation3 + $0x8] sm:$0xff]  }
 0x940   :  { %v1910_v44 = vpack.i.bf16 %v1491_v40, %v1687_v37  ;;  %v1691_v57 = vunpack.c.h.bf16 %v1689_v55  ;;  %v1690_v8 = vunpack.c.l.bf16 %v1689_v55 }
 0x941   :  { %v1915_v45 = vpack.i.bf16 %v1498_v42, %v1449_v41  ;;  %v1504_v47 = vld [vmem:[#allocation3 + $0x10] sm:$0xff]  }
 0x942   :  { %v1464_v48 = vld [vmem:[#allocation3 + $0x10] sm:$0xff]   ;;  %1911 = vrot.lane.b32.xlu0 %v1910_v44, %s1998_s13  ;;  %v1505_v3 = vunpack.c.l.bf16 %v1504_v47  ;;  %v1512_v51 = vunpack.c.h.bf16 %v1504_v47 }
 0x943   :  { %1916 = vrot.lane.b32.xlu1 %v1915_v45, %s1943_s26  ;;  %v1465_v50 = vunpack.c.l.bf16 %v1464_v48  ;;  %v1473_v54 = vunpack.c.h.bf16 %v1464_v48  ;;  %v1542_v56 = vld [vmem:[#allocation3 + $0x10] sm:$0xff]  }
 0x944   :  { %v1920_v52 = vpack.i.bf16 %v1505_v3, %v1457_v46  ;;  %v1543_v58 = vunpack.c.l.bf16 %v1542_v56  ;;  %v1550_v59 = vunpack.c.h.bf16 %v1542_v56 }
 0x945   :  { %v1925_v53 = vpack.i.bf16 %v1512_v51, %v1465_v50 }
 0x946   :  { %1921 = vrot.lane.b32.xlu0 %v1920_v52, %s1987_s30 }
 0x947   :  { %1521 = vrot.lane.b32.xlu1 %v1519_v49, %s1957_s24 }
 0x94a   :  { %1926 = vrot.lane.b32.xlu0 %v1925_v53, %s1986_s10 }
 0x94b   :  { %1475 = vrot.lane.b32.xlu1 %v1473_v54, %s2548_s25 }
 0x94e   :  { %1538 = vrot.lane.b32.xlu0 %v1691_v57, %s1998_s13 }
 0x94f   :  { %1545 = vrot.lane.b32.xlu1 %v1543_v58, %s1943_s26 }
 0x952   :  { %1552 = vrot.lane.b32.xlu0 %v1550_v59, %s1987_s30 }
 0x953   :  { %1565 = vperm.xlu1 %1879, %v1562_v60  }
 0x9b0   :  { %v1907_v62 = vpop.permute.xlu1 %1906 }
 0x9b1   :  { %v1908_v0 = vunpack.i.l.bf16 %v1907_v62  ;;  %v1909_v9 = vunpack.i.h.bf16 %v1907_v62 }
 0x9b3   :  { %1486 = vst.msk [vmem:[#allocation4 + $0x8] sm:$0xff] %vm1438_vm5, %v1908_v0 }
 0x9b4   :  { %1489 = vst.msk [vmem:[#allocation4 + $0x8] sm:$0xff] %vm1446_vm3, %v1488_v63  ;;  %v1912_v1 = vpop.permute.xlu0 %1911 }
 0x9b5   :  { %v1917_v2 = vpop.permute.xlu1 %1916  ;;  %v1914_v4 = vunpack.i.h.bf16 %v1912_v1  ;;  %v1913_v5 = vunpack.i.l.bf16 %v1912_v1 }
 0x9b6   :  { %v1919_v6 = vunpack.i.h.bf16 %v1917_v2  ;;  %v1918_v7 = vunpack.i.l.bf16 %v1917_v2 }
 0x9b7   :  { %1496 = vst.msk [vmem:[#allocation4 + $0x8] sm:$0xff] %vm1454_vm0, %v1914_v4 }
 0x9b8   :  { %1447 = vst.msk [vmem:[#allocation4] sm:$0xff] %vm1446_vm3, %v1913_v5  ;;  %v1922_v10 = vpop.permute.xlu0 %1921 }
 0x9b9   :  { %1455 = vst.msk [vmem:[#allocation4] sm:$0xff] %vm1454_vm0, %v1918_v7  ;;  %v1522_v11 = vpop.permute.xlu1 %1521  ;;  %v1924_v12 = vunpack.i.h.bf16 %v1922_v10  ;;  %v1923_v13 = vunpack.i.l.bf16 %v1922_v10 }
 0x9ba   :  { %1503 = vst.msk [vmem:[#allocation4 + $0x8] sm:$0xff] %vm1462_vm2, %v1919_v6 }
 0x9bb   :  { %1524 = vst.msk [vmem:[#allocation4 + $0x10] sm:$0xff] %vm1438_vm5, %v1522_v11 }
 0x9bc   :  { %1531 = vst.msk [vmem:[#allocation4 + $0x10] sm:$0xff] %vm1446_vm3, %v1909_v9  ;;  %v1927_v14 = vpop.permute.xlu0 %1926 }
 0x9bd   :  { %1463 = vst.msk [vmem:[#allocation4] sm:$0xff] %vm1462_vm2, %v1923_v13  ;;  %v1476_v15 = vpop.permute.xlu1 %1475  ;;  %v1929_v16 = vunpack.i.h.bf16 %v1927_v14  ;;  %v1928_v17 = vunpack.i.l.bf16 %v1927_v14 }
 0x9be   :  { %1510 = vst.msk [vmem:[#allocation4 + $0x8] sm:$0xff] %vm1470_vm4, %v1924_v12 }
 0x9bf   :  { %1534 = vst.msk [vmem:[#allocation4 + $0x10] sm:$0xff] %vm1454_vm0, %v1690_v8 }
 0x9c0   :  { %1471 = vst.msk [vmem:[#allocation4] sm:$0xff] %vm1470_vm4, %v1928_v17  ;;  %v1539_v18 = vpop.permute.xlu0 %1538 }
 0x9c1   :  { %1517 = vst.msk [vmem:[#allocation4 + $0x8] sm:$0xff] %vm1478_vm1, %v1929_v16  ;;  %1479 = vst.msk [vmem:[#allocation4] sm:$0xff] %vm1478_vm1, %v1476_v15  ;;  %v1546_v19 = vpop.permute.xlu1 %1545 }
 0x9c2   :  { %1541 = vst.msk [vmem:[#allocation4 + $0x10] sm:$0xff] %vm1462_vm2, %v1539_v18 }
 0x9c3   :  { %1548 = vst.msk [vmem:[#allocation4 + $0x10] sm:$0xff] %vm1470_vm4, %v1546_v19 }
 0x9c4   :  { %v1553_v20 = vpop.permute.xlu0 %1552 }
 0x9c5   :  { %1555 = vst.msk [vmem:[#allocation4 + $0x10] sm:$0xff] %vm1478_vm1, %v1553_v20 }
 0x9c8   :  { %v1557_v21 = vld [vmem:[#allocation4 + $0x8] sm:$0xff]  ;;  %v1556_v22 = vld [vmem:[#allocation4] sm:$0xff] }
 0x9c9   :  { %v1559_v23 = vpack.c.bf16 %v1557_v21, %v1556_v22 }
 0x9cb   :  { %1813 = vmatpush3.bf16.msra.mxu0 %v1559_v23 }
 0x9cc   :  { %1814 = vmatprep.subr.bf16.mxu0 %v1944_v36  ;;  %v1558_v24 = vld [vmem:[#allocation4 + $0x10] sm:$0xff] }
 0x9cd   :  { %v1560_v25 = vpack.c.bf16 %v1558_v24, %v1558_v24 }
 0x9cf   :  { %v1573_v26 = vsel %vm541_vm12, %v1560_v25, 0 }
 0x9d0   :  { %1815 = vmatpush3.bf16.msra.mxu0 %v1573_v26 }
 0x9d2   :  { %v1566_v28 = vpop.permute.xlu1 %1565 }
 0x9d3   :  { %1817 = vmatmul.mubr.msk.bf16.vlgmr.msra.gmra.mrb[20].mxu0 %vm1568_vm6, %v1561_v27 }
 0xaa6   :  { %v1609_v29 = vpop.f32.mrb[20].mxu0 }
 0xaa7   :  { %v1610_v30 = vadd.f32 %v1609_v29, %v1566_v28  ;;  %v1818_v31 = vpop.f32.mrb[21].mxu0 }
 0xaa8   :  { %v1612_v32 = vpop.f32.mrb[22].mxu0 }
 0xaa9   :  { %1616 = vst.msk [vmem:[%s2543_s15] sm:$0x1] %vm1615_vm7, %v1610_v30  ;;  %v1819_v36 = vpop.f32.mrb[23].mxu0 }

</bundles_post_ra>
